<compile_context>
chip_gen: v7x
topology: tpu7x:2x2x1
jax: 0.10.0
libtpu: 0.0.40
codegen_flags: <defaults>
</compile_context>

<pallas_src>
import functools

import jax
import jax.numpy as jnp
from jax import lax
from jax.experimental import pallas as pl
from jax.experimental.pallas import tpu as pltpu


# ---------------------------------------------------------------------------
# Kernel 1: fused atrous branches + global-average-pool branch -> lane-dense
#           channel concat [aspp2 | aspp3 | aspp4 | pool]
# ---------------------------------------------------------------------------
def _aspp_branches_kernel(xpad_ref, wa_ref, ba_ref, wp_ref, o_ref, acc_ref,
                          *, dils, H, W, d_max, cout):
    # xpad_ref: (1, H+2*d_max, W+2*d_max, Cin)  bf16, resident across taps
    # wa_ref  : (3, 1, 3*Cin, Cout)             bf16, this row-tap's weights
    # ba_ref  : (3, 1, Cout)                    f32 folded-BN biases
    # wp_ref  : (Cin, Cout)                     f32 pool-branch 1x1 weights
    # o_ref   : (1, H, W, 4*Cout)               bf16 output (lane dense)
    # acc_ref : (3, H*W, Cout)                  f32 VMEM scratch accumulator
    t = pl.program_id(1)                     # row-tap index: 0, 1, 2
    hw = H * W
    cin = xpad_ref.shape[-1]

    @pl.when(t == 0)
    def _init():
        acc_ref[...] = jnp.zeros_like(acc_ref)

    for b, d in enumerate(dils):             # static unroll: 3 branches
        r0 = (d_max - d) + t * d             # row start of this tap's window
        taps = []
        for tj in range(3):                  # static unroll: 3 column taps
            c0 = (d_max - d) + tj * d
            win = xpad_ref[0, pl.ds(r0, H), c0:c0 + W, :]      # (H, W, Cin)
            taps.append(win.reshape(hw, cin))
        im2col = jnp.concatenate(taps, axis=-1)                # (H*W, 3*Cin)
        acc_ref[b] += jnp.dot(im2col, wa_ref[b, 0],
                              preferred_element_type=jnp.float32)

    @pl.when(t == pl.num_programs(1) - 1)
    def _finalize():
        # Global-average-pool branch: mean -> 1x1 conv (no BN/bias) -> SiLU ->
        # broadcast (bilinear upsample of a 1x1 map w/ align_corners=True is a
        # constant broadcast).
        center = xpad_ref[0, d_max:d_max + H, d_max:d_max + W, :]
        mean = jnp.mean(center.astype(jnp.float32).reshape(hw, cin),
                        axis=0, keepdims=True)                 # (1, Cin)
        p5 = jnp.dot(mean, wp_ref[...], preferred_element_type=jnp.float32)
        p5 = p5 * jax.nn.sigmoid(p5)                           # SiLU
        x5 = jnp.broadcast_to(p5, (hw, cout))

        parts = []
        for b in range(3):
            yb = acc_ref[b] + ba_ref[b]                        # + folded BN bias
            parts.append(yb * jax.nn.sigmoid(yb))              # SiLU
        parts.append(x5)
        y = jnp.concatenate(parts, axis=-1)                    # (H*W, 4*Cout)
        o_ref[...] = y.reshape(1, H, W, 4 * cout).astype(o_ref.dtype)


# ---------------------------------------------------------------------------
# Kernel 2: 1x1 conv (+ folded BN) (+ SiLU) as an M-tiled pipelined matmul
# ---------------------------------------------------------------------------
def _pointwise_kernel(x_ref, w_ref, b_ref, o_ref, *, silu):
    # x_ref: (TM, Cin), w_ref: (Cin, Cout), b_ref: (1, Cout), o_ref: (TM, Cout)
    y = jnp.dot(x_ref[...], w_ref[...], preferred_element_type=jnp.float32)
    y = y + b_ref[...]
    if silu:
        y = y * jax.nn.sigmoid(y)
    o_ref[...] = y.astype(o_ref.dtype)


def pointwise_conv(x2d, w, b, *, silu=True, out_dtype=None, tm=256):
    """1x1 conv (+ folded BN) (+ SiLU) tiled over rows with a pipelined grid.

    For realistic M, 512-2048-row tiles hit ~85% of the HBM roofline; this demo
    uses 256 so the small test problem still exercises the pipeline.
    """
    M, Cin = x2d.shape
    Cout = w.shape[1]
    out_dtype = out_dtype if out_dtype is not None else x2d.dtype
    if M % tm != 0 or tm % 8 != 0:
        tm = M                               # tiny problems: one full block
    return pl.pallas_call(
        functools.partial(_pointwise_kernel, silu=silu),
        grid=(M // tm,),
        in_specs=[
            pl.BlockSpec((tm, Cin), lambda i: (i, 0)),
            pl.BlockSpec((Cin, Cout), lambda i: (0, 0)),
            pl.BlockSpec((1, Cout), lambda i: (0, 0)),
        ],
        out_specs=pl.BlockSpec((tm, Cout), lambda i: (i, 0)),
        out_shape=jax.ShapeDtypeStruct((M, Cout), out_dtype),
        compiler_params=pltpu.CompilerParams(
            dimension_semantics=("parallel",),
            vmem_limit_bytes=32 * 1024 * 1024),
    )(x2d, w, b)


# ---------------------------------------------------------------------------
# Parameter construction (deterministic; eval-mode BN folded into the convs)
# ---------------------------------------------------------------------------
def _fold_bn(w, gamma, beta, mean, var, eps=1e-5):
    # w has Cout as its LAST axis; module convs have bias=False.
    scale = gamma / jnp.sqrt(var + eps)
    return w * scale, beta - mean * scale


def make_aspp_params(key, inplanes, outplanes, output_stride=4):
    if output_stride == 4:
        dilations = [1, 6, 12, 18]
    elif output_stride == 8:
        dilations = [1, 4, 6, 10]
    elif output_stride == 2:
        dilations = [1, 12, 24, 36]
    else:
        raise NotImplementedError
    dils = tuple(int(d) for d in dilations[1:])          # aspp2 / aspp3 / aspp4

    def bn_stats(k, c):
        kg, kb, km, kv = jax.random.split(k, 4)
        gamma = jax.random.uniform(kg, (c,), jnp.float32, 0.8, 1.2)
        beta = jax.random.normal(kb, (c,), jnp.float32) * 0.1
        mean = jax.random.normal(km, (c,), jnp.float32) * 0.1
        var = jax.random.uniform(kv, (c,), jnp.float32, 0.5, 1.5)
        return gamma, beta, mean, var

    keys = jax.random.split(key, 8)
    atrous = []
    for b in range(3):
        kw, kbn = jax.random.split(keys[b])
        w = jax.random.normal(kw, (3, 3, inplanes, outplanes), jnp.float32) * 0.1
        atrous.append(_fold_bn(w, *bn_stats(kbn, outplanes)))

    w_pool = jax.random.normal(keys[3], (inplanes, outplanes), jnp.float32) * 0.1

    kw, kbn = jax.random.split(keys[4])
    w1 = jax.random.normal(kw, (4 * outplanes, outplanes), jnp.float32) * 0.1
    conv1 = _fold_bn(w1, *bn_stats(kbn, outplanes))

    return {"dilations": dils, "atrous": tuple(atrous),
            "w_pool": w_pool, "conv1": conv1}


# ---------------------------------------------------------------------------
# Full ASPP forward (Pallas kernels; transposes / pad / reshape are JAX glue)
# ---------------------------------------------------------------------------
def aspp_forward(x_nchw, params, *, compute_dtype=jnp.bfloat16):
    dils = params["dilations"]
    d_max = max(dils)
    x = jnp.transpose(x_nchw, (0, 2, 3, 1))               # NCHW -> NHWC
    N, H, W, Cin = x.shape
    Cout = params["w_pool"].shape[1]

    # bf16 at the kernel boundary (halves HBM/VMEM bytes, native MXU rate on
    # v6e/v7x); accumulation / bias / SiLU stay f32 inside the kernels.
    x_c = x.astype(compute_dtype)
    # One shared zero-pad (to the max dilation) reused by all three branches.
    # TODO(synk): for large H*W replace this with in-kernel halo DMA
    # (memory_space=pl.ANY + pltpu.make_async_copy) so no padded copy hits HBM.
    xpad = jnp.pad(x_c, ((0, 0), (d_max, d_max), (d_max, d_max), (0, 0)))
    Hp, Wp = H + 2 * d_max, W + 2 * d_max

    # Pack the three branches' folded weights:
    #   (branch, row_tap, col_tap, Cin, Cout) -> (branch, row_tap, 3*Cin, Cout)
    wa = jnp.stack([params["atrous"][b][0] for b in range(3)], axis=0)
    wa = wa.reshape(3, 3, 3 * Cin, Cout).astype(compute_dtype)
    ba = jnp.stack([params["atrous"][b][1] for b in range(3)], axis=0)
    ba = ba.reshape(3, 1, Cout)                           # f32 folded-BN biases

    cat = pl.pallas_call(
        functools.partial(_aspp_branches_kernel,
                          dils=dils, H=H, W=W, d_max=d_max, cout=Cout),
        grid=(N, 3),                                      # (batch, row-tap)
        in_specs=[
            pl.BlockSpec((1, Hp, Wp, Cin), lambda n, t: (n, 0, 0, 0)),
            pl.BlockSpec((3, 1, 3 * Cin, Cout), lambda n, t: (0, t, 0, 0)),
            pl.BlockSpec((3, 1, Cout), lambda n, t: (0, 0, 0)),
            pl.BlockSpec((Cin, Cout), lambda n, t: (0, 0)),
        ],
        out_specs=pl.BlockSpec((1, H, W, 4 * Cout), lambda n, t: (n, 0, 0, 0)),
        out_shape=jax.ShapeDtypeStruct((N, H, W, 4 * Cout), compute_dtype),
        scratch_shapes=[pltpu.VMEM((3, H * W, Cout), jnp.float32)],
        compiler_params=pltpu.CompilerParams(
            dimension_semantics=("parallel", "arbitrary"),
            vmem_limit_bytes=32 * 1024 * 1024),
    )(xpad, wa, ba, params["w_pool"])

    # Final 1x1 conv (+ folded BN) + SiLU on the lane-dense (M, 4*Cout) slab.
    M = N * H * W
    cat2d = cat.reshape(M, 4 * Cout)
    w1 = params["conv1"][0].astype(compute_dtype)
    b1 = params["conv1"][1].reshape(1, Cout)
    out2d = pointwise_conv(cat2d, w1, b1, silu=True, out_dtype=jnp.float32)
    out = out2d.reshape(N, H, W, Cout)
    # Dropout(p=0.0) is an identity -> omitted.
    return jnp.transpose(out, (0, 3, 1, 2))               # NHWC -> NCHW


# ---------------------------------------------------------------------------
# Pure-JAX f32 reference (for the correctness check)
# ---------------------------------------------------------------------------
def aspp_reference(x_nchw, params):
    x = jnp.transpose(x_nchw, (0, 2, 3, 1))
    parts = []
    for b, d in enumerate(params["dilations"]):
        w, bias = params["atrous"][b]
        y = lax.conv_general_dilated(
            x, w, window_strides=(1, 1), padding=[(d, d), (d, d)],
            rhs_dilation=(d, d), dimension_numbers=("NHWC", "HWIO", "NHWC"))
        y = y + bias
        parts.append(y * jax.nn.sigmoid(y))
    mean = jnp.mean(x, axis=(1, 2))                       # global avg pool
    p5 = mean @ params["w_pool"]
    p5 = p5 * jax.nn.sigmoid(p5)
    parts.append(jnp.broadcast_to(p5[:, None, None, :], parts[0].shape))
    cat = jnp.concatenate(parts, axis=-1)
    w1, b1 = params["conv1"]
    y = jnp.einsum("nhwc,co->nhwo", cat, w1) + b1
    y = y * jax.nn.sigmoid(y)
    return jnp.transpose(y, (0, 3, 1, 2))


# ---------------------------------------------------------------------------
if __name__ == "__main__":
    key = jax.random.PRNGKey(0)
    k_param, k_x = jax.random.split(key)

    # Small shapes: 4*outplanes = 128 -> lane-dense concat / conv1 input.
    N, INPLANES, OUTPLANES, H, W = 2, 64, 32, 16, 16
    params = make_aspp_params(k_param, INPLANES, OUTPLANES, output_stride=4)
    x = jax.random.normal(k_x, (N, INPLANES, H, W), jnp.float32)   # NCHW

    fwd = jax.jit(lambda xx: aspp_forward(xx, params))
    out = jax.block_until_ready(fwd(x))

    ref = jax.block_until_ready(aspp_reference(x, params))
    assert out.shape == (N, OUTPLANES, H, W)
    max_err = float(jnp.max(jnp.abs(out - ref)))
    # bf16 matmul inputs (f32 accumulation) vs pure-f32 reference.
    assert jnp.allclose(out, ref, atol=1e-1, rtol=1e-1), (
        f"mismatch vs reference (max abs err {max_err})")

    print("KERNEL_OK")
</pallas_src>

<mosaic_0001>
module attributes {stable_mosaic.version = 11 : i64} {
  func.func @_aspp_branches_kernel(%arg0: i32, %arg1: i32, %arg2: memref<1x52x52x64xbf16, #tpu.memory_space<vmem>>, %arg3: memref<3x1x192x32xbf16, #tpu.memory_space<vmem>>, %arg4: memref<3x1x32xf32, #tpu.memory_space<vmem>>, %arg5: memref<64x32xf32, #tpu.memory_space<vmem>>, %arg6: memref<1x16x16x128xbf16, #tpu.memory_space<vmem>>, %arg7: memref<3x256x32xf32, #tpu.memory_space<vmem>>) attributes {dimension_semantics = [#tpu.dimension_semantics<parallel>, #tpu.dimension_semantics<arbitrary>], iteration_bounds = array<i64: 2, 3>, scalar_prefetch = 0 : i64, scratch_operands = 1 : i64, tpu.core_type = #tpu.core_type<tc>, window_params = [{transform_indices = @transform_0, window_bounds = array<i64: 1, 52, 52, 64>}, {transform_indices = @transform_1, window_bounds = array<i64: 3, 1, 192, 32>}, {pipeline_mode = #tpu.pipeline_mode<synchronous>, transform_indices = @transform_2, window_bounds = array<i64: 3, 1, 32>}, {pipeline_mode = #tpu.pipeline_mode<synchronous>, transform_indices = @transform_3, window_bounds = array<i64: 64, 32>}, {transform_indices = @transform_4, window_bounds = array<i64: 1, 16, 16, 128>}]} {
    %c0_i32 = arith.constant 0 : i32
    %0 = arith.cmpi eq, %arg1, %c0_i32 : i32
    %1 = arith.extui %0 : i1 to i32
    %c0_i32_0 = arith.constant 0 : i32
    %2 = arith.cmpi ne, %1, %c0_i32_0 : i32
    scf.if %2 {
      %cst_55 = arith.constant 0.000000e+00 : f32
      %78 = vector.broadcast %cst_55 : f32 to vector<3x256x32xf32>
      %c0_56 = arith.constant 0 : index
      %c0_57 = arith.constant 0 : index
      %c0_58 = arith.constant 0 : index
      %79 = vector.load %arg7[%c0_56, %c0_57, %c0_58] : memref<3x256x32xf32, #tpu.memory_space<vmem>>, vector<3x256x32xf32>
      tpu.vector_store %arg7[%c0_56, %c0_57, %c0_58], %78 {strides = array<i32>} : memref<3x256x32xf32, #tpu.memory_space<vmem>>, vector<3x256x32xf32>,
    } else {
    }
    %c6_i32 = arith.constant 6 : i32
    %3 = arith.muli %arg1, %c6_i32 : i32
    %c12_i32 = arith.constant 12 : i32
    %4 = arith.addi %c12_i32, %3 : i32
    %c0 = arith.constant 0 : index
    %5 = arith.index_cast %4 : i32 to index
    %c12 = arith.constant 12 : index
    %c0_1 = arith.constant 0 : index
    %6 = vector.load %arg2[%c0, %5, %c12, %c0_1] : memref<1x52x52x64xbf16, #tpu.memory_space<vmem>>, vector<1x16x16x64xbf16>
    %7 = vector.shape_cast %6 : vector<1x16x16x64xbf16> to vector<16x16x64xbf16>
    %8 = vector.shape_cast %7 : vector<16x16x64xbf16> to vector<256x64xbf16>
    %c0_2 = arith.constant 0 : index
    %9 = arith.index_cast %4 : i32 to index
    %c18 = arith.constant 18 : index
    %c0_3 = arith.constant 0 : index
    %10 = vector.load %arg2[%c0_2, %9, %c18, %c0_3] : memref<1x52x52x64xbf16, #tpu.memory_space<vmem>>, vector<1x16x16x64xbf16>
    %11 = vector.shape_cast %10 : vector<1x16x16x64xbf16> to vector<16x16x64xbf16>
    %12 = vector.shape_cast %11 : vector<16x16x64xbf16> to vector<256x64xbf16>
    %c0_4 = arith.constant 0 : index
    %13 = arith.index_cast %4 : i32 to index
    %c24 = arith.constant 24 : index
    %c0_5 = arith.constant 0 : index
    %14 = vector.load %arg2[%c0_4, %13, %c24, %c0_5] : memref<1x52x52x64xbf16, #tpu.memory_space<vmem>>, vector<1x16x16x64xbf16>
    %15 = vector.shape_cast %14 : vector<1x16x16x64xbf16> to vector<16x16x64xbf16>
    %16 = vector.shape_cast %15 : vector<16x16x64xbf16> to vector<256x64xbf16>
    %17 = tpu.concatenate %8, %12, %16 in 1 : vector<256x64xbf16>, vector<256x64xbf16>, vector<256x64xbf16> -> vector<256x192xbf16>
    %c0_6 = arith.constant 0 : index
    %c0_7 = arith.constant 0 : index
    %c0_8 = arith.constant 0 : index
    %18 = vector.load %arg7[%c0_6, %c0_7, %c0_8] : memref<3x256x32xf32, #tpu.memory_space<vmem>>, vector<1x256x32xf32>
    %19 = vector.shape_cast %18 : vector<1x256x32xf32> to vector<256x32xf32>
    %c0_9 = arith.constant 0 : index
    %c0_10 = arith.constant 0 : index
    %c0_11 = arith.constant 0 : index
    %c0_12 = arith.constant 0 : index
    %20 = vector.load %arg3[%c0_9, %c0_10, %c0_11, %c0_12] : memref<3x1x192x32xbf16, #tpu.memory_space<vmem>>, vector<1x1x192x32xbf16>
    %21 = vector.shape_cast %20 : vector<1x1x192x32xbf16> to vector<192x32xbf16>
    %cst = arith.constant dense<0.000000e+00> : vector<256x32xf32>
    %22 = tpu.matmul %17, %21, %cst {dimension_numbers = #tpu.dot_dimension_numbers<[1], [0], [0], [1], [0, 0, 1, 1], [], []>} : vector<256x192xbf16>, vector<192x32xbf16>, vector<256x32xf32> -> vector<256x32xf32>
    %23 = arith.addf %19, %22 : vector<256x32xf32>
    %c0_13 = arith.constant 0 : index
    %c0_14 = arith.constant 0 : index
    %c0_15 = arith.constant 0 : index
    %24 = vector.load %arg7[%c0_13, %c0_14, %c0_15] : memref<3x256x32xf32, #tpu.memory_space<vmem>>, vector<1x256x32xf32>
    %25 = vector.shape_cast %24 : vector<1x256x32xf32> to vector<256x32xf32>
    %26 = vector.shape_cast %23 : vector<256x32xf32> to vector<1x256x32xf32>
    tpu.vector_store %arg7[%c0_13, %c0_14, %c0_15], %26 {strides = array<i32>} : memref<3x256x32xf32, #tpu.memory_space<vmem>>, vector<1x256x32xf32>,
    %c12_i32_16 = arith.constant 12 : i32
    %27 = arith.muli %arg1, %c12_i32_16 : i32
    %c6_i32_17 = arith.constant 6 : i32
    %28 = arith.addi %c6_i32_17, %27 : i32
    %c0_18 = arith.constant 0 : index
    %29 = arith.index_cast %28 : i32 to index
    %c6 = arith.constant 6 : index
    %c0_19 = arith.constant 0 : index
    %30 = vector.load %arg2[%c0_18, %29, %c6, %c0_19] : memref<1x52x52x64xbf16, #tpu.memory_space<vmem>>, vector<1x16x16x64xbf16>
    %31 = vector.shape_cast %30 : vector<1x16x16x64xbf16> to vector<16x16x64xbf16>
    %32 = vector.shape_cast %31 : vector<16x16x64xbf16> to vector<256x64xbf16>
    %c0_20 = arith.constant 0 : index
    %33 = arith.index_cast %28 : i32 to index
    %c18_21 = arith.constant 18 : index
    %c0_22 = arith.constant 0 : index
    %34 = vector.load %arg2[%c0_20, %33, %c18_21, %c0_22] : memref<1x52x52x64xbf16, #tpu.memory_space<vmem>>, vector<1x16x16x64xbf16>
    %35 = vector.shape_cast %34 : vector<1x16x16x64xbf16> to vector<16x16x64xbf16>
    %36 = vector.shape_cast %35 : vector<16x16x64xbf16> to vector<256x64xbf16>
    %c0_23 = arith.constant 0 : index
    %37 = arith.index_cast %28 : i32 to index
    %c30 = arith.constant 30 : index
    %c0_24 = arith.constant 0 : index
    %38 = vector.load %arg2[%c0_23, %37, %c30, %c0_24] : memref<1x52x52x64xbf16, #tpu.memory_space<vmem>>, vector<1x16x16x64xbf16>
    %39 = vector.shape_cast %38 : vector<1x16x16x64xbf16> to vector<16x16x64xbf16>
    %40 = vector.shape_cast %39 : vector<16x16x64xbf16> to vector<256x64xbf16>
    %41 = tpu.concatenate %32, %36, %40 in 1 : vector<256x64xbf16>, vector<256x64xbf16>, vector<256x64xbf16> -> vector<256x192xbf16>
    %c1 = arith.constant 1 : index
    %c0_25 = arith.constant 0 : index
    %c0_26 = arith.constant 0 : index
    %42 = vector.load %arg7[%c1, %c0_25, %c0_26] : memref<3x256x32xf32, #tpu.memory_space<vmem>>, vector<1x256x32xf32>
    %43 = vector.shape_cast %42 : vector<1x256x32xf32> to vector<256x32xf32>
    %c1_27 = arith.constant 1 : index
    %c0_28 = arith.constant 0 : index
    %c0_29 = arith.constant 0 : index
    %c0_30 = arith.constant 0 : index
    %44 = vector.load %arg3[%c1_27, %c0_28, %c0_29, %c0_30] : memref<3x1x192x32xbf16, #tpu.memory_space<vmem>>, vector<1x1x192x32xbf16>
    %45 = vector.shape_cast %44 : vector<1x1x192x32xbf16> to vector<192x32xbf16>
    %cst_31 = arith.constant dense<0.000000e+00> : vector<256x32xf32>
    %46 = tpu.matmul %41, %45, %cst_31 {dimension_numbers = #tpu.dot_dimension_numbers<[1], [0], [0], [1], [0, 0, 1, 1], [], []>} : vector<256x192xbf16>, vector<192x32xbf16>, vector<256x32xf32> -> vector<256x32xf32>
    %47 = arith.addf %43, %46 : vector<256x32xf32>
    %c1_32 = arith.constant 1 : index
    %c0_33 = arith.constant 0 : index
    %c0_34 = arith.constant 0 : index
    %48 = vector.load %arg7[%c1_32, %c0_33, %c0_34] : memref<3x256x32xf32, #tpu.memory_space<vmem>>, vector<1x256x32xf32>
    %49 = vector.shape_cast %48 : vector<1x256x32xf32> to vector<256x32xf32>
    %50 = vector.shape_cast %47 : vector<256x32xf32> to vector<1x256x32xf32>
    tpu.vector_store %arg7[%c1_32, %c0_33, %c0_34], %50 {strides = array<i32>} : memref<3x256x32xf32, #tpu.memory_space<vmem>>, vector<1x256x32xf32>,
    %c18_i32 = arith.constant 18 : i32
    %51 = arith.muli %arg1, %c18_i32 : i32
    %c0_i32_35 = arith.constant 0 : i32
    %52 = arith.addi %c0_i32_35, %51 : i32
    %c0_36 = arith.constant 0 : index
    %53 = arith.index_cast %52 : i32 to index
    %c0_37 = arith.constant 0 : index
    %c0_38 = arith.constant 0 : index
    %54 = vector.load %arg2[%c0_36, %53, %c0_37, %c0_38] : memref<1x52x52x64xbf16, #tpu.memory_space<vmem>>, vector<1x16x16x64xbf16>
    %55 = vector.shape_cast %54 : vector<1x16x16x64xbf16> to vector<16x16x64xbf16>
    %56 = vector.shape_cast %55 : vector<16x16x64xbf16> to vector<256x64xbf16>
    %c0_39 = arith.constant 0 : index
    %57 = arith.index_cast %52 : i32 to index
    %c18_40 = arith.constant 18 : index
    %c0_41 = arith.constant 0 : index
    %58 = vector.load %arg2[%c0_39, %57, %c18_40, %c0_41] : memref<1x52x52x64xbf16, #tpu.memory_space<vmem>>, vector<1x16x16x64xbf16>
    %59 = vector.shape_cast %58 : vector<1x16x16x64xbf16> to vector<16x16x64xbf16>
    %60 = vector.shape_cast %59 : vector<16x16x64xbf16> to vector<256x64xbf16>
    %c0_42 = arith.constant 0 : index
    %61 = arith.index_cast %52 : i32 to index
    %c36 = arith.constant 36 : index
    %c0_43 = arith.constant 0 : index
    %62 = vector.load %arg2[%c0_42, %61, %c36, %c0_43] : memref<1x52x52x64xbf16, #tpu.memory_space<vmem>>, vector<1x16x16x64xbf16>
    %63 = vector.shape_cast %62 : vector<1x16x16x64xbf16> to vector<16x16x64xbf16>
    %64 = vector.shape_cast %63 : vector<16x16x64xbf16> to vector<256x64xbf16>
    %65 = tpu.concatenate %56, %60, %64 in 1 : vector<256x64xbf16>, vector<256x64xbf16>, vector<256x64xbf16> -> vector<256x192xbf16>
    %c2 = arith.constant 2 : index
    %c0_44 = arith.constant 0 : index
    %c0_45 = arith.constant 0 : index
    %66 = vector.load %arg7[%c2, %c0_44, %c0_45] : memref<3x256x32xf32, #tpu.memory_space<vmem>>, vector<1x256x32xf32>
    %67 = vector.shape_cast %66 : vector<1x256x32xf32> to vector<256x32xf32>
    %c2_46 = arith.constant 2 : index
    %c0_47 = arith.constant 0 : index
    %c0_48 = arith.constant 0 : index
    %c0_49 = arith.constant 0 : index
    %68 = vector.load %arg3[%c2_46, %c0_47, %c0_48, %c0_49] : memref<3x1x192x32xbf16, #tpu.memory_space<vmem>>, vector<1x1x192x32xbf16>
    %69 = vector.shape_cast %68 : vector<1x1x192x32xbf16> to vector<192x32xbf16>
    %cst_50 = arith.constant dense<0.000000e+00> : vector<256x32xf32>
    %70 = tpu.matmul %65, %69, %cst_50 {dimension_numbers = #tpu.dot_dimension_numbers<[1], [0], [0], [1], [0, 0, 1, 1], [], []>} : vector<256x192xbf16>, vector<192x32xbf16>, vector<256x32xf32> -> vector<256x32xf32>
    %71 = arith.addf %67, %70 : vector<256x32xf32>
    %c2_51 = arith.constant 2 : index
    %c0_52 = arith.constant 0 : index
    %c0_53 = arith.constant 0 : index
    %72 = vector.load %arg7[%c2_51, %c0_52, %c0_53] : memref<3x256x32xf32, #tpu.memory_space<vmem>>, vector<1x256x32xf32>
    %73 = vector.shape_cast %72 : vector<1x256x32xf32> to vector<256x32xf32>
    %74 = vector.shape_cast %71 : vector<256x32xf32> to vector<1x256x32xf32>
    tpu.vector_store %arg7[%c2_51, %c0_52, %c0_53], %74 {strides = array<i32>} : memref<3x256x32xf32, #tpu.memory_space<vmem>>, vector<1x256x32xf32>,
    %c2_i32 = arith.constant 2 : i32
    %75 = arith.cmpi eq, %arg1, %c2_i32 : i32
    %76 = arith.extui %75 : i1 to i32
    %c0_i32_54 = arith.constant 0 : i32
    %77 = arith.cmpi ne, %76, %c0_i32_54 : i32
    scf.if %77 {
      %c0_55 = arith.constant 0 : index
      %c18_56 = arith.constant 18 : index
      %c18_57 = arith.constant 18 : index
      %c0_58 = arith.constant 0 : index
      %78 = vector.load %arg2[%c0_55, %c18_56, %c18_57, %c0_58] : memref<1x52x52x64xbf16, #tpu.memory_space<vmem>>, vector<1x16x16x64xbf16>
      %79 = vector.shape_cast %78 : vector<1x16x16x64xbf16> to vector<16x16x64xbf16>
      %80 = arith.extf %79 : vector<16x16x64xbf16> to vector<16x16x64xf32>
      %81 = vector.shape_cast %80 : vector<16x16x64xf32> to vector<256x64xf32>
      %cst_59 = arith.constant dense<0.000000e+00> : vector<64xf32>
      %82 = vector.multi_reduction <add>, %81, %cst_59 [0] : vector<256x64xf32> to vector<64xf32>
      %83 = vector.shape_cast %82 : vector<64xf32> to vector<1x64xf32>
      %cst_60 = arith.constant 2.560000e+02 : f32
      %84 = vector.broadcast %cst_60 : f32 to vector<1x64xf32>
      %85 = arith.divf %83, %84 : vector<1x64xf32>
      %c0_61 = arith.constant 0 : index
      %c0_62 = arith.constant 0 : index
      %86 = vector.load %arg5[%c0_61, %c0_62] : memref<64x32xf32, #tpu.memory_space<vmem>>, vector<64x32xf32>
      %cst_63 = arith.constant dense<0.000000e+00> : vector<1x32xf32>
      %87 = tpu.matmul %85, %86, %cst_63 {dimension_numbers = #tpu.dot_dimension_numbers<[1], [0], [0], [1], [0, 0, 1, 1], [], []>} : vector<1x64xf32>, vector<64x32xf32>, vector<1x32xf32> -> vector<1x32xf32>
      %88 = arith.negf %87 : vector<1x32xf32>
      %89 = math.exp %88 : vector<1x32xf32>
      %cst_64 = arith.constant 1.000000e+00 : f32
      %90 = vector.broadcast %cst_64 : f32 to vector<1x32xf32>
      %91 = arith.addf %90, %89 : vector<1x32xf32>
      %92 = arith.divf %90, %91 : vector<1x32xf32>
      %93 = arith.mulf %87, %92 : vector<1x32xf32>
      %94 = vector.shape_cast %93 : vector<1x32xf32> to vector<1x32xf32>
      %95 = vector.broadcast %94 : vector<1x32xf32> to vector<256x32xf32>
      %c0_65 = arith.constant 0 : index
      %c0_66 = arith.constant 0 : index
      %c0_67 = arith.constant 0 : index
      %96 = vector.load %arg7[%c0_65, %c0_66, %c0_67] : memref<3x256x32xf32, #tpu.memory_space<vmem>>, vector<1x256x32xf32>
      %97 = vector.shape_cast %96 : vector<1x256x32xf32> to vector<256x32xf32>
      %c0_68 = arith.constant 0 : index
      %c0_69 = arith.constant 0 : index
      %c0_70 = arith.constant 0 : index
      %98 = vector.load %arg4[%c0_68, %c0_69, %c0_70] : memref<3x1x32xf32, #tpu.memory_space<vmem>>, vector<1x1x32xf32>
      %99 = vector.shape_cast %98 : vector<1x1x32xf32> to vector<1x32xf32>
      %100 = vector.broadcast %99 : vector<1x32xf32> to vector<256x32xf32>
      %101 = arith.addf %97, %100 : vector<256x32xf32>
      %102 = arith.negf %101 : vector<256x32xf32>
      %103 = math.exp %102 : vector<256x32xf32>
      %cst_71 = arith.constant 1.000000e+00 : f32
      %104 = vector.broadcast %cst_71 : f32 to vector<256x32xf32>
      %105 = arith.addf %104, %103 : vector<256x32xf32>
      %106 = arith.divf %104, %105 : vector<256x32xf32>
      %107 = arith.mulf %101, %106 : vector<256x32xf32>
      %c1_72 = arith.constant 1 : index
      %c0_73 = arith.constant 0 : index
      %c0_74 = arith.constant 0 : index
      %108 = vector.load %arg7[%c1_72, %c0_73, %c0_74] : memref<3x256x32xf32, #tpu.memory_space<vmem>>, vector<1x256x32xf32>
      %109 = vector.shape_cast %108 : vector<1x256x32xf32> to vector<256x32xf32>
      %c1_75 = arith.constant 1 : index
      %c0_76 = arith.constant 0 : index
      %c0_77 = arith.constant 0 : index
      %110 = vector.load %arg4[%c1_75, %c0_76, %c0_77] : memref<3x1x32xf32, #tpu.memory_space<vmem>>, vector<1x1x32xf32>
      %111 = vector.shape_cast %110 : vector<1x1x32xf32> to vector<1x32xf32>
      %112 = vector.broadcast %111 : vector<1x32xf32> to vector<256x32xf32>
      %113 = arith.addf %109, %112 : vector<256x32xf32>
      %114 = arith.negf %113 : vector<256x32xf32>
      %115 = math.exp %114 : vector<256x32xf32>
      %cst_78 = arith.constant 1.000000e+00 : f32
      %116 = vector.broadcast %cst_78 : f32 to vector<256x32xf32>
      %117 = arith.addf %116, %115 : vector<256x32xf32>
      %118 = arith.divf %116, %117 : vector<256x32xf32>
      %119 = arith.mulf %113, %118 : vector<256x32xf32>
      %c2_79 = arith.constant 2 : index
      %c0_80 = arith.constant 0 : index
      %c0_81 = arith.constant 0 : index
      %120 = vector.load %arg7[%c2_79, %c0_80, %c0_81] : memref<3x256x32xf32, #tpu.memory_space<vmem>>, vector<1x256x32xf32>
      %121 = vector.shape_cast %120 : vector<1x256x32xf32> to vector<256x32xf32>
      %c2_82 = arith.constant 2 : index
      %c0_83 = arith.constant 0 : index
      %c0_84 = arith.constant 0 : index
      %122 = vector.load %arg4[%c2_82, %c0_83, %c0_84] : memref<3x1x32xf32, #tpu.memory_space<vmem>>, vector<1x1x32xf32>
      %123 = vector.shape_cast %122 : vector<1x1x32xf32> to vector<1x32xf32>
      %124 = vector.broadcast %123 : vector<1x32xf32> to vector<256x32xf32>
      %125 = arith.addf %121, %124 : vector<256x32xf32>
      %126 = arith.negf %125 : vector<256x32xf32>
      %127 = math.exp %126 : vector<256x32xf32>
      %cst_85 = arith.constant 1.000000e+00 : f32
      %128 = vector.broadcast %cst_85 : f32 to vector<256x32xf32>
      %129 = arith.addf %128, %127 : vector<256x32xf32>
      %130 = arith.divf %128, %129 : vector<256x32xf32>
      %131 = arith.mulf %125, %130 : vector<256x32xf32>
      %132 = tpu.concatenate %107, %119, %131, %95 in 1 : vector<256x32xf32>, vector<256x32xf32>, vector<256x32xf32>, vector<256x32xf32> -> vector<256x128xf32>
      %133 = vector.shape_cast %132 : vector<256x128xf32> to vector<1x16x16x128xf32>
      %134 = arith.truncf %133 : vector<1x16x16x128xf32> to vector<1x16x16x128xbf16>
      %c0_86 = arith.constant 0 : index
      %c0_87 = arith.constant 0 : index
      %c0_88 = arith.constant 0 : index
      %c0_89 = arith.constant 0 : index
      %135 = vector.load %arg6[%c0_86, %c0_87, %c0_88, %c0_89] : memref<1x16x16x128xbf16, #tpu.memory_space<vmem>>, vector<1x16x16x128xbf16>
      tpu.vector_store %arg6[%c0_86, %c0_87, %c0_88, %c0_89], %134 {strides = array<i32>} : memref<1x16x16x128xbf16, #tpu.memory_space<vmem>>, vector<1x16x16x128xbf16>,
    } else {
    }
    return
  }
  func.func @transform_0(%arg0: i32, %arg1: i32) -> (i32, i32, i32, i32) {
    %c0_i32 = arith.constant 0 : i32
    %c0_i32_0 = arith.constant 0 : i32
    %c0_i32_1 = arith.constant 0 : i32
    %c0_i32_2 = arith.constant 0 : i32
    return %arg0, %c0_i32, %c0_i32_0, %c0_i32_1 : i32, i32, i32, i32
  }
  func.func @transform_1(%arg0: i32, %arg1: i32) -> (i32, i32, i32, i32) {
    %c0_i32 = arith.constant 0 : i32
    %c0_i32_0 = arith.constant 0 : i32
    %c0_i32_1 = arith.constant 0 : i32
    %c0_i32_2 = arith.constant 0 : i32
    return %c0_i32, %arg1, %c0_i32_0, %c0_i32_1 : i32, i32, i32, i32
  }
  func.func @transform_2(%arg0: i32, %arg1: i32) -> (i32, i32, i32) {
    %c0_i32 = arith.constant 0 : i32
    %c0_i32_0 = arith.constant 0 : i32
    %c0_i32_1 = arith.constant 0 : i32
    %c0_i32_2 = arith.constant 0 : i32
    return %c0_i32, %c0_i32_0, %c0_i32_1 : i32, i32, i32
  }
  func.func @transform_3(%arg0: i32, %arg1: i32) -> (i32, i32) {
    %c0_i32 = arith.constant 0 : i32
    %c0_i32_0 = arith.constant 0 : i32
    %c0_i32_1 = arith.constant 0 : i32
    return %c0_i32, %c0_i32_0 : i32, i32
  }
  func.func @transform_4(%arg0: i32, %arg1: i32) -> (i32, i32, i32, i32) {
    %c0_i32 = arith.constant 0 : i32
    %c0_i32_0 = arith.constant 0 : i32
    %c0_i32_1 = arith.constant 0 : i32
    %c0_i32_2 = arith.constant 0 : i32
    return %arg0, %c0_i32, %c0_i32_0, %c0_i32_1 : i32, i32, i32, i32
  }
}

module attributes {stable_mosaic.version = 11 : i64} {
  func.func @_pointwise_kernel(%arg0: i32, %arg1: memref<256x128xbf16, #tpu.memory_space<vmem>>, %arg2: memref<128x32xbf16, #tpu.memory_space<vmem>>, %arg3: memref<1x32xf32, #tpu.memory_space<vmem>>, %arg4: memref<256x32xf32, #tpu.memory_space<vmem>>) attributes {dimension_semantics = [#tpu.dimension_semantics<parallel>], iteration_bounds = array<i64: 2>, scalar_prefetch = 0 : i64, scratch_operands = 0 : i64, tpu.core_type = #tpu.core_type<tc>, window_params = [{transform_indices = @transform_0, window_bounds = array<i64: 256, 128>}, {pipeline_mode = #tpu.pipeline_mode<synchronous>, transform_indices = @transform_1, window_bounds = array<i64: 128, 32>}, {pipeline_mode = #tpu.pipeline_mode<synchronous>, transform_indices = @transform_2, window_bounds = array<i64: 1, 32>}, {transform_indices = @transform_3, window_bounds = array<i64: 256, 32>}]} {
    %c0 = arith.constant 0 : index
    %c0_0 = arith.constant 0 : index
    %0 = vector.load %arg1[%c0, %c0_0] : memref<256x128xbf16, #tpu.memory_space<vmem>>, vector<256x128xbf16>
    %c0_1 = arith.constant 0 : index
    %c0_2 = arith.constant 0 : index
    %1 = vector.load %arg2[%c0_1, %c0_2] : memref<128x32xbf16, #tpu.memory_space<vmem>>, vector<128x32xbf16>
    %cst = arith.constant dense<0.000000e+00> : vector<256x32xf32>
    %2 = tpu.matmul %0, %1, %cst {dimension_numbers = #tpu.dot_dimension_numbers<[1], [0], [0], [1], [0, 0, 1, 1], [], []>} : vector<256x128xbf16>, vector<128x32xbf16>, vector<256x32xf32> -> vector<256x32xf32>
    %c0_3 = arith.constant 0 : index
    %c0_4 = arith.constant 0 : index
    %3 = vector.load %arg3[%c0_3, %c0_4] : memref<1x32xf32, #tpu.memory_space<vmem>>, vector<1x32xf32>
    %4 = vector.broadcast %3 : vector<1x32xf32> to vector<256x32xf32>
    %5 = arith.addf %2, %4 : vector<256x32xf32>
    %6 = arith.negf %5 : vector<256x32xf32>
    %7 = math.exp %6 : vector<256x32xf32>
    %cst_5 = arith.constant 1.000000e+00 : f32
    %8 = vector.broadcast %cst_5 : f32 to vector<256x32xf32>
    %9 = arith.addf %8, %7 : vector<256x32xf32>
    %10 = arith.divf %8, %9 : vector<256x32xf32>
    %11 = arith.mulf %5, %10 : vector<256x32xf32>
    %c0_6 = arith.constant 0 : index
    %c0_7 = arith.constant 0 : index
    %12 = vector.load %arg4[%c0_6, %c0_7] : memref<256x32xf32, #tpu.memory_space<vmem>>, vector<256x32xf32>
    tpu.vector_store %arg4[%c0_6, %c0_7], %11 {strides = array<i32>} : memref<256x32xf32, #tpu.memory_space<vmem>>, vector<256x32xf32>,
    return
  }
  func.func @transform_0(%arg0: i32) -> (i32, i32) {
    %c0_i32 = arith.constant 0 : i32
    %c0_i32_0 = arith.constant 0 : i32
    return %arg0, %c0_i32 : i32, i32
  }
  func.func @transform_1(%arg0: i32) -> (i32, i32) {
    %c0_i32 = arith.constant 0 : i32
    %c0_i32_0 = arith.constant 0 : i32
    %c0_i32_1 = arith.constant 0 : i32
    return %c0_i32, %c0_i32_0 : i32, i32
  }
  func.func @transform_2(%arg0: i32) -> (i32, i32) {
    %c0_i32 = arith.constant 0 : i32
    %c0_i32_0 = arith.constant 0 : i32
    %c0_i32_1 = arith.constant 0 : i32
    return %c0_i32, %c0_i32_0 : i32, i32
  }
  func.func @transform_3(%arg0: i32) -> (i32, i32) {
    %c0_i32 = arith.constant 0 : i32
    %c0_i32_0 = arith.constant 0 : i32
    return %arg0, %c0_i32 : i32, i32
  }
}

</mosaic_0001>

<bundles_post_ra>
// kernel: _lambda_.3
= control target key start
LH: loop header
LB: loop body
LE: loop exit
PB: predicated region body
PF: predicated region fallthrough
CT: control target
= control target key end

     0   :  { %8 = vsyncpa [#allocation3], 0  ;;  %s1714_s0 = inlined_call_operand.vmem [shape: bf16[512,128], index: 0, kind: input, shape index: {}]   ;;  %s1715_s1 = inlined_call_operand.vmem [shape: bf16[128,32], index: 1, kind: input, shape index: {}]   ;;  %s1716_s2 = inlined_call_operand.vmem [shape: f32[1,32], index: 2, kind: input, shape index: {}]   ;;  %s1717_s3 = inlined_call_operand.hbm [shape: f32[512,32], index: 3, kind: output, shape index: {}]  }
   0x1   :  { %10 = vsyncpa [#allocation3 + $0x1], 0  ;;  %s1304_s12 = smov 0   ;;  %s1306_s13 = smov 0  }
   0x2   :  { %s1308_s14 = smov 0   ;;  %s1310_s15 = smov 0  }
   0x3 LB: > { %s1325_s16 = sadd.s32 4294967295, %s1279_s15   ;;  %s866_s17 = sadd.s32 4294967294, %s1279_s15   ;;  %s1279_s15 = sphi %s1310_s15, %s1723_s15   ;;  %s1275_s14 = sphi %s1308_s14, %s1722_s14   ;;  %s1271_s13 = sphi %s1306_s13, %s1721_s13   ;;  %s1267_s12 = sphi %s1304_s12, %s1720_s12  }
   0x4   : > { %s1329_s18 = sadd.s32 1, %s1279_s15   ;;  %s91_s19 = sadd.s32 1, %s1275_s14 }
   0x5   : > { %s88_s20 = ssub.s32 %s1279_s15, %s1329_s18  ;;  %p101_p0 = scmp.ne.s32.totalorder %s1275_s14, %s1271_s13 }
   0x6   : > { %p89_p1 = scmp.eq.s32.totalorder %s88_s20, 0  ;;  %p102_p2 = scmp.eq.s32.totalorder %s1325_s16, 1 }
   0x7   : > { %p107_p3 = scmp.ne.s32.totalorder %s1271_s13, %s1267_s12  ;;  %p108_p4 = scmp.eq.s32.totalorder %s866_s17, 1 }
   0x8   : > { %s1340_s21 = scalar_select %p89_p1, %s1275_s14, %s91_s19  }
   0x9   : > { %p1342_p5 = por %p102_p2, %p101_p0  ;;  %p1346_p6 = por %p108_p4, %p107_p3 }
   0xa   : > { %p869_p7 = scmp.ge.s32.totalorder %s1279_s15, 1  ;;  %p141_p8 = scmp.lt.s32.totalorder %s1279_s15, 3 }
   0xc   : > { %p142_p9 = pnand %p869_p7, %p141_p8 }
   0xd   : > { %v1065_v0 = vld [vmem:[%s1715_s1] sm:$0xff] (!%p142_p9)   ;;  %s871_s26 = sshll.u32 (!%p142_p9), %s1325_s16, 5  ;;  %v1066_v1 = vld [vmem:[%s1715_s1 + $0x8] sm:$0xff] (!%p142_p9)   ;;  %v1067_v2 = vld [vmem:[%s1715_s1 + $0x10] sm:$0xff] (!%p142_p9)   ;;  %s162_s29 = sand.u32 (!%p142_p9), 1, %s1271_s13   ;;  %vm757_vm0 = vcmask (!%p142_p9), 261120  }
   0xe   : > { %145 = sbr.rel (%p142_p9) target bundleno = 362 (0x16a), region = 32  ;;  %p166_p10 = scmp.lt.s32.totalorder (!%p142_p9), %s871_s26, 63  ;;  %960 = vmatprep.subr.bf16.mxu0 (!%p142_p9), %v1065_v0  ;;  %1008 = vmatprep.subr.bf16.mxu1 (!%p142_p9), %v1065_v0  ;;  %v1068_v3 = vld [vmem:[%s1715_s1 + $0x18] sm:$0xff] (!%p142_p9)   ;;  %v1069_v6 = vld [vmem:[%s1715_s1 + $0x20] sm:$0xff] (!%p142_p9)   ;;  %v1070_v7 = vld [vmem:[%s1715_s1 + $0x28] sm:$0xff] (!%p142_p9)  }
   0xf   : > { %961 = vmatpush3.bf16.msra.mxu0 (!%p142_p9), %v1065_v0  ;;  %1016 = vmatpush3.bf16.msra.mxu1 (!%p142_p9), %v1065_v0  ;;  %v1071_v8 = vld [vmem:[%s1715_s1 + $0x30] sm:$0xff] (!%p142_p9)   ;;  %v1072_v9 = vld [vmem:[%s1715_s1 + $0x38] sm:$0xff] (!%p142_p9)   ;;  %v1401_v24 = vld [vmem:[%s1716_s2] ss:$0 sm:$0xff] (!%p142_p9)  ;;  %s1470_s30 = sshll.u32 (!%p142_p9), %s162_s29, 8  ;;  %s935_s5 = sshll.u32 (!%p142_p9), %s1325_s16, 12 }
  0x10   : > { %962 = vmatprep.subr.bf16.mxu0 (!%p142_p9), %v1066_v1  ;;  %1009 = vmatprep.subr.bf16.mxu1 (!%p142_p9), %v1066_v1  ;;  %s1660_s8 = scalar_lea.hbm (!%p142_p9), %s1717_s3, %s935_s5  ;;  %s1673_s9 = scalar_lea.sflag (!%p142_p9), [#allocation3], %s162_s29 }
  0x11   : > { %s1281_s11 = smov (!%p142_p9), [#allocation2]  }
  0x12   : > { %s1221_s17 = sshll.u32 (!%p142_p9), %s1281_s11, 4  ;;  %s1222_s17 = int_to_ptr.vmem [resolvable:$false] %s1221_s17 }
  0x13   : > { %963 = vmatpush3.bf16.msra.mxu0 (!%p142_p9), %v1066_v1  ;;  %1017 = vmatpush3.bf16.msra.mxu1 (!%p142_p9), %v1066_v1  ;;  %s1223_s19 = scalar_lea.vmem (!%p142_p9), %s1222_s17, 8192 }
  0x14   : > { %964 = vmatprep.subr.bf16.mxu0 (!%p142_p9), %v1067_v2  ;;  %1010 = vmatprep.subr.bf16.mxu1 (!%p142_p9), %v1067_v2 }
  0x15   : > { %s1725_s26 = smov (!%p166_p10, %s871_s26), 63 }
  0x16   : > { %s872_s4 = sshll.u32 %s1725_s26, 2 }
  0x17   : > { %s1365_s7 = scalar_lea.vmem %s1714_s0, %s872_s4  ;;  %965 = vmatpush3.bf16.msra.mxu0 %v1067_v2  ;;  %1018 = vmatpush3.bf16.msra.mxu1 %v1067_v2  ;;  %s1509_s4 = scalar_lea.vmem [#allocation2], %s1470_s30 }
  0x18   : > { %v1073_v4 = vld [vmem:[%s1365_s7] sm:$0xff]   ;;  %966 = vmatprep.subr.bf16.mxu0 %v1068_v3  ;;  %1011 = vmatprep.subr.bf16.mxu1 %v1068_v3  ;;  %v1075_v10 = vld [vmem:[%s1365_s7 + $0x8] sm:$0xff]   ;;  %v1077_v12 = vld [vmem:[%s1365_s7 + $0x10] sm:$0xff]   ;;  %s804_s6 = sshll.u32 %s1509_s4, 4  ;;  %s1662_s6 = int_to_ptr.vmem [resolvable:$true] %s804_s6 }
  0x19   : > { %v1074_v5 = vld [vmem:[%s1365_s7 + $0x40] sm:$0xff]   ;;  %976 = vmatprep.mubr.bf16.mxu0 %v1073_v4  ;;  %v1076_v11 = vld [vmem:[%s1365_s7 + $0x48] sm:$0xff]   ;;  %v1078_v13 = vld [vmem:[%s1365_s7 + $0x50] sm:$0xff]   ;;  %s1217_s10 = scalar_lea.vmem %s1662_s6, 4096  ;;  %p1224_p0 = scmp.lt.s32.totalorder %s1662_s6, %s1222_s17 }
  0x1a   : > { %992 = vmatprep.mubr.bf16.mxu1 %v1074_v5  ;;  %v1079_v14 = vld [vmem:[%s1365_s7 + $0x18] sm:$0xff]   ;;  %v1081_v16 = vld [vmem:[%s1365_s7 + $0x20] sm:$0xff]   ;;  %v1083_v18 = vld [vmem:[%s1365_s7 + $0x28] sm:$0xff]   ;;  %p1218_p11 = scmp.ne.s32.totalorder %s1662_s6, %s1217_s10  ;;  %p1225_p1 = scmp.lt.s32.totalorder %s1223_s19, %s1217_s10 }
  0x1b   : > { %967 = vmatpush3.bf16.msra.mxu0 %v1068_v3  ;;  %1019 = vmatpush3.bf16.msra.mxu1 %v1068_v3  ;;  %v1080_v15 = vld [vmem:[%s1365_s7 + $0x58] sm:$0xff]   ;;  %v1082_v17 = vld [vmem:[%s1365_s7 + $0x60] sm:$0xff]   ;;  %v1084_v19 = vld [vmem:[%s1365_s7 + $0x68] sm:$0xff]  }
  0x1c   : > { %968 = vmatprep.subr.bf16.mxu0 %v1069_v6  ;;  %1012 = vmatprep.subr.bf16.mxu1 %v1069_v6  ;;  %v1085_v20 = vld [vmem:[%s1365_s7 + $0x30] sm:$0xff]   ;;  %v1087_v22 = vld [vmem:[%s1365_s7 + $0x38] sm:$0xff]   ;;  %p1219_p12 = pnand %p1218_p11, %p1342_p5  ;;  %p1226_p2 = por %p1225_p1, %p1224_p0 }
  0x1d   : > { %v1086_v21 = vld [vmem:[%s1365_s7 + $0x70] sm:$0xff]   ;;  %v1088_v23 = vld [vmem:[%s1365_s7 + $0x78] sm:$0xff]  }
  0x1e   : > { %p1220_p13 = pneg %p1219_p12 }
  0x1f   : > { %969 = vmatpush3.bf16.msra.mxu0 %v1069_v6  ;;  %1020 = vmatpush3.bf16.msra.mxu1 %v1069_v6 }
  0x20   : > { %970 = vmatprep.subr.bf16.mxu0 %v1070_v7  ;;  %1013 = vmatprep.subr.bf16.mxu1 %v1070_v7  ;;  %p1227_p3 = pnand %p1226_p2, %p1220_p13 }
  0x23   : > { %971 = vmatpush3.bf16.msra.mxu0 %v1070_v7  ;;  %1021 = vmatpush3.bf16.msra.mxu1 %v1070_v7 }
  0x24   : > { %972 = vmatprep.subr.bf16.mxu0 %v1071_v8  ;;  %1014 = vmatprep.subr.bf16.mxu1 %v1071_v8 }
  0x27   : > { %973 = vmatpush3.bf16.msra.mxu0 %v1071_v8  ;;  %1022 = vmatpush3.bf16.msra.mxu1 %v1071_v8 }
  0x28   : > { %974 = vmatprep.subr.bf16.mxu0 %v1072_v9  ;;  %1015 = vmatprep.subr.bf16.mxu1 %v1072_v9 }
  0x2b   : > { %975 = vmatpush3.bf16.msra.mxu0 %v1072_v9  ;;  %1023 = vmatpush3.bf16.msra.mxu1 %v1072_v9 }
  0x2e   : > { %977 = vmatmul.mubr.bf16.vlgmr.msra.gmra.mrb[0].mxu0 %v1075_v10  ;;  %993 = vmatmul.mubr.bf16.vlgmr.msra.gmra.mrb[0].mxu1 %v1076_v11 }
  0x2f   : > { %980 = vmatprep.mubr.bf16.mxu0 %v1077_v12  ;;  %996 = vmatprep.mubr.bf16.mxu1 %v1078_v13 }
  0x36   : > { %981 = vmatmul.mubr.bf16.gmra.mrb[4].mxu0 %v1079_v14  ;;  %997 = vmatmul.mubr.bf16.gmra.mrb[4].mxu1 %v1080_v15 }
  0x37   : > { %984 = vmatprep.mubr.bf16.mxu0 %v1081_v16  ;;  %1000 = vmatprep.mubr.bf16.mxu1 %v1082_v17 }
  0x3e   : > { %985 = vmatmul.mubr.bf16.gmra.mrb[8].mxu0 %v1083_v18  ;;  %1001 = vmatmul.mubr.bf16.gmra.mrb[8].mxu1 %v1084_v19 }
  0x3f   : > { %988 = vmatprep.mubr.bf16.mxu0 %v1085_v20  ;;  %1004 = vmatprep.mubr.bf16.mxu1 %v1086_v21 }
  0x46   : > { %989 = vmatmul.mubr.bf16.gmra.mrb[12].mxu0 %v1087_v22  ;;  %1005 = vmatmul.mubr.bf16.gmra.mrb[12].mxu1 %v1088_v23 }
 0x101   : > { %v978_v25 = vpop.f32.mrb[0].mxu0  ;;  %v994_v26 = vpop.f32.mrb[0].mxu1 }
 0x102   : > { %v1404_v27 = vadd.f32 %v978_v25, %v1401_v24  ;;  %v1407_v28 = vadd.f32 %v994_v26, %v1401_v24  ;;  %v406_v29 = vpop.f32.mrb[1].mxu0  ;;  %v470_v30 = vpop.f32.mrb[1].mxu1 }
 0x103   : > { %v1410_v31 = vadd.f32 %v1401_v24, %v406_v29  ;;  %v1413_v32 = vadd.f32 %v1401_v24, %v470_v30  ;;  %v979_v33 = vpop.f32.mrb[2].mxu0  ;;  %v995_v34 = vpop.f32.mrb[2].mxu1 }
 0x104   : > { %v900_v35 = vmul.f32 -1.442695, %v1404_v27  ;;  %v916_v36 = vmul.f32 -1.442695, %v1407_v28  ;;  %v1418_v37 = vadd.f32 %v979_v33, %v1401_v24  ;;  %v1421_v38 = vadd.f32 %v995_v34, %v1401_v24  ;;  %v409_v39 = vpop.f32.mrb[3].mxu0  ;;  %v473_v40 = vpop.f32.mrb[3].mxu1 }
 0x105   : > { %v898_v41 = vmul.f32 -1.442695, %v1410_v31  ;;  %v914_v42 = vmul.f32 -1.442695, %v1413_v32  ;;  %v1426_v43 = vadd.f32 %v1401_v24, %v409_v39  ;;  %v1429_v44 = vadd.f32 %v1401_v24, %v473_v40 }
 0x106   : > { %1089 = vpow2.f32 %v900_v35  ;;  %v901_v45 = vmul.f32 -1.442695, %v1418_v37  ;;  %v917_v46 = vmul.f32 -1.442695, %v1421_v38 }
 0x107   : > { %1091 = vpow2.f32 %v916_v36  ;;  %v899_v47 = vmul.f32 -1.442695, %v1426_v43  ;;  %v915_v48 = vmul.f32 -1.442695, %v1429_v44 }
 0x108   : > { %1093 = vpow2.f32 %v898_v41 }
 0x109   : > { %1095 = vpow2.f32 %v914_v42  ;;  %v982_v49 = vpop.f32.mrb[4].mxu0  ;;  %v998_v50 = vpop.f32.mrb[4].mxu1 }
 0x10a   : > { %1097 = vpow2.f32 %v901_v45  ;;  %v1436_v51 = vadd.f32 %v982_v49, %v1401_v24  ;;  %v1439_v52 = vadd.f32 %v998_v50, %v1401_v24  ;;  %v422_v53 = vpop.f32.mrb[5].mxu0  ;;  %v486_v54 = vpop.f32.mrb[5].mxu1 }
 0x10b   : > { %1099 = vpow2.f32 %v917_v46  ;;  %v1442_v55 = vadd.f32 %v1401_v24, %v422_v53  ;;  %v1445_v56 = vadd.f32 %v1401_v24, %v486_v54  ;;  %v983_v57 = vpop.f32.mrb[6].mxu0  ;;  %v999_v58 = vpop.f32.mrb[6].mxu1 }
 0x10c   : > { %1101 = vpow2.f32 %v899_v47  ;;  %v904_v59 = vmul.f32 -1.442695, %v1436_v51  ;;  %v920_v60 = vmul.f32 -1.442695, %v1439_v52  ;;  %v1450_v61 = vadd.f32 %v983_v57, %v1401_v24  ;;  %v425_v62 = vpop.f32.mrb[7].mxu0  ;;  %v489_v63 = vpop.f32.mrb[7].mxu1 }
 0x10d   : > { %1103 = vpow2.f32 %v915_v48  ;;  %v902_v0 = vmul.f32 -1.442695, %v1442_v55  ;;  %v918_v1 = vmul.f32 -1.442695, %v1445_v56  ;;  %v1463_v33 = vadd.f32 %v999_v58, %v1401_v24 }
 0x10e   : > { %1105 = vpow2.f32 %v904_v59  ;;  %v905_v2 = vmul.f32 -1.442695, %v1450_v61  ;;  %v1466_v36 = vadd.f32 %v1401_v24, %v425_v62  ;;  %v1473_v42 = vadd.f32 %v1401_v24, %v489_v63 }
 0x10f   : > { %1107 = vpow2.f32 %v920_v60  ;;  %v921_v58 = vmul.f32 -1.442695, %v1463_v33 }
 0x110   : > { %v1090_v3 = vpop.eup %1089  ;;  %1109 = vpow2.f32 %v902_v0 }
 0x111   : > { %v1092_v4 = vpop.eup %1091  ;;  %v631_v5 = vadd.f32 1.0, %v1090_v3  ;;  %1111 = vpow2.f32 %v918_v1  ;;  %v986_v6 = vpop.f32.mrb[8].mxu0  ;;  %v903_v1 = vmul.f32 -1.442695, %v1466_v36 }
 0x112   : > { %v1002_v7 = vpop.f32.mrb[8].mxu1  ;;  %v1094_v8 = vpop.eup %1093  ;;  %v647_v9 = vadd.f32 1.0, %v1092_v4  ;;  %1113 = vpow2.f32 %v905_v2  ;;  %v1478_v49 = vadd.f32 %v986_v6, %v1401_v24  ;;  %v919_v6 = vmul.f32 -1.442695, %v1473_v42 }
 0x113   : > { %v438_v10 = vpop.f32.mrb[9].mxu0  ;;  %v502_v11 = vpop.f32.mrb[9].mxu1  ;;  %1115 = vrcp.f32 %v631_v5  ;;  %v629_v13 = vadd.f32 1.0, %v1094_v8  ;;  %v1486_v59 = vadd.f32 %v1002_v7, %v1401_v24 }
 0x114   : > { %v1096_v12 = vpop.eup %1095  ;;  %v987_v14 = vpop.f32.mrb[10].mxu0  ;;  %1117 = vrcp.f32 %v647_v9  ;;  %v1494_v2 = vadd.f32 %v1401_v24, %v438_v10  ;;  %v1501_v7 = vadd.f32 %v1401_v24, %v502_v11 }
 0x115   : > { %v1455_v15 = vpop.f32.mrb[10].mxu1  ;;  %v1098_v16 = vpop.eup %1097  ;;  %v645_v17 = vadd.f32 1.0, %v1096_v12  ;;  %1119 = vrcp.f32 %v629_v13  ;;  %v908_v12 = vmul.f32 -1.442695, %v1478_v49  ;;  %v1506_v10 = vadd.f32 %v987_v14, %v1401_v24 }
 0x116   : > { %v1457_v18 = vpop.f32.mrb[11].mxu0  ;;  %v1100_v19 = vpop.eup %1099  ;;  %v632_v20 = vadd.f32 1.0, %v1098_v16  ;;  %v1517_v11 = vadd.f32 %v1455_v15, %v1401_v24  ;;  %v922_v15 = vmul.f32 -1.442695, %v1501_v7 }
 0x117   : > { %v1459_v21 = vpop.f32.mrb[11].mxu1  ;;  %v1102_v22 = vpop.eup %1101  ;;  %1121 = vrcp.f32 %v645_v17  ;;  %v648_v23 = vadd.f32 1.0, %v1100_v19  ;;  %v906_v17 = vmul.f32 -1.442695, %v1494_v2 }
 0x118   : > { %v1104_v25 = vpop.eup %1103  ;;  %1123 = vrcp.f32 %v632_v20  ;;  %v630_v26 = vadd.f32 1.0, %v1102_v22 }
 0x119   : > { %v1106_v29 = vpop.eup %1105  ;;  %1125 = vrcp.f32 %v648_v23  ;;  %v646_v30 = vadd.f32 1.0, %v1104_v25  ;;  %v990_v39 = vpop.f32.mrb[12].mxu0 }
 0x11a   : > { %v1108_v34 = vpop.eup %1107  ;;  %1127 = vrcp.f32 %v630_v26  ;;  %v635_v35 = vadd.f32 1.0, %v1106_v29  ;;  %v1006_v45 = vpop.f32.mrb[12].mxu1  ;;  %v1540_v25 = vadd.f32 %v990_v39, %v1401_v24 }
 0x11b   : > { %v1110_v40 = vpop.eup %1109  ;;  %1129 = vrcp.f32 %v646_v30  ;;  %v651_v41 = vadd.f32 1.0, %v1108_v34  ;;  %v1475_v46 = vpop.f32.mrb[13].mxu0  ;;  %v1547_v29 = vadd.f32 %v1006_v45, %v1401_v24 }
 0x11c   : > { %v1112_v47 = vpop.eup %1111  ;;  %1131 = vrcp.f32 %v635_v35  ;;  %v633_v48 = vadd.f32 1.0, %v1110_v40  ;;  %v1480_v50 = vpop.f32.mrb[13].mxu1 }
 0x11d   : > { %v1482_v53 = vpop.f32.mrb[14].mxu0  ;;  %v1114_v54 = vpop.eup %1113  ;;  %1133 = vrcp.f32 %v651_v41  ;;  %v649_v57 = vadd.f32 1.0, %v1112_v47 }
 0x11e   : > { %v1488_v60 = vpop.f32.mrb[14].mxu1  ;;  %v1490_v62 = vpop.f32.mrb[15].mxu0  ;;  %1135 = vrcp.f32 %v633_v48  ;;  %v636_v0 = vadd.f32 1.0, %v1114_v54 }
 0x11f   : > { %v1116_v63 = vpop.eup %1115  ;;  %v1496_v3 = vpop.f32.mrb[15].mxu1  ;;  %1137 = vrcp.f32 %v649_v57 }
 0x120   : > { %v1118_v4 = vpop.eup %1117  ;;  %v727_v5 = vmul.f32 %v1116_v63, %v1404_v27  ;;  %1139 = vrcp.f32 %v636_v0 }
 0x121   : > { %v1120_v8 = vpop.eup %1119  ;;  %v743_v9 = vmul.f32 %v1118_v4, %v1407_v28  ;;  %1141 = vpow2.f32 %v921_v58  ;;  %v924_v28 = vmul.f32 -1.442695, %v1486_v59 }
 0x122   : > { %v1122_v13 = vpop.eup %1121  ;;  %760 = vst.msk [vmem:[%s1509_s4 + $0x10] sm:$0xff] %vm757_vm0, %v727_v5  ;;  %v725_v27 = vmul.f32 %v1120_v8, %v1410_v31  ;;  %1143 = vpow2.f32 %v903_v1  ;;  %v1525_v31 = vadd.f32 %v1401_v24, %v1457_v18  ;;  %v909_v18 = vmul.f32 -1.442695, %v1506_v10 }
 0x123   : > { %v1124_v14 = vpop.eup %1123  ;;  %776 = vst.msk [vmem:[%s1509_s4 + $0x90] sm:$0xff] %vm757_vm0, %v743_v9  ;;  %v741_v16 = vmul.f32 %v1122_v13, %v1413_v32  ;;  %1145 = vpow2.f32 %v919_v6  ;;  %v1533_v32 = vadd.f32 %v1401_v24, %v1459_v21  ;;  %v925_v21 = vmul.f32 -1.442695, %v1517_v11 }
 0x124   : > { %v1126_v19 = vpop.eup %1125  ;;  %758 = vst.msk [vmem:[%s1509_s4] sm:$0xff] %vm757_vm0, %v725_v27  ;;  %v728_v20 = vmul.f32 %v1124_v14, %v1418_v37  ;;  %1147 = vpow2.f32 %v908_v12  ;;  %v907_v34 = vmul.f32 -1.442695, %v1525_v31  ;;  %v1577_v14 = vadd.f32 %v1401_v24, %v1475_v46 }
 0x125   : > { %v1128_v22 = vpop.eup %1127  ;;  %774 = vst.msk [vmem:[%s1509_s4 + $0x80] sm:$0xff] %vm757_vm0, %v741_v16  ;;  %v744_v23 = vmul.f32 %v1126_v19, %v1421_v38  ;;  %1149 = vpow2.f32 %v924_v28  ;;  %v923_v39 = vmul.f32 -1.442695, %v1533_v32  ;;  %v1581_v19 = vadd.f32 %v1401_v24, %v1480_v50 }
 0x126   : > { %v1130_v37 = vpop.eup %1129  ;;  %761 = vst.msk [vmem:[%s1509_s4 + $0x18] sm:$0xff] %vm757_vm0, %v728_v20  ;;  %v726_v26 = vmul.f32 %v1128_v22, %v1426_v43  ;;  %1151 = vpow2.f32 %v906_v17  ;;  %v1585_v22 = vadd.f32 %v1482_v53, %v1401_v24  ;;  %v1589_v46 = vadd.f32 %v1488_v60, %v1401_v24 }
 0x127   : > { %v1132_v38 = vpop.eup %1131  ;;  %777 = vst.msk [vmem:[%s1509_s4 + $0x98] sm:$0xff] %vm757_vm0, %v744_v23  ;;  %v742_v30 = vmul.f32 %v1130_v37, %v1429_v44  ;;  %1153 = vpow2.f32 %v922_v15  ;;  %v912_v44 = vmul.f32 -1.442695, %v1540_v25  ;;  %v910_v50 = vmul.f32 -1.442695, %v1577_v14 }
 0x128   : > { %v1134_v35 = vpop.eup %1133  ;;  %759 = vst.msk [vmem:[%s1509_s4 + $0x8] sm:$0xff] %vm757_vm0, %v726_v26  ;;  %v731_v43 = vmul.f32 %v1132_v38, %v1436_v51  ;;  %1155 = vpow2.f32 %v909_v18  ;;  %v928_v51 = vmul.f32 -1.442695, %v1547_v29  ;;  %v1599_v60 = vadd.f32 %v1401_v24, %v1496_v3 }
 0x129   : > { %v1136_v40 = vpop.eup %1135  ;;  %775 = vst.msk [vmem:[%s1509_s4 + $0x88] sm:$0xff] %vm757_vm0, %v742_v30  ;;  %v747_v41 = vmul.f32 %v1134_v35, %v1439_v52  ;;  %1157 = vpow2.f32 %v925_v21  ;;  %v1594_v21 = vadd.f32 %v1401_v24, %v1490_v62  ;;  %v926_v30 = vmul.f32 -1.442695, %v1581_v19 }
 0x12a   : > { %v1138_v45 = vpop.eup %1137  ;;  %764 = vst.msk [vmem:[%s1509_s4 + $0x30] sm:$0xff] %vm757_vm0, %v731_v43  ;;  %v729_v47 = vmul.f32 %v1136_v40, %v1442_v55  ;;  %1159 = vpow2.f32 %v907_v34  ;;  %v913_v43 = vmul.f32 -1.442695, %v1585_v22  ;;  %v929_v40 = vmul.f32 -1.442695, %v1589_v46 }
 0x12b   : > { %v1140_v48 = vpop.eup %1139  ;;  %780 = vst.msk [vmem:[%s1509_s4 + $0xb0] sm:$0xff] %vm757_vm0, %v747_v41  ;;  %v745_v54 = vmul.f32 %v1138_v45, %v1445_v56  ;;  %1161 = vpow2.f32 %v923_v39 }
 0x12c   : > { %v1142_v52 = vpop.eup %1141  ;;  %762 = vst.msk [vmem:[%s1509_s4 + $0x20] sm:$0xff] %vm757_vm0, %v729_v47  ;;  %v732_v57 = vmul.f32 %v1140_v48, %v1450_v61  ;;  %1163 = vpow2.f32 %v912_v44 }
 0x12d   : > { %v1144_v58 = vpop.eup %1143  ;;  %778 = vst.msk [vmem:[%s1509_s4 + $0xa0] sm:$0xff] %vm757_vm0, %v745_v54  ;;  %v652_v55 = vadd.f32 1.0, %v1142_v52  ;;  %1165 = vpow2.f32 %v928_v51 }
 0x12e   : > { %v1146_v63 = vpop.eup %1145  ;;  %765 = vst.msk [vmem:[%s1509_s4 + $0x38] sm:$0xff] %vm757_vm0, %v732_v57  ;;  %v634_v0 = vadd.f32 1.0, %v1144_v58 }
 0x12f   : > { %v1148_v1 = vpop.eup %1147  ;;  %1167 = vrcp.f32 %v652_v55  ;;  %v650_v56 = vadd.f32 1.0, %v1146_v63 }
 0x130   : > { %v1150_v4 = vpop.eup %1149  ;;  %1169 = vrcp.f32 %v634_v0  ;;  %v639_v5 = vadd.f32 1.0, %v1148_v1 }
 0x131   : > { %v1152_v6 = vpop.eup %1151  ;;  %1171 = vrcp.f32 %v650_v56  ;;  %v655_v61 = vadd.f32 1.0, %v1150_v4 }
 0x132   : > { %v1154_v8 = vpop.eup %1153  ;;  %1173 = vrcp.f32 %v639_v5  ;;  %v637_v9 = vadd.f32 1.0, %v1152_v6 }
 0x133   : > { %v1156_v12 = vpop.eup %1155  ;;  %1175 = vrcp.f32 %v655_v61  ;;  %v653_v13 = vadd.f32 1.0, %v1154_v8 }
 0x134   : > { %v1158_v27 = vpop.eup %1157  ;;  %1177 = vrcp.f32 %v637_v9  ;;  %v640_v28 = vadd.f32 1.0, %v1156_v12 }
 0x135   : > { %v1160_v16 = vpop.eup %1159  ;;  %1179 = vrcp.f32 %v653_v13  ;;  %v656_v17 = vadd.f32 1.0, %v1158_v27 }
 0x136   : > { %v1162_v20 = vpop.eup %1161  ;;  %1181 = vrcp.f32 %v640_v28  ;;  %v638_v15 = vadd.f32 1.0, %v1160_v16 }
 0x137   : > { %v1164_v23 = vpop.eup %1163  ;;  %1183 = vrcp.f32 %v656_v17  ;;  %v654_v18 = vadd.f32 1.0, %v1162_v20 }
 0x138   : > { %v1166_v37 = vpop.eup %1165  ;;  %1185 = vrcp.f32 %v638_v15  ;;  %v643_v26 = vadd.f32 1.0, %v1164_v23 }
 0x139   : > { %v1168_v38 = vpop.eup %1167  ;;  %1187 = vrcp.f32 %v654_v18  ;;  %v659_v53 = vadd.f32 1.0, %v1166_v37 }
 0x13a   : > { %v1170_v34 = vpop.eup %1169  ;;  %v748_v35 = vmul.f32 %v1168_v38, %v1463_v33  ;;  %1189 = vrcp.f32 %v643_v26  ;;  %v911_v33 = vmul.f32 -1.442695, %v1594_v21 }
 0x13b   : > { %v1172_v39 = vpop.eup %1171  ;;  %v730_v62 = vmul.f32 %v1170_v34, %v1466_v36  ;;  %1191 = vrcp.f32 %v659_v53  ;;  %v927_v36 = vmul.f32 -1.442695, %v1599_v60 }
 0x13c   : > { %v1174_v41 = vpop.eup %1173  ;;  %781 = vst.msk [vmem:[%s1509_s4 + $0xb8] sm:$0xff] %vm757_vm0, %v748_v35  ;;  %v746_v24 = vmul.f32 %v1172_v39, %v1473_v42  ;;  %1193 = vpow2.f32 %v910_v50 }
 0x13d   : > { %v1176_v3 = vpop.eup %1175  ;;  %763 = vst.msk [vmem:[%s1509_s4 + $0x28] sm:$0xff] %vm757_vm0, %v730_v62  ;;  %v735_v44 = vmul.f32 %v1174_v41, %v1478_v49  ;;  %1195 = vpow2.f32 %v926_v30 }
 0x13e   : > { %v1178_v45 = vpop.eup %1177  ;;  %779 = vst.msk [vmem:[%s1509_s4 + $0xa8] sm:$0xff] %vm757_vm0, %v746_v24  ;;  %v751_v47 = vmul.f32 %v1176_v3, %v1486_v59  ;;  %1197 = vpow2.f32 %v913_v43 }
 0x13f   : > { %v1180_v42 = vpop.eup %1179  ;;  %768 = vst.msk [vmem:[%s1509_s4 + $0x50] sm:$0xff] %vm757_vm0, %v735_v44  ;;  %v733_v51 = vmul.f32 %v1178_v45, %v1494_v2  ;;  %1199 = vpow2.f32 %v929_v40 }
 0x140   : > { %v1182_v49 = vpop.eup %1181  ;;  %784 = vst.msk [vmem:[%s1509_s4 + $0xd0] sm:$0xff] %vm757_vm0, %v751_v47  ;;  %v749_v48 = vmul.f32 %v1180_v42, %v1501_v7  ;;  %1201 = vpow2.f32 %v911_v33 }
 0x141   : > { %v1184_v54 = vpop.eup %1183  ;;  %766 = vst.msk [vmem:[%s1509_s4 + $0x40] sm:$0xff] %vm757_vm0, %v733_v51  ;;  %v736_v59 = vmul.f32 %v1182_v49, %v1506_v10  ;;  %1203 = vpow2.f32 %v927_v36 }
 0x142   : > { %v1186_v52 = vpop.eup %1185  ;;  %782 = vst.msk [vmem:[%s1509_s4 + $0xc0] sm:$0xff] %vm757_vm0, %v749_v48  ;;  %v752_v2 = vmul.f32 %v1184_v54, %v1517_v11 }
 0x143   : > { %v1188_v57 = vpop.eup %1187  ;;  %769 = vst.msk [vmem:[%s1509_s4 + $0x58] sm:$0xff] %vm757_vm0, %v736_v59  ;;  %v734_v7 = vmul.f32 %v1186_v52, %v1525_v31 }
 0x144   : > { %v1190_v58 = vpop.eup %1189  ;;  %785 = vst.msk [vmem:[%s1509_s4 + $0xd8] sm:$0xff] %vm757_vm0, %v752_v2  ;;  %v750_v55 = vmul.f32 %v1188_v57, %v1533_v32 }
 0x145   : > { %v1192_v63 = vpop.eup %1191  ;;  %767 = vst.msk [vmem:[%s1509_s4 + $0x48] sm:$0xff] %vm757_vm0, %v734_v7  ;;  %v739_v10 = vmul.f32 %v1190_v58, %v1540_v25 }
 0x146   : > { %v1194_v0 = vpop.eup %1193  ;;  %783 = vst.msk [vmem:[%s1509_s4 + $0xc8] sm:$0xff] %vm757_vm0, %v750_v55  ;;  %v755_v11 = vmul.f32 %v1192_v63, %v1547_v29 }
 0x147   : > { %v1196_v1 = vpop.eup %1195  ;;  %772 = vst.msk [vmem:[%s1509_s4 + $0x70] sm:$0xff] %vm757_vm0, %v739_v10  ;;  %v641_v56 = vadd.f32 1.0, %v1194_v0 }
 0x148   : > { %v1198_v31 = vpop.eup %1197  ;;  %788 = vst.msk [vmem:[%s1509_s4 + $0xf0] sm:$0xff] %vm757_vm0, %v755_v11  ;;  %v657_v4 = vadd.f32 1.0, %v1196_v1 }
 0x149   : > { %v1200_v5 = vpop.eup %1199  ;;  %1205 = vrcp.f32 %v641_v56  ;;  %v644_v32 = vadd.f32 1.0, %v1198_v31 }
 0x14a   : > { %v1202_v6 = vpop.eup %1201  ;;  %1207 = vrcp.f32 %v657_v4  ;;  %v660_v25 = vadd.f32 1.0, %v1200_v5 }
 0x14b   : > { %v1204_v61 = vpop.eup %1203  ;;  %1209 = vrcp.f32 %v644_v32  ;;  %v642_v29 = vadd.f32 1.0, %v1202_v6 }
 0x14c   : > { %1211 = vrcp.f32 %v660_v25  ;;  %v658_v8 = vadd.f32 1.0, %v1204_v61 }
 0x14d   : > { %1213 = vrcp.f32 %v642_v29 }
 0x14e   : > { %1215 = vrcp.f32 %v658_v8 }
 0x153   : > { %v1206_v9 = vpop.eup %1205 }
 0x154   : > { %v1208_v12 = vpop.eup %1207  ;;  %v737_v13 = vmul.f32 %v1206_v9, %v1577_v14 }
 0x155   : > { %v1210_v27 = vpop.eup %1209  ;;  %v753_v28 = vmul.f32 %v1208_v12, %v1581_v19 }
 0x156   : > { %v1212_v16 = vpop.eup %1211  ;;  %770 = vst.msk [vmem:[%s1509_s4 + $0x60] sm:$0xff] %vm757_vm0, %v737_v13  ;;  %v740_v17 = vmul.f32 %v1210_v27, %v1585_v22 }
 0x157   : > { %v1214_v20 = vpop.eup %1213  ;;  %786 = vst.msk [vmem:[%s1509_s4 + $0xe0] sm:$0xff] %vm757_vm0, %v753_v28  ;;  %v756_v14 = vmul.f32 %v1212_v16, %v1589_v46 }
 0x158   : > { %v1216_v15 = vpop.eup %1215  ;;  %773 = vst.msk [vmem:[%s1509_s4 + $0x78] sm:$0xff] %vm757_vm0, %v740_v17  ;;  %v738_v19 = vmul.f32 %v1214_v20, %v1594_v21 }
 0x159   : > { %789 = vst.msk [vmem:[%s1509_s4 + $0xf8] sm:$0xff] %vm757_vm0, %v756_v14  ;;  %v754_v22 = vmul.f32 %v1216_v15, %v1599_v60 }
 0x15a   : > { %771 = vst.msk [vmem:[%s1509_s4 + $0x68] sm:$0xff] %vm757_vm0, %v738_v19 }
 0x15b   : > { %787 = vst.msk [vmem:[%s1509_s4 + $0xe8] sm:$0xff] %vm757_vm0, %v754_v22 }
 0x15c   : > { %1230 = shalt.err (!%p1227_p3)
}
 0x15d   : > { %s1231_s20 = scalar_lea.hbm %s1660_s8, 4096  ;;  %s1235_s26 = scalar_lea.hbm %s1717_s3, 8192 }
 0x15e   : > { %p1232_p4 = scmp.ne.s32.totalorder %s1660_s8, %s1231_s20  ;;  %p1236_p9 = scmp.lt.u32.totalorder %s1660_s8, %s1717_s3 }
 0x15f   : > { %p1237_p10 = scmp.lt.u32.totalorder %s1235_s26, %s1231_s20  ;;  %p1239_p12 = scmp.lt.u32.totalorder %s1231_s20, %s1660_s8 }
 0x160   : > { %p1233_p7 = pnand %p1232_p4, %p1342_p5 }
 0x161   : > { %p1238_p11 = por %p1237_p10, %p1236_p9 }
 0x162   : > { %p1234_p8 = pneg %p1233_p7 }
 0x163   : > { %p1240_p13 = por %p1239_p12, %p1238_p11 }
 0x165   : > { %p1241_p0 = pnand %p1240_p13, %p1234_p8 }
 0x167   : > { %1244 = shalt.err (!%p1241_p0)
}
 0x168   : > { %s1282_s29 = smov 128   ;;  %s1283_s30 = smov 8  }
 0x169   : > { %1024 = dma.vmem_to_hbm [thread:$0]  (%p1342_p5), %s1662_s6, 4096, %s1660_s8, %s1673_s9, %s1282_s29, %s1282_s29, %s1283_s30  }
 0x16a PF: > { %p1030_p1 = scmp.ge.s32.totalorder %s1279_s15, 2  ;;  %s819_s4 = sand.u32 1, %s1267_s12  }
 0x16b   : > { %s820_s5 = scalar_lea.sflag [#allocation3], %s819_s4 }
 0x16c   : > { %p1027_p2 = pnand %p1030_p1, %p1346_p6 }
 0x16e   : > { %1262 = dma.done.wait (!%p1027_p2), %s820_s5, 4096  }
 0x16f   : > { %1264 = vsyncadd (!%p1027_p2), %s820_s5, 4294963200  ;;  %p13_p3 = scmp.ge.s32.totalorder %s1329_s18, 4   ;;  %s1720_s12 = smov %s1271_s13 }
 0x170   : > { %s1721_s13 = smov %s1275_s14  ;;  %s1722_s14 = smov %s1340_s21 }
 0x171   : > { %s1723_s15 = smov %s1329_s18  ;;  %15 = sbr.rel (!%p13_p3) target bundleno = 3 (0x3), region = 67 }
 0x178   :  { %825 = vsyncpa [#allocation3], 1 }
 0x179   :  { %827 = vsyncpa [#allocation3 + $0x1], 1 }

// kernel: _lambda_.2
= control target key start
LH: loop header
LB: loop body
LE: loop exit
PB: predicated region body
PF: predicated region fallthrough
CT: control target
= control target key end

     0   :  { %s7911_s15 = smov 0   ;;  %s7913_s16 = smov 0   ;;  %s11109_s0 = inlined_call_operand.vmem [shape: bf16[2,52,52,64], index: 0, kind: input, shape index: {}]   ;;  %s11110_s1 = inlined_call_operand.vmem [shape: bf16[3,3,192,32], index: 1, kind: input, shape index: {}]   ;;  %s11111_s2 = inlined_call_operand.vmem [shape: f32[3,1,32], index: 2, kind: input, shape index: {}]   ;;  %s11112_s3 = inlined_call_operand.vmem [shape: f32[64,32], index: 3, kind: input, shape index: {}]   ;;  %s11113_s4 = inlined_call_operand.vmem [shape: bf16[2,16,16,128], index: 4, kind: output, shape index: {}]  }
   0x1   :  { %s7915_s17 = smov 0   ;;  %s7917_s18 = smov 0  }
   0x2   :  { %s7919_s19 = smov 0   ;;  %s7921_s20 = smov 0  }
   0x3   :  { %s7923_s21 = smov 0  }
   0x4 LB: > { %s23_s22 = sadd.s32 1, %s7867_s19  ;;  %s26_s23 = sadd.s32 1, %s7871_s20  ;;  %s7875_s21 = sphi %s7923_s21, %s14_s21   ;;  %s7871_s20 = sphi %s7921_s20, %s11235_s20   ;;  %s7867_s19 = sphi %s7919_s19, %s11234_s19   ;;  %s7863_s18 = sphi %s7917_s18, %s11233_s18   ;;  %s7859_s17 = sphi %s7915_s17, %s11232_s17   ;;  %s7855_s16 = sphi %s7913_s16, %s11231_s16   ;;  %s7851_s15 = sphi %s7911_s15, %s11230_s15  }
   0x5   : > { %p24_p0 = scmp.ge.s32.totalorder %s23_s22, 3  ;;  %s59_s24 = sadd.s32 1, %s7855_s16 }
   0x6   : > { %p66_p1 = scmp.ne.s32.totalorder %s7855_s16, %s7851_s15  ;;  %p67_p2 = scmp.eq.s32.totalorder %s7875_s21, 0 }
   0x7   : > { %s11237_s22 = smov (%p24_p0, %s23_s22), 0  ;;  %s11239_s23 = smov (!%p24_p0, %s26_s23), %s7871_s20 }
   0x8   : > { %s56_s25 = ssub.s32 %s7867_s19, %s11237_s22  ;;  %p68_p3 = por %p67_p2, %p66_p1 }
   0x9   : > { %p28_p4 = scmp.ge.s32.totalorder %s11239_s23, 2  ;;  %p57_p5 = scmp.eq.s32.totalorder %s56_s25, 0 }
   0xa   : > { %p6088_p6 = scmp.ge.s32.totalorder %s7875_s21, 6 }
   0xb   : > { %s11241_s23 = smov (%p28_p4, %s11239_s23), 0 }
   0xc   : > { %s7960_s26 = scalar_select %p57_p5, %s7855_s16, %s59_s24  }
   0xd   : > { %166 = sbr.rel (%p6088_p6) target bundleno = 43 (0x2b), region = 24 }
  0x14   : > { %177 = sbr.rel (!%p68_p3) target bundleno = 43 (0x2b), region = 32  ;;  %s179_s27 = sand.u32 (%p68_p3), 1, %s7855_s16  }
  0x15   : > { %s7123_s28 = smul.u32 (%p68_p3), 96, %s7867_s19 }
  0x16   : > { %s7122_s29 = smul.u32 (%p68_p3), 288, %s179_s27 }
  0x17   : > { %s7968_s6 = scalar_lea.vmem (%p68_p3), %s11110_s1, %s7123_s28 }
  0x18   : > { %v200_v0 = vld [vmem:[%s7968_s6] sm:$0xff] (%p68_p3)   ;;  %v204_v1 = vld [vmem:[%s7968_s6 + $0x8] sm:$0xff] (%p68_p3)   ;;  %v208_v2 = vld [vmem:[%s7968_s6 + $0x10] sm:$0xff] (%p68_p3)   ;;  %s7973_s7 = scalar_lea.vmem (%p68_p3), [#allocation3], %s7122_s29 }
  0x19   : > { %201 = vst [vmem:[%s7973_s7] sm:$0xff] (%p68_p3), %v200_v0   ;;  %205 = vst [vmem:[%s7973_s7 + $0x8] sm:$0xff] (%p68_p3), %v204_v1   ;;  %v212_v3 = vld [vmem:[%s7968_s6 + $0x18] sm:$0xff] (%p68_p3)   ;;  %v216_v4 = vld [vmem:[%s7968_s6 + $0x20] sm:$0xff] (%p68_p3)  }
  0x1a   : > { %209 = vst [vmem:[%s7973_s7 + $0x10] sm:$0xff] (%p68_p3), %v208_v2   ;;  %v220_v5 = vld [vmem:[%s7968_s6 + $0x28] sm:$0xff] (%p68_p3)   ;;  %213 = vst [vmem:[%s7973_s7 + $0x18] sm:$0xff] (%p68_p3), %v212_v3   ;;  %v224_v6 = vld [vmem:[%s7968_s6 + $0x30] sm:$0xff] (%p68_p3)  }
  0x1b   : > { %217 = vst [vmem:[%s7973_s7 + $0x20] sm:$0xff] %v216_v4   ;;  %221 = vst [vmem:[%s7973_s7 + $0x28] sm:$0xff] %v220_v5   ;;  %v228_v7 = vld [vmem:[%s7968_s6 + $0x38] sm:$0xff]   ;;  %v232_v8 = vld [vmem:[%s7968_s6 + $0x40] sm:$0xff]  }
  0x1c   : > { %225 = vst [vmem:[%s7973_s7 + $0x30] sm:$0xff] %v224_v6   ;;  %229 = vst [vmem:[%s7973_s7 + $0x38] sm:$0xff] %v228_v7   ;;  %v236_v9 = vld [vmem:[%s7968_s6 + $0x48] sm:$0xff]   ;;  %v240_v10 = vld [vmem:[%s7968_s6 + $0x50] sm:$0xff]  }
  0x1d   : > { %233 = vst [vmem:[%s7973_s7 + $0x40] sm:$0xff] %v232_v8   ;;  %v244_v11 = vld [vmem:[%s7968_s6 + $0x58] sm:$0xff]   ;;  %237 = vst [vmem:[%s7973_s7 + $0x48] sm:$0xff] %v236_v9   ;;  %v248_v12 = vld [vmem:[%s7968_s6 + $0x120] sm:$0xff]  }
  0x1e   : > { %241 = vst [vmem:[%s7973_s7 + $0x50] sm:$0xff] %v240_v10   ;;  %245 = vst [vmem:[%s7973_s7 + $0x58] sm:$0xff] %v244_v11   ;;  %v252_v13 = vld [vmem:[%s7968_s6 + $0x128] sm:$0xff]   ;;  %v256_v14 = vld [vmem:[%s7968_s6 + $0x130] sm:$0xff]  }
  0x1f   : > { %249 = vst [vmem:[%s7973_s7 + $0x60] sm:$0xff] %v248_v12   ;;  %253 = vst [vmem:[%s7973_s7 + $0x68] sm:$0xff] %v252_v13   ;;  %v260_v15 = vld [vmem:[%s7968_s6 + $0x138] sm:$0xff]   ;;  %v264_v16 = vld [vmem:[%s7968_s6 + $0x140] sm:$0xff]  }
  0x20   : > { %257 = vst [vmem:[%s7973_s7 + $0x70] sm:$0xff] %v256_v14   ;;  %v268_v17 = vld [vmem:[%s7968_s6 + $0x148] sm:$0xff]   ;;  %261 = vst [vmem:[%s7973_s7 + $0x78] sm:$0xff] %v260_v15   ;;  %v272_v18 = vld [vmem:[%s7968_s6 + $0x150] sm:$0xff]  }
  0x21   : > { %265 = vst [vmem:[%s7973_s7 + $0x80] sm:$0xff] %v264_v16   ;;  %269 = vst [vmem:[%s7973_s7 + $0x88] sm:$0xff] %v268_v17   ;;  %v276_v19 = vld [vmem:[%s7968_s6 + $0x158] sm:$0xff]   ;;  %v280_v20 = vld [vmem:[%s7968_s6 + $0x160] sm:$0xff]  }
  0x22   : > { %273 = vst [vmem:[%s7973_s7 + $0x90] sm:$0xff] %v272_v18   ;;  %277 = vst [vmem:[%s7973_s7 + $0x98] sm:$0xff] %v276_v19   ;;  %v284_v21 = vld [vmem:[%s7968_s6 + $0x168] sm:$0xff]   ;;  %v288_v22 = vld [vmem:[%s7968_s6 + $0x170] sm:$0xff]  }
  0x23   : > { %281 = vst [vmem:[%s7973_s7 + $0xa0] sm:$0xff] %v280_v20   ;;  %v292_v23 = vld [vmem:[%s7968_s6 + $0x178] sm:$0xff]   ;;  %285 = vst [vmem:[%s7973_s7 + $0xa8] sm:$0xff] %v284_v21   ;;  %v296_v24 = vld [vmem:[%s7968_s6 + $0x240] sm:$0xff]  }
  0x24   : > { %289 = vst [vmem:[%s7973_s7 + $0xb0] sm:$0xff] %v288_v22   ;;  %293 = vst [vmem:[%s7973_s7 + $0xb8] sm:$0xff] %v292_v23   ;;  %v300_v25 = vld [vmem:[%s7968_s6 + $0x248] sm:$0xff]   ;;  %v304_v26 = vld [vmem:[%s7968_s6 + $0x250] sm:$0xff]  }
  0x25   : > { %297 = vst [vmem:[%s7973_s7 + $0xc0] sm:$0xff] %v296_v24   ;;  %301 = vst [vmem:[%s7973_s7 + $0xc8] sm:$0xff] %v300_v25   ;;  %v308_v27 = vld [vmem:[%s7968_s6 + $0x258] sm:$0xff]   ;;  %v312_v28 = vld [vmem:[%s7968_s6 + $0x260] sm:$0xff]  }
  0x26   : > { %305 = vst [vmem:[%s7973_s7 + $0xd0] sm:$0xff] %v304_v26   ;;  %v316_v29 = vld [vmem:[%s7968_s6 + $0x268] sm:$0xff]   ;;  %309 = vst [vmem:[%s7973_s7 + $0xd8] sm:$0xff] %v308_v27   ;;  %v320_v30 = vld [vmem:[%s7968_s6 + $0x270] sm:$0xff]  }
  0x27   : > { %313 = vst [vmem:[%s7973_s7 + $0xe0] sm:$0xff] %v312_v28   ;;  %317 = vst [vmem:[%s7973_s7 + $0xe8] sm:$0xff] %v316_v29   ;;  %v324_v31 = vld [vmem:[%s7968_s6 + $0x278] sm:$0xff]   ;;  %v328_v32 = vld [vmem:[%s7968_s6 + $0x280] sm:$0xff]  }
  0x28   : > { %321 = vst [vmem:[%s7973_s7 + $0xf0] sm:$0xff] %v320_v30   ;;  %325 = vst [vmem:[%s7973_s7 + $0xf8] sm:$0xff] %v324_v31   ;;  %v332_v33 = vld [vmem:[%s7968_s6 + $0x288] sm:$0xff]   ;;  %v336_v34 = vld [vmem:[%s7968_s6 + $0x290] sm:$0xff]  }
  0x29   : > { %329 = vst [vmem:[%s7973_s7 + $0x100] sm:$0xff] %v328_v32   ;;  %v340_v35 = vld [vmem:[%s7968_s6 + $0x298] sm:$0xff]   ;;  %333 = vst [vmem:[%s7973_s7 + $0x108] sm:$0xff] %v332_v33  }
  0x2a   : > { %337 = vst [vmem:[%s7973_s7 + $0x110] sm:$0xff] %v336_v34   ;;  %341 = vst [vmem:[%s7973_s7 + $0x118] sm:$0xff] %v340_v35  }
  0x2b PF: > { %p6090_p7 = scmp.ge.s32.totalorder %s7875_s21, 1  ;;  %p509_p8 = scmp.lt.s32.totalorder %s7875_s21, 7 }
  0x2d   : > { %p510_p9 = pnand %p6090_p7, %p509_p8 }
  0x2e   : > { %s516_s8 = sand.u32 (!%p510_p9), 1, %s7851_s15   ;;  %p546_p10 = scmp.lt.s32.totalorder (!%p510_p9), %s7863_s18, 1 }
  0x2f   : > { %513 = sbr.rel (%p510_p9) target bundleno = 1121 (0x461), region = 73  ;;  %p6094_p11 = scmp.ne.s32.totalorder (!%p510_p9), %s7859_s17, 0 }
  0x30   : > { %s7124_s9 = smul.u32 (!%p510_p9), 288, %s516_s8 }
  0x32   : > { %s8059_s28 = scalar_lea.vmem (!%p510_p9), [#allocation3], %s7124_s9 }
  0x36   : > { %s11243_s18 = smov (!%p546_p10, %s7863_s18), 1  ;;  %560 = sbr.rel (%p6094_p11) target bundleno = 104 (0x68), region = 81 }
  0x37   : > { %s7125_s10 = smul.u32 1456, %s11243_s18  ;;  %s6929_s11 = sshll.u32 %s11243_s18, 7  ;;  %vm561_vm0 = vcmask (!%p6094_p11), 261120   ;;  %v7877_v36 = vmov (!%p6094_p11), 0.0  }
  0x38   : > { %s8052_s14 = scalar_lea.vmem %s11113_s4, %s6929_s11  ;;  %562 = vst.msk [vmem:[#allocation2] sm:$0xff] (!%p6094_p11), %vm561_vm0, %v7877_v36  ;;  %563 = vst.msk [vmem:[#allocation2 + $0x8] sm:$0xff] (!%p6094_p11), %vm561_vm0, %v7877_v36 }
  0x39   : > { %s8057_s27 = scalar_lea.vmem %s11109_s0, %s7125_s10  ;;  %564 = vst.msk [vmem:[#allocation2 + $0x10] sm:$0xff] (!%p6094_p11), %vm561_vm0, %v7877_v36  ;;  %565 = vst.msk [vmem:[#allocation2 + $0x18] sm:$0xff] (!%p6094_p11), %vm561_vm0, %v7877_v36 }
  0x3a   : > { %566 = vst.msk [vmem:[#allocation2 + $0x20] sm:$0xff] (!%p6094_p11), %vm561_vm0, %v7877_v36  ;;  %567 = vst.msk [vmem:[#allocation2 + $0x28] sm:$0xff] (!%p6094_p11), %vm561_vm0, %v7877_v36 }
  0x3b   : > { %568 = vst.msk [vmem:[#allocation2 + $0x30] sm:$0xff] (!%p6094_p11), %vm561_vm0, %v7877_v36  ;;  %569 = vst.msk [vmem:[#allocation2 + $0x38] sm:$0xff] (!%p6094_p11), %vm561_vm0, %v7877_v36 }
  0x3c   : > { %570 = vst.msk [vmem:[#allocation2 + $0x40] sm:$0xff] (!%p6094_p11), %vm561_vm0, %v7877_v36  ;;  %571 = vst.msk [vmem:[#allocation2 + $0x48] sm:$0xff] (!%p6094_p11), %vm561_vm0, %v7877_v36 }
  0x3d   : > { %572 = vst.msk [vmem:[#allocation2 + $0x50] sm:$0xff] %vm561_vm0, %v7877_v36  ;;  %573 = vst.msk [vmem:[#allocation2 + $0x58] sm:$0xff] %vm561_vm0, %v7877_v36 }
  0x3e   : > { %574 = vst.msk [vmem:[#allocation2 + $0x60] sm:$0xff] %vm561_vm0, %v7877_v36  ;;  %575 = vst.msk [vmem:[#allocation2 + $0x68] sm:$0xff] %vm561_vm0, %v7877_v36 }
  0x3f   : > { %576 = vst.msk [vmem:[#allocation2 + $0x70] sm:$0xff] %vm561_vm0, %v7877_v36  ;;  %577 = vst.msk [vmem:[#allocation2 + $0x78] sm:$0xff] %vm561_vm0, %v7877_v36 }
  0x40   : > { %578 = vst.msk [vmem:[#allocation2 + $0x80] sm:$0xff] %vm561_vm0, %v7877_v36  ;;  %579 = vst.msk [vmem:[#allocation2 + $0x88] sm:$0xff] %vm561_vm0, %v7877_v36 }
  0x41   : > { %580 = vst.msk [vmem:[#allocation2 + $0x90] sm:$0xff] %vm561_vm0, %v7877_v36  ;;  %581 = vst.msk [vmem:[#allocation2 + $0x98] sm:$0xff] %vm561_vm0, %v7877_v36 }
  0x42   : > { %582 = vst.msk [vmem:[#allocation2 + $0xa0] sm:$0xff] %vm561_vm0, %v7877_v36  ;;  %583 = vst.msk [vmem:[#allocation2 + $0xa8] sm:$0xff] %vm561_vm0, %v7877_v36 }
  0x43   : > { %584 = vst.msk [vmem:[#allocation2 + $0xb0] sm:$0xff] %vm561_vm0, %v7877_v36  ;;  %585 = vst.msk [vmem:[#allocation2 + $0xb8] sm:$0xff] %vm561_vm0, %v7877_v36 }
  0x44   : > { %586 = vst.msk [vmem:[#allocation2 + $0xc0] sm:$0xff] %vm561_vm0, %v7877_v36  ;;  %587 = vst.msk [vmem:[#allocation2 + $0xc8] sm:$0xff] %vm561_vm0, %v7877_v36 }
  0x45   : > { %588 = vst.msk [vmem:[#allocation2 + $0xd0] sm:$0xff] %vm561_vm0, %v7877_v36  ;;  %589 = vst.msk [vmem:[#allocation2 + $0xd8] sm:$0xff] %vm561_vm0, %v7877_v36 }
  0x46   : > { %590 = vst.msk [vmem:[#allocation2 + $0xe0] sm:$0xff] %vm561_vm0, %v7877_v36  ;;  %591 = vst.msk [vmem:[#allocation2 + $0xe8] sm:$0xff] %vm561_vm0, %v7877_v36 }
  0x47   : > { %592 = vst.msk [vmem:[#allocation2 + $0xf0] sm:$0xff] %vm561_vm0, %v7877_v36  ;;  %593 = vst.msk [vmem:[#allocation2 + $0xf8] sm:$0xff] %vm561_vm0, %v7877_v36 }
  0x48   : > { %594 = vst.msk [vmem:[#allocation2 + $0x100] sm:$0xff] %vm561_vm0, %v7877_v36  ;;  %595 = vst.msk [vmem:[#allocation2 + $0x108] sm:$0xff] %vm561_vm0, %v7877_v36 }
  0x49   : > { %596 = vst.msk [vmem:[#allocation2 + $0x110] sm:$0xff] %vm561_vm0, %v7877_v36  ;;  %597 = vst.msk [vmem:[#allocation2 + $0x118] sm:$0xff] %vm561_vm0, %v7877_v36 }
  0x4a   : > { %598 = vst.msk [vmem:[#allocation2 + $0x120] sm:$0xff] %vm561_vm0, %v7877_v36  ;;  %599 = vst.msk [vmem:[#allocation2 + $0x128] sm:$0xff] %vm561_vm0, %v7877_v36 }
  0x4b   : > { %600 = vst.msk [vmem:[#allocation2 + $0x130] sm:$0xff] %vm561_vm0, %v7877_v36  ;;  %601 = vst.msk [vmem:[#allocation2 + $0x138] sm:$0xff] %vm561_vm0, %v7877_v36 }
  0x4c   : > { %602 = vst.msk [vmem:[#allocation2 + $0x140] sm:$0xff] %vm561_vm0, %v7877_v36  ;;  %603 = vst.msk [vmem:[#allocation2 + $0x148] sm:$0xff] %vm561_vm0, %v7877_v36 }
  0x4d   : > { %604 = vst.msk [vmem:[#allocation2 + $0x150] sm:$0xff] %vm561_vm0, %v7877_v36  ;;  %605 = vst.msk [vmem:[#allocation2 + $0x158] sm:$0xff] %vm561_vm0, %v7877_v36 }
  0x4e   : > { %606 = vst.msk [vmem:[#allocation2 + $0x160] sm:$0xff] %vm561_vm0, %v7877_v36  ;;  %607 = vst.msk [vmem:[#allocation2 + $0x168] sm:$0xff] %vm561_vm0, %v7877_v36 }
  0x4f   : > { %608 = vst.msk [vmem:[#allocation2 + $0x170] sm:$0xff] %vm561_vm0, %v7877_v36  ;;  %609 = vst.msk [vmem:[#allocation2 + $0x178] sm:$0xff] %vm561_vm0, %v7877_v36 }
  0x50   : > { %610 = vst.msk [vmem:[#allocation2 + $0x180] sm:$0xff] %vm561_vm0, %v7877_v36  ;;  %611 = vst.msk [vmem:[#allocation2 + $0x188] sm:$0xff] %vm561_vm0, %v7877_v36 }
  0x51   : > { %612 = vst.msk [vmem:[#allocation2 + $0x190] sm:$0xff] %vm561_vm0, %v7877_v36  ;;  %613 = vst.msk [vmem:[#allocation2 + $0x198] sm:$0xff] %vm561_vm0, %v7877_v36 }
  0x52   : > { %614 = vst.msk [vmem:[#allocation2 + $0x1a0] sm:$0xff] %vm561_vm0, %v7877_v36  ;;  %615 = vst.msk [vmem:[#allocation2 + $0x1a8] sm:$0xff] %vm561_vm0, %v7877_v36 }
  0x53   : > { %616 = vst.msk [vmem:[#allocation2 + $0x1b0] sm:$0xff] %vm561_vm0, %v7877_v36  ;;  %617 = vst.msk [vmem:[#allocation2 + $0x1b8] sm:$0xff] %vm561_vm0, %v7877_v36 }
  0x54   : > { %618 = vst.msk [vmem:[#allocation2 + $0x1c0] sm:$0xff] %vm561_vm0, %v7877_v36  ;;  %619 = vst.msk [vmem:[#allocation2 + $0x1c8] sm:$0xff] %vm561_vm0, %v7877_v36 }
  0x55   : > { %620 = vst.msk [vmem:[#allocation2 + $0x1d0] sm:$0xff] %vm561_vm0, %v7877_v36  ;;  %621 = vst.msk [vmem:[#allocation2 + $0x1d8] sm:$0xff] %vm561_vm0, %v7877_v36 }
  0x56   : > { %622 = vst.msk [vmem:[#allocation2 + $0x1e0] sm:$0xff] %vm561_vm0, %v7877_v36  ;;  %623 = vst.msk [vmem:[#allocation2 + $0x1e8] sm:$0xff] %vm561_vm0, %v7877_v36 }
  0x57   : > { %624 = vst.msk [vmem:[#allocation2 + $0x1f0] sm:$0xff] %vm561_vm0, %v7877_v36  ;;  %625 = vst.msk [vmem:[#allocation2 + $0x1f8] sm:$0xff] %vm561_vm0, %v7877_v36 }
  0x58   : > { %626 = vst.msk [vmem:[#allocation2 + $0x200] sm:$0xff] %vm561_vm0, %v7877_v36  ;;  %627 = vst.msk [vmem:[#allocation2 + $0x208] sm:$0xff] %vm561_vm0, %v7877_v36 }
  0x59   : > { %628 = vst.msk [vmem:[#allocation2 + $0x210] sm:$0xff] %vm561_vm0, %v7877_v36  ;;  %629 = vst.msk [vmem:[#allocation2 + $0x218] sm:$0xff] %vm561_vm0, %v7877_v36 }
  0x5a   : > { %630 = vst.msk [vmem:[#allocation2 + $0x220] sm:$0xff] %vm561_vm0, %v7877_v36  ;;  %631 = vst.msk [vmem:[#allocation2 + $0x228] sm:$0xff] %vm561_vm0, %v7877_v36 }
  0x5b   : > { %632 = vst.msk [vmem:[#allocation2 + $0x230] sm:$0xff] %vm561_vm0, %v7877_v36  ;;  %633 = vst.msk [vmem:[#allocation2 + $0x238] sm:$0xff] %vm561_vm0, %v7877_v36 }
  0x5c   : > { %634 = vst.msk [vmem:[#allocation2 + $0x240] sm:$0xff] %vm561_vm0, %v7877_v36  ;;  %635 = vst.msk [vmem:[#allocation2 + $0x248] sm:$0xff] %vm561_vm0, %v7877_v36 }
  0x5d   : > { %636 = vst.msk [vmem:[#allocation2 + $0x250] sm:$0xff] %vm561_vm0, %v7877_v36  ;;  %637 = vst.msk [vmem:[#allocation2 + $0x258] sm:$0xff] %vm561_vm0, %v7877_v36 }
  0x5e   : > { %638 = vst.msk [vmem:[#allocation2 + $0x260] sm:$0xff] %vm561_vm0, %v7877_v36  ;;  %639 = vst.msk [vmem:[#allocation2 + $0x268] sm:$0xff] %vm561_vm0, %v7877_v36 }
  0x5f   : > { %640 = vst.msk [vmem:[#allocation2 + $0x270] sm:$0xff] %vm561_vm0, %v7877_v36  ;;  %641 = vst.msk [vmem:[#allocation2 + $0x278] sm:$0xff] %vm561_vm0, %v7877_v36 }
  0x60   : > { %642 = vst.msk [vmem:[#allocation2 + $0x280] sm:$0xff] %vm561_vm0, %v7877_v36  ;;  %643 = vst.msk [vmem:[#allocation2 + $0x288] sm:$0xff] %vm561_vm0, %v7877_v36 }
  0x61   : > { %644 = vst.msk [vmem:[#allocation2 + $0x290] sm:$0xff] %vm561_vm0, %v7877_v36  ;;  %645 = vst.msk [vmem:[#allocation2 + $0x298] sm:$0xff] %vm561_vm0, %v7877_v36 }
  0x62   : > { %646 = vst.msk [vmem:[#allocation2 + $0x2a0] sm:$0xff] %vm561_vm0, %v7877_v36  ;;  %647 = vst.msk [vmem:[#allocation2 + $0x2a8] sm:$0xff] %vm561_vm0, %v7877_v36 }
  0x63   : > { %648 = vst.msk [vmem:[#allocation2 + $0x2b0] sm:$0xff] %vm561_vm0, %v7877_v36  ;;  %649 = vst.msk [vmem:[#allocation2 + $0x2b8] sm:$0xff] %vm561_vm0, %v7877_v36 }
  0x64   : > { %650 = vst.msk [vmem:[#allocation2 + $0x2c0] sm:$0xff] %vm561_vm0, %v7877_v36  ;;  %651 = vst.msk [vmem:[#allocation2 + $0x2c8] sm:$0xff] %vm561_vm0, %v7877_v36 }
  0x65   : > { %652 = vst.msk [vmem:[#allocation2 + $0x2d0] sm:$0xff] %vm561_vm0, %v7877_v36  ;;  %653 = vst.msk [vmem:[#allocation2 + $0x2d8] sm:$0xff] %vm561_vm0, %v7877_v36 }
  0x66   : > { %654 = vst.msk [vmem:[#allocation2 + $0x2e0] sm:$0xff] %vm561_vm0, %v7877_v36  ;;  %655 = vst.msk [vmem:[#allocation2 + $0x2e8] sm:$0xff] %vm561_vm0, %v7877_v36 }
  0x67   : > { %656 = vst.msk [vmem:[#allocation2 + $0x2f0] sm:$0xff] %vm561_vm0, %v7877_v36  ;;  %657 = vst.msk [vmem:[#allocation2 + $0x2f8] sm:$0xff] %vm561_vm0, %v7877_v36 }
  0x68 PF: > { %s6095_s15 = smul.u32 168, %s7859_s17  ;;  %vm970_vm1 = vcmask 1042432   ;;  %vm971_vm2 = vcmask 1046532   ;;  %v7191_v37 = vld [vmem:[%s8059_s28] sm:$0xff]   ;;  %v7878_v39 = vmov 0   ;;  %v7192_v40 = vld [vmem:[%s8059_s28 + $0x8] sm:$0xff]  }
  0x69   : > { %vm8256_vm3 = vmor %vm970_vm1, %vm971_vm2  ;;  %1534 = vmatprep.subr.bf16.mxu0 %v7878_v39  ;;  %7098 = vmatprep.subr.bf16.mxu1 %v7878_v39  ;;  %v7193_v56 = vld [vmem:[%s8059_s28 + $0x10] sm:$0xff]   ;;  %v7194_v7 = vld [vmem:[%s8059_s28 + $0x18] sm:$0xff]   ;;  %s7879_s29 = smov 64   ;;  %s6930_s30 = smul.u32 504, %s7859_s17  ;;  %vm1293_vm4 = vcmask 523264   ;;  %vm759_vm5 = vcmask 1041408  }
  0x6a   : > { %s8263_s18 = scalar_lea.vmem %s8057_s27, %s6095_s15  ;;  %1535 = vmatpush1.bf16.msra.mxu0 %v7191_v37  ;;  %7110 = vmatpush1.bf16.msra.mxu1 %v7191_v37  ;;  %v7195_v25 = vld [vmem:[%s8059_s28 + $0x20] sm:$0xff]   ;;  %s6316_s5 = smul.u32 336, %s7859_s17  ;;  %vm760_vm6 = vcmask 1045508   ;;  %vm1861_vm8 = vcmask 1040384   ;;  %vm1862_vm9 = vcmask 1044484   ;;  %vm1727_vm11 = vcmask 261120  }
  0x6b   : > { %v6160_v41 = vld [vmem:[%s8263_s18 + $0x158] sm:$0xe]  ;;  %v8268_v42 = vld [vmem:[%s8263_s18 + $0x15c] sm:$0xf]  ;;  %v6162_v43 = vld [vmem:[%s8263_s18 + $0x160] sm:$0x1]  ;;  %1536 = vmatprep.subr.bf16.mxu0 %v7878_v39  ;;  %7099 = vmatprep.subr.bf16.mxu1 %v7878_v39  ;;  %s8399_s6 = scalar_lea.vmem %s8057_s27, %s6930_s30 }
  0x6c   : > { %v6208_v44 = vrot.slane %v6160_v41, 9  ;;  %v975_v45 = vrot.slane %v8268_v42, 5  ;;  %v978_v46 = vrot.slane %v6162_v43, 5  ;;  %v6184_v47 = vld [vmem:[%s8263_s18 + $0x238] sm:$0xe]  ;;  %s8418_s7 = scalar_lea.vmem %s8057_s27, %s6316_s5  ;;  %vm8691_vm7 = vmor %vm759_vm5, %vm760_vm6  ;;  %p6743_p12 = scmp.ne.s32.totalorder %s7859_s17, 2 }
  0x6d   : > { %v8276_v48 = vld [vmem:[%s8263_s18 + $0x23c] sm:$0xf]  ;;  %v6186_v49 = vld [vmem:[%s8263_s18 + $0x240] sm:$0x1]  ;;  %v6216_v50 = vrot.slane %v6184_v47, 9  ;;  %vm9176_vm10 = vmor %vm1861_vm8, %vm1862_vm9 }
  0x6e   : > { %v976_v51 = vsel %vm8256_vm3, %v6208_v44, %v975_v45  ;;  %v977_v52 = vrot.slane %v975_v45, 4  ;;  %v1031_v53 = vrot.slane %v8276_v48, 5  ;;  %v1034_v54 = vrot.slane %v6186_v49, 5  ;;  %v6163_v55 = vld [vmem:[%s8263_s18 + $0x174] sm:$0xe]  ;;  %1537 = vmatpush1.bf16.msra.mxu0 %v7192_v40  ;;  %7111 = vmatpush1.bf16.msra.mxu1 %v7192_v40 }
  0x6f   : > { %v6164_v57 = vld [vmem:[%s8263_s18 + $0x178] sm:$0xf]  ;;  %v6165_v58 = vld [vmem:[%s8263_s18 + $0x17c] sm:$0x1]  ;;  %v6209_v59 = vrot.slane %v6163_v55, 9  ;;  %1538 = vmatprep.subr.bf16.mxu0 %v7878_v39  ;;  %7100 = vmatprep.subr.bf16.mxu1 %v7878_v39 }
  0x70   : > { %v979_v60 = vsel %vm8256_vm3, %v977_v52, %v978_v46  ;;  %v1032_v61 = vsel %vm8256_vm3, %v6216_v50, %v1031_v53  ;;  %v1033_v62 = vrot.slane %v1031_v53, 4  ;;  %v982_v63 = vrot.slane %v6164_v57, 5  ;;  %v6187_v0 = vld [vmem:[%s8263_s18 + $0x254] sm:$0xe]  ;;  %v6188_v1 = vld [vmem:[%s8263_s18 + $0x258] sm:$0xf] }
  0x71   : > { %v6256_v2 = vcombine.low %v976_v51, %v979_v60  ;;  %v985_v3 = vrot.slane %v6165_v58, 5  ;;  %v6189_v4 = vld [vmem:[%s8263_s18 + $0x25c] sm:$0x1]  ;;  %v6217_v5 = vrot.slane %v6187_v0, 9  ;;  %v1038_v6 = vrot.slane %v6188_v1, 5  ;;  %v7196_v58 = vld [vmem:[%s8059_s28 + $0x28] sm:$0xff]  }
  0x72   : > { %v1035_v8 = vsel %vm8256_vm3, %v1033_v62, %v1034_v54  ;;  %v983_v9 = vsel %vm8256_vm3, %v6209_v59, %v982_v63  ;;  %v984_v10 = vrot.slane %v982_v63, 4  ;;  %v1041_v11 = vrot.slane %v6189_v4, 5  ;;  %v6166_v12 = vld [vmem:[%s8263_s18 + $0x190] sm:$0xe]  ;;  %v6167_v13 = vld [vmem:[%s8263_s18 + $0x194] sm:$0xf]  ;;  %1539 = vmatpush1.bf16.msra.mxu0 %v7193_v56  ;;  %7112 = vmatpush1.bf16.msra.mxu1 %v7193_v56 }
  0x73   : > { %1197 = vrot.lane.b32.xlu0 %v6256_v2, %s7879_s29  ;;  %v6264_v14 = vcombine.low %v1032_v61, %v1035_v8  ;;  %v1039_v15 = vsel %vm8256_vm3, %v6217_v5, %v1038_v6  ;;  %v1040_v16 = vrot.slane %v1038_v6, 4  ;;  %v6168_v17 = vld [vmem:[%s8263_s18 + $0x198] sm:$0x1]  ;;  %v6210_v18 = vrot.slane %v6166_v12, 9  ;;  %v6190_v19 = vld [vmem:[%s8263_s18 + $0x270] sm:$0xe]  ;;  %1540 = vmatprep.subr.bf16.mxu0 %v7878_v39 }
  0x74   : > { %v986_v20 = vsel %vm8256_vm3, %v984_v10, %v985_v3  ;;  %v989_v21 = vrot.slane %v6167_v13, 5  ;;  %v992_v22 = vrot.slane %v6168_v17, 5  ;;  %v6191_v23 = vld [vmem:[%s8263_s18 + $0x274] sm:$0xf]  ;;  %v6192_v24 = vld [vmem:[%s8263_s18 + $0x278] sm:$0x1]  ;;  %7101 = vmatprep.subr.bf16.mxu1 %v7878_v39 }
  0x75   : > { %v6257_v26 = vcombine.low %v983_v9, %v986_v20  ;;  %v1042_v27 = vsel %vm8256_vm3, %v1040_v16, %v1041_v11  ;;  %v6218_v28 = vrot.slane %v6190_v19, 9  ;;  %v1045_v29 = vrot.slane %v6191_v23, 5  ;;  %v6169_v30 = vld [vmem:[%s8263_s18 + $0x1ac] sm:$0xe]  ;;  %v6170_v31 = vld [vmem:[%s8263_s18 + $0x1b0] sm:$0xf] }
  0x76   : > { %v6265_v32 = vcombine.low %v1039_v15, %v1042_v27  ;;  %v990_v33 = vsel %vm8256_vm3, %v6210_v18, %v989_v21  ;;  %v991_v34 = vrot.slane %v989_v21, 4  ;;  %v1048_v35 = vrot.slane %v6192_v24, 5  ;;  %v6171_v36 = vld [vmem:[%s8263_s18 + $0x1b4] sm:$0x1]  ;;  %v6193_v37 = vld [vmem:[%s8263_s18 + $0x28c] sm:$0xe]  ;;  %1541 = vmatpush1.bf16.msra.mxu0 %v7194_v7  ;;  %7113 = vmatpush1.bf16.msra.mxu1 %v7194_v7 }
  0x77   : > { %1213 = vrot.lane.b32.xlu0 %v6264_v14, %s7879_s29  ;;  %1199 = vrot.lane.b32.xlu1 %v6257_v26, %s7879_s29  ;;  %v1046_v40 = vsel %vm8256_vm3, %v6218_v28, %v1045_v29  ;;  %v1047_v41 = vrot.slane %v1045_v29, 4  ;;  %v6211_v43 = vrot.slane %v6169_v30, 9  ;;  %v996_v44 = vrot.slane %v6170_v31, 5  ;;  %v6194_v45 = vld [vmem:[%s8263_s18 + $0x290] sm:$0xf] }
  0x78   : > { %v993_v46 = vsel %vm8256_vm3, %v991_v34, %v992_v22  ;;  %v999_v47 = vrot.slane %v6171_v36, 5  ;;  %v6195_v49 = vld [vmem:[%s8263_s18 + $0x294] sm:$0x1]  ;;  %v6219_v50 = vrot.slane %v6193_v37, 9  ;;  %v1052_v51 = vrot.slane %v6194_v45, 5  ;;  %1542 = vmatprep.subr.bf16.mxu0 %v7878_v39  ;;  %7102 = vmatprep.subr.bf16.mxu1 %v7878_v39 }
  0x79   : > { %v6258_v52 = vcombine.low %v990_v33, %v993_v46  ;;  %v1049_v53 = vsel %vm8256_vm3, %v1047_v41, %v1048_v35  ;;  %v997_v54 = vsel %vm8256_vm3, %v6211_v43, %v996_v44  ;;  %v998_v55 = vrot.slane %v996_v44, 4  ;;  %v6172_v56 = vld [vmem:[%s8263_s18 + $0x1c8] sm:$0xe]  ;;  %v6173_v57 = vld [vmem:[%s8263_s18 + $0x1cc] sm:$0xf]  ;;  %v7197_v22 = vld [vmem:[%s8059_s28 + $0x30] sm:$0xff]  }
  0x7a   : > { %v6266_v59 = vcombine.low %v1046_v40, %v1049_v53  ;;  %v8341_v60 = vsel %vm8256_vm3, %v6219_v50, %v1052_v51  ;;  %v1054_v61 = vrot.slane %v1052_v51, 4  ;;  %v1055_v62 = vrot.slane %v6195_v49, 5  ;;  %v6174_v63 = vld [vmem:[%s8263_s18 + $0x1d0] sm:$0x1]  ;;  %v6196_v0 = vld [vmem:[%s8263_s18 + $0x2a8] sm:$0xe]  ;;  %1543 = vmatpush1.bf16.msra.mxu0 %v7195_v25  ;;  %7114 = vmatpush1.bf16.msra.mxu1 %v7195_v25 }
  0x7b   : > { %1215 = vrot.lane.b32.xlu1 %v6265_v32, %s7879_s29  ;;  %1201 = vrot.lane.b32.xlu0 %v6258_v52, %s7879_s29  ;;  %v1000_v1 = vsel %vm8256_vm3, %v998_v55, %v999_v47  ;;  %v6212_v2 = vrot.slane %v6172_v56, 9  ;;  %v1003_v3 = vrot.slane %v6173_v57, 5  ;;  %v1006_v4 = vrot.slane %v6174_v63, 5  ;;  %v6197_v5 = vld [vmem:[%s8263_s18 + $0x2ac] sm:$0xf]  ;;  %v7198_v41 = vld [vmem:[%s8059_s28 + $0x38] sm:$0xff]  }
  0x7c   : > { %v6259_v6 = vcombine.low %v997_v54, %v1000_v1  ;;  %v1056_v7 = vsel %vm8256_vm3, %v1054_v61, %v1055_v62  ;;  %v6198_v8 = vld [vmem:[%s8263_s18 + $0x2b0] sm:$0x1]  ;;  %v6220_v9 = vrot.slane %v6196_v0, 9  ;;  %v1059_v10 = vrot.slane %v6197_v5, 5  ;;  %v6175_v11 = vld [vmem:[%s8263_s18 + $0x1e4] sm:$0xe]  ;;  %1544 = vmatprep.subr.bf16.mxu0 %v7878_v39  ;;  %7103 = vmatprep.subr.bf16.mxu1 %v7878_v39 }
  0x7d   : > { %v1004_v12 = vsel %vm8256_vm3, %v6212_v2, %v1003_v3  ;;  %v1005_v13 = vrot.slane %v1003_v3, 4  ;;  %v1062_v14 = vrot.slane %v6198_v8, 5  ;;  %v6176_v15 = vld [vmem:[%s8263_s18 + $0x1e8] sm:$0xf]  ;;  %v6177_v16 = vld [vmem:[%s8263_s18 + $0x1ec] sm:$0x1]  ;;  %v6267_v17 = vcombine.low %v8341_v60, %v1056_v7 }
  0x7e   : > { %v1061_v18 = vrot.slane %v1059_v10, 4  ;;  %v6213_v19 = vrot.slane %v6175_v11, 9  ;;  %v1010_v20 = vrot.slane %v6176_v15, 5  ;;  %v6199_v21 = vld [vmem:[%s8263_s18 + $0x2c4] sm:$0xe]  ;;  %1545 = vmatpush1.bf16.msra.mxu0 %v7196_v58  ;;  %7115 = vmatpush1.bf16.msra.mxu1 %v7196_v58  ;;  %v1060_v24 = vsel %vm8256_vm3, %v6220_v9, %v1059_v10 }
  0x7f   : > { %1217 = vrot.lane.b32.xlu1 %v6266_v59, %s7879_s29  ;;  %1203 = vrot.lane.b32.xlu0 %v6259_v6, %s7879_s29  ;;  %v1007_v23 = vsel %vm8256_vm3, %v1005_v13, %v1006_v4  ;;  %v1013_v25 = vrot.slane %v6177_v16, 5  ;;  %v6200_v26 = vld [vmem:[%s8263_s18 + $0x2c8] sm:$0xf]  ;;  %v6201_v27 = vld [vmem:[%s8263_s18 + $0x2cc] sm:$0x1]  ;;  %v6221_v28 = vrot.slane %v6199_v21, 9 }
  0x80   : > { %v6260_v29 = vcombine.low %v1004_v12, %v1007_v23  ;;  %v1063_v30 = vsel %vm8256_vm3, %v1061_v18, %v1062_v14  ;;  %v1011_v31 = vsel %vm8256_vm3, %v6213_v19, %v1010_v20  ;;  %v1012_v32 = vrot.slane %v1010_v20, 4  ;;  %v6178_v33 = vld [vmem:[%s8263_s18 + $0x200] sm:$0xe]  ;;  %v6179_v34 = vld [vmem:[%s8263_s18 + $0x204] sm:$0xf]  ;;  %1546 = vmatprep.subr.bf16.mxu0 %v7878_v39  ;;  %7104 = vmatprep.subr.bf16.mxu1 %v7878_v39  ;;  %v7200_v20 = vld [vmem:[%s8059_s28 + $0x48] sm:$0xff]  }
  0x81   : > { %v1066_v35 = vrot.slane %v6200_v26, 5  ;;  %v1069_v36 = vrot.slane %v6201_v27, 5  ;;  %v6180_v37 = vld [vmem:[%s8263_s18 + $0x208] sm:$0x1]  ;;  %v6214_v40 = vrot.slane %v6178_v33, 9  ;;  %v6268_v43 = vcombine.low %v1060_v24, %v1063_v30  ;;  %v7199_v8 = vld [vmem:[%s8059_s28 + $0x40] sm:$0xff]  }
  0x82   : > { %v1014_v44 = vsel %vm8256_vm3, %v1012_v32, %v1013_v25  ;;  %v1017_v45 = vrot.slane %v6179_v34, 5  ;;  %v1020_v46 = vrot.slane %v6180_v37, 5  ;;  %v6202_v47 = vld [vmem:[%s8263_s18 + $0x2e0] sm:$0xe]  ;;  %v6203_v49 = vld [vmem:[%s8263_s18 + $0x2e4] sm:$0xf]  ;;  %1547 = vmatpush1.bf16.msra.mxu0 %v7197_v22  ;;  %7116 = vmatpush1.bf16.msra.mxu1 %v7197_v22 }
  0x83   : > { %1219 = vrot.lane.b32.xlu1 %v6267_v17, %s7879_s29  ;;  %1205 = vrot.lane.b32.xlu0 %v6260_v29, %s7879_s29  ;;  %v6261_v50 = vcombine.low %v1011_v31, %v1014_v44  ;;  %v1067_v51 = vsel %vm8256_vm3, %v6221_v28, %v1066_v35  ;;  %v1068_v52 = vrot.slane %v1066_v35, 4  ;;  %v6204_v53 = vld [vmem:[%s8263_s18 + $0x2e8] sm:$0x1]  ;;  %v6222_v54 = vrot.slane %v6202_v47, 9  ;;  %v6181_v55 = vld [vmem:[%s8263_s18 + $0x21c] sm:$0xe] }
  0x84   : > { %v1018_v56 = vsel %vm8256_vm3, %v6214_v40, %v1017_v45  ;;  %v1019_v57 = vrot.slane %v1017_v45, 4  ;;  %v1073_v58 = vrot.slane %v6203_v49, 5  ;;  %v1076_v59 = vrot.slane %v6204_v53, 5  ;;  %v6182_v60 = vld [vmem:[%s8263_s18 + $0x220] sm:$0xf]  ;;  %1548 = vmatprep.subr.bf16.mxu0 %v7878_v39  ;;  %7105 = vmatprep.subr.bf16.mxu1 %v7878_v39  ;;  %v7201_v44 = vld [vmem:[%s8059_s28 + $0x50] sm:$0xff]  }
  0x85   : > { %v1070_v61 = vsel %vm8256_vm3, %v1068_v52, %v1069_v36  ;;  %v6183_v62 = vld [vmem:[%s8263_s18 + $0x224] sm:$0x1]  ;;  %v6215_v63 = vrot.slane %v6181_v55, 9  ;;  %v1024_v0 = vrot.slane %v6182_v60, 5  ;;  %v6205_v1 = vld [vmem:[%s8263_s18 + $0x2fc] sm:$0xe] }
  0x86   : > { %v6269_v2 = vcombine.low %v1067_v51, %v1070_v61  ;;  %v1021_v3 = vsel %vm8256_vm3, %v1019_v57, %v1020_v46  ;;  %v8411_v4 = vsel %vm8256_vm3, %v6222_v54, %v1073_v58  ;;  %v1075_v5 = vrot.slane %v1073_v58, 4  ;;  %v6206_v6 = vld [vmem:[%s8263_s18 + $0x300] sm:$0xf]  ;;  %v6207_v7 = vld [vmem:[%s8263_s18 + $0x304] sm:$0x1]  ;;  %1549 = vmatpush1.bf16.msra.mxu0 %v7198_v41  ;;  %7117 = vmatpush1.bf16.msra.mxu1 %v7198_v41 }
  0x87   : > { %1221 = vrot.lane.b32.xlu1 %v6268_v43, %s7879_s29  ;;  %1207 = vrot.lane.b32.xlu0 %v6261_v50, %s7879_s29  ;;  %v6262_v9 = vcombine.low %v1018_v56, %v1021_v3  ;;  %v1025_v10 = vsel %vm8256_vm3, %v6215_v63, %v1024_v0  ;;  %v1026_v11 = vrot.slane %v1024_v0, 4  ;;  %v1027_v12 = vrot.slane %v6183_v62, 5  ;;  %v3071_v13 = vld [vmem:[%s8399_s6 + $0x8] sm:$0xe]  ;;  %v3072_v14 = vld [vmem:[%s8399_s6 + $0xc] sm:$0xf] }
  0x88   : > { %v1077_v15 = vsel %vm8256_vm3, %v1075_v5, %v1076_v59  ;;  %v6223_v16 = vrot.slane %v6205_v1, 9  ;;  %v1080_v17 = vrot.slane %v6206_v6, 5  ;;  %v1083_v18 = vrot.slane %v6207_v7, 5  ;;  %v3073_v19 = vld [vmem:[%s8399_s6 + $0x10] sm:$0x1]  ;;  %1550 = vmatprep.subr.bf16.mxu0 %v7878_v39  ;;  %7106 = vmatprep.subr.bf16.mxu1 %v7878_v39  ;;  %v7202_v63 = vld [vmem:[%s8059_s28 + $0x58] sm:$0xff]  }
  0x89   : > { %v1028_v21 = vsel %vm8256_vm3, %v1026_v11, %v1027_v12  ;;  %v6611_v22 = vrot.slane %v3071_v13, 9  ;;  %v3169_v23 = vrot.slane %v3072_v14, 5  ;;  %v6381_v24 = vld [vmem:[%s8418_s7 + $0xb0] sm:$0xe]  ;;  %v6382_v25 = vld [vmem:[%s8418_s7 + $0xb4] sm:$0xf]  ;;  %v6270_v26 = vcombine.low %v8411_v4, %v1077_v15 }
  0x8a   : > { %v6263_v27 = vcombine.low %v1025_v10, %v1028_v21  ;;  %v1082_v28 = vrot.slane %v1080_v17, 4  ;;  %v3172_v29 = vrot.slane %v3073_v19, 5  ;;  %v6383_v30 = vld [vmem:[%s8418_s7 + $0xb8] sm:$0x1]  ;;  %v3074_v31 = vld [vmem:[%s8399_s6 + $0x24] sm:$0xe]  ;;  %1551 = vmatpush1.bf16.msra.mxu0 %v7199_v8  ;;  %7118 = vmatpush1.bf16.msra.mxu1 %v7199_v8  ;;  %v1081_v32 = vsel %vm8256_vm3, %v6223_v16, %v1080_v17 }
  0x8b   : > { %1223 = vrot.lane.b32.xlu1 %v6269_v2, %s7879_s29  ;;  %1209 = vrot.lane.b32.xlu0 %v6262_v9, %s7879_s29  ;;  %v3171_v33 = vrot.slane %v3169_v23, 4  ;;  %v6429_v34 = vrot.slane %v6381_v24, 9  ;;  %v2074_v35 = vrot.slane %v6382_v25, 5  ;;  %v3075_v36 = vld [vmem:[%s8399_s6 + $0x28] sm:$0xf]  ;;  %v2077_v40 = vrot.slane %v6383_v30, 5 }
  0x8c   : > { %v1084_v37 = vsel %vm8256_vm3, %v1082_v28, %v1083_v18  ;;  %v3076_v41 = vld [vmem:[%s8399_s6 + $0x2c] sm:$0x1]  ;;  %v3176_v43 = vrot.slane %v3075_v36, 5  ;;  %1552 = vmatprep.subr.bf16.mxu0 %v7878_v39  ;;  %7107 = vmatprep.subr.bf16.mxu1 %v7878_v39  ;;  %v3170_v45 = vsel %vm8256_vm3, %v6611_v22, %v3169_v23  ;;  %v6612_v49 = vrot.slane %v3074_v31, 9  ;;  %v6384_v50 = vld [vmem:[%s8418_s7 + $0xcc] sm:$0xe] }
  0x8d   : > { %v2075_v46 = vsel %vm8256_vm3, %v6429_v34, %v2074_v35  ;;  %v2076_v47 = vrot.slane %v2074_v35, 4  ;;  %v6385_v51 = vld [vmem:[%s8418_s7 + $0xd0] sm:$0xf]  ;;  %v6271_v52 = vcombine.low %v1081_v32, %v1084_v37  ;;  %v3173_v53 = vsel %vm8256_vm3, %v3171_v33, %v3172_v29  ;;  %v6386_v56 = vld [vmem:[%s8418_s7 + $0xd4] sm:$0x1] }
  0x8e   : > { %v3178_v54 = vrot.slane %v3176_v43, 4  ;;  %v3179_v55 = vrot.slane %v3076_v41, 5  ;;  %1553 = vmatpush1.bf16.msra.mxu0 %v7200_v20  ;;  %7119 = vmatpush1.bf16.msra.mxu1 %v7200_v20  ;;  %v6430_v58 = vrot.slane %v6384_v50, 9  ;;  %v2081_v59 = vrot.slane %v6385_v51, 5  ;;  %v3077_v62 = vld [vmem:[%s8399_s6 + $0x40] sm:$0xe] }
  0x8f   : > { %1225 = vrot.lane.b32.xlu1 %v6270_v26, %s7879_s29  ;;  %1211 = vrot.lane.b32.xlu0 %v6263_v27, %s7879_s29  ;;  %v2078_v57 = vsel %vm8256_vm3, %v2076_v47, %v2077_v40  ;;  %v2084_v60 = vrot.slane %v6386_v56, 5  ;;  %v3078_v2 = vld [vmem:[%s8399_s6 + $0x44] sm:$0xf]  ;;  %v3079_v3 = vld [vmem:[%s8399_s6 + $0x48] sm:$0x1]  ;;  %v6613_v4 = vrot.slane %v3077_v62, 9  ;;  %v6659_v5 = vcombine.low %v3170_v45, %v3173_v53 }
  0x90   : > { %v6525_v61 = vcombine.low %v2075_v46, %v2078_v57  ;;  %1554 = vmatprep.subr.bf16.mxu0 %v7878_v39  ;;  %7108 = vmatprep.subr.bf16.mxu1 %v7878_v39  ;;  %v2082_v0 = vsel %vm8256_vm3, %v6430_v58, %v2081_v59  ;;  %v2083_v1 = vrot.slane %v2081_v59, 4  ;;  %v3177_v6 = vsel %vm8256_vm3, %v6612_v49, %v3176_v43  ;;  %v6387_v9 = vld [vmem:[%s8418_s7 + $0xe8] sm:$0xe]  ;;  %v6388_v10 = vld [vmem:[%s8418_s7 + $0xec] sm:$0xf] }
  0x91   : > { %v3183_v7 = vrot.slane %v3078_v2, 5  ;;  %v3186_v8 = vrot.slane %v3079_v3, 5  ;;  %v3180_v11 = vsel %vm8256_vm3, %v3178_v54, %v3179_v55  ;;  %v6389_v13 = vld [vmem:[%s8418_s7 + $0xf0] sm:$0x1]  ;;  %v6431_v14 = vrot.slane %v6387_v9, 9 }
  0x92   : > { %1555 = vmatpush1.bf16.msra.mxu0 %v7201_v44  ;;  %7120 = vmatpush1.bf16.msra.mxu1 %v7201_v44  ;;  %v2085_v12 = vsel %vm8256_vm3, %v2083_v1, %v2084_v60  ;;  %v2088_v15 = vrot.slane %v6388_v10, 5  ;;  %v2091_v18 = vrot.slane %v6389_v13, 5  ;;  %v3080_v21 = vld [vmem:[%s8399_s6 + $0x5c] sm:$0xe]  ;;  %v6660_v22 = vcombine.low %v3177_v6, %v3180_v11  ;;  %v3081_v23 = vld [vmem:[%s8399_s6 + $0x60] sm:$0xf] }
  0x93   : > { %1227 = vrot.lane.b32.xlu1 %v6271_v52, %s7879_s29  ;;  %2488 = vrot.lane.b32.xlu0 %v6525_v61, %s7879_s29  ;;  %v6526_v16 = vcombine.low %v2082_v0, %v2085_v12  ;;  %v3185_v17 = vrot.slane %v3183_v7, 4  ;;  %v3082_v24 = vld [vmem:[%s8399_s6 + $0x64] sm:$0x1]  ;;  %v6614_v25 = vrot.slane %v3080_v21, 9  ;;  %v3184_v26 = vsel %vm8256_vm3, %v6613_v4, %v3183_v7  ;;  %v6390_v30 = vld [vmem:[%s8418_s7 + $0x104] sm:$0xe] }
  0x94   : > { %1556 = vmatprep.subr.bf16.mxu0 %v7878_v39  ;;  %7109 = vmatprep.subr.bf16.mxu1 %v7878_v39  ;;  %v2089_v19 = vsel %vm8256_vm3, %v6431_v14, %v2088_v15  ;;  %v2090_v20 = vrot.slane %v2088_v15, 4  ;;  %v3190_v28 = vrot.slane %v3081_v23, 5  ;;  %v3193_v29 = vrot.slane %v3082_v24, 5  ;;  %v6391_v31 = vld [vmem:[%s8418_s7 + $0x108] sm:$0xf] }
  0x95   : > { %v3187_v32 = vsel %vm8256_vm3, %v3185_v17, %v3186_v8  ;;  %v6392_v34 = vld [vmem:[%s8418_s7 + $0x10c] sm:$0x1]  ;;  %v6432_v35 = vrot.slane %v6390_v30, 9  ;;  %v2095_v36 = vrot.slane %v6391_v31, 5  ;;  %v3083_v44 = vld [vmem:[%s8399_s6 + $0x78] sm:$0xe] }
  0x96   : > { %1557 = vmatpush1.bf16.msra.mxu0 %v7202_v63  ;;  %7121 = vmatpush1.bf16.msra.mxu1 %v7202_v63  ;;  %v2092_v27 = vsel %vm8256_vm3, %v2090_v20, %v2091_v18  ;;  %v3192_v37 = vrot.slane %v3190_v28, 4  ;;  %v2098_v40 = vrot.slane %v6392_v34, 5  ;;  %v6661_v45 = vcombine.low %v3184_v26, %v3187_v32  ;;  %v3084_v47 = vld [vmem:[%s8399_s6 + $0x7c] sm:$0xf]  ;;  %v3085_v49 = vld [vmem:[%s8399_s6 + $0x80] sm:$0x1] }
  0x97   : > { %3615 = vrot.lane.b32.xlu1 %v6659_v5, %s7879_s29  ;;  %2490 = vrot.lane.b32.xlu0 %v6526_v16, %s7879_s29  ;;  %v6527_v33 = vcombine.low %v2089_v19, %v2092_v27  ;;  %v2096_v41 = vsel %vm8256_vm3, %v6432_v35, %v2095_v36  ;;  %v2097_v43 = vrot.slane %v2095_v36, 4  ;;  %v3191_v46 = vsel %vm8256_vm3, %v6614_v25, %v3190_v28  ;;  %v6393_v55 = vld [vmem:[%s8418_s7 + $0x120] sm:$0xe]  ;;  %v6394_v56 = vld [vmem:[%s8418_s7 + $0x124] sm:$0xf] }
  0x98   : > { %2810 = vmatprep.subr.bf16.mxu1 %v7878_v39  ;;  %3937 = vmatprep.subr.bf16.mxu0 %v7878_v39  ;;  %v6615_v50 = vrot.slane %v3083_v44, 9  ;;  %v3194_v51 = vsel %vm8256_vm3, %v3192_v37, %v3193_v29  ;;  %v3197_v53 = vrot.slane %v3084_v47, 5  ;;  %v3200_v54 = vrot.slane %v3085_v49, 5  ;;  %v6395_v58 = vld [vmem:[%s8418_s7 + $0x128] sm:$0x1] }
  0x99   : > { %v2099_v52 = vsel %vm8256_vm3, %v2097_v43, %v2098_v40  ;;  %v6433_v59 = vrot.slane %v6393_v55, 9  ;;  %v2102_v60 = vrot.slane %v6394_v56, 5  ;;  %v2105_v62 = vrot.slane %v6395_v58, 5  ;;  %v3086_v2 = vld [vmem:[%s8399_s6 + $0x94] sm:$0xe] }
  0x9a   : > { %v6528_v57 = vcombine.low %v2096_v41, %v2099_v52  ;;  %v3199_v61 = vrot.slane %v3197_v53, 4  ;;  %v6662_v63 = vcombine.low %v3191_v46, %v3194_v51  ;;  %v3198_v3 = vsel %vm8256_vm3, %v6615_v50, %v3197_v53  ;;  %v3087_v5 = vld [vmem:[%s8399_s6 + $0x98] sm:$0xf]  ;;  %v3088_v6 = vld [vmem:[%s8399_s6 + $0x9c] sm:$0x1] }
  0x9b   : > { %3617 = vrot.lane.b32.xlu1 %v6660_v22, %s7879_s29  ;;  %2492 = vrot.lane.b32.xlu0 %v6527_v33, %s7879_s29  ;;  %v2103_v0 = vsel %vm8256_vm3, %v6433_v59, %v2102_v60  ;;  %v2104_v1 = vrot.slane %v2102_v60, 4  ;;  %v6616_v7 = vrot.slane %v3086_v2, 9  ;;  %v3204_v9 = vrot.slane %v3087_v5, 5  ;;  %v6396_v11 = vld [vmem:[%s8418_s7 + $0x13c] sm:$0xe] }
  0x9c   : > { %v3201_v4 = vsel %vm8256_vm3, %v3199_v61, %v3200_v54  ;;  %v3207_v10 = vrot.slane %v3088_v6, 5  ;;  %v6397_v12 = vld [vmem:[%s8418_s7 + $0x140] sm:$0xf]  ;;  %v6398_v14 = vld [vmem:[%s8418_s7 + $0x144] sm:$0x1]  ;;  %v6434_v15 = vrot.slane %v6396_v11, 9 }
  0x9d   : > { %v2106_v8 = vsel %vm8256_vm3, %v2104_v1, %v2105_v62  ;;  %v2109_v16 = vrot.slane %v6397_v12, 5  ;;  %v6663_v17 = vcombine.low %v3198_v3, %v3201_v4  ;;  %v3206_v18 = vrot.slane %v3204_v9, 4  ;;  %v3089_v23 = vld [vmem:[%s8399_s6 + $0xb0] sm:$0xe]  ;;  %v3090_v25 = vld [vmem:[%s8399_s6 + $0xb4] sm:$0xf] }
  0x9e   : > { %v6529_v13 = vcombine.low %v2103_v0, %v2106_v8  ;;  %v2112_v19 = vrot.slane %v6398_v14, 5  ;;  %v3205_v20 = vsel %vm8256_vm3, %v6616_v7, %v3204_v9  ;;  %v3091_v26 = vld [vmem:[%s8399_s6 + $0xb8] sm:$0x1]  ;;  %v6617_v27 = vrot.slane %v3089_v23, 9  ;;  %v6224_v31 = vld [vmem:[%s8263_s18 + $0x160] sm:$0xf] }
  0x9f   : > { %3619 = vrot.lane.b32.xlu1 %v6661_v45, %s7879_s29  ;;  %2494 = vrot.lane.b32.xlu0 %v6528_v57, %s7879_s29  ;;  %v2110_v21 = vsel %vm8256_vm3, %v6434_v15, %v2109_v16  ;;  %v2111_v22 = vrot.slane %v2109_v16, 4  ;;  %v3208_v24 = vsel %vm8256_vm3, %v3206_v18, %v3207_v10  ;;  %v3211_v29 = vrot.slane %v3090_v25, 5  ;;  %v6399_v32 = vld [vmem:[%s8418_s7 + $0x158] sm:$0xe]  ;;  %v6400_v36 = vld [vmem:[%s8418_s7 + $0x15c] sm:$0xf] }
  0xa0   : > { %v3214_v30 = vrot.slane %v3091_v26, 5  ;;  %v6664_v33 = vcombine.low %v3205_v20, %v3208_v24  ;;  %v6272_v35 = vcombine.low %v8268_v42, %v6224_v31  ;;  %v6401_v37 = vld [vmem:[%s8418_s7 + $0x160] sm:$0x1]  ;;  %v6435_v40 = vrot.slane %v6399_v32, 9  ;;  %v3092_v54 = vld [vmem:[%s8399_s6 + $0xcc] sm:$0xe] }
  0xa1   : > { %v2113_v28 = vsel %vm8256_vm3, %v2111_v22, %v2112_v19  ;;  %v3212_v41 = vsel %vm8256_vm3, %v6617_v27, %v3211_v29  ;;  %v3213_v43 = vrot.slane %v3211_v29, 4  ;;  %v2116_v44 = vrot.slane %v6400_v36, 5  ;;  %v6232_v49 = vld [vmem:[%s8263_s18 + $0x240] sm:$0xf]  ;;  %v3093_v55 = vld [vmem:[%s8399_s6 + $0xd0] sm:$0xf] }
  0xa2   : > { %v6530_v34 = vcombine.low %v2110_v21, %v2113_v28  ;;  %v2119_v45 = vrot.slane %v6401_v37, 5  ;;  %6300 = vmatprep.mubr.msk.bf16.mxu0 %vm1293_vm4, %v6272_v35  ;;  %v6280_v51 = vcombine.low %v8276_v48, %v6232_v49  ;;  %v3094_v56 = vld [vmem:[%s8399_s6 + $0xd4] sm:$0x1]  ;;  %v6618_v57 = vrot.slane %v3092_v54, 9  ;;  %v6402_v60 = vld [vmem:[%s8418_s7 + $0x174] sm:$0xe] }
  0xa3   : > { %3621 = vrot.lane.b32.xlu1 %v6662_v63, %s7879_s29  ;;  %2496 = vrot.lane.b32.xlu0 %v6529_v13, %s7879_s29  ;;  %v3215_v46 = vsel %vm8256_vm3, %v3213_v43, %v3214_v30  ;;  %v2117_v42 = vsel %vm8256_vm3, %v6435_v40, %v2116_v44  ;;  %v2118_v47 = vrot.slane %v2116_v44, 4  ;;  %v3218_v58 = vrot.slane %v3093_v55, 5  ;;  %v6403_v48 = vld [vmem:[%s8418_s7 + $0x178] sm:$0xf]  ;;  %v6404_v63 = vld [vmem:[%s8418_s7 + $0x17c] sm:$0x1] }
  0xa4   : > { %v6665_v50 = vcombine.low %v3212_v41, %v3215_v46  ;;  %6308 = vmatprep.mubr.msk.bf16.mxu1 %vm1293_vm4, %v6280_v51  ;;  %v3221_v59 = vrot.slane %v3094_v56, 5  ;;  %v6436_v0 = vrot.slane %v6402_v60, 9  ;;  %v2123_v1 = vrot.slane %v6403_v48, 5  ;;  %v3095_v9 = vld [vmem:[%s8399_s6 + $0xe8] sm:$0xe] }
  0xa5   : > { %v2120_v52 = vsel %vm8256_vm3, %v2118_v47, %v2119_v45  ;;  %v3219_v61 = vsel %vm8256_vm3, %v6618_v57, %v3218_v58  ;;  %v3220_v62 = vrot.slane %v3218_v58, 4  ;;  %v2126_v2 = vrot.slane %v6404_v63, 5  ;;  %v3096_v10 = vld [vmem:[%s8399_s6 + $0xec] sm:$0xf]  ;;  %v3097_v11 = vld [vmem:[%s8399_s6 + $0xf0] sm:$0x1] }
  0xa6   : > { %v6531_v53 = vcombine.low %v2117_v42, %v2120_v52  ;;  %v2124_v5 = vsel %vm8256_vm3, %v6436_v0, %v2123_v1  ;;  %v2125_v6 = vrot.slane %v2123_v1, 4  ;;  %v6619_v12 = vrot.slane %v3095_v9, 9  ;;  %v6406_v18 = vld [vmem:[%s8418_s7 + $0x194] sm:$0xf]  ;;  %v6407_v19 = vld [vmem:[%s8418_s7 + $0x198] sm:$0x1] }
  0xa7   : > { %3623 = vrot.lane.b32.xlu1 %v6663_v17, %s7879_s29  ;;  %2498 = vrot.lane.b32.xlu0 %v6530_v34, %s7879_s29  ;;  %v3222_v3 = vsel %vm8256_vm3, %v3220_v62, %v3221_v59  ;;  %v3225_v13 = vrot.slane %v3096_v10, 5  ;;  %v3228_v14 = vrot.slane %v3097_v11, 5  ;;  %v6405_v17 = vld [vmem:[%s8418_s7 + $0x190] sm:$0xe]  ;;  %v2130_v22 = vrot.slane %v6406_v18, 5 }
  0xa8   : > { %v6666_v4 = vcombine.low %v3219_v61, %v3222_v3  ;;  %v2127_v7 = vsel %vm8256_vm3, %v2125_v6, %v2126_v2  ;;  %v6437_v21 = vrot.slane %v6405_v17, 9  ;;  %v2133_v24 = vrot.slane %v6407_v19, 5  ;;  %v3098_v29 = vld [vmem:[%s8399_s6 + $0x104] sm:$0xe]  ;;  %v3099_v30 = vld [vmem:[%s8399_s6 + $0x108] sm:$0xf] }
  0xa9   : > { %v6532_v8 = vcombine.low %v2124_v5, %v2127_v7  ;;  %v3226_v15 = vsel %vm8256_vm3, %v6619_v12, %v3225_v13  ;;  %v3227_v16 = vrot.slane %v3225_v13, 4  ;;  %v2132_v26 = vrot.slane %v2130_v22, 4  ;;  %v3100_v31 = vld [vmem:[%s8399_s6 + $0x10c] sm:$0x1]  ;;  %v6409_v34 = vld [vmem:[%s8418_s7 + $0x1b0] sm:$0xf] }
  0xaa   : > { %v2131_v25 = vsel %vm8256_vm3, %v6437_v21, %v2130_v22  ;;  %v6620_v32 = vrot.slane %v3098_v29, 9  ;;  %v3232_v35 = vrot.slane %v3099_v30, 5  ;;  %v3235_v36 = vrot.slane %v3100_v31, 5  ;;  %v6410_v37 = vld [vmem:[%s8418_s7 + $0x1b4] sm:$0x1] }
  0xab   : > { %3625 = vrot.lane.b32.xlu1 %v6664_v33, %s7879_s29  ;;  %2500 = vrot.lane.b32.xlu0 %v6531_v53, %s7879_s29  ;;  %v3229_v20 = vsel %vm8256_vm3, %v3227_v16, %v3228_v14  ;;  %v2134_v27 = vsel %vm8256_vm3, %v2132_v26, %v2133_v24  ;;  %v6408_v33 = vld [vmem:[%s8418_s7 + $0x1ac] sm:$0xe]  ;;  %v2137_v41 = vrot.slane %v6409_v34, 5  ;;  %v2140_v43 = vrot.slane %v6410_v37, 5  ;;  %v8617_v51 = vld [vmem:[%s8263_s18 + $0x158] sm:$0xf] }
  0xac   : > { %v6667_v23 = vcombine.low %v3226_v15, %v3229_v20  ;;  %v6533_v28 = vcombine.low %v2131_v25, %v2134_v27  ;;  %v6438_v40 = vrot.slane %v6408_v33, 9  ;;  %v3233_v44 = vsel %vm8256_vm3, %v6620_v32, %v3232_v35  ;;  %v8620_v53 = vld [vmem:[%s8263_s18 + $0x238] sm:$0xf]  ;;  %v3101_v54 = vld [vmem:[%s8399_s6 + $0x120] sm:$0xe] }
  0xad   : > { %v3234_v45 = vrot.slane %v3232_v35, 4  ;;  %v2139_v42 = vrot.slane %v2137_v41, 4  ;;  %v8625_v55 = vld [vmem:[%s8263_s18 + $0x154] sm:$0xc]  ;;  %v3102_v56 = vld [vmem:[%s8399_s6 + $0x124] sm:$0xf] }
  0xae   : > { %v2138_v46 = vsel %vm8256_vm3, %v6438_v40, %v2137_v41  ;;  %v3103_v57 = vld [vmem:[%s8399_s6 + $0x128] sm:$0x1]  ;;  %v6621_v58 = vrot.slane %v3101_v54, 9  ;;  %v8631_v59 = vld [vmem:[%s8263_s18 + $0x15c] sm:$0x3]  ;;  %v764_v60 = vrot.slane %v8617_v51, 6 }
  0xaf   : > { %3627 = vrot.lane.b32.xlu1 %v6665_v50, %s7879_s29  ;;  %2502 = vrot.lane.b32.xlu0 %v6532_v8, %s7879_s29  ;;  %v3236_v47 = vsel %vm8256_vm3, %v3234_v45, %v3235_v36  ;;  %v2141_v50 = vsel %vm8256_vm3, %v2139_v42, %v2140_v43  ;;  %v3239_v48 = vrot.slane %v3102_v56, 5  ;;  %v3242_v61 = vrot.slane %v3103_v57, 5  ;;  %v8635_v62 = vld [vmem:[%s8263_s18 + $0x234] sm:$0xc]  ;;  %v6411_v2 = vld [vmem:[%s8418_s7 + $0x1c8] sm:$0xe] }
  0xb0   : > { %v6668_v49 = vcombine.low %v3233_v44, %v3236_v47  ;;  %v6534_v52 = vcombine.low %v2138_v46, %v2141_v50  ;;  %v820_v63 = vrot.slane %v8620_v53, 6  ;;  %v6412_v3 = vld [vmem:[%s8418_s7 + $0x1cc] sm:$0xf]  ;;  %v6413_v5 = vld [vmem:[%s8418_s7 + $0x1d0] sm:$0x1]  ;;  %v6439_v6 = vrot.slane %v6411_v2, 9 }
  0xb1   : > { %v3240_v0 = vsel %vm8256_vm3, %v6621_v58, %v3239_v48  ;;  %v3241_v1 = vrot.slane %v3239_v48, 4  ;;  %v2144_v7 = vrot.slane %v6412_v3, 5  ;;  %v6144_v8 = vrot.slane %v8625_v55, 10  ;;  %v8659_v19 = vld [vmem:[%s8263_s18 + $0x170] sm:$0xc] }
  0xb2   : > { %v2147_v10 = vrot.slane %v6413_v5, 5  ;;  %v767_v11 = vrot.slane %v8631_v59, 6  ;;  %v766_v15 = vrot.slane %v764_v60, 4  ;;  %v6152_v16 = vrot.slane %v8635_v62, 10  ;;  %v8662_v20 = vld [vmem:[%s8263_s18 + $0x174] sm:$0xf] }
  0xb3   : > { %3629 = vrot.lane.b32.xlu1 %v6666_v4, %s7879_s29  ;;  %2504 = vrot.lane.b32.xlu0 %v6533_v28, %s7879_s29  ;;  %v8643_v4 = vld [vmem:[%s8263_s18 + $0x23c] sm:$0x3]  ;;  %v3243_v9 = vsel %vm8256_vm3, %v3241_v1, %v3242_v61  ;;  %v2145_v13 = vsel %vm8256_vm3, %v6439_v6, %v2144_v7  ;;  %v2146_v14 = vrot.slane %v2144_v7, 4  ;;  %v822_v17 = vrot.slane %v820_v63, 4  ;;  %v8668_v22 = vld [vmem:[%s8263_s18 + $0x178] sm:$0x3] }
  0xb4   : > { %v6669_v12 = vcombine.low %v3240_v0, %v3243_v9  ;;  %v823_v18 = vrot.slane %v8643_v4, 6  ;;  %v8671_v24 = vld [vmem:[%s8263_s18 + $0x254] sm:$0xf]  ;;  %v3104_v25 = vld [vmem:[%s8399_s6 + $0x13c] sm:$0xe]  ;;  %v771_v26 = vrot.slane %v8662_v20, 6  ;;  %v765_v2 = vsel %vm8691_vm7, %v6144_v8, %v764_v60 }
  0xb5   : > { %v2148_v21 = vsel %vm8256_vm3, %v2146_v14, %v2147_v10  ;;  %v3105_v27 = vld [vmem:[%s8399_s6 + $0x140] sm:$0xf]  ;;  %v3106_v28 = vld [vmem:[%s8399_s6 + $0x144] sm:$0x1]  ;;  %v6622_v29 = vrot.slane %v3104_v25, 9  ;;  %v6145_v34 = vrot.slane %v8659_v19, 10  ;;  %v768_v3 = vsel %vm8691_vm7, %v766_v15, %v767_v11 }
  0xb6   : > { %v3246_v30 = vrot.slane %v3105_v27, 5  ;;  %v3249_v31 = vrot.slane %v3106_v28, 5  ;;  %v6414_v32 = vld [vmem:[%s8418_s7 + $0x1e4] sm:$0xe]  ;;  %v6415_v33 = vld [vmem:[%s8418_s7 + $0x1e8] sm:$0xf]  ;;  %v8737_v51 = vsel %vm8691_vm7, %v6152_v16, %v820_v63  ;;  %v8741_v60 = vsel %vm8691_vm7, %v822_v17, %v823_v18 }
  0xb7   : > { %3631 = vrot.lane.b32.xlu1 %v6667_v23, %s7879_s29  ;;  %2506 = vrot.lane.b32.xlu0 %v6534_v52, %s7879_s29  ;;  %v6535_v23 = vcombine.low %v2145_v13, %v2148_v21  ;;  %v774_v35 = vrot.slane %v8668_v22, 6  ;;  %v6416_v36 = vld [vmem:[%s8418_s7 + $0x1ec] sm:$0x1]  ;;  %v6440_v37 = vrot.slane %v6414_v32, 9  ;;  %v2151_v40 = vrot.slane %v6415_v33, 5  ;;  %v7206_v14 = vld [vmem:[%s8059_s28 + $0xc0] sm:$0xff]  }
  0xb8   : > { %v8684_v41 = vld [vmem:[%s8263_s18 + $0x250] sm:$0xc]  ;;  %v827_v43 = vrot.slane %v8671_v24, 6  ;;  %v3247_v44 = vsel %vm8256_vm3, %v6622_v29, %v3246_v30  ;;  %v3248_v45 = vrot.slane %v3246_v30, 4  ;;  %v2154_v46 = vrot.slane %v6416_v36, 5 }
  0xb9   : > { %v773_v47 = vrot.slane %v771_v26, 4  ;;  %v8701_v50 = vld [vmem:[%s8263_s18 + $0x18c] sm:$0xc]  ;;  %v2152_v52 = vsel %vm8256_vm3, %v6440_v37, %v2151_v40  ;;  %v2153_v54 = vrot.slane %v2151_v40, 4  ;;  %v8706_v55 = vld [vmem:[%s8263_s18 + $0x190] sm:$0xf]  ;;  %v6240_v13 = vcombine.low %v765_v2, %v768_v3 }
  0xba   : > { %v3250_v56 = vsel %vm8256_vm3, %v3248_v45, %v3249_v31  ;;  %v8711_v57 = vld [vmem:[%s8263_s18 + $0x194] sm:$0x3]  ;;  %v6225_v48 = vld [vmem:[%s8263_s18 + $0x17c] sm:$0xf]  ;;  %v6153_v61 = vrot.slane %v8684_v41, 10  ;;  %v829_v62 = vrot.slane %v827_v43, 4  ;;  %v6248_v18 = vcombine.low %v8737_v51, %v8741_v60 }
  0xbb   : > { %3633 = vrot.lane.b32.xlu1 %v6668_v49, %s7879_s29  ;;  %2508 = vrot.lane.b32.xlu0 %v6535_v23, %s7879_s29  ;;  %v8698_v49 = vld [vmem:[%s8263_s18 + $0x258] sm:$0x3]  ;;  %v6670_v58 = vcombine.low %v3247_v44, %v3250_v56  ;;  %v2155_v59 = vsel %vm8256_vm3, %v2153_v54, %v2154_v46  ;;  %v6146_v4 = vrot.slane %v8701_v50, 10  ;;  %v778_v5 = vrot.slane %v8706_v55, 6  ;;  %v8729_v6 = vld [vmem:[%s8263_s18 + $0x270] sm:$0xf] }
  0xbc   : > { %v830_v0 = vrot.slane %v8698_v49, 6  ;;  %v6536_v1 = vcombine.low %v2152_v52, %v2155_v59  ;;  %v3107_v7 = vld [vmem:[%s8399_s6 + $0x158] sm:$0xe]  ;;  %v781_v8 = vrot.slane %v8711_v57, 6  ;;  %v3108_v9 = vld [vmem:[%s8399_s6 + $0x15c] sm:$0xf]  ;;  %v772_v27 = vsel %vm8691_vm7, %v6145_v34, %v771_v26 }
  0xbd   : > { %v3109_v10 = vld [vmem:[%s8399_s6 + $0x160] sm:$0x1]  ;;  %v6623_v11 = vrot.slane %v3107_v7, 9  ;;  %v3253_v53 = vrot.slane %v3108_v9, 5  ;;  %v7259_v15 = vld [vmem:[%s8263_s18 + $0x178] sm:$0xf]  ;;  %v775_v28 = vsel %vm8691_vm7, %v773_v47, %v774_v35  ;;  %v8790_v59 = vsel %vm8691_vm7, %v6153_v61, %v827_v43 }
  0xbe   : > { %v3256_v63 = vrot.slane %v3109_v10, 5  ;;  %v6273_v16 = vcombine.low %v7259_v15, %v6225_v48  ;;  %v6126_v17 = vld [vmem:[%s8263_s18 + $0x26c] sm:$0xc]  ;;  %v834_v19 = vrot.slane %v8729_v6, 6  ;;  %v6417_v23 = vld [vmem:[%s8418_s7 + $0x200] sm:$0xe]  ;;  %v6241_v49 = vcombine.low %v772_v27, %v775_v28 }
  0xbf   : > { %3635 = vrot.lane.b32.xlu1 %v6669_v12, %s7879_s29  ;;  %2510 = vrot.lane.b32.xlu0 %v6536_v1, %s7879_s29  ;;  %v8748_v12 = vld [vmem:[%s8263_s18 + $0x1ac] sm:$0xf]  ;;  %v3254_v21 = vsel %vm8256_vm3, %v6623_v11, %v3253_v53  ;;  %v3255_v22 = vrot.slane %v3253_v53, 4  ;;  %v6418_v25 = vld [vmem:[%s8418_s7 + $0x204] sm:$0xf]  ;;  %v6441_v31 = vrot.slane %v6417_v23, 9  ;;  %v8794_v48 = vsel %vm8691_vm7, %v829_v62, %v830_v0 }
  0xc0   : > { %v6128_v29 = vld [vmem:[%s8263_s18 + $0x274] sm:$0x3]  ;;  %v6419_v30 = vld [vmem:[%s8418_s7 + $0x208] sm:$0x1]  ;;  %v2158_v32 = vrot.slane %v6418_v25, 5  ;;  %v780_v36 = vrot.slane %v778_v5, 4  ;;  %v8823_v53 = vsel %vm8691_vm7, %v6146_v4, %v778_v5  ;;  %v6249_v55 = vcombine.low %v8790_v59, %v8794_v48 }
  0xc1   : > { %v8771_v37 = vld [vmem:[%s8263_s18 + $0x1a8] sm:$0xc]  ;;  %v785_v40 = vrot.slane %v8748_v12, 6  ;;  %v3257_v20 = vsel %vm8256_vm3, %v3255_v22, %v3256_v63  ;;  %v2161_v26 = vrot.slane %v6419_v30, 5  ;;  %v6233_v35 = vld [vmem:[%s8263_s18 + $0x25c] sm:$0xf] }
  0xc2   : > { %v8779_v41 = vld [vmem:[%s8263_s18 + $0x1b0] sm:$0x3]  ;;  %v6671_v44 = vcombine.low %v3254_v21, %v3257_v20  ;;  %v2159_v45 = vsel %vm8256_vm3, %v6441_v31, %v2158_v32  ;;  %v2160_v46 = vrot.slane %v2158_v32, 4  ;;  %v7205_v47 = vld [vmem:[%s8059_s28 + $0x60] sm:$0xff]   ;;  %v6154_v52 = vrot.slane %v6126_v17, 10  ;;  %v7208_v10 = vld [vmem:[%s8059_s28 + $0x68] sm:$0xff]  }
  0xc3   : > { %3637 = vrot.lane.b32.xlu1 %v6670_v58, %s7879_s29  ;;  %v836_v54 = vrot.slane %v834_v19, 4  ;;  %v837_v56 = vrot.slane %v6128_v29, 6  ;;  %v7209_v58 = vld [vmem:[%s8059_s28 + $0xc8] sm:$0xff]   ;;  %v8797_v1 = vld [vmem:[%s8263_s18 + $0x198] sm:$0xf]  ;;  %v6147_v3 = vrot.slane %v8771_v37, 10  ;;  %v8829_v63 = vsel %vm8691_vm7, %v780_v36, %v781_v8 }
  0xc4   : > { %v8800_v2 = vld [vmem:[%s8263_s18 + $0x278] sm:$0xf]  ;;  %v2162_v6 = vsel %vm8256_vm3, %v2160_v46, %v2161_v26  ;;  %v8808_v62 = vld [vmem:[%s8263_s18 + $0x1b4] sm:$0xf]  ;;  %v787_v0 = vrot.slane %v785_v40, 4  ;;  %v788_v51 = vrot.slane %v8779_v41, 6  ;;  %v8838_v50 = vsel %vm8691_vm7, %v6154_v52, %v834_v19 }
  0xc5   : > { %v7260_v43 = vld [vmem:[%s8263_s18 + $0x258] sm:$0xf]  ;;  %v6537_v60 = vcombine.low %v2159_v45, %v2162_v6  ;;  %v7212_v11 = vld [vmem:[%s8059_s28 + $0xd0] sm:$0xff]   ;;  %v8842_v57 = vsel %vm8691_vm7, %v836_v54, %v837_v56  ;;  %v8845_v4 = vld [vmem:[%s8263_s18 + $0x1c8] sm:$0xf]  ;;  %v6242_v25 = vcombine.low %v8823_v53, %v8829_v63  ;;  %v8899_v59 = vsel %vm8691_vm7, %v6147_v3, %v785_v40 }
  0xc6   : > { %v6281_v61 = vcombine.low %v7260_v43, %v6233_v35  ;;  %v3110_v5 = vld [vmem:[%s8399_s6 + $0x174] sm:$0xe]  ;;  %v3111_v8 = vld [vmem:[%s8399_s6 + $0x178] sm:$0xf]  ;;  %v8854_v17 = vld [vmem:[%s8263_s18 + $0x288] sm:$0xc]  ;;  %v6250_v20 = vcombine.low %v8838_v50, %v8842_v57  ;;  %v8903_v48 = vsel %vm8691_vm7, %v787_v0, %v788_v51 }
  0xc7   : > { %3639 = vrot.lane.b32.xlu1 %v6671_v44, %s7879_s29  ;;  %2512 = vrot.lane.b32.xlu0 %v6537_v60, %s7879_s29  ;;  %v7261_v15 = vld [vmem:[%s8263_s18 + $0x194] sm:$0xf]  ;;  %v6624_v19 = vrot.slane %v3110_v5, 9  ;;  %v3260_v21 = vrot.slane %v3111_v8, 5  ;;  %v6420_v22 = vld [vmem:[%s8418_s7 + $0x21c] sm:$0xe] }
  0xc8   : > { %v7262_v27 = vld [vmem:[%s8263_s18 + $0x274] sm:$0xf]  ;;  %v8865_v29 = vld [vmem:[%s8263_s18 + $0x290] sm:$0x3]  ;;  %v6421_v31 = vld [vmem:[%s8418_s7 + $0x220] sm:$0xf] }
  0xc9   : > { %v6282_v28 = vcombine.low %v7262_v27, %v8800_v2  ;;  %v6422_v32 = vld [vmem:[%s8418_s7 + $0x224] sm:$0x1]  ;;  %v7211_v36 = vld [vmem:[%s8059_s28 + $0x70] sm:$0xff]   ;;  %v8880_v41 = vld [vmem:[%s8263_s18 + $0x1c4] sm:$0xc]  ;;  %v792_v45 = vrot.slane %v8845_v4, 6 }
  0xca   : > { %v8874_v26 = vld [vmem:[%s8263_s18 + $0x1b0] sm:$0xf]  ;;  %v8883_v44 = vld [vmem:[%s8263_s18 + $0x1cc] sm:$0x3]  ;;  %v7216_v46 = vld [vmem:[%s8059_s28 + $0xd8] sm:$0xff]   ;;  %v3262_v52 = vrot.slane %v3260_v21, 4 }
  0xcb   : > { %v2165_v54 = vrot.slane %v6421_v31, 5  ;;  %v2168_v56 = vrot.slane %v6422_v32, 5  ;;  %v8909_v2 = vld [vmem:[%s8263_s18 + $0x2ac] sm:$0x3]  ;;  %v6155_v12 = vrot.slane %v8854_v17, 10  ;;  %v844_v43 = vrot.slane %v8865_v29, 6 }
  0xcc   : > { %v7219_v51 = vld [vmem:[%s8059_s28 + $0xe0] sm:$0xff]   ;;  %v8926_v60 = vld [vmem:[%s8263_s18 + $0x294] sm:$0xf]  ;;  %v851_v5 = vrot.slane %v8909_v2, 6  ;;  %v3115_v17 = vld [vmem:[%s8399_s6 + $0x198] sm:$0x1] }
  0xcd   : > { %v2167_v3 = vrot.slane %v2165_v54, 4  ;;  %v8952_v27 = vld [vmem:[%s8263_s18 + $0x1e4] sm:$0xf]  ;;  %v3270_v31 = vrot.slane %v3115_v17, 5 }
  0xcf   : > { %v2169_v53 = vsel %vm8256_vm3, %v2167_v3, %v2168_v56  ;;  %v7221_v3 = vld [vmem:[%s8059_s28 + $0x88] sm:$0xff]  }
  0xe5   : > { %v1198_v33 = vpop.permute.xlu0 %1197 }
  0xe6   : > { %v1296_v34 = vsel %vm1293_vm4, %v6240_v13, %v1198_v33  ;;  %v8832_v13 = vld [vmem:[%s8263_s18 + $0x28c] sm:$0xf]  ;;  %v6442_v33 = vrot.slane %v6420_v22, 9  ;;  %v7264_v22 = vld [vmem:[%s8263_s18 + $0x290] sm:$0xf] }
  0xe7   : > { %1567 = vmatmul.mubr.bf16.vlgmr.msra.gmra.mrb[0].mxu0 %v1296_v34  ;;  %v6275_v34 = vcombine.low %v8874_v26, %v8808_v62  ;;  %v841_v35 = vrot.slane %v8832_v13, 6  ;;  %v7222_v62 = vld [vmem:[%s8059_s28 + $0xe8] sm:$0xff]  }
  0xe8   : > { %3938 = vmatpush1.bf16.msra.mxu0 %v7206_v14  ;;  %6301 = vmatprep.mubr.msk.bf16.mxu0 %vm1293_vm4, %v6273_v16  ;;  %v6274_v16 = vcombine.low %v7261_v15, %v8797_v1  ;;  %v8906_v1 = vld [vmem:[%s8263_s18 + $0x2a8] sm:$0xf]  ;;  %v2166_v40 = vsel %vm8256_vm3, %v6442_v33, %v2165_v54  ;;  %v3114_v15 = vld [vmem:[%s8399_s6 + $0x194] sm:$0xf] }
  0xe9   : > { %v1214_v24 = vpop.permute.xlu0 %1213  ;;  %v1200_v7 = vpop.permute.xlu1 %1199  ;;  %3939 = vmatprep.subr.bf16.mxu0 %v7878_v39  ;;  %v6538_v8 = vcombine.low %v2166_v40, %v2169_v53  ;;  %v842_v33 = vsel %vm8691_vm7, %v6155_v12, %v841_v35  ;;  %v6229_v53 = vld [vmem:[%s8263_s18 + $0x1ec] sm:$0xf] }
  0xea   : > { %v1328_v9 = vsel %vm1293_vm4, %v6248_v18, %v1214_v24  ;;  %v1300_v14 = vsel %vm1293_vm4, %v6241_v49, %v1200_v7  ;;  %v3112_v18 = vld [vmem:[%s8399_s6 + $0x17c] sm:$0x1]  ;;  %v3261_v49 = vsel %vm8256_vm3, %v6624_v19, %v3260_v21  ;;  %v843_v7 = vrot.slane %v841_v35, 4  ;;  %v7218_v21 = vld [vmem:[%s8059_s28 + $0x80] sm:$0xff]  }
  0xeb   : > { %1631 = vmatmul.mubr.bf16.vlgmr.msra.gmra.mrb[0].mxu1 %v1328_v9  ;;  %v3263_v30 = vrot.slane %v3112_v18, 5  ;;  %v7215_v24 = vld [vmem:[%s8059_s28 + $0x78] sm:$0xff]   ;;  %v795_v9 = vrot.slane %v8883_v44, 6  ;;  %v3267_v19 = vrot.slane %v3114_v15, 5  ;;  %2514 = vrot.lane.b32.xlu0 %v6538_v8, %s7879_s29  ;;  %v799_v35 = vrot.slane %v8952_v27, 6 }
  0xec   : > { %2811 = vmatpush1.bf16.msra.mxu1 %v7205_v47  ;;  %3940 = vmatpush1.bf16.msra.mxu0 %v7209_v58  ;;  %v8888_v47 = vld [vmem:[%s8263_s18 + $0x2a4] sm:$0xc]  ;;  %v6135_v15 = vld [vmem:[%s8263_s18 + $0x2c0] sm:$0xc]  ;;  %v6427_v27 = vld [vmem:[%s8418_s7 + $0x258] sm:$0xf] }
  0xed   : > { %2812 = vmatprep.subr.bf16.mxu1 %v7878_v39  ;;  %v1216_v23 = vpop.permute.xlu1 %1215  ;;  %6309 = vmatprep.mubr.msk.bf16.mxu1 %vm1293_vm4, %v6281_v61  ;;  %v1202_v6 = vpop.permute.xlu0 %1201  ;;  %v3264_v37 = vsel %vm8256_vm3, %v3262_v52, %v3263_v30  ;;  %v6148_v61 = vrot.slane %v8880_v41, 10  ;;  %v3269_v30 = vrot.slane %v3267_v19, 4 }
  0xee   : > { %3941 = vmatprep.subr.bf16.mxu0 %v7878_v39  ;;  %v1332_v58 = vsel %vm1293_vm4, %v6249_v55, %v1216_v23  ;;  %v6672_v0 = vcombine.low %v3261_v49, %v3264_v37  ;;  %v1304_v63 = vsel %vm1293_vm4, %v6242_v25, %v1202_v6  ;;  %v8937_v55 = vrot.slane %v792_v45, 4  ;;  %v8949_v25 = vld [vmem:[%s8263_s18 + $0x1d0] sm:$0xf]  ;;  %v6424_v49 = vld [vmem:[%s8418_s7 + $0x23c] sm:$0xf] }
  0xef   : > { %1575 = vmatmul.mubr.bf16.gmra.mrb[4].mxu0 %v1300_v14  ;;  %v3113_v14 = vld [vmem:[%s8399_s6 + $0x190] sm:$0xe]  ;;  %v6283_v23 = vcombine.low %v7264_v22, %v8926_v60  ;;  %v3271_v13 = vsel %vm8256_vm3, %v3269_v30, %v3270_v31  ;;  %v6113_v6 = vld [vmem:[%s8263_s18 + $0x1e8] sm:$0x3] }
  0xf0   : > { %2813 = vmatpush1.bf16.msra.mxu1 %v7208_v10  ;;  %3942 = vmatpush1.bf16.msra.mxu0 %v7212_v11  ;;  %v6156_v10 = vrot.slane %v8888_v47, 10  ;;  %v848_v11 = vrot.slane %v8906_v1, 6  ;;  %v6625_v18 = vrot.slane %v3113_v14, 9  ;;  %v796_v4 = vsel %vm8691_vm7, %v8937_v55, %v795_v9  ;;  %v9023_v47 = vld [vmem:[%s8263_s18 + $0x2c4] sm:$0xf]  ;;  %v7225_v1 = vld [vmem:[%s8059_s28 + $0x90] sm:$0xff]  }
  0xf1   : > { %2814 = vmatprep.subr.bf16.mxu1 %v7878_v39  ;;  %6302 = vmatprep.mubr.msk.bf16.mxu0 %vm1293_vm4, %v6274_v16  ;;  %v1218_v16 = vpop.permute.xlu1 %1217  ;;  %v1204_v50 = vpop.permute.xlu0 %1203  ;;  %v802_v2 = vrot.slane %v6113_v6, 6  ;;  %v3116_v9 = vld [vmem:[%s8399_s6 + $0x1ac] sm:$0xe]  ;;  %v3117_v55 = vld [vmem:[%s8399_s6 + $0x1b0] sm:$0xf] }
  0xf2   : > { %3943 = vmatprep.subr.bf16.mxu0 %v7878_v39  ;;  %3641 = vrot.lane.b32.xlu1 %v6672_v0, %s7879_s29  ;;  %v3268_v29 = vsel %vm8256_vm3, %v6625_v18, %v3267_v19  ;;  %v1336_v32 = vsel %vm1293_vm4, %v6250_v20, %v1218_v16  ;;  %v850_v57 = vrot.slane %v848_v11, 4  ;;  %v6425_v20 = vld [vmem:[%s8418_s7 + $0x240] sm:$0x1]  ;;  %v855_v16 = vrot.slane %v9023_v47, 6  ;;  %v6426_v18 = vld [vmem:[%s8418_s7 + $0x254] sm:$0xe] }
  0xf3   : > { %1639 = vmatmul.mubr.bf16.gmra.mrb[4].mxu1 %v1332_v58  ;;  %v6673_v52 = vcombine.low %v3268_v29, %v3271_v13  ;;  %v2175_v54 = vrot.slane %v6425_v20, 5  ;;  %v7265_v58 = vld [vmem:[%s8263_s18 + $0x1cc] sm:$0xf]  ;;  %v6626_v17 = vrot.slane %v3116_v9, 9  ;;  %v6137_v22 = vld [vmem:[%s8263_s18 + $0x2c8] sm:$0x3] }
  0xf4   : > { %2815 = vmatpush1.bf16.msra.mxu1 %v7211_v36  ;;  %6310 = vmatprep.mubr.msk.bf16.mxu1 %vm1293_vm4, %v6282_v28  ;;  %v6243_v28 = vcombine.low %v8899_v59, %v8903_v48  ;;  %v845_v36 = vsel %vm8691_vm7, %v843_v7, %v844_v43  ;;  %v6276_v59 = vcombine.low %v7265_v58, %v8949_v25  ;;  %v6111_v48 = vld [vmem:[%s8263_s18 + $0x1e0] sm:$0xc]  ;;  %v6236_v7 = vld [vmem:[%s8263_s18 + $0x2b0] sm:$0xf]  ;;  %v857_v20 = vrot.slane %v855_v16, 4 }
  0xf5   : > { %2816 = vmatprep.subr.bf16.mxu1 %v7878_v39  ;;  %3944 = vmatpush1.bf16.msra.mxu0 %v7216_v46  ;;  %v6423_v46 = vld [vmem:[%s8418_s7 + $0x238] sm:$0xe]  ;;  %v6251_v56 = vcombine.low %v842_v33, %v845_v36  ;;  %v9007_v43 = vsel %vm8691_vm7, %v6156_v10, %v848_v11  ;;  %v1220_v0 = vpop.permute.xlu1 %1219  ;;  %v9019_v41 = vsel %vm8691_vm7, %v850_v57, %v851_v5  ;;  %v7266_v10 = vld [vmem:[%s8263_s18 + $0x2ac] sm:$0xf]  ;;  %v3118_v5 = vld [vmem:[%s8399_s6 + $0x1b4] sm:$0x1]  ;;  %v1206_v19 = vpop.permute.xlu0 %1205 }
  0xf6   : > { %3945 = vmatprep.subr.bf16.mxu0 %v7878_v39  ;;  %v6443_v26 = vrot.slane %v6423_v46, 9  ;;  %v1308_v40 = vsel %vm1293_vm4, %v6243_v28, %v1204_v50  ;;  %3643 = vrot.lane.b32.xlu1 %v6673_v52, %s7879_s29  ;;  %v6284_v11 = vcombine.low %v7266_v10, %v6236_v7  ;;  %v3277_v25 = vrot.slane %v3118_v5, 5  ;;  %v7267_v28 = vld [vmem:[%s8263_s18 + $0x1e8] sm:$0xf]  ;;  %v9058_v33 = vld [vmem:[%s8263_s18 + $0x200] sm:$0xf] }
  0xf7   : > { %1583 = vmatmul.mubr.bf16.gmra.mrb[8].mxu0 %v1304_v63  ;;  %v7229_v63 = vld [vmem:[%s8059_s28 + $0xf8] sm:$0xff]   ;;  %v1340_v8 = vsel %vm1293_vm4, %v6251_v56, %v1220_v0  ;;  %v6277_v29 = vcombine.low %v7267_v28, %v6229_v53  ;;  %v6444_v57 = vrot.slane %v6426_v18, 9  ;;  %v6116_v56 = vld [vmem:[%s8263_s18 + $0x204] sm:$0x3]  ;;  %v806_v58 = vrot.slane %v9058_v33, 6  ;;  %v7238_v33 = vld [vmem:[%s8059_s28 + $0xb0] sm:$0xff]  }
  0xf8   : > { %2817 = vmatpush1.bf16.msra.mxu1 %v7215_v24  ;;  %6303 = vmatprep.mubr.msk.bf16.mxu0 %vm1293_vm4, %v6275_v34  ;;  %v2172_v34 = vrot.slane %v6424_v49, 5  ;;  %v793_v24 = vsel %vm8691_vm7, %v6148_v61, %v792_v45  ;;  %v7226_v45 = vld [vmem:[%s8059_s28 + $0xf0] sm:$0xff]   ;;  %v6149_v61 = vrot.slane %v6111_v48, 10  ;;  %v6428_v36 = vld [vmem:[%s8418_s7 + $0x25c] sm:$0x1]  ;;  %v6157_v49 = vrot.slane %v6135_v15, 10 }
  0xf9   : > { %2818 = vmatprep.subr.bf16.mxu1 %v7878_v39  ;;  %3946 = vmatpush1.bf16.msra.mxu0 %v7219_v51  ;;  %v801_v51 = vrot.slane %v799_v35, 4  ;;  %v6244_v14 = vcombine.low %v793_v24, %v796_v4  ;;  %v7228_v46 = vld [vmem:[%s8059_s28 + $0x98] sm:$0xff]   ;;  %v1222_v52 = vpop.permute.xlu1 %1221  ;;  %v2182_v48 = vrot.slane %v6428_v36, 5  ;;  %v9076_v6 = vld [vmem:[%s8263_s18 + $0x2e0] sm:$0xf] }
  0xfa   : > { %3947 = vmatprep.subr.bf16.mxu0 %v7878_v39  ;;  %v2173_v12 = vsel %vm8256_vm3, %v6443_v26, %v2172_v34  ;;  %v2174_v37 = vrot.slane %v2172_v34, 4  ;;  %v9049_v30 = vsel %vm8691_vm7, %v6149_v61, %v799_v35  ;;  %v858_v26 = vrot.slane %v6137_v22, 6  ;;  %v7232_v34 = vld [vmem:[%s8059_s28 + $0x100] sm:$0xff]   ;;  %v9082_v24 = vld [vmem:[%s8263_s18 + $0x21c] sm:$0xf]  ;;  %v1208_v61 = vpop.permute.xlu0 %1207 }
  0xfb   : > { %1647 = vmatmul.mubr.bf16.gmra.mrb[8].mxu1 %v1336_v32  ;;  %v9053_v31 = vsel %vm8691_vm7, %v801_v51, %v802_v2  ;;  %v6237_v32 = vld [vmem:[%s8263_s18 + $0x2cc] sm:$0xf]  ;;  %v1312_v13 = vsel %vm1293_vm4, %v6244_v14, %v1206_v19  ;;  %v2179_v35 = vrot.slane %v6427_v27, 5  ;;  %v856_v4 = vsel %vm8691_vm7, %v6157_v49, %v855_v16  ;;  %v6140_v9 = vld [vmem:[%s8263_s18 + $0x2e4] sm:$0x3] }
  0xfc   : > { %2819 = vmatpush1.bf16.msra.mxu1 %v7218_v21  ;;  %6311 = vmatprep.mubr.msk.bf16.mxu1 %vm1293_vm4, %v6283_v23  ;;  %v2176_v44 = vsel %vm8256_vm3, %v2174_v37, %v2175_v54  ;;  %v6252_v21 = vcombine.low %v9007_v43, %v9019_v41  ;;  %v3274_v23 = vrot.slane %v3117_v55, 5  ;;  %v6114_v54 = vld [vmem:[%s8263_s18 + $0x1fc] sm:$0xc]  ;;  %v6245_v37 = vcombine.low %v9049_v30, %v9053_v31  ;;  %v7231_v41 = vld [vmem:[%s8059_s28 + $0xa0] sm:$0xff]   ;;  %v6117_v55 = vld [vmem:[%s8263_s18 + $0x218] sm:$0xc] }
  0xfd   : > { %2820 = vmatprep.subr.bf16.mxu1 %v7878_v39  ;;  %3948 = vmatpush1.bf16.msra.mxu0 %v7222_v62  ;;  %v6539_v60 = vcombine.low %v2173_v12, %v2176_v44  ;;  %v2180_v7 = vsel %vm8256_vm3, %v6444_v57, %v2179_v35  ;;  %v2181_v43 = vrot.slane %v2179_v35, 4  ;;  %v6150_v47 = vrot.slane %v6114_v54, 10  ;;  %v6119_v5 = vld [vmem:[%s8263_s18 + $0x220] sm:$0x3]  ;;  %v7269_v14 = vld [vmem:[%s8263_s18 + $0x204] sm:$0xf] }
  0xfe   : > { %3949 = vmatprep.subr.bf16.mxu0 %v7878_v39  ;;  %v3275_v50 = vsel %vm8256_vm3, %v6626_v17, %v3274_v23  ;;  %v3276_v62 = vrot.slane %v3274_v23, 4  ;;  %v1344_v0 = vsel %vm1293_vm4, %v6252_v21, %v1222_v52  ;;  %v809_v44 = vrot.slane %v6116_v56, 6  ;;  %v7235_v17 = vld [vmem:[%s8059_s28 + $0xa8] sm:$0xff]   ;;  %v9111_v18 = vld [vmem:[%s8263_s18 + $0x2fc] sm:$0xf]  ;;  %v1224_v21 = vpop.permute.xlu1 %1223  ;;  %v1210_v52 = vpop.permute.xlu0 %1209 }
  0xff   : > { %1591 = vmatmul.mubr.bf16.gmra.mrb[12].mxu0 %v1308_v40  ;;  %2516 = vrot.lane.b32.xlu0 %v6539_v60, %s7879_s29  ;;  %v7268_v40 = vld [vmem:[%s8263_s18 + $0x2c8] sm:$0xf]  ;;  %v859_v51 = vsel %vm8691_vm7, %v857_v20, %v858_v26  ;;  %v808_v2 = vrot.slane %v806_v58, 4  ;;  %v6138_v60 = vld [vmem:[%s8263_s18 + $0x2dc] sm:$0xc]  ;;  %v862_v10 = vrot.slane %v9076_v6, 6  ;;  %v807_v22 = vsel %vm8691_vm7, %v6150_v47, %v806_v58 }
 0x100   : > { %2821 = vmatpush1.bf16.msra.mxu1 %v7221_v3  ;;  %6304 = vmatprep.mubr.msk.bf16.mxu0 %vm1293_vm4, %v6276_v59  ;;  %v3278_v59 = vsel %vm8256_vm3, %v3276_v62, %v3277_v25  ;;  %v6285_v3 = vcombine.low %v7268_v40, %v6237_v32  ;;  %v813_v53 = vrot.slane %v9082_v24, 6  ;;  %v6253_v38 = vcombine.low %v856_v4, %v859_v51  ;;  %v9114_v19 = vld [vmem:[%s8399_s6 + $0x14] sm:$0xf]  ;;  %v6238_v25 = vld [vmem:[%s8263_s18 + $0x2e8] sm:$0xf]  ;;  %v7243_v47 = vld [vmem:[%s8059_s28 + $0xb8] sm:$0xff]  }
 0x101   : > { %2822 = vmatprep.subr.bf16.mxu1 %v7878_v39  ;;  %3950 = vmatpush1.bf16.msra.mxu0 %v7226_v45  ;;  %v6674_v12 = vcombine.low %v3275_v50, %v3278_v59  ;;  %v6230_v45 = vld [vmem:[%s8263_s18 + $0x208] sm:$0xf]  ;;  %v6158_v16 = vrot.slane %v6138_v60, 10  ;;  %v810_v23 = vsel %vm8691_vm7, %v808_v2, %v809_v44  ;;  %v864_v27 = vrot.slane %v862_v10, 4  ;;  %v6141_v36 = vld [vmem:[%s8263_s18 + $0x2f8] sm:$0xc] }
 0x102   : > { %3951 = vmatprep.subr.bf16.mxu0 %v7878_v39  ;;  %v6278_v15 = vcombine.low %v7269_v14, %v6230_v45  ;;  %v865_v28 = vrot.slane %v6140_v9, 6  ;;  %v6151_v30 = vrot.slane %v6117_v55, 10  ;;  %v815_v31 = vrot.slane %v813_v53, 4  ;;  %v7241_v50 = vld [vmem:[%s8059_s28 + $0x118] sm:$0xff]   ;;  %v7270_v20 = vld [vmem:[%s8263_s18 + $0x2e4] sm:$0xf]  ;;  %v1212_v14 = vpop.permute.xlu0 %1211 }
 0x103   : > { %1655 = vmatmul.mubr.bf16.gmra.mrb[12].mxu1 %v1340_v8  ;;  %3645 = vrot.lane.b32.xlu1 %v6674_v12, %s7879_s29  ;;  %v1316_v8 = vsel %vm1293_vm4, %v6245_v37, %v1208_v61  ;;  %v816_v32 = vrot.slane %v6119_v5, 6  ;;  %v869_v49 = vrot.slane %v9111_v18, 6  ;;  %v3377_v62 = vrot.slane %v9114_v19, 6  ;;  %v3281_v35 = vld [vmem:[%s8399_s6 + $0x18] sm:$0x3]  ;;  %v1226_v61 = vpop.permute.xlu1 %1225  ;;  %v1374_v19 = vld [vmem:[#allocation2 + $0x80] sm:$0xff] }
 0x104   : > { %6312 = vmatprep.mubr.msk.bf16.mxu1 %vm1293_vm4, %v6284_v11  ;;  %2823 = vmatpush1.bf16.msra.mxu1 %v7225_v1  ;;  %v7236_v1 = vld [vmem:[%s8059_s28 + $0x108] sm:$0xff]   ;;  %v2183_v11 = vsel %vm8256_vm3, %v2181_v43, %v2182_v48  ;;  %v1348_v57 = vsel %vm1293_vm4, %v6253_v38, %v1224_v21  ;;  %v6286_v26 = vcombine.low %v7270_v20, %v6238_v25  ;;  %v6231_v58 = vld [vmem:[%s8263_s18 + $0x224] sm:$0xf]  ;;  %v9143_v59 = vld [vmem:[%s8418_s7 + $0xb8] sm:$0xf]  ;;  %v6159_v12 = vrot.slane %v6141_v36, 10 }
 0x105   : > { %2824 = vmatprep.subr.bf16.mxu1 %v7878_v39  ;;  %3952 = vmatpush1.bf16.msra.mxu0 %v7229_v63  ;;  %v6540_v63 = vcombine.low %v2180_v7, %v2183_v11  ;;  %v863_v54 = vsel %vm8691_vm7, %v6158_v16, %v862_v10  ;;  %v866_v56 = vsel %vm8691_vm7, %v864_v27, %v865_v28  ;;  %v6239_v40 = vld [vmem:[%s8263_s18 + $0x304] sm:$0xf]  ;;  %v3379_v7 = vrot.slane %v3377_v62, 4  ;;  %v6318_v44 = vld [vmem:[%s8418_s7 + $0xac] sm:$0xf] }
 0x106   : > { %3953 = vmatprep.subr.bf16.mxu0 %v7878_v39  ;;  %v814_v48 = vsel %vm8691_vm7, %v6151_v30, %v813_v53  ;;  %v817_v6 = vsel %vm8691_vm7, %v815_v31, %v816_v32  ;;  %v3380_v43 = vrot.slane %v3281_v35, 6  ;;  %v6254_v4 = vcombine.low %v863_v54, %v866_v56  ;;  %v6445_v51 = vld [vmem:[%s8418_s7 + $0xb4] sm:$0x8]  ;;  %v6447_v2 = vld [vmem:[%s8418_s7 + $0xbc] sm:$0x7]  ;;  %v7242_v35 = vld [vmem:[%s8399_s6] sm:$0xff]  }
 0x107   : > { %1599 = vmatmul.mubr.bf16.gmra.mrb[16].mxu0 %v1312_v13  ;;  %2518 = vrot.lane.b32.xlu0 %v6540_v63, %s7879_s29  ;;  %v6246_v13 = vcombine.low %v807_v22, %v810_v23  ;;  %v6247_v60 = vcombine.low %v814_v48, %v817_v6  ;;  %v7272_v9 = vld [vmem:[%s8263_s18 + $0x300] sm:$0xf]  ;;  %v870_v11 = vsel %vm8691_vm7, %v6159_v12, %v869_v49  ;;  %v3283_v53 = vld [vmem:[%s8399_s6 + $0x30] sm:$0xf]  ;;  %v6317_v5 = vld [vmem:[%s8418_s7 + $0xa8] sm:$0x8]  ;;  %v1228_v30 = vpop.permute.xlu1 %1227 }
 0x108   : > { %6305 = vmatprep.mubr.msk.bf16.mxu0 %vm1293_vm4, %v6277_v29  ;;  %2825 = vmatpush1.bf16.msra.mxu1 %v7228_v46  ;;  %v7239_v29 = vld [vmem:[%s8059_s28 + $0x110] sm:$0xff]   ;;  %v6143_v46 = vld [vmem:[%s8263_s18 + $0x300] sm:$0x3]  ;;  %v6287_v10 = vcombine.low %v7272_v9, %v6239_v40  ;;  %v3381_v55 = vsel %vm8691_vm7, %v3379_v7, %v3380_v43  ;;  %v1352_v38 = vsel %vm1293_vm4, %v6254_v4, %v1226_v61  ;;  %v6493_v16 = vrot.slane %v6445_v51, 11  ;;  %v3282_v21 = vld [vmem:[%s8399_s6 + $0x2c] sm:$0xc]  ;;  %v2489_v51 = vpop.permute.xlu0 %2488 }
 0x109   : > { %2826 = vmatprep.subr.bf16.mxu1 %v7878_v39  ;;  %3954 = vmatpush1.bf16.msra.mxu0 %v7232_v34  ;;  %v3279_v34 = vld [vmem:[%s8399_s6 + $0x10] sm:$0xc]  ;;  %v872_v37 = vrot.slane %v6143_v46, 6  ;;  %v2285_v18 = vrot.slane %v6447_v2, 7  ;;  %v3284_v22 = vld [vmem:[%s8399_s6 + $0x34] sm:$0x3] }
 0x10a   : > { %3955 = vmatprep.subr.bf16.mxu0 %v7878_v39  ;;  %v6627_v24 = vrot.slane %v3279_v34, 10  ;;  %v3384_v23 = vrot.slane %v3283_v53, 6  ;;  %v6365_v27 = vrot.slane %v6317_v5, 11  ;;  %v6449_v28 = vld [vmem:[%s8418_s7 + $0xd4] sm:$0xf] }
 0x10b   : > { %1663 = vmatmul.mubr.bf16.gmra.mrb[16].mxu1 %v1344_v0  ;;  %v1320_v0 = vsel %vm1293_vm4, %v6246_v13, %v1210_v52  ;;  %v2289_v13 = vrot.slane %v6449_v28, 7  ;;  %v6321_v20 = vld [vmem:[%s8418_s7 + $0xc8] sm:$0xf]  ;;  %v3286_v34 = vld [vmem:[%s8399_s6 + $0x4c] sm:$0xf] }
 0x10c   : > { %6313 = vmatprep.mubr.msk.bf16.mxu1 %vm1293_vm4, %v6285_v3  ;;  %2827 = vmatpush1.bf16.msra.mxu1 %v7231_v41  ;;  %v871_v3 = vrot.slane %v869_v49, 4  ;;  %v7271_v41 = vld [vmem:[%s8263_s18 + $0x220] sm:$0xf]  ;;  %v6628_v49 = vrot.slane %v3282_v21, 10  ;;  %v6322_v12 = vld [vmem:[%s8418_s7 + $0xcc] sm:$0x7] }
 0x10d   : > { %2828 = vmatprep.subr.bf16.mxu1 %v7878_v39  ;;  %3956 = vmatpush1.bf16.msra.mxu0 %v7236_v1  ;;  %v6279_v45 = vcombine.low %v7271_v41, %v6231_v58  ;;  %v2282_v1 = vrot.slane %v9143_v59, 7  ;;  %v6320_v58 = vld [vmem:[%s8418_s7 + $0xc4] sm:$0x8]  ;;  %v3285_v40 = vld [vmem:[%s8399_s6 + $0x48] sm:$0xc]  ;;  %v2291_v7 = vrot.slane %v2289_v13, 4 }
 0x10e   : > { %3957 = vmatprep.subr.bf16.mxu0 %v7878_v39  ;;  %v873_v63 = vsel %vm8691_vm7, %v871_v3, %v872_v37  ;;  %v3385_v48 = vsel %vm8691_vm7, %v6628_v49, %v3384_v23  ;;  %v1873_v37 = vrot.slane %v6321_v20, 7  ;;  %v3616_v3 = vpop.permute.xlu1 %3615  ;;  %v6452_v4 = vld [vmem:[%s8418_s7 + $0xf0] sm:$0xf]  ;;  %v6453_v5 = vld [vmem:[%s8418_s7 + $0xf4] sm:$0x7] }
 0x10f   : > { %1607 = vmatmul.mubr.bf16.gmra.mrb[20].mxu0 %v1316_v8  ;;  %v1866_v8 = vrot.slane %v6318_v44, 7  ;;  %v6255_v25 = vcombine.low %v870_v11, %v873_v63  ;;  %v2283_v36 = vsel %vm9176_vm10, %v6493_v16, %v2282_v1  ;;  %v3287_v41 = vld [vmem:[%s8399_s6 + $0x50] sm:$0x3]  ;;  %v1876_v44 = vrot.slane %v6322_v12, 7  ;;  %v6323_v16 = vld [vmem:[%s8418_s7 + $0xe0] sm:$0x8] }
 0x110   : > { %6306 = vmatprep.mubr.msk.bf16.mxu0 %vm1293_vm4, %v6278_v15  ;;  %2829 = vmatpush1.bf16.msra.mxu1 %v7235_v17  ;;  %v6319_v15 = vld [vmem:[%s8418_s7 + $0xb0] sm:$0x7]  ;;  %v2284_v17 = vrot.slane %v2282_v1, 4  ;;  %v6629_v1 = vrot.slane %v3285_v40, 10  ;;  %v3697_v61 = vsel %vm1293_vm4, %v7242_v35, %v3616_v3  ;;  %v2296_v9 = vrot.slane %v6452_v4, 7 }
 0x111   : > { %2830 = vmatprep.subr.bf16.mxu1 %v7878_v39  ;;  %3958 = vmatpush1.bf16.msra.mxu0 %v7239_v29  ;;  %v1324_v29 = vsel %vm1293_vm4, %v6247_v60, %v1212_v14  ;;  %v1868_v32 = vrot.slane %v1866_v8, 4  ;;  %v1867_v52 = vsel %vm9176_vm10, %v6365_v27, %v1866_v8  ;;  %v1356_v59 = vsel %vm1293_vm4, %v6255_v25, %v1228_v30  ;;  %v3289_v8 = vld [vmem:[%s8399_s6 + $0x68] sm:$0xf]  ;;  %v7244_v14 = vld [vmem:[%s8399_s6 + $0x1c] sm:$0xff]   ;;  %v3292_v12 = vld [vmem:[%s8399_s6 + $0x84] sm:$0xf] }
 0x112   : > { %3959 = vmatprep.subr.bf16.mxu0 %v7878_v39  ;;  %v2286_v46 = vsel %vm9176_vm10, %v2284_v17, %v2285_v18  ;;  %v1875_v60 = vrot.slane %v1873_v37, 4  ;;  %v3618_v18 = vpop.permute.xlu1 %3617  ;;  %v2298_v25 = vrot.slane %v2296_v9, 4  ;;  %v6325_v27 = vld [vmem:[%s8418_s7 + $0xe8] sm:$0x7]  ;;  %v2299_v30 = vrot.slane %v6453_v5, 7 }
 0x113   : > { %1671 = vmatmul.mubr.bf16.gmra.mrb[20].mxu1 %v1348_v57  ;;  %v6448_v57 = vld [vmem:[%s8418_s7 + $0xd0] sm:$0x8]  ;;  %v6541_v56 = vcombine.low %v2283_v36, %v2286_v46  ;;  %v3290_v36 = vld [vmem:[%s8399_s6 + $0x6c] sm:$0x3]  ;;  %v3701_v46 = vsel %vm1293_vm4, %v7244_v14, %v3618_v18  ;;  %v6367_v49 = vrot.slane %v6323_v16, 11 }
 0x114   : > { %6314 = vmatprep.mubr.msk.bf16.mxu1 %vm1293_vm4, %v6286_v26  ;;  %2831 = vmatpush1.bf16.msra.mxu1 %v7238_v33  ;;  %v1869_v33 = vrot.slane %v6319_v15, 7  ;;  %v6450_v26 = vld [vmem:[%s8418_s7 + $0xd8] sm:$0x7]  ;;  %v6494_v6 = vrot.slane %v6448_v57, 11  ;;  %v6327_v35 = vld [vmem:[%s8418_s7 + $0x100] sm:$0xf] }
 0x115   : > { %2832 = vmatprep.subr.bf16.mxu1 %v7878_v39  ;;  %3960 = vmatpush1.bf16.msra.mxu0 %v7241_v50  ;;  %v3378_v39 = vsel %vm8691_vm7, %v6627_v24, %v3377_v62  ;;  %v3387_v50 = vrot.slane %v3284_v22, 6  ;;  %v3386_v62 = vrot.slane %v3384_v23, 4  ;;  %v2292_v43 = vrot.slane %v6450_v26, 7  ;;  %v6454_v26 = vld [vmem:[%s8418_s7 + $0x108] sm:$0x8] }
 0x116   : > { %v6675_v31 = vcombine.low %v3378_v39, %v3381_v55  ;;  %v1870_v54 = vsel %vm9176_vm10, %v1868_v32, %v1869_v33  ;;  %v2290_v11 = vsel %vm9176_vm10, %v6494_v6, %v2289_v13  ;;  %v3394_v39 = vrot.slane %v3287_v41, 6  ;;  %v6451_v55 = vld [vmem:[%s8418_s7 + $0xec] sm:$0x8]  ;;  %v3288_v33 = vld [vmem:[%s8399_s6 + $0x64] sm:$0xc]  ;;  %v7245_v6 = vld [vmem:[%s8399_s6 + $0x38] sm:$0xff]  }
 0x117   : > { %1615 = vmatmul.mubr.bf16.gmra.mrb[24].mxu0 %v1320_v0  ;;  %v3388_v24 = vsel %vm8691_vm7, %v3386_v62, %v3387_v50  ;;  %v3391_v0 = vrot.slane %v3286_v34, 6  ;;  %v2293_v53 = vsel %vm9176_vm10, %v2291_v7, %v2292_v43  ;;  %v1877_v22 = vsel %vm9176_vm10, %v1875_v60, %v1876_v44  ;;  %v6455_v32 = vld [vmem:[%s8418_s7 + $0x10c] sm:$0xf]  ;;  %v6330_v18 = vld [vmem:[%s8418_s7 + $0x11c] sm:$0xf] }
 0x118   : > { %6307 = vmatprep.mubr.msk.bf16.mxu0 %vm1293_vm4, %v6279_v45  ;;  %2833 = vmatpush1.bf16.msra.mxu1 %v7243_v47  ;;  %v6509_v45 = vcombine.low %v1867_v52, %v1870_v54  ;;  %v6366_v47 = vrot.slane %v6320_v58, 11  ;;  %v6676_v2 = vcombine.low %v3385_v48, %v3388_v24  ;;  %v6542_v21 = vcombine.low %v2290_v11, %v2293_v53  ;;  %v2491_v52 = vpop.permute.xlu0 %2490  ;;  %v6456_v48 = vld [vmem:[%s8418_s7 + $0x110] sm:$0x7] }
 0x119   : > { %v3393_v63 = vrot.slane %v3391_v0, 4  ;;  %v6495_v23 = vrot.slane %v6451_v55, 11  ;;  %v3392_v28 = vsel %vm8691_vm7, %v6629_v1, %v3391_v0  ;;  %v1883_v62 = vrot.slane %v6325_v27, 7 }
 0x11a   : > { %v1874_v15 = vsel %vm9176_vm10, %v6366_v47, %v1873_v37  ;;  %v2303_v34 = vrot.slane %v6455_v32, 7  ;;  %v2300_v54 = vsel %vm9176_vm10, %v2298_v25, %v2299_v30  ;;  %v3620_v37 = vpop.permute.xlu1 %3619  ;;  %v6496_v24 = vrot.slane %v6454_v26, 11  ;;  %v6328_v47 = vld [vmem:[%s8418_s7 + $0x104] sm:$0x7]  ;;  %v7246_v25 = vld [vmem:[%s8399_s6 + $0x54] sm:$0xff]  }
 0x11b   : > { %1679 = vmatmul.mubr.bf16.gmra.mrb[24].mxu1 %v1352_v38  ;;  %v2570_v38 = vsel %vm1293_vm4, %v6509_v45, %v2489_v51  ;;  %v6510_v57 = vcombine.low %v1874_v15, %v1877_v22  ;;  %v2297_v20 = vsel %vm9176_vm10, %v6495_v23, %v2296_v9  ;;  %v1887_v7 = vrot.slane %v6327_v35, 7  ;;  %v6326_v45 = vld [vmem:[%s8418_s7 + $0xfc] sm:$0x8]  ;;  %v3293_v51 = vld [vmem:[%s8399_s6 + $0x88] sm:$0x3] }
 0x11c   : > { %6315 = vmatprep.mubr.msk.bf16.mxu1 %vm1293_vm4, %v6287_v10  ;;  %v6324_v10 = vld [vmem:[%s8418_s7 + $0xe4] sm:$0xf]  ;;  %v6543_v0 = vcombine.low %v2297_v20, %v2300_v54  ;;  %v2305_v4 = vrot.slane %v2303_v34, 4  ;;  %v2306_v41 = vrot.slane %v6456_v48, 7  ;;  %v3705_v60 = vsel %vm1293_vm4, %v7245_v6, %v3620_v37  ;;  %v2493_v55 = vpop.permute.xlu0 %2492  ;;  %v3295_v22 = vld [vmem:[%s8399_s6 + $0xa0] sm:$0xf] }
 0x11d   : > { %v1880_v17 = vrot.slane %v6324_v10, 7  ;;  %v2574_v43 = vsel %vm1293_vm4, %v6510_v57, %v2491_v52  ;;  %v6458_v10 = vld [vmem:[%s8418_s7 + $0x128] sm:$0xf]  ;;  %v2304_v11 = vsel %vm9176_vm10, %v6496_v24, %v2303_v34  ;;  %v6368_v53 = vrot.slane %v6326_v45, 11  ;;  %v6457_v15 = vld [vmem:[%s8418_s7 + $0x124] sm:$0x8] }
 0x11e   : > { %v3408_v14 = vrot.slane %v3293_v51, 6  ;;  %v6497_v32 = vrot.slane %v6457_v15, 11  ;;  %v3294_v57 = vld [vmem:[%s8399_s6 + $0x9c] sm:$0xc]  ;;  %v3296_v20 = vld [vmem:[%s8399_s6 + $0xa4] sm:$0x3] }
 0x11f   : > { %1623 = vmatmul.mubr.bf16.gmra.mrb[28].mxu0 %v1324_v29  ;;  %v3395_v29 = vsel %vm8691_vm7, %v3393_v63, %v3394_v39  ;;  %v1882_v50 = vrot.slane %v1880_v17, 4  ;;  %v1881_v40 = vsel %vm9176_vm10, %v6367_v49, %v1880_v17  ;;  %v1889_v63 = vrot.slane %v1887_v7, 4  ;;  %v6461_v26 = vld [vmem:[%s8418_s7 + $0x144] sm:$0xf]  ;;  %v6333_v37 = vld [vmem:[%s8418_s7 + $0x138] sm:$0xf] }
 0x120   : > { %6727 = vmatprep.mubr.msk.bf16.mxu0 %vm1293_vm4, %v6675_v31  ;;  %v3398_v31 = vrot.slane %v3289_v8, 6  ;;  %v6677_v13 = vcombine.low %v3392_v28, %v3395_v29  ;;  %v1890_v39 = vrot.slane %v6328_v47, 7  ;;  %v2307_v8 = vsel %vm9176_vm10, %v2305_v4, %v2306_v41  ;;  %v3622_v29 = vpop.permute.xlu1 %3621  ;;  %v6332_v45 = vld [vmem:[%s8418_s7 + $0x134] sm:$0x8]  ;;  %v6334_v47 = vld [vmem:[%s8418_s7 + $0x13c] sm:$0x7] }
 0x121   : > { %v1884_v3 = vsel %vm9176_vm10, %v1882_v50, %v1883_v62  ;;  %v2310_v17 = vrot.slane %v6458_v10, 7  ;;  %v6544_v27 = vcombine.low %v2304_v11, %v2307_v8  ;;  %v1888_v28 = vsel %vm9176_vm10, %v6368_v53, %v1887_v7  ;;  %v6462_v7 = vld [vmem:[%s8418_s7 + $0x148] sm:$0x7]  ;;  %v3297_v8 = vld [vmem:[%s8399_s6 + $0xb8] sm:$0xc] }
 0x122   : > { %v3400_v58 = vrot.slane %v3398_v31, 4  ;;  %v6511_v9 = vcombine.low %v1881_v40, %v1884_v3  ;;  %v1891_v30 = vsel %vm9176_vm10, %v1889_v63, %v1890_v39  ;;  %v3709_v34 = vsel %vm1293_vm4, %v7246_v25, %v3622_v29  ;;  %v6463_v15 = vld [vmem:[%s8418_s7 + $0x15c] sm:$0x8]  ;;  %v6465_v25 = vld [vmem:[%s8418_s7 + $0x164] sm:$0x7] }
 0x123   : > { %1687 = vmatmul.mubr.bf16.gmra.mrb[28].mxu1 %v1356_v59  ;;  %v3401_v59 = vrot.slane %v3290_v36, 6  ;;  %v6331_v36 = vld [vmem:[%s8418_s7 + $0x120] sm:$0x7]  ;;  %v2312_v50 = vrot.slane %v2310_v17, 4  ;;  %v6512_v35 = vcombine.low %v1888_v28, %v1891_v30  ;;  %v6632_v6 = vrot.slane %v3294_v57, 10 }
 0x124   : > { %6593 = vmatprep.mubr.msk.bf16.mxu1 %vm1293_vm4, %v6541_v56  ;;  %v6630_v56 = vrot.slane %v3288_v33, 10  ;;  %v2578_v23 = vsel %vm1293_vm4, %v6511_v9, %v2493_v55  ;;  %v6329_v33 = vld [vmem:[%s8418_s7 + $0x118] sm:$0x8]  ;;  %v1897_v54 = vrot.slane %v6331_v36, 7  ;;  %v3415_v24 = vrot.slane %v3296_v20, 6  ;;  %v3624_v10 = vpop.permute.xlu1 %3623 }
 0x125   : > { %v3402_v1 = vsel %vm8691_vm7, %v3400_v58, %v3401_v59  ;;  %v6369_v52 = vrot.slane %v6329_v33, 11  ;;  %v2311_v59 = vsel %vm9176_vm10, %v6497_v32, %v2310_v17  ;;  %v6464_v9 = vld [vmem:[%s8418_s7 + $0x160] sm:$0xf]  ;;  %v6370_v55 = vrot.slane %v6332_v45, 11  ;;  %v6336_v17 = vld [vmem:[%s8418_s7 + $0x154] sm:$0xf] }
 0x126   : > { %v3399_v44 = vsel %vm8691_vm7, %v6630_v56, %v3398_v31  ;;  %v2495_v56 = vpop.permute.xlu0 %2494  ;;  %v6633_v29 = vrot.slane %v3297_v8, 10  ;;  %v3301_v32 = vld [vmem:[%s8399_s6 + $0xd8] sm:$0xf]  ;;  %v6499_v33 = vrot.slane %v6463_v15, 11  ;;  %v6335_v36 = vld [vmem:[%s8418_s7 + $0x150] sm:$0x8] }
 0x127   : > { %3970 = vmatmul.mubr.bf16.vlgmr.msra.gmra.mrb[32].mxu0 %v3697_v61  ;;  %v3291_v61 = vld [vmem:[%s8399_s6 + $0x80] sm:$0xc]  ;;  %v6678_v5 = vcombine.low %v3399_v44, %v3402_v1  ;;  %v2582_v4 = vsel %vm1293_vm4, %v6512_v35, %v2495_v56  ;;  %v1901_v44 = vrot.slane %v6333_v37, 7  ;;  %v7247_v1 = vld [vmem:[%s8399_s6 + $0x70] sm:$0xff]   ;;  %v6371_v37 = vrot.slane %v6335_v36, 11 }
 0x128   : > { %6728 = vmatprep.mubr.msk.bf16.mxu0 %vm1293_vm4, %v6676_v2  ;;  %v3405_v2 = vrot.slane %v3292_v12, 6  ;;  %v6460_v12 = vld [vmem:[%s8418_s7 + $0x140] sm:$0x8]  ;;  %v3300_v20 = vld [vmem:[%s8399_s6 + $0xd4] sm:$0xc]  ;;  %v3626_v56 = vpop.permute.xlu1 %3625 }
 0x129   : > { %v6340_v15 = vld [vmem:[%s8418_s7 + $0x174] sm:$0x7] }
 0x12a   : > { %v3407_v16 = vrot.slane %v3405_v2, 4 }
 0x12b   : > { %2843 = vmatmul.mubr.bf16.vlgmr.msra.gmra.mrb[32].mxu1 %v2570_v38  ;;  %v6631_v38 = vrot.slane %v3291_v61, 10 }
 0x12c   : > { %6594 = vmatprep.mubr.msk.bf16.mxu1 %vm1293_vm4, %v6542_v21  ;;  %v6459_v21 = vld [vmem:[%s8418_s7 + $0x12c] sm:$0x7]  ;;  %v3409_v49 = vsel %vm8691_vm7, %v3407_v16, %v3408_v14  ;;  %v1903_v14 = vrot.slane %v1901_v44, 4  ;;  %v2324_v16 = vrot.slane %v6464_v9, 7 }
 0x12d   : > { %v3406_v31 = vsel %vm8691_vm7, %v6631_v38, %v3405_v2  ;;  %v2313_v62 = vrot.slane %v6459_v21, 7  ;;  %v6498_v2 = vrot.slane %v6460_v12, 11  ;;  %v3299_v38 = vld [vmem:[%s8399_s6 + $0xc0] sm:$0x3] }
 0x12e   : > { %v6679_v58 = vcombine.low %v3406_v31, %v3409_v49  ;;  %v3422_v31 = vrot.slane %v3299_v38, 6  ;;  %v1908_v49 = vrot.slane %v6336_v17, 7  ;;  %v2326_v57 = vrot.slane %v2324_v16, 4 }
 0x12f   : > { %3978 = vmatmul.mubr.bf16.gmra.mrb[36].mxu0 %v3701_v46  ;;  %v1894_v46 = vrot.slane %v6330_v18, 7  ;;  %v2314_v40 = vsel %vm9176_vm10, %v2312_v50, %v2313_v62  ;;  %v3713_v18 = vsel %vm1293_vm4, %v7247_v1, %v3624_v10  ;;  %v1902_v50 = vsel %vm9176_vm10, %v6370_v55, %v1901_v44  ;;  %v6468_v44 = vld [vmem:[%s8418_s7 + $0x180] sm:$0x7]  ;;  %v6338_v55 = vld [vmem:[%s8418_s7 + $0x16c] sm:$0x8] }
 0x130   : > { %6729 = vmatprep.mubr.msk.bf16.mxu0 %vm1293_vm4, %v6677_v13  ;;  %v3412_v13 = vrot.slane %v3295_v22, 6  ;;  %v6545_v61 = vcombine.low %v2311_v59, %v2314_v40  ;;  %v2325_v12 = vsel %vm9176_vm10, %v6499_v33, %v2324_v16  ;;  %v1910_v40 = vrot.slane %v1908_v49, 4  ;;  %v3303_v16 = vld [vmem:[%s8399_s6 + $0xf0] sm:$0xc] }
 0x131   : > { %v1896_v48 = vrot.slane %v1894_v46, 4  ;;  %v1895_v41 = vsel %vm9176_vm10, %v6369_v52, %v1894_v46  ;;  %v6337_v46 = vld [vmem:[%s8418_s7 + $0x158] sm:$0x7]  ;;  %v3302_v52 = vld [vmem:[%s8399_s6 + $0xdc] sm:$0x3]  ;;  %v1909_v10 = vsel %vm9176_vm10, %v6371_v37, %v1908_v49 }
 0x132   : > { %v3414_v3 = vrot.slane %v3412_v13, 4  ;;  %v3413_v11 = vsel %vm8691_vm7, %v6632_v6, %v3412_v13  ;;  %v2327_v13 = vrot.slane %v6465_v25, 7  ;;  %v6470_v25 = vld [vmem:[%s8418_s7 + $0x198] sm:$0xf]  ;;  %v6469_v49 = vld [vmem:[%s8418_s7 + $0x194] sm:$0x8] }
 0x133   : > { %2851 = vmatmul.mubr.bf16.gmra.mrb[36].mxu1 %v2574_v43  ;;  %v2317_v43 = vrot.slane %v6461_v26, 7  ;;  %v1898_v51 = vsel %vm9176_vm10, %v1896_v48, %v1897_v54  ;;  %v3426_v54 = vrot.slane %v3301_v32, 6  ;;  %v6467_v48 = vld [vmem:[%s8418_s7 + $0x17c] sm:$0xf] }
 0x134   : > { %6595 = vmatprep.mubr.msk.bf16.mxu1 %vm1293_vm4, %v6543_v0  ;;  %v3298_v0 = vld [vmem:[%s8399_s6 + $0xbc] sm:$0xf]  ;;  %v3416_v53 = vsel %vm8691_vm7, %v3414_v3, %v3415_v24  ;;  %v6513_v21 = vcombine.low %v1895_v41, %v1898_v51  ;;  %v2328_v24 = vsel %vm9176_vm10, %v2326_v57, %v2327_v13  ;;  %v2331_v1 = vrot.slane %v6467_v48, 7  ;;  %v3304_v51 = vld [vmem:[%s8399_s6 + $0xf4] sm:$0xf] }
 0x135   : > { %v2319_v63 = vrot.slane %v2317_v43, 4  ;;  %v3419_v39 = vrot.slane %v3298_v0, 6  ;;  %v6680_v22 = vcombine.low %v3413_v11, %v3416_v53  ;;  %v3429_v0 = vrot.slane %v3302_v52, 6  ;;  %v3628_v11 = vpop.permute.xlu1 %3627  ;;  %v6471_v57 = vld [vmem:[%s8418_s7 + $0x19c] sm:$0x7] }
 0x136   : > { %v6547_v9 = vcombine.low %v2325_v12, %v2328_v24  ;;  %v3433_v17 = vrot.slane %v3304_v51, 6  ;;  %v3307_v13 = vld [vmem:[%s8399_s6 + $0x110] sm:$0xf]  ;;  %v6341_v48 = vld [vmem:[%s8418_s7 + $0x188] sm:$0x8] }
 0x137   : > { %3986 = vmatmul.mubr.bf16.gmra.mrb[40].mxu0 %v3705_v60  ;;  %v2320_v60 = vrot.slane %v6462_v7, 7  ;;  %v3421_v30 = vrot.slane %v3419_v39, 4  ;;  %v1911_v7 = vrot.slane %v6337_v46, 7  ;;  %v3440_v24 = vrot.slane %v3307_v13, 6 }
 0x138   : > { %6730 = vmatprep.mubr.msk.bf16.mxu0 %vm1293_vm4, %v6678_v5  ;;  %v1904_v5 = vrot.slane %v6334_v47, 7  ;;  %v3428_v47 = vrot.slane %v3426_v54, 4  ;;  %v3435_v36 = vrot.slane %v3433_v17, 4 }
 0x139   : > { %v2321_v28 = vsel %vm9176_vm10, %v2319_v63, %v2320_v60  ;;  %v3423_v59 = vsel %vm8691_vm7, %v3421_v30, %v3422_v31  ;;  %v7249_v60 = vld [vmem:[%s8399_s6 + $0xa8] sm:$0xff]   ;;  %v1912_v53 = vsel %vm9176_vm10, %v1910_v40, %v1911_v7  ;;  %v6635_v30 = vrot.slane %v3303_v16, 10  ;;  %v3308_v7 = vld [vmem:[%s8399_s6 + $0x114] sm:$0x3] }
 0x13a   : > { %v1905_v62 = vsel %vm9176_vm10, %v1903_v14, %v1904_v5  ;;  %v3430_v38 = vsel %vm8691_vm7, %v3428_v47, %v3429_v0  ;;  %v2333_v14 = vrot.slane %v2331_v1, 4  ;;  %v2341_v40 = vrot.slane %v6471_v57, 7 }
 0x13b   : > { %2859 = vmatmul.mubr.bf16.gmra.mrb[40].mxu1 %v2578_v23  ;;  %v2318_v23 = vsel %vm9176_vm10, %v6498_v2, %v2317_v43  ;;  %v6514_v6 = vcombine.low %v1902_v50, %v1905_v62  ;;  %v6634_v43 = vrot.slane %v3300_v20, 10  ;;  %v2338_v50 = vrot.slane %v6470_v25, 7  ;;  %v6342_v62 = vld [vmem:[%s8418_s7 + $0x18c] sm:$0xf] }
 0x13c   : > { %6596 = vmatprep.mubr.msk.bf16.mxu1 %vm1293_vm4, %v6544_v27  ;;  %v2497_v27 = vpop.permute.xlu0 %2496  ;;  %v6546_v35 = vcombine.low %v2318_v23, %v2321_v28  ;;  %v6372_v23 = vrot.slane %v6338_v55, 11  ;;  %v1922_v12 = vrot.slane %v6342_v62, 7 }
 0x13d   : > { %v2586_v26 = vsel %vm1293_vm4, %v6513_v21, %v2497_v27  ;;  %v3427_v8 = vsel %vm8691_vm7, %v6634_v43, %v3426_v54  ;;  %v3721_v21 = vsel %vm1293_vm4, %v7249_v60, %v3628_v11  ;;  %v3630_v54 = vpop.permute.xlu1 %3629  ;;  %v2340_v37 = vrot.slane %v2338_v50, 4  ;;  %v6473_v43 = vld [vmem:[%s8418_s7 + $0x1b4] sm:$0xf]  ;;  %v6472_v11 = vld [vmem:[%s8418_s7 + $0x1b0] sm:$0x8] }
 0x13e   : > { %v6682_v27 = vcombine.low %v3427_v8, %v3430_v38  ;;  %v6344_v8 = vld [vmem:[%s8418_s7 + $0x1a4] sm:$0x8] }
 0x13f   : > { %3994 = vmatmul.mubr.bf16.gmra.mrb[44].mxu0 %v3709_v34  ;;  %v7248_v34 = vld [vmem:[%s8399_s6 + $0x8c] sm:$0xff]   ;;  %v2342_v60 = vsel %vm9176_vm10, %v2340_v37, %v2341_v40 }
 0x140   : > { %6731 = vmatprep.mubr.msk.bf16.mxu0 %vm1293_vm4, %v6679_v58  ;;  %v3420_v58 = vsel %vm8691_vm7, %v6633_v29, %v3419_v39  ;;  %v2499_v3 = vpop.permute.xlu0 %2498  ;;  %v3717_v41 = vsel %vm1293_vm4, %v7248_v34, %v3626_v56  ;;  %v2334_v39 = vrot.slane %v6468_v44, 7  ;;  %v1918_v29 = vrot.slane %v6340_v15, 7 }
 0x141   : > { %v6681_v45 = vcombine.low %v3420_v58, %v3423_v59  ;;  %v2590_v2 = vsel %vm1293_vm4, %v6514_v6, %v2499_v3  ;;  %v3434_v56 = vsel %vm8691_vm7, %v6635_v30, %v3433_v17  ;;  %v6501_v59 = vrot.slane %v6469_v49, 11  ;;  %v6343_v6 = vld [vmem:[%s8418_s7 + $0x190] sm:$0x7]  ;;  %v3306_v3 = vld [vmem:[%s8399_s6 + $0x10c] sm:$0xc] }
 0x142   : > { %v2335_v33 = vsel %vm9176_vm10, %v2333_v14, %v2334_v39  ;;  %v6636_v51 = vrot.slane %v3306_v3, 10  ;;  %v3310_v39 = vld [vmem:[%s8399_s6 + $0x12c] sm:$0xf]  ;;  %v7251_v14 = vld [vmem:[%s8399_s6 + $0xe0] sm:$0xff]   ;;  %v6374_v30 = vrot.slane %v6344_v8, 11 }
 0x143   : > { %2867 = vmatmul.mubr.bf16.gmra.mrb[44].mxu1 %v2582_v4  ;;  %v6466_v4 = vld [vmem:[%s8418_s7 + $0x178] sm:$0x8]  ;;  %v2339_v44 = vsel %vm9176_vm10, %v6501_v59, %v2338_v50  ;;  %v6349_v3 = vld [vmem:[%s8418_s7 + $0x1c8] sm:$0x7] }
 0x144   : > { %6597 = vmatprep.mubr.msk.bf16.mxu1 %vm1293_vm4, %v6545_v61  ;;  %v6339_v61 = vld [vmem:[%s8418_s7 + $0x170] sm:$0xf]  ;;  %v6500_v63 = vrot.slane %v6466_v4, 11  ;;  %v2501_v31 = vpop.permute.xlu0 %2500  ;;  %v6549_v15 = vcombine.low %v2339_v44, %v2342_v60  ;;  %v3441_v17 = vsel %vm8691_vm7, %v6636_v51, %v3440_v24 }
 0x145   : > { %v1915_v5 = vrot.slane %v6339_v61, 7  ;;  %v1925_v61 = vrot.slane %v6343_v6, 7  ;;  %v6347_v6 = vld [vmem:[%s8418_s7 + $0x1c0] sm:$0x8] }
 0x146   : > { %v2332_v32 = vsel %vm9176_vm10, %v6500_v63, %v2331_v1  ;;  %v1924_v1 = vrot.slane %v1922_v12, 4  ;;  %v6474_v63 = vld [vmem:[%s8418_s7 + $0x1b8] sm:$0x7]  ;;  %v6375_v60 = vrot.slane %v6347_v6, 11 }
 0x147   : > { %4002 = vmatmul.mubr.bf16.gmra.mrb[48].mxu0 %v3713_v18  ;;  %v3305_v18 = vld [vmem:[%s8399_s6 + $0xf8] sm:$0x3]  ;;  %v1917_v28 = vrot.slane %v1915_v5, 4  ;;  %v6548_v34 = vcombine.low %v2332_v32, %v2335_v33  ;;  %v3311_v32 = vld [vmem:[%s8399_s6 + $0x130] sm:$0x3] }
 0x148   : > { %6732 = vmatprep.mubr.msk.bf16.mxu0 %vm1293_vm4, %v6680_v22  ;;  %v6515_v22 = vcombine.low %v1909_v10, %v1912_v53  ;;  %v3436_v46 = vrot.slane %v3305_v18, 6  ;;  %v2503_v47 = vpop.permute.xlu0 %2502  ;;  %v3443_v10 = vrot.slane %v3308_v7, 6  ;;  %v2345_v53 = vrot.slane %v6473_v43, 7  ;;  %v7252_v43 = vld [vmem:[%s8399_s6 + $0xfc] sm:$0xff]  }
 0x149   : > { %v1919_v52 = vsel %vm9176_vm10, %v1917_v28, %v1918_v29  ;;  %v1926_v16 = vsel %vm9176_vm10, %v1924_v1, %v1925_v61  ;;  %v6502_v18 = vrot.slane %v6472_v11, 11  ;;  %v2348_v28 = vrot.slane %v6474_v63, 7  ;;  %v6479_v61 = vld [vmem:[%s8418_s7 + $0x1ec] sm:$0xf] }
 0x14a   : > { %v2594_v20 = vsel %vm1293_vm4, %v6515_v22, %v2501_v31  ;;  %v3437_v58 = vsel %vm8691_vm7, %v3435_v36, %v3436_v46  ;;  %v6476_v22 = vld [vmem:[%s8418_s7 + $0x1d0] sm:$0xf]  ;;  %v3447_v29 = vrot.slane %v3310_v39, 6  ;;  %v3309_v31 = vld [vmem:[%s8399_s6 + $0x128] sm:$0xc] }
 0x14b   : > { %2875 = vmatmul.mubr.bf16.gmra.mrb[48].mxu1 %v2586_v26  ;;  %v7250_v26 = vld [vmem:[%s8399_s6 + $0xc4] sm:$0xff]   ;;  %v6475_v46 = vld [vmem:[%s8418_s7 + $0x1cc] sm:$0x8]  ;;  %v2352_v49 = vrot.slane %v6476_v22, 7  ;;  %v2346_v13 = vsel %vm9176_vm10, %v6502_v18, %v2345_v53  ;;  %v7253_v22 = vld [vmem:[%s8399_s6 + $0x118] sm:$0xff]  }
 0x14c   : > { %6598 = vmatprep.mubr.msk.bf16.mxu1 %vm1293_vm4, %v6546_v35  ;;  %v1916_v35 = vsel %vm9176_vm10, %v6372_v23, %v1915_v5  ;;  %v3725_v0 = vsel %vm1293_vm4, %v7250_v26, %v3630_v54  ;;  %v3632_v23 = vpop.permute.xlu1 %3631  ;;  %v6348_v26 = vld [vmem:[%s8418_s7 + $0x1c4] sm:$0xf]  ;;  %v3449_v54 = vrot.slane %v3447_v29, 4 }
 0x14d   : > { %v6516_v4 = vcombine.low %v1916_v35, %v1919_v52  ;;  %v3729_v50 = vsel %vm1293_vm4, %v7251_v14, %v3632_v23  ;;  %v6637_v52 = vrot.slane %v3309_v31, 10  ;;  %v2354_v37 = vrot.slane %v2352_v49, 4  ;;  %v6480_v14 = vld [vmem:[%s8418_s7 + $0x1f0] sm:$0x7] }
 0x14f   : > { %4010 = vmatmul.mubr.bf16.gmra.mrb[52].mxu0 %v3717_v41  ;;  %v6683_v41 = vcombine.low %v3434_v56, %v3437_v58  ;;  %v2598_v55 = vsel %vm1293_vm4, %v6516_v4, %v2503_v47  ;;  %v3450_v56 = vrot.slane %v3311_v32, 6  ;;  %v3313_v58 = vld [vmem:[%s8399_s6 + $0x148] sm:$0xf]  ;;  %v3312_v4 = vld [vmem:[%s8399_s6 + $0x144] sm:$0xc]  ;;  %v3448_v44 = vsel %vm8691_vm7, %v6637_v52, %v3447_v29 }
 0x150   : > { %6733 = vmatprep.mubr.msk.bf16.mxu0 %vm1293_vm4, %v6681_v45  ;;  %v6373_v45 = vrot.slane %v6341_v48, 11  ;;  %v6503_v48 = vrot.slane %v6475_v46, 11  ;;  %v3634_v47 = vpop.permute.xlu1 %3633  ;;  %v6638_v63 = vrot.slane %v3312_v4, 10  ;;  %v6350_v32 = vld [vmem:[%s8418_s7 + $0x1dc] sm:$0x8] }
 0x151   : > { %v3451_v1 = vsel %vm8691_vm7, %v3449_v54, %v3450_v56  ;;  %v6355_v4 = vld [vmem:[%s8418_s7 + $0x200] sm:$0x7] }
 0x152   : > { %v1923_v5 = vsel %vm9176_vm10, %v6373_v45, %v1922_v12  ;;  %v3454_v45 = vrot.slane %v3313_v58, 6 }
 0x153   : > { %2883 = vmatmul.mubr.bf16.gmra.mrb[52].mxu1 %v2590_v2  ;;  %v6345_v2 = vld [vmem:[%s8418_s7 + $0x1a8] sm:$0xf]  ;;  %v6517_v62 = vcombine.low %v1923_v5, %v1926_v16  ;;  %v6685_v5 = vcombine.low %v3448_v44, %v3451_v1  ;;  %v6351_v16 = vld [vmem:[%s8418_s7 + $0x1e0] sm:$0xf] }
 0x154   : > { %6599 = vmatprep.mubr.msk.bf16.mxu1 %vm1293_vm4, %v6547_v9  ;;  %v3442_v9 = vrot.slane %v3440_v24, 4  ;;  %v1929_v38 = vrot.slane %v6345_v2, 7  ;;  %v1936_v24 = vrot.slane %v6348_v26, 7  ;;  %v2353_v2 = vsel %vm9176_vm10, %v6503_v48, %v2352_v49  ;;  %v3636_v46 = vpop.permute.xlu1 %3635  ;;  %v3315_v49 = vld [vmem:[%s8399_s6 + $0x160] sm:$0xc] }
 0x155   : > { %v3456_v8 = vrot.slane %v3454_v45, 4  ;;  %v3455_v29 = vsel %vm8691_vm7, %v6638_v63, %v3454_v45  ;;  %v3737_v52 = vsel %vm1293_vm4, %v7253_v22, %v3636_v46  ;;  %v6639_v58 = vrot.slane %v3315_v49, 10  ;;  %v6356_v46 = vld [vmem:[%s8418_s7 + $0x214] sm:$0x8]  ;;  %v6358_v49 = vld [vmem:[%s8418_s7 + $0x21c] sm:$0x7] }
 0x156   : > { %v3444_v25 = vsel %vm8691_vm7, %v3442_v9, %v3443_v10  ;;  %v1931_v33 = vrot.slane %v1929_v38, 4  ;;  %v1930_v59 = vsel %vm9176_vm10, %v6374_v30, %v1929_v38  ;;  %v1939_v9 = vrot.slane %v6349_v3, 7  ;;  %v6478_v38 = vld [vmem:[%s8418_s7 + $0x1e8] sm:$0x8]  ;;  %v6483_v3 = vld [vmem:[%s8418_s7 + $0x20c] sm:$0x7] }
 0x157   : > { %4018 = vmatmul.mubr.bf16.gmra.mrb[56].mxu0 %v3721_v21  ;;  %v6346_v21 = vld [vmem:[%s8418_s7 + $0x1ac] sm:$0x7]  ;;  %v6684_v57 = vcombine.low %v3441_v17, %v3444_v25  ;;  %v1937_v23 = vsel %vm9176_vm10, %v6375_v60, %v1936_v24  ;;  %v1953_v63 = vrot.slane %v6355_v4, 7  ;;  %v6489_v4 = vld [vmem:[%s8418_s7 + $0x244] sm:$0x7] }
 0x158   : > { %6734 = vmatprep.mubr.msk.bf16.mxu0 %vm1293_vm4, %v6682_v27  ;;  %v2347_v27 = vrot.slane %v2345_v53, 4  ;;  %v1932_v36 = vrot.slane %v6346_v21, 7  ;;  %v1938_v53 = vrot.slane %v1936_v24, 4  ;;  %v3316_v21 = vld [vmem:[%s8399_s6 + $0x164] sm:$0xf] }
 0x159   : > { %v3319_v24 = vld [vmem:[%s8399_s6 + $0x180] sm:$0xf] }
 0x15a   : > { %v2349_v35 = vsel %vm9176_vm10, %v2347_v27, %v2348_v28  ;;  %v1933_v12 = vsel %vm9176_vm10, %v1931_v33, %v1932_v36  ;;  %v1940_v25 = vsel %vm9176_vm10, %v1938_v53, %v1939_v9  ;;  %v6504_v27 = vrot.slane %v6478_v38, 11  ;;  %v6352_v33 = vld [vmem:[%s8418_s7 + $0x1e4] sm:$0x7]  ;;  %v6486_v38 = vld [vmem:[%s8418_s7 + $0x228] sm:$0x7] }
 0x15b   : > { %2891 = vmatmul.mubr.bf16.gmra.mrb[56].mxu1 %v2594_v20  ;;  %v6477_v20 = vld [vmem:[%s8418_s7 + $0x1d4] sm:$0x7]  ;;  %v6518_v51 = vcombine.low %v1930_v59, %v1933_v12  ;;  %v2362_v28 = vrot.slane %v6480_v14, 7  ;;  %v1943_v36 = vrot.slane %v6351_v16, 7  ;;  %v6354_v59 = vld [vmem:[%s8418_s7 + $0x1fc] sm:$0xf] }
 0x15c   : > { %6600 = vmatprep.mubr.msk.bf16.mxu1 %vm1293_vm4, %v6548_v34  ;;  %v2505_v34 = vpop.permute.xlu0 %2504  ;;  %v2355_v40 = vrot.slane %v6477_v20, 7 }
 0x15d   : > { %v2602_v7 = vsel %vm1293_vm4, %v6517_v62, %v2505_v34  ;;  %v6519_v62 = vcombine.low %v1937_v23, %v1940_v25  ;;  %v6376_v34 = vrot.slane %v6350_v32, 11  ;;  %v1945_v56 = vrot.slane %v1943_v36, 4 }
 0x15e   : > { %v2356_v11 = vsel %vm9176_vm10, %v2354_v37, %v2355_v40  ;;  %v6481_v37 = vld [vmem:[%s8418_s7 + $0x204] sm:$0x8] }
 0x15f   : > { %4026 = vmatmul.mubr.bf16.gmra.mrb[60].mxu0 %v3725_v0  ;;  %v6550_v0 = vcombine.low %v2346_v13, %v2349_v35  ;;  %v6551_v18 = vcombine.low %v2353_v2, %v2356_v11  ;;  %v6482_v13 = vld [vmem:[%s8418_s7 + $0x208] sm:$0xf]  ;;  %v1946_v35 = vrot.slane %v6352_v33, 7  ;;  %v3638_v2 = vpop.permute.xlu1 %3637  ;;  %v3468_v11 = vrot.slane %v3319_v24, 6 }
 0x160   : > { %6735 = vmatprep.mubr.msk.bf16.mxu0 %vm1293_vm4, %v6683_v41  ;;  %v3314_v41 = vld [vmem:[%s8399_s6 + $0x14c] sm:$0x3]  ;;  %v2507_v10 = vpop.permute.xlu0 %2506  ;;  %v2366_v40 = vrot.slane %v6482_v13, 7 }
 0x161   : > { %v3457_v39 = vrot.slane %v3314_v41, 6  ;;  %v2606_v17 = vsel %vm1293_vm4, %v6518_v51, %v2507_v10  ;;  %v1950_v41 = vrot.slane %v6354_v59, 7  ;;  %v1947_v44 = vsel %vm9176_vm10, %v1945_v56, %v1946_v35  ;;  %v6485_v51 = vld [vmem:[%s8418_s7 + $0x224] sm:$0xf]  ;;  %v6488_v56 = vld [vmem:[%s8418_s7 + $0x240] sm:$0xf] }
 0x162   : > { %v2368_v9 = vrot.slane %v2366_v40, 4  ;;  %v2369_v10 = vrot.slane %v6483_v3, 7  ;;  %v2373_v14 = vrot.slane %v6485_v51, 7  ;;  %v7256_v51 = vld [vmem:[%s8399_s6 + $0x16c] sm:$0xff]  }
 0x163   : > { %2899 = vmatmul.mubr.bf16.gmra.mrb[60].mxu1 %v2598_v55  ;;  %v3733_v55 = vsel %vm1293_vm4, %v7252_v43, %v3634_v47  ;;  %v3458_v30 = vsel %vm8691_vm7, %v3456_v8, %v3457_v39  ;;  %v1944_v43 = vsel %vm9176_vm10, %v6376_v34, %v1943_v36  ;;  %v7254_v47 = vld [vmem:[%s8399_s6 + $0x134] sm:$0xff]   ;;  %v3318_v39 = vld [vmem:[%s8399_s6 + $0x17c] sm:$0xc]  ;;  %v6484_v8 = vld [vmem:[%s8418_s7 + $0x220] sm:$0x8]  ;;  %v3640_v35 = vpop.permute.xlu1 %3639 }
 0x164   : > { %6601 = vmatprep.mubr.msk.bf16.mxu1 %vm1293_vm4, %v6549_v15  ;;  %v2359_v15 = vrot.slane %v6479_v61, 7  ;;  %v6686_v20 = vcombine.low %v3455_v29, %v3458_v30  ;;  %v2509_v48 = vpop.permute.xlu0 %2508  ;;  %v6505_v61 = vrot.slane %v6481_v37, 11  ;;  %v6520_v16 = vcombine.low %v1944_v43, %v1947_v44  ;;  %v3322_v29 = vld [vmem:[%s8399_s6 + $0x19c] sm:$0xf] }
 0x165   : > { %v2610_v45 = vsel %vm1293_vm4, %v6519_v62, %v2509_v48  ;;  %v2370_v23 = vsel %vm9176_vm10, %v2368_v9, %v2369_v10  ;;  %v6640_v25 = vrot.slane %v3318_v39, 10  ;;  %v6506_v30 = vrot.slane %v6484_v8, 11  ;;  %v6359_v39 = vld [vmem:[%s8418_s7 + $0x230] sm:$0x8] }
 0x166   : > { %v2361_v31 = vrot.slane %v2359_v15, 4  ;;  %v2360_v26 = vsel %vm9176_vm10, %v6504_v27, %v2359_v15  ;;  %v3741_v15 = vsel %vm1293_vm4, %v7254_v47, %v3638_v2  ;;  %v3470_v27 = vrot.slane %v3468_v11, 4  ;;  %v6360_v47 = vld [vmem:[%s8418_s7 + $0x234] sm:$0xf] }
 0x167   : > { %4034 = vmatmul.mubr.bf16.gmra.mrb[64].mxu0 %v3729_v50  ;;  %v3461_v50 = vrot.slane %v3316_v21, 6  ;;  %v6357_v21 = vld [vmem:[%s8418_s7 + $0x218] sm:$0xf]  ;;  %v2375_v36 = vrot.slane %v2373_v14, 4  ;;  %v3475_v34 = vrot.slane %v3322_v29, 6  ;;  %v2374_v59 = vsel %vm9176_vm10, %v6506_v30, %v2373_v14  ;;  %v3642_v8 = vpop.permute.xlu1 %3641 }
 0x168   : > { %6736 = vmatprep.mubr.msk.bf16.mxu0 %vm1293_vm4, %v6684_v57  ;;  %v3317_v57 = vld [vmem:[%s8399_s6 + $0x168] sm:$0x3]  ;;  %v2363_v54 = vsel %vm9176_vm10, %v2361_v31, %v2362_v28  ;;  %v2511_v22 = vpop.permute.xlu0 %2510  ;;  %v2376_v31 = vrot.slane %v6486_v38, 7  ;;  %v6378_v48 = vrot.slane %v6356_v46, 11  ;;  %v2383_v10 = vrot.slane %v6489_v4, 7 }
 0x169   : > { %v3463_v6 = vrot.slane %v3461_v50, 4  ;;  %v3464_v12 = vrot.slane %v3317_v57, 6  ;;  %v3462_v1 = vsel %vm8691_vm7, %v6639_v58, %v3461_v50  ;;  %v1957_v50 = vrot.slane %v6357_v21, 7  ;;  %v7255_v57 = vld [vmem:[%s8399_s6 + $0x150] sm:$0xff]   ;;  %v6492_v46 = vld [vmem:[%s8418_s7 + $0x260] sm:$0x7] }
 0x16a   : > { %v2614_v62 = vsel %vm1293_vm4, %v6520_v16, %v2511_v22  ;;  %v3745_v24 = vsel %vm1293_vm4, %v7255_v57, %v3640_v35  ;;  %v3477_v43 = vrot.slane %v3475_v34, 4  ;;  %v3324_v38 = vld [vmem:[%s8399_s6 + $0x1b4] sm:$0xc]  ;;  %v3326_v16 = vld [vmem:[%s8399_s6 + $0x1bc] sm:$0x3]  ;;  %v6379_v22 = vrot.slane %v6359_v39, 11 }
 0x16b   : > { %2907 = vmatmul.mubr.bf16.gmra.mrb[64].mxu1 %v2602_v7  ;;  %v6552_v7 = vcombine.low %v2360_v26, %v2363_v54  ;;  %v3465_v60 = vsel %vm8691_vm7, %v3463_v6, %v3464_v12  ;;  %v3323_v26 = vld [vmem:[%s8399_s6 + $0x1a0] sm:$0x3]  ;;  %v1960_v6 = vrot.slane %v6358_v49, 7  ;;  %v2377_v12 = vsel %vm9176_vm10, %v2375_v36, %v2376_v31  ;;  %v6363_v49 = vld [vmem:[%s8418_s7 + $0x250] sm:$0xf]  ;;  %v3644_v35 = vpop.permute.xlu1 %3643  ;;  %v7258_v4 = vld [vmem:[%s8399_s6 + $0x1a4] sm:$0xff]  }
 0x16c   : > { %6602 = vmatprep.mubr.msk.bf16.mxu1 %vm1293_vm4, %v6550_v0  ;;  %v6353_v0 = vld [vmem:[%s8418_s7 + $0x1f8] sm:$0x8]  ;;  %v1959_v37 = vrot.slane %v1957_v50, 4  ;;  %v3478_v3 = vrot.slane %v3323_v26, 6  ;;  %v6554_v44 = vcombine.low %v2374_v59, %v2377_v12  ;;  %v6642_v29 = vrot.slane %v3324_v38, 10 }
 0x16d   : > { %v6377_v53 = vrot.slane %v6353_v0, 11  ;;  %v6487_v0 = vld [vmem:[%s8418_s7 + $0x23c] sm:$0x8]  ;;  %v1971_v59 = vrot.slane %v6363_v49, 7  ;;  %v1362_v49 = vld [vmem:[#allocation2 + $0x20] sm:$0xff] }
 0x16e   : > { %v1961_v2 = vsel %vm9176_vm10, %v1959_v37, %v1960_v6  ;;  %v6507_v9 = vrot.slane %v6487_v0, 11 }
 0x16f   : > { %4042 = vmatmul.mubr.bf16.gmra.mrb[68].mxu0 %v3733_v55  ;;  %v3320_v55 = vld [vmem:[%s8399_s6 + $0x184] sm:$0x3]  ;;  %v1951_v32 = vsel %vm9176_vm10, %v6377_v53, %v1950_v41  ;;  %v3479_v53 = vsel %vm8691_vm7, %v3477_v43, %v3478_v3 }
 0x170   : > { %6737 = vmatprep.mubr.msk.bf16.mxu0 %vm1293_vm4, %v6685_v5  ;;  %v1952_v5 = vrot.slane %v1950_v41, 4  ;;  %v3471_v28 = vrot.slane %v3320_v55, 6  ;;  %v2380_v41 = vrot.slane %v6488_v56, 7  ;;  %v6361_v55 = vld [vmem:[%s8418_s7 + $0x238] sm:$0x7]  ;;  %v2390_v56 = vrot.slane %v6492_v46, 7 }
 0x172   : > { %v1954_v33 = vsel %vm9176_vm10, %v1952_v5, %v1953_v63  ;;  %v3472_v54 = vsel %vm8691_vm7, %v3470_v27, %v3471_v28  ;;  %v2382_v63 = vrot.slane %v2380_v41, 4  ;;  %v1964_v5 = vrot.slane %v6360_v47, 7 }
 0x173   : > { %2915 = vmatmul.mubr.bf16.gmra.mrb[68].mxu1 %v2606_v17  ;;  %v6687_v17 = vcombine.low %v3462_v1, %v3465_v60  ;;  %v6521_v58 = vcombine.low %v1951_v32, %v1954_v33  ;;  %v1958_v1 = vsel %vm9176_vm10, %v6378_v48, %v1957_v50  ;;  %v2381_v21 = vsel %vm9176_vm10, %v6507_v9, %v2380_v41  ;;  %v6490_v33 = vld [vmem:[%s8418_s7 + $0x258] sm:$0x8]  ;;  %v6364_v48 = vld [vmem:[%s8418_s7 + $0x254] sm:$0x7] }
 0x174   : > { %6603 = vmatprep.mubr.msk.bf16.mxu1 %vm1293_vm4, %v6551_v18  ;;  %v2367_v18 = vsel %vm9176_vm10, %v6505_v61, %v2366_v40  ;;  %v3325_v61 = vld [vmem:[%s8399_s6 + $0x1b8] sm:$0xf]  ;;  %v2384_v27 = vsel %vm9176_vm10, %v2382_v63, %v2383_v10  ;;  %v1966_v28 = vrot.slane %v1964_v5, 4  ;;  %v3485_v32 = vrot.slane %v3326_v16, 6  ;;  %v1359_v10 = vld [vmem:[#allocation2 + $0x8] sm:$0xff]  ;;  %v1360_v16 = vld [vmem:[#allocation2 + $0x10] sm:$0xff] }
 0x175   : > { %v6553_v13 = vcombine.low %v2367_v18, %v2370_v23  ;;  %v3482_v14 = vrot.slane %v3325_v61, 6  ;;  %v1967_v23 = vrot.slane %v6361_v55, 7  ;;  %v6555_v50 = vcombine.low %v2381_v21, %v2384_v27 }
 0x176   : > { %v1974_v43 = vrot.slane %v6364_v48, 7 }
 0x177   : > { %4050 = vmatmul.mubr.bf16.gmra.mrb[72].mxu0 %v3737_v52  ;;  %v3469_v52 = vsel %vm8691_vm7, %v6640_v25, %v3468_v11  ;;  %v3749_v25 = vsel %vm1293_vm4, %v7256_v51, %v3642_v8  ;;  %v3484_v31 = vrot.slane %v3482_v14, 4  ;;  %v3483_v26 = vsel %vm8691_vm7, %v6642_v29, %v3482_v14  ;;  %v1375_v8 = vld [vmem:[#allocation2 + $0x88] sm:$0xff] }
 0x178   : > { %6738 = vmatprep.mubr.msk.bf16.mxu0 %vm1293_vm4, %v6686_v20  ;;  %v3321_v20 = vld [vmem:[%s8399_s6 + $0x198] sm:$0xc] }
 0x179   : > { %v6641_v40 = vrot.slane %v3321_v20, 10  ;;  %v1968_v20 = vsel %vm9176_vm10, %v1966_v28, %v1967_v23  ;;  %v1376_v28 = vld [vmem:[#allocation2 + $0x90] sm:$0xff] }
 0x17b   : > { %2923 = vmatmul.mubr.bf16.gmra.mrb[72].mxu1 %v2610_v45  ;;  %v2513_v45 = vpop.permute.xlu0 %2512  ;;  %v3476_v60 = vsel %vm8691_vm7, %v6641_v40, %v3475_v34  ;;  %v6508_v34 = vrot.slane %v6490_v33, 11 }
 0x17c   : > { %6604 = vmatprep.mubr.msk.bf16.mxu1 %vm1293_vm4, %v6552_v7  ;;  %v6688_v7 = vcombine.low %v3469_v52, %v3472_v54  ;;  %v2618_v11 = vsel %vm1293_vm4, %v6521_v58, %v2513_v45  ;;  %v6689_v18 = vcombine.low %v3476_v60, %v3479_v53  ;;  %v3486_v52 = vsel %vm8691_vm7, %v3484_v31, %v3485_v32  ;;  %v6362_v58 = vld [vmem:[%s8418_s7 + $0x24c] sm:$0x8]  ;;  %v3646_v45 = vpop.permute.xlu1 %3645  ;;  %v1358_v60 = vld [vmem:[#allocation2] sm:$0xff]  ;;  %v1377_v32 = vld [vmem:[#allocation2 + $0x98] sm:$0xff] }
 0x17d   : > { %v6690_v37 = vcombine.low %v3483_v26, %v3486_v52  ;;  %v6380_v40 = vrot.slane %v6362_v58, 11  ;;  %v1379_v58 = vld [vmem:[#allocation2 + $0xa8] sm:$0xff] }
 0x17f   : > { %4058 = vmatmul.mubr.bf16.gmra.mrb[76].mxu0 %v3741_v15  ;;  %v6522_v15 = vcombine.low %v1958_v1, %v1961_v2  ;;  %v2515_v30 = vpop.permute.xlu0 %2514  ;;  %v1972_v47 = vsel %vm9176_vm10, %v6380_v40, %v1971_v59  ;;  %v3757_v1 = vsel %vm1293_vm4, %v7258_v4, %v3646_v45 }
 0x180   : > { %6739 = vmatprep.mubr.msk.bf16.mxu0 %vm1293_vm4, %v6687_v17  ;;  %v6491_v17 = vld [vmem:[%s8418_s7 + $0x25c] sm:$0xf] }
 0x181   : > { %v2387_v36 = vrot.slane %v6491_v17, 7  ;;  %v2622_v57 = vsel %vm1293_vm4, %v6522_v15, %v2515_v30 }
 0x183   : > { %2931 = vmatmul.mubr.bf16.gmra.mrb[76].mxu1 %v2614_v62  ;;  %v1965_v62 = vsel %vm9176_vm10, %v6379_v22, %v1964_v5  ;;  %v2389_v54 = vrot.slane %v2387_v36, 4  ;;  %v2517_v3 = vpop.permute.xlu0 %2516  ;;  %v1361_v22 = vld [vmem:[#allocation2 + $0x18] sm:$0xff] }
 0x184   : > { %6605 = vmatprep.mubr.msk.bf16.mxu1 %vm1293_vm4, %v6553_v13  ;;  %v7257_v13 = vld [vmem:[%s8399_s6 + $0x188] sm:$0xff]   ;;  %v6523_v12 = vcombine.low %v1965_v62, %v1968_v20 }
 0x185   : > { %v3753_v6 = vsel %vm1293_vm4, %v7257_v13, %v3644_v35  ;;  %v2391_v42 = vsel %vm9176_vm10, %v2389_v54, %v2390_v56  ;;  %v1363_v13 = vld [vmem:[#allocation2 + $0x28] sm:$0xff]  ;;  %v1378_v35 = vld [vmem:[#allocation2 + $0xa0] sm:$0xff] }
 0x186   : > { %v2626_v0 = vsel %vm1293_vm4, %v6523_v12, %v2517_v3  ;;  %v1364_v12 = vld [vmem:[#allocation2 + $0x30] sm:$0xff] }
 0x187   : > { %4066 = vmatmul.mubr.bf16.gmra.mrb[80].mxu0 %v3745_v24  ;;  %v2388_v24 = vsel %vm9176_vm10, %v6508_v34, %v2387_v36  ;;  %v2519_v51 = vpop.permute.xlu0 %2518 }
 0x188   : > { %6740 = vmatprep.mubr.msk.bf16.mxu0 %vm1293_vm4, %v6688_v7  ;;  %v1973_v7 = vrot.slane %v1971_v59, 4  ;;  %v6556_v41 = vcombine.low %v2388_v24, %v2391_v42  ;;  %v1365_v24 = vld [vmem:[#allocation2 + $0x38] sm:$0xff] }
 0x18b   : > { %2939 = vmatmul.mubr.bf16.gmra.mrb[80].mxu1 %v2618_v11 }
 0x18c   : > { %6606 = vmatprep.mubr.msk.bf16.mxu1 %vm1293_vm4, %v6554_v44  ;;  %v1975_v44 = vsel %vm9176_vm10, %v1973_v7, %v1974_v43 }
 0x18d   : > { %v6524_v61 = vcombine.low %v1972_v47, %v1975_v44  ;;  %v1381_v47 = vld [vmem:[#allocation2 + $0xb8] sm:$0xff] }
 0x18f   : > { %4074 = vmatmul.mubr.bf16.gmra.mrb[84].mxu0 %v3749_v25  ;;  %v2630_v2 = vsel %vm1293_vm4, %v6524_v61, %v2519_v51  ;;  %v1366_v51 = vld [vmem:[#allocation2 + $0x40] sm:$0xff] }
 0x190   : > { %6741 = vmatprep.mubr.msk.bf16.mxu0 %vm1293_vm4, %v6689_v18 }
 0x193   : > { %2947 = vmatmul.mubr.bf16.gmra.mrb[84].mxu1 %v2622_v57 }
 0x194   : > { %6607 = vmatprep.mubr.msk.bf16.mxu1 %vm1293_vm4, %v6555_v50 }
 0x197   : > { %4082 = vmatmul.mubr.bf16.gmra.mrb[88].mxu0 %v3753_v6 }
 0x198   : > { %6742 = vmatprep.mubr.msk.bf16.mxu0 %vm1293_vm4, %v6690_v37 }
 0x19b   : > { %2955 = vmatmul.mubr.bf16.gmra.mrb[88].mxu1 %v2626_v0  ;;  %v1380_v0 = vld [vmem:[#allocation2 + $0xb0] sm:$0xff] }
 0x19c   : > { %6608 = vmatprep.mubr.msk.bf16.mxu1 %vm1293_vm4, %v6556_v41 }
 0x19f   : > { %4090 = vmatmul.mubr.bf16.gmra.mrb[92].mxu0 %v3757_v1 }
 0x1a3   : > { %2963 = vmatmul.mubr.bf16.gmra.mrb[92].mxu1 %v2630_v2 }
 0x1ba   : > { %v1568_v9 = vpop.f32.mrb[0].mxu0 }
 0x1bb   : > { %v1695_v11 = vadd.f32 %v1568_v9, %v1358_v60  ;;  %v1570_v53 = vpop.f32.mrb[1].mxu0 }
 0x1bc   : > { %v1571_v63 = vpop.f32.mrb[2].mxu0 }
 0x1bd   : > { %1728 = vst.msk [vmem:[#allocation2] sm:$0xff] %vm1727_vm11, %v1695_v11  ;;  %v1696_v39 = vadd.f32 %v1571_v63, %v1359_v10  ;;  %v1573_v55 = vpop.f32.mrb[3].mxu0  ;;  %v1367_v10 = vld [vmem:[#allocation2 + $0x48] sm:$0xff] }
 0x1be   : > { %v1632_v5 = vpop.f32.mrb[0].mxu1 }
 0x1bf   : > { %1729 = vst.msk [vmem:[#allocation2 + $0x8] sm:$0xff] %vm1727_vm11, %v1696_v39  ;;  %v1711_v38 = vadd.f32 %v1632_v5, %v1374_v19  ;;  %v1634_v14 = vpop.f32.mrb[1].mxu1  ;;  %v1382_v19 = vld [vmem:[#allocation2 + $0xc0] sm:$0xff] }
 0x1c0   : > { %v1635_v15 = vpop.f32.mrb[2].mxu1 }
 0x1c1   : > { %1744 = vst.msk [vmem:[#allocation2 + $0x80] sm:$0xff] %vm1727_vm11, %v1711_v38  ;;  %v1712_v17 = vadd.f32 %v1635_v15, %v1375_v8  ;;  %v1637_v18 = vpop.f32.mrb[3].mxu1  ;;  %v1383_v8 = vld [vmem:[#allocation2 + $0xc8] sm:$0xff] }
 0x1c2   : > { %v1576_v21 = vpop.f32.mrb[4].mxu0 }
 0x1c3   : > { %1745 = vst.msk [vmem:[#allocation2 + $0x88] sm:$0xff] %vm1727_vm11, %v1712_v17  ;;  %v1697_v23 = vadd.f32 %v1576_v21, %v1360_v16  ;;  %v1578_v25 = vpop.f32.mrb[5].mxu0  ;;  %v1368_v16 = vld [vmem:[#allocation2 + $0x50] sm:$0xff] }
 0x1c4   : > { %v1579_v27 = vpop.f32.mrb[6].mxu0 }
 0x1c5   : > { %1730 = vst.msk [vmem:[#allocation2 + $0x10] sm:$0xff] %vm1727_vm11, %v1697_v23  ;;  %v1698_v29 = vadd.f32 %v1579_v27, %v1361_v22  ;;  %v1581_v30 = vpop.f32.mrb[7].mxu0  ;;  %v1369_v22 = vld [vmem:[#allocation2 + $0x58] sm:$0xff] }
 0x1c6   : > { %v1640_v31 = vpop.f32.mrb[4].mxu1 }
 0x1c7   : > { %1731 = vst.msk [vmem:[#allocation2 + $0x18] sm:$0xff] %vm1727_vm11, %v1698_v29  ;;  %v1713_v33 = vadd.f32 %v1640_v31, %v1376_v28  ;;  %v1642_v36 = vpop.f32.mrb[5].mxu1  ;;  %v1384_v28 = vld [vmem:[#allocation2 + $0xd0] sm:$0xff] }
 0x1c8   : > { %v1643_v46 = vpop.f32.mrb[6].mxu1 }
 0x1c9   : > { %1746 = vst.msk [vmem:[#allocation2 + $0x90] sm:$0xff] %vm1727_vm11, %v1713_v33  ;;  %v1714_v50 = vadd.f32 %v1643_v46, %v1377_v32  ;;  %v1645_v62 = vpop.f32.mrb[7].mxu1  ;;  %v1385_v32 = vld [vmem:[#allocation2 + $0xd8] sm:$0xff] }
 0x1ca   : > { %v1584_v57 = vpop.f32.mrb[8].mxu0 }
 0x1cb   : > { %1747 = vst.msk [vmem:[#allocation2 + $0x98] sm:$0xff] %vm1727_vm11, %v1714_v50  ;;  %v1699_v20 = vadd.f32 %v1584_v57, %v1362_v49  ;;  %v1586_v26 = vpop.f32.mrb[9].mxu0  ;;  %v1370_v49 = vld [vmem:[#allocation2 + $0x60] sm:$0xff] }
 0x1cc   : > { %v1587_v34 = vpop.f32.mrb[10].mxu0 }
 0x1cd   : > { %1732 = vst.msk [vmem:[#allocation2 + $0x20] sm:$0xff] %vm1727_vm11, %v1699_v20  ;;  %v1700_v52 = vadd.f32 %v1587_v34, %v1363_v13  ;;  %v1589_v54 = vpop.f32.mrb[11].mxu0  ;;  %v1371_v13 = vld [vmem:[#allocation2 + $0x68] sm:$0xff] }
 0x1ce   : > { %v1648_v56 = vpop.f32.mrb[8].mxu1 }
 0x1cf   : > { %1733 = vst.msk [vmem:[#allocation2 + $0x28] sm:$0xff] %vm1727_vm11, %v1700_v52  ;;  %v1715_v59 = vadd.f32 %v1648_v56, %v1378_v35  ;;  %v1650_v48 = vpop.f32.mrb[9].mxu1  ;;  %v1386_v35 = vld [vmem:[#allocation2 + $0xe0] sm:$0xff] }
 0x1d0   : > { %v1651_v6 = vpop.f32.mrb[10].mxu1 }
 0x1d1   : > { %1748 = vst.msk [vmem:[#allocation2 + $0xa0] sm:$0xff] %vm1727_vm11, %v1715_v59  ;;  %v1716_v37 = vadd.f32 %v1651_v6, %v1379_v58  ;;  %v1653_v40 = vpop.f32.mrb[11].mxu1  ;;  %v1387_v58 = vld [vmem:[#allocation2 + $0xe8] sm:$0xff] }
 0x1d2   : > { %v1592_v3 = vpop.f32.mrb[12].mxu0 }
 0x1d3   : > { %1749 = vst.msk [vmem:[#allocation2 + $0xa8] sm:$0xff] %vm1727_vm11, %v1716_v37  ;;  %v1701_v42 = vadd.f32 %v1592_v3, %v1364_v12  ;;  %v1594_v7 = vpop.f32.mrb[13].mxu0  ;;  %v1372_v12 = vld [vmem:[#allocation2 + $0x70] sm:$0xff] }
 0x1d4   : > { %v1595_v43 = vpop.f32.mrb[14].mxu0 }
 0x1d5   : > { %1734 = vst.msk [vmem:[#allocation2 + $0x30] sm:$0xff] %vm1727_vm11, %v1701_v42  ;;  %v1702_v4 = vadd.f32 %v1595_v43, %v1365_v24  ;;  %v1597_v41 = vpop.f32.mrb[15].mxu0  ;;  %v1373_v24 = vld [vmem:[#allocation2 + $0x78] sm:$0xff] }
 0x1d6   : > { %v1656_v45 = vpop.f32.mrb[12].mxu1 }
 0x1d7   : > { %1735 = vst.msk [vmem:[#allocation2 + $0x38] sm:$0xff] %vm1727_vm11, %v1702_v4  ;;  %v1717_v44 = vadd.f32 %v1656_v45, %v1380_v0  ;;  %v1658_v1 = vpop.f32.mrb[13].mxu1  ;;  %v1388_v0 = vld [vmem:[#allocation2 + $0xf0] sm:$0xff] }
 0x1d8   : > { %v1659_v61 = vpop.f32.mrb[14].mxu1 }
 0x1d9   : > { %1750 = vst.msk [vmem:[#allocation2 + $0xb0] sm:$0xff] %vm1727_vm11, %v1717_v44  ;;  %v1718_v2 = vadd.f32 %v1659_v61, %v1381_v47  ;;  %v1661_v60 = vpop.f32.mrb[15].mxu1  ;;  %v1389_v47 = vld [vmem:[#allocation2 + $0xf8] sm:$0xff] }
 0x1da   : > { %v1600_v9 = vpop.f32.mrb[16].mxu0 }
 0x1db   : > { %1751 = vst.msk [vmem:[#allocation2 + $0xb8] sm:$0xff] %vm1727_vm11, %v1718_v2  ;;  %v1703_v11 = vadd.f32 %v1600_v9, %v1366_v51  ;;  %v1602_v53 = vpop.f32.mrb[17].mxu0  ;;  %v3760_v51 = vld [vmem:[#allocation2 + $0x200] sm:$0xff] }
 0x1dc   : > { %v1603_v63 = vpop.f32.mrb[18].mxu0 }
 0x1dd   : > { %1736 = vst.msk [vmem:[#allocation2 + $0x40] sm:$0xff] %vm1727_vm11, %v1703_v11  ;;  %v1704_v39 = vadd.f32 %v1603_v63, %v1367_v10  ;;  %v1605_v55 = vpop.f32.mrb[19].mxu0  ;;  %v3761_v10 = vld [vmem:[#allocation2 + $0x208] sm:$0xff] }
 0x1de   : > { %v1664_v5 = vpop.f32.mrb[16].mxu1 }
 0x1df   : > { %1737 = vst.msk [vmem:[#allocation2 + $0x48] sm:$0xff] %vm1727_vm11, %v1704_v39  ;;  %v1719_v38 = vadd.f32 %v1664_v5, %v1382_v19  ;;  %v1666_v14 = vpop.f32.mrb[17].mxu1  ;;  %v2633_v19 = vld [vmem:[#allocation2 + $0x100] sm:$0xff] }
 0x1e0   : > { %v1667_v15 = vpop.f32.mrb[18].mxu1 }
 0x1e1   : > { %1752 = vst.msk [vmem:[#allocation2 + $0xc0] sm:$0xff] %vm1727_vm11, %v1719_v38  ;;  %v1720_v17 = vadd.f32 %v1667_v15, %v1383_v8  ;;  %v1669_v18 = vpop.f32.mrb[19].mxu1  ;;  %v2634_v8 = vld [vmem:[#allocation2 + $0x108] sm:$0xff] }
 0x1e2   : > { %v1608_v21 = vpop.f32.mrb[20].mxu0 }
 0x1e3   : > { %1753 = vst.msk [vmem:[#allocation2 + $0xc8] sm:$0xff] %vm1727_vm11, %v1720_v17  ;;  %v1705_v23 = vadd.f32 %v1608_v21, %v1368_v16  ;;  %v1610_v25 = vpop.f32.mrb[21].mxu0  ;;  %v3762_v16 = vld [vmem:[#allocation2 + $0x210] sm:$0xff] }
 0x1e4   : > { %v1611_v27 = vpop.f32.mrb[22].mxu0 }
 0x1e5   : > { %1738 = vst.msk [vmem:[#allocation2 + $0x50] sm:$0xff] %vm1727_vm11, %v1705_v23  ;;  %v1706_v29 = vadd.f32 %v1611_v27, %v1369_v22  ;;  %v1613_v30 = vpop.f32.mrb[23].mxu0  ;;  %v3763_v22 = vld [vmem:[#allocation2 + $0x218] sm:$0xff] }
 0x1e6   : > { %v1672_v31 = vpop.f32.mrb[20].mxu1 }
 0x1e7   : > { %1739 = vst.msk [vmem:[#allocation2 + $0x58] sm:$0xff] %vm1727_vm11, %v1706_v29  ;;  %v1721_v33 = vadd.f32 %v1672_v31, %v1384_v28  ;;  %v1674_v36 = vpop.f32.mrb[21].mxu1  ;;  %v2635_v28 = vld [vmem:[#allocation2 + $0x110] sm:$0xff] }
 0x1e8   : > { %v1675_v46 = vpop.f32.mrb[22].mxu1 }
 0x1e9   : > { %1754 = vst.msk [vmem:[#allocation2 + $0xd0] sm:$0xff] %vm1727_vm11, %v1721_v33  ;;  %v1722_v50 = vadd.f32 %v1675_v46, %v1385_v32  ;;  %v1677_v62 = vpop.f32.mrb[23].mxu1  ;;  %v2636_v32 = vld [vmem:[#allocation2 + $0x118] sm:$0xff] }
 0x1ea   : > { %v1616_v57 = vpop.f32.mrb[24].mxu0 }
 0x1eb   : > { %1755 = vst.msk [vmem:[#allocation2 + $0xd8] sm:$0xff] %vm1727_vm11, %v1722_v50  ;;  %v1707_v20 = vadd.f32 %v1616_v57, %v1370_v49  ;;  %v1618_v26 = vpop.f32.mrb[25].mxu0  ;;  %v3764_v49 = vld [vmem:[#allocation2 + $0x220] sm:$0xff] }
 0x1ec   : > { %v1619_v34 = vpop.f32.mrb[26].mxu0 }
 0x1ed   : > { %1740 = vst.msk [vmem:[#allocation2 + $0x60] sm:$0xff] %vm1727_vm11, %v1707_v20  ;;  %v1708_v52 = vadd.f32 %v1619_v34, %v1371_v13  ;;  %v1621_v54 = vpop.f32.mrb[27].mxu0  ;;  %v3765_v13 = vld [vmem:[#allocation2 + $0x228] sm:$0xff] }
 0x1ee   : > { %v1680_v56 = vpop.f32.mrb[24].mxu1 }
 0x1ef   : > { %1741 = vst.msk [vmem:[#allocation2 + $0x68] sm:$0xff] %vm1727_vm11, %v1708_v52  ;;  %v1723_v59 = vadd.f32 %v1680_v56, %v1386_v35  ;;  %v1682_v48 = vpop.f32.mrb[25].mxu1  ;;  %v2637_v35 = vld [vmem:[#allocation2 + $0x120] sm:$0xff] }
 0x1f0   : > { %v1683_v6 = vpop.f32.mrb[26].mxu1 }
 0x1f1   : > { %1756 = vst.msk [vmem:[#allocation2 + $0xe0] sm:$0xff] %vm1727_vm11, %v1723_v59  ;;  %v1724_v37 = vadd.f32 %v1683_v6, %v1387_v58  ;;  %v1685_v40 = vpop.f32.mrb[27].mxu1  ;;  %v2638_v58 = vld [vmem:[#allocation2 + $0x128] sm:$0xff] }
 0x1f2   : > { %v1624_v3 = vpop.f32.mrb[28].mxu0 }
 0x1f3   : > { %1757 = vst.msk [vmem:[#allocation2 + $0xe8] sm:$0xff] %vm1727_vm11, %v1724_v37  ;;  %v1709_v42 = vadd.f32 %v1624_v3, %v1372_v12  ;;  %v1626_v7 = vpop.f32.mrb[29].mxu0  ;;  %v3766_v12 = vld [vmem:[#allocation2 + $0x230] sm:$0xff] }
 0x1f4   : > { %v1627_v43 = vpop.f32.mrb[30].mxu0 }
 0x1f5   : > { %1742 = vst.msk [vmem:[#allocation2 + $0x70] sm:$0xff] %vm1727_vm11, %v1709_v42  ;;  %v1710_v4 = vadd.f32 %v1627_v43, %v1373_v24  ;;  %v1629_v41 = vpop.f32.mrb[31].mxu0  ;;  %v3767_v24 = vld [vmem:[#allocation2 + $0x238] sm:$0xff] }
 0x1f6   : > { %v1688_v45 = vpop.f32.mrb[28].mxu1 }
 0x1f7   : > { %1743 = vst.msk [vmem:[#allocation2 + $0x78] sm:$0xff] %vm1727_vm11, %v1710_v4  ;;  %v1725_v44 = vadd.f32 %v1688_v45, %v1388_v0  ;;  %v1690_v1 = vpop.f32.mrb[29].mxu1  ;;  %v2639_v0 = vld [vmem:[#allocation2 + $0x130] sm:$0xff] }
 0x1f8   : > { %v1691_v61 = vpop.f32.mrb[30].mxu1 }
 0x1f9   : > { %1758 = vst.msk [vmem:[#allocation2 + $0xf0] sm:$0xff] %vm1727_vm11, %v1725_v44  ;;  %v1726_v2 = vadd.f32 %v1691_v61, %v1389_v47  ;;  %v1693_v60 = vpop.f32.mrb[31].mxu1  ;;  %v2640_v47 = vld [vmem:[#allocation2 + $0x138] sm:$0xff] }
 0x1fa   : > { %v3971_v9 = vpop.f32.mrb[32].mxu0 }
 0x1fb   : > { %1759 = vst.msk [vmem:[#allocation2 + $0xf8] sm:$0xff] %vm1727_vm11, %v1726_v2  ;;  %v4098_v11 = vadd.f32 %v3971_v9, %v3760_v51  ;;  %v3973_v53 = vpop.f32.mrb[33].mxu0  ;;  %v3768_v51 = vld [vmem:[#allocation2 + $0x240] sm:$0xff] }
 0x1fc   : > { %v3974_v63 = vpop.f32.mrb[34].mxu0 }
 0x1fd   : > { %4130 = vst.msk [vmem:[#allocation2 + $0x200] sm:$0xff] %vm1727_vm11, %v4098_v11  ;;  %v4099_v39 = vadd.f32 %v3974_v63, %v3761_v10  ;;  %v3976_v55 = vpop.f32.mrb[35].mxu0  ;;  %v3769_v10 = vld [vmem:[#allocation2 + $0x248] sm:$0xff] }
 0x1fe   : > { %v2844_v5 = vpop.f32.mrb[32].mxu1 }
 0x1ff   : > { %4131 = vst.msk [vmem:[#allocation2 + $0x208] sm:$0xff] %vm1727_vm11, %v4099_v39  ;;  %v2971_v38 = vadd.f32 %v2844_v5, %v2633_v19  ;;  %v2846_v14 = vpop.f32.mrb[33].mxu1  ;;  %v2641_v19 = vld [vmem:[#allocation2 + $0x140] sm:$0xff] }
 0x200   : > { %v2847_v15 = vpop.f32.mrb[34].mxu1 }
 0x201   : > { %3003 = vst.msk [vmem:[#allocation2 + $0x100] sm:$0xff] %vm1727_vm11, %v2971_v38  ;;  %v2972_v17 = vadd.f32 %v2847_v15, %v2634_v8  ;;  %v2849_v18 = vpop.f32.mrb[35].mxu1  ;;  %v2642_v8 = vld [vmem:[#allocation2 + $0x148] sm:$0xff] }
 0x202   : > { %v3979_v21 = vpop.f32.mrb[36].mxu0 }
 0x203   : > { %3004 = vst.msk [vmem:[#allocation2 + $0x108] sm:$0xff] %vm1727_vm11, %v2972_v17  ;;  %v4100_v23 = vadd.f32 %v3979_v21, %v3762_v16  ;;  %v3981_v25 = vpop.f32.mrb[37].mxu0  ;;  %v3770_v16 = vld [vmem:[#allocation2 + $0x250] sm:$0xff] }
 0x204   : > { %v3982_v27 = vpop.f32.mrb[38].mxu0 }
 0x205   : > { %4132 = vst.msk [vmem:[#allocation2 + $0x210] sm:$0xff] %vm1727_vm11, %v4100_v23  ;;  %v4101_v29 = vadd.f32 %v3982_v27, %v3763_v22  ;;  %v3984_v30 = vpop.f32.mrb[39].mxu0  ;;  %v3771_v22 = vld [vmem:[#allocation2 + $0x258] sm:$0xff] }
 0x206   : > { %v2852_v31 = vpop.f32.mrb[36].mxu1 }
 0x207   : > { %4133 = vst.msk [vmem:[#allocation2 + $0x218] sm:$0xff] %vm1727_vm11, %v4101_v29  ;;  %v2973_v33 = vadd.f32 %v2852_v31, %v2635_v28  ;;  %v2854_v36 = vpop.f32.mrb[37].mxu1  ;;  %v2643_v28 = vld [vmem:[#allocation2 + $0x150] sm:$0xff] }
 0x208   : > { %v2855_v46 = vpop.f32.mrb[38].mxu1 }
 0x209   : > { %3005 = vst.msk [vmem:[#allocation2 + $0x110] sm:$0xff] %vm1727_vm11, %v2973_v33  ;;  %v2974_v50 = vadd.f32 %v2855_v46, %v2636_v32  ;;  %v2857_v62 = vpop.f32.mrb[39].mxu1  ;;  %v2644_v32 = vld [vmem:[#allocation2 + $0x158] sm:$0xff] }
 0x20a   : > { %v3987_v57 = vpop.f32.mrb[40].mxu0 }
 0x20b   : > { %3006 = vst.msk [vmem:[#allocation2 + $0x118] sm:$0xff] %vm1727_vm11, %v2974_v50  ;;  %v4102_v20 = vadd.f32 %v3987_v57, %v3764_v49  ;;  %v3989_v26 = vpop.f32.mrb[41].mxu0  ;;  %v3772_v49 = vld [vmem:[#allocation2 + $0x260] sm:$0xff] }
 0x20c   : > { %v3990_v34 = vpop.f32.mrb[42].mxu0 }
 0x20d   : > { %4134 = vst.msk [vmem:[#allocation2 + $0x220] sm:$0xff] %vm1727_vm11, %v4102_v20  ;;  %v4103_v52 = vadd.f32 %v3990_v34, %v3765_v13  ;;  %v3992_v54 = vpop.f32.mrb[43].mxu0  ;;  %v3773_v13 = vld [vmem:[#allocation2 + $0x268] sm:$0xff] }
 0x20e   : > { %v2860_v56 = vpop.f32.mrb[40].mxu1 }
 0x20f   : > { %4135 = vst.msk [vmem:[#allocation2 + $0x228] sm:$0xff] %vm1727_vm11, %v4103_v52  ;;  %v2975_v59 = vadd.f32 %v2860_v56, %v2637_v35  ;;  %v2862_v48 = vpop.f32.mrb[41].mxu1  ;;  %v2645_v35 = vld [vmem:[#allocation2 + $0x160] sm:$0xff] }
 0x210   : > { %v2863_v6 = vpop.f32.mrb[42].mxu1 }
 0x211   : > { %3007 = vst.msk [vmem:[#allocation2 + $0x120] sm:$0xff] %vm1727_vm11, %v2975_v59  ;;  %v2976_v37 = vadd.f32 %v2863_v6, %v2638_v58  ;;  %v2865_v40 = vpop.f32.mrb[43].mxu1  ;;  %v2646_v58 = vld [vmem:[#allocation2 + $0x168] sm:$0xff] }
 0x212   : > { %v3995_v3 = vpop.f32.mrb[44].mxu0 }
 0x213   : > { %3008 = vst.msk [vmem:[#allocation2 + $0x128] sm:$0xff] %vm1727_vm11, %v2976_v37  ;;  %v4104_v42 = vadd.f32 %v3995_v3, %v3766_v12  ;;  %v3997_v7 = vpop.f32.mrb[45].mxu0  ;;  %v3774_v12 = vld [vmem:[#allocation2 + $0x270] sm:$0xff] }
 0x214   : > { %v3998_v43 = vpop.f32.mrb[46].mxu0 }
 0x215   : > { %4136 = vst.msk [vmem:[#allocation2 + $0x230] sm:$0xff] %vm1727_vm11, %v4104_v42  ;;  %v4105_v4 = vadd.f32 %v3998_v43, %v3767_v24  ;;  %v4000_v41 = vpop.f32.mrb[47].mxu0  ;;  %v3775_v24 = vld [vmem:[#allocation2 + $0x278] sm:$0xff] }
 0x216   : > { %v2868_v45 = vpop.f32.mrb[44].mxu1 }
 0x217   : > { %4137 = vst.msk [vmem:[#allocation2 + $0x238] sm:$0xff] %vm1727_vm11, %v4105_v4  ;;  %v2977_v44 = vadd.f32 %v2868_v45, %v2639_v0  ;;  %v2870_v1 = vpop.f32.mrb[45].mxu1  ;;  %v2647_v0 = vld [vmem:[#allocation2 + $0x170] sm:$0xff] }
 0x218   : > { %v2871_v61 = vpop.f32.mrb[46].mxu1 }
 0x219   : > { %3009 = vst.msk [vmem:[#allocation2 + $0x130] sm:$0xff] %vm1727_vm11, %v2977_v44  ;;  %v2978_v2 = vadd.f32 %v2871_v61, %v2640_v47  ;;  %v2873_v60 = vpop.f32.mrb[47].mxu1  ;;  %v2648_v47 = vld [vmem:[#allocation2 + $0x178] sm:$0xff] }
 0x21a   : > { %v4003_v9 = vpop.f32.mrb[48].mxu0 }
 0x21b   : > { %3010 = vst.msk [vmem:[#allocation2 + $0x138] sm:$0xff] %vm1727_vm11, %v2978_v2  ;;  %v4106_v11 = vadd.f32 %v4003_v9, %v3768_v51  ;;  %v4005_v53 = vpop.f32.mrb[49].mxu0  ;;  %v3776_v51 = vld [vmem:[#allocation2 + $0x280] sm:$0xff] }
 0x21c   : > { %v4006_v63 = vpop.f32.mrb[50].mxu0 }
 0x21d   : > { %4138 = vst.msk [vmem:[#allocation2 + $0x240] sm:$0xff] %vm1727_vm11, %v4106_v11  ;;  %v4107_v39 = vadd.f32 %v4006_v63, %v3769_v10  ;;  %v4008_v55 = vpop.f32.mrb[51].mxu0  ;;  %v3777_v10 = vld [vmem:[#allocation2 + $0x288] sm:$0xff] }
 0x21e   : > { %v2876_v5 = vpop.f32.mrb[48].mxu1 }
 0x21f   : > { %4139 = vst.msk [vmem:[#allocation2 + $0x248] sm:$0xff] %vm1727_vm11, %v4107_v39  ;;  %v2979_v38 = vadd.f32 %v2876_v5, %v2641_v19  ;;  %v2878_v14 = vpop.f32.mrb[49].mxu1  ;;  %v2649_v19 = vld [vmem:[#allocation2 + $0x180] sm:$0xff] }
 0x220   : > { %v2879_v15 = vpop.f32.mrb[50].mxu1 }
 0x221   : > { %3011 = vst.msk [vmem:[#allocation2 + $0x140] sm:$0xff] %vm1727_vm11, %v2979_v38  ;;  %v2980_v17 = vadd.f32 %v2879_v15, %v2642_v8  ;;  %v2881_v18 = vpop.f32.mrb[51].mxu1  ;;  %v2650_v8 = vld [vmem:[#allocation2 + $0x188] sm:$0xff] }
 0x222   : > { %v4011_v21 = vpop.f32.mrb[52].mxu0 }
 0x223   : > { %3012 = vst.msk [vmem:[#allocation2 + $0x148] sm:$0xff] %vm1727_vm11, %v2980_v17  ;;  %v4108_v23 = vadd.f32 %v4011_v21, %v3770_v16  ;;  %v4013_v25 = vpop.f32.mrb[53].mxu0  ;;  %v3778_v16 = vld [vmem:[#allocation2 + $0x290] sm:$0xff] }
 0x224   : > { %v4014_v27 = vpop.f32.mrb[54].mxu0 }
 0x225   : > { %4140 = vst.msk [vmem:[#allocation2 + $0x250] sm:$0xff] %vm1727_vm11, %v4108_v23  ;;  %v4109_v29 = vadd.f32 %v4014_v27, %v3771_v22  ;;  %v4016_v30 = vpop.f32.mrb[55].mxu0  ;;  %v3779_v22 = vld [vmem:[#allocation2 + $0x298] sm:$0xff] }
 0x226   : > { %v2884_v31 = vpop.f32.mrb[52].mxu1 }
 0x227   : > { %4141 = vst.msk [vmem:[#allocation2 + $0x258] sm:$0xff] %vm1727_vm11, %v4109_v29  ;;  %v2981_v33 = vadd.f32 %v2884_v31, %v2643_v28  ;;  %v2886_v36 = vpop.f32.mrb[53].mxu1  ;;  %v2651_v28 = vld [vmem:[#allocation2 + $0x190] sm:$0xff] }
 0x228   : > { %v2887_v46 = vpop.f32.mrb[54].mxu1 }
 0x229   : > { %3013 = vst.msk [vmem:[#allocation2 + $0x150] sm:$0xff] %vm1727_vm11, %v2981_v33  ;;  %v2982_v50 = vadd.f32 %v2887_v46, %v2644_v32  ;;  %v2889_v62 = vpop.f32.mrb[55].mxu1  ;;  %v2652_v32 = vld [vmem:[#allocation2 + $0x198] sm:$0xff] }
 0x22a   : > { %v4019_v57 = vpop.f32.mrb[56].mxu0 }
 0x22b   : > { %3014 = vst.msk [vmem:[#allocation2 + $0x158] sm:$0xff] %vm1727_vm11, %v2982_v50  ;;  %v4110_v20 = vadd.f32 %v4019_v57, %v3772_v49  ;;  %v4021_v26 = vpop.f32.mrb[57].mxu0  ;;  %v3780_v49 = vld [vmem:[#allocation2 + $0x2a0] sm:$0xff] }
 0x22c   : > { %v4022_v34 = vpop.f32.mrb[58].mxu0 }
 0x22d   : > { %4142 = vst.msk [vmem:[#allocation2 + $0x260] sm:$0xff] %vm1727_vm11, %v4110_v20  ;;  %v4111_v52 = vadd.f32 %v4022_v34, %v3773_v13  ;;  %v4024_v54 = vpop.f32.mrb[59].mxu0  ;;  %v3781_v13 = vld [vmem:[#allocation2 + $0x2a8] sm:$0xff] }
 0x22e   : > { %v2892_v56 = vpop.f32.mrb[56].mxu1 }
 0x22f   : > { %4143 = vst.msk [vmem:[#allocation2 + $0x268] sm:$0xff] %vm1727_vm11, %v4111_v52  ;;  %v2983_v59 = vadd.f32 %v2892_v56, %v2645_v35  ;;  %v2894_v48 = vpop.f32.mrb[57].mxu1  ;;  %v2653_v35 = vld [vmem:[#allocation2 + $0x1a0] sm:$0xff] }
 0x230   : > { %v2895_v6 = vpop.f32.mrb[58].mxu1 }
 0x231   : > { %3015 = vst.msk [vmem:[#allocation2 + $0x160] sm:$0xff] %vm1727_vm11, %v2983_v59  ;;  %v2984_v37 = vadd.f32 %v2895_v6, %v2646_v58  ;;  %v2897_v40 = vpop.f32.mrb[59].mxu1  ;;  %v2654_v58 = vld [vmem:[#allocation2 + $0x1a8] sm:$0xff] }
 0x232   : > { %v4027_v3 = vpop.f32.mrb[60].mxu0 }
 0x233   : > { %3016 = vst.msk [vmem:[#allocation2 + $0x168] sm:$0xff] %vm1727_vm11, %v2984_v37  ;;  %v4112_v42 = vadd.f32 %v4027_v3, %v3774_v12  ;;  %v4029_v7 = vpop.f32.mrb[61].mxu0  ;;  %v3782_v12 = vld [vmem:[#allocation2 + $0x2b0] sm:$0xff] }
 0x234   : > { %v4030_v43 = vpop.f32.mrb[62].mxu0 }
 0x235   : > { %4144 = vst.msk [vmem:[#allocation2 + $0x270] sm:$0xff] %vm1727_vm11, %v4112_v42  ;;  %v4113_v4 = vadd.f32 %v4030_v43, %v3775_v24  ;;  %v4032_v41 = vpop.f32.mrb[63].mxu0  ;;  %v3783_v24 = vld [vmem:[#allocation2 + $0x2b8] sm:$0xff] }
 0x236   : > { %v2900_v45 = vpop.f32.mrb[60].mxu1 }
 0x237   : > { %4145 = vst.msk [vmem:[#allocation2 + $0x278] sm:$0xff] %vm1727_vm11, %v4113_v4  ;;  %v2985_v44 = vadd.f32 %v2900_v45, %v2647_v0  ;;  %v2902_v1 = vpop.f32.mrb[61].mxu1  ;;  %v2655_v0 = vld [vmem:[#allocation2 + $0x1b0] sm:$0xff] }
 0x238   : > { %v2903_v61 = vpop.f32.mrb[62].mxu1 }
 0x239   : > { %3017 = vst.msk [vmem:[#allocation2 + $0x170] sm:$0xff] %vm1727_vm11, %v2985_v44  ;;  %v2986_v2 = vadd.f32 %v2903_v61, %v2648_v47  ;;  %v2905_v60 = vpop.f32.mrb[63].mxu1  ;;  %v2656_v47 = vld [vmem:[#allocation2 + $0x1b8] sm:$0xff] }
 0x23a   : > { %v4035_v9 = vpop.f32.mrb[64].mxu0 }
 0x23b   : > { %3018 = vst.msk [vmem:[#allocation2 + $0x178] sm:$0xff] %vm1727_vm11, %v2986_v2  ;;  %v4114_v11 = vadd.f32 %v4035_v9, %v3776_v51  ;;  %v4037_v53 = vpop.f32.mrb[65].mxu0  ;;  %v3784_v51 = vld [vmem:[#allocation2 + $0x2c0] sm:$0xff] }
 0x23c   : > { %v4038_v63 = vpop.f32.mrb[66].mxu0 }
 0x23d   : > { %4146 = vst.msk [vmem:[#allocation2 + $0x280] sm:$0xff] %vm1727_vm11, %v4114_v11  ;;  %v4115_v39 = vadd.f32 %v4038_v63, %v3777_v10  ;;  %v4040_v55 = vpop.f32.mrb[67].mxu0  ;;  %v3785_v10 = vld [vmem:[#allocation2 + $0x2c8] sm:$0xff] }
 0x23e   : > { %v2908_v5 = vpop.f32.mrb[64].mxu1 }
 0x23f   : > { %4147 = vst.msk [vmem:[#allocation2 + $0x288] sm:$0xff] %vm1727_vm11, %v4115_v39  ;;  %v2987_v38 = vadd.f32 %v2908_v5, %v2649_v19  ;;  %v2910_v14 = vpop.f32.mrb[65].mxu1  ;;  %v2657_v19 = vld [vmem:[#allocation2 + $0x1c0] sm:$0xff] }
 0x240   : > { %v2911_v15 = vpop.f32.mrb[66].mxu1 }
 0x241   : > { %3019 = vst.msk [vmem:[#allocation2 + $0x180] sm:$0xff] %vm1727_vm11, %v2987_v38  ;;  %v2988_v17 = vadd.f32 %v2911_v15, %v2650_v8  ;;  %v2913_v18 = vpop.f32.mrb[67].mxu1  ;;  %v2658_v8 = vld [vmem:[#allocation2 + $0x1c8] sm:$0xff] }
 0x242   : > { %v4043_v21 = vpop.f32.mrb[68].mxu0 }
 0x243   : > { %3020 = vst.msk [vmem:[#allocation2 + $0x188] sm:$0xff] %vm1727_vm11, %v2988_v17  ;;  %v4116_v23 = vadd.f32 %v4043_v21, %v3778_v16  ;;  %v4045_v25 = vpop.f32.mrb[69].mxu0  ;;  %v3786_v16 = vld [vmem:[#allocation2 + $0x2d0] sm:$0xff] }
 0x244   : > { %v4046_v27 = vpop.f32.mrb[70].mxu0 }
 0x245   : > { %4148 = vst.msk [vmem:[#allocation2 + $0x290] sm:$0xff] %vm1727_vm11, %v4116_v23  ;;  %v4117_v29 = vadd.f32 %v4046_v27, %v3779_v22  ;;  %v4048_v30 = vpop.f32.mrb[71].mxu0  ;;  %v3787_v22 = vld [vmem:[#allocation2 + $0x2d8] sm:$0xff] }
 0x246   : > { %v2916_v31 = vpop.f32.mrb[68].mxu1 }
 0x247   : > { %4149 = vst.msk [vmem:[#allocation2 + $0x298] sm:$0xff] %vm1727_vm11, %v4117_v29  ;;  %v2989_v33 = vadd.f32 %v2916_v31, %v2651_v28  ;;  %v2918_v36 = vpop.f32.mrb[69].mxu1  ;;  %v2659_v28 = vld [vmem:[#allocation2 + $0x1d0] sm:$0xff] }
 0x248   : > { %v2919_v46 = vpop.f32.mrb[70].mxu1 }
 0x249   : > { %3021 = vst.msk [vmem:[#allocation2 + $0x190] sm:$0xff] %vm1727_vm11, %v2989_v33  ;;  %v2990_v50 = vadd.f32 %v2919_v46, %v2652_v32  ;;  %v2921_v62 = vpop.f32.mrb[71].mxu1  ;;  %v2660_v32 = vld [vmem:[#allocation2 + $0x1d8] sm:$0xff] }
 0x24a   : > { %v4051_v57 = vpop.f32.mrb[72].mxu0 }
 0x24b   : > { %3022 = vst.msk [vmem:[#allocation2 + $0x198] sm:$0xff] %vm1727_vm11, %v2990_v50  ;;  %v4118_v20 = vadd.f32 %v4051_v57, %v3780_v49  ;;  %v4053_v26 = vpop.f32.mrb[73].mxu0  ;;  %v3788_v49 = vld [vmem:[#allocation2 + $0x2e0] sm:$0xff] }
 0x24c   : > { %v4054_v34 = vpop.f32.mrb[74].mxu0 }
 0x24d   : > { %4150 = vst.msk [vmem:[#allocation2 + $0x2a0] sm:$0xff] %vm1727_vm11, %v4118_v20  ;;  %v4119_v52 = vadd.f32 %v4054_v34, %v3781_v13  ;;  %v4056_v54 = vpop.f32.mrb[75].mxu0  ;;  %v3789_v13 = vld [vmem:[#allocation2 + $0x2e8] sm:$0xff] }
 0x24e   : > { %v2924_v56 = vpop.f32.mrb[72].mxu1 }
 0x24f   : > { %4151 = vst.msk [vmem:[#allocation2 + $0x2a8] sm:$0xff] %vm1727_vm11, %v4119_v52  ;;  %v2991_v59 = vadd.f32 %v2924_v56, %v2653_v35  ;;  %v2926_v48 = vpop.f32.mrb[73].mxu1  ;;  %v2661_v35 = vld [vmem:[#allocation2 + $0x1e0] sm:$0xff] }
 0x250   : > { %v2927_v6 = vpop.f32.mrb[74].mxu1 }
 0x251   : > { %3023 = vst.msk [vmem:[#allocation2 + $0x1a0] sm:$0xff] %vm1727_vm11, %v2991_v59  ;;  %v2992_v37 = vadd.f32 %v2927_v6, %v2654_v58  ;;  %v2929_v40 = vpop.f32.mrb[75].mxu1  ;;  %v2662_v58 = vld [vmem:[#allocation2 + $0x1e8] sm:$0xff] }
 0x252   : > { %v4059_v3 = vpop.f32.mrb[76].mxu0 }
 0x253   : > { %3024 = vst.msk [vmem:[#allocation2 + $0x1a8] sm:$0xff] %vm1727_vm11, %v2992_v37  ;;  %v4120_v42 = vadd.f32 %v4059_v3, %v3782_v12  ;;  %v4061_v7 = vpop.f32.mrb[77].mxu0  ;;  %v3790_v12 = vld [vmem:[#allocation2 + $0x2f0] sm:$0xff] }
 0x254   : > { %v4062_v43 = vpop.f32.mrb[78].mxu0 }
 0x255   : > { %4152 = vst.msk [vmem:[#allocation2 + $0x2b0] sm:$0xff] %vm1727_vm11, %v4120_v42  ;;  %v4121_v4 = vadd.f32 %v4062_v43, %v3783_v24  ;;  %v4064_v41 = vpop.f32.mrb[79].mxu0  ;;  %v3791_v24 = vld [vmem:[#allocation2 + $0x2f8] sm:$0xff] }
 0x256   : > { %v2932_v45 = vpop.f32.mrb[76].mxu1 }
 0x257   : > { %4153 = vst.msk [vmem:[#allocation2 + $0x2b8] sm:$0xff] %vm1727_vm11, %v4121_v4  ;;  %v2993_v44 = vadd.f32 %v2932_v45, %v2655_v0  ;;  %v2934_v1 = vpop.f32.mrb[77].mxu1  ;;  %v2663_v0 = vld [vmem:[#allocation2 + $0x1f0] sm:$0xff] }
 0x258   : > { %v2935_v61 = vpop.f32.mrb[78].mxu1 }
 0x259   : > { %3025 = vst.msk [vmem:[#allocation2 + $0x1b0] sm:$0xff] %vm1727_vm11, %v2993_v44  ;;  %v2994_v2 = vadd.f32 %v2935_v61, %v2656_v47  ;;  %v2937_v60 = vpop.f32.mrb[79].mxu1  ;;  %v2664_v47 = vld [vmem:[#allocation2 + $0x1f8] sm:$0xff] }
 0x25a   : > { %v4067_v9 = vpop.f32.mrb[80].mxu0 }
 0x25b   : > { %3026 = vst.msk [vmem:[#allocation2 + $0x1b8] sm:$0xff] %vm1727_vm11, %v2994_v2  ;;  %v4122_v11 = vadd.f32 %v4067_v9, %v3784_v51  ;;  %v4069_v53 = vpop.f32.mrb[81].mxu0 }
 0x25c   : > { %v4070_v63 = vpop.f32.mrb[82].mxu0 }
 0x25d   : > { %4154 = vst.msk [vmem:[#allocation2 + $0x2c0] sm:$0xff] %vm1727_vm11, %v4122_v11  ;;  %v4123_v39 = vadd.f32 %v4070_v63, %v3785_v10  ;;  %v4072_v55 = vpop.f32.mrb[83].mxu0 }
 0x25e   : > { %v2940_v5 = vpop.f32.mrb[80].mxu1 }
 0x25f   : > { %4155 = vst.msk [vmem:[#allocation2 + $0x2c8] sm:$0xff] %vm1727_vm11, %v4123_v39  ;;  %v2995_v38 = vadd.f32 %v2940_v5, %v2657_v19  ;;  %v2942_v14 = vpop.f32.mrb[81].mxu1 }
 0x260   : > { %v2943_v15 = vpop.f32.mrb[82].mxu1 }
 0x261   : > { %3027 = vst.msk [vmem:[#allocation2 + $0x1c0] sm:$0xff] %vm1727_vm11, %v2995_v38  ;;  %v2996_v17 = vadd.f32 %v2943_v15, %v2658_v8  ;;  %v2945_v18 = vpop.f32.mrb[83].mxu1 }
 0x262   : > { %v4075_v21 = vpop.f32.mrb[84].mxu0 }
 0x263   : > { %3028 = vst.msk [vmem:[#allocation2 + $0x1c8] sm:$0xff] %vm1727_vm11, %v2996_v17  ;;  %v4124_v23 = vadd.f32 %v4075_v21, %v3786_v16  ;;  %v4077_v25 = vpop.f32.mrb[85].mxu0 }
 0x264   : > { %v4078_v27 = vpop.f32.mrb[86].mxu0 }
 0x265   : > { %4156 = vst.msk [vmem:[#allocation2 + $0x2d0] sm:$0xff] %vm1727_vm11, %v4124_v23  ;;  %v4125_v29 = vadd.f32 %v4078_v27, %v3787_v22  ;;  %v4080_v30 = vpop.f32.mrb[87].mxu0 }
 0x266   : > { %v2948_v31 = vpop.f32.mrb[84].mxu1 }
 0x267   : > { %4157 = vst.msk [vmem:[#allocation2 + $0x2d8] sm:$0xff] %vm1727_vm11, %v4125_v29  ;;  %v2997_v33 = vadd.f32 %v2948_v31, %v2659_v28  ;;  %v2950_v36 = vpop.f32.mrb[85].mxu1 }
 0x268   : > { %v2951_v46 = vpop.f32.mrb[86].mxu1 }
 0x269   : > { %3029 = vst.msk [vmem:[#allocation2 + $0x1d0] sm:$0xff] %vm1727_vm11, %v2997_v33  ;;  %v2998_v50 = vadd.f32 %v2951_v46, %v2660_v32  ;;  %v2953_v62 = vpop.f32.mrb[87].mxu1 }
 0x26a   : > { %v4083_v57 = vpop.f32.mrb[88].mxu0 }
 0x26b   : > { %3030 = vst.msk [vmem:[#allocation2 + $0x1d8] sm:$0xff] %vm1727_vm11, %v2998_v50  ;;  %v4126_v20 = vadd.f32 %v4083_v57, %v3788_v49  ;;  %v4085_v26 = vpop.f32.mrb[89].mxu0 }
 0x26c   : > { %v4086_v34 = vpop.f32.mrb[90].mxu0 }
 0x26d   : > { %4158 = vst.msk [vmem:[#allocation2 + $0x2e0] sm:$0xff] %vm1727_vm11, %v4126_v20  ;;  %v4127_v52 = vadd.f32 %v4086_v34, %v3789_v13  ;;  %v4088_v54 = vpop.f32.mrb[91].mxu0 }
 0x26e   : > { %v2956_v56 = vpop.f32.mrb[88].mxu1 }
 0x26f   : > { %4159 = vst.msk [vmem:[#allocation2 + $0x2e8] sm:$0xff] %vm1727_vm11, %v4127_v52  ;;  %v2999_v59 = vadd.f32 %v2956_v56, %v2661_v35  ;;  %v2958_v48 = vpop.f32.mrb[89].mxu1 }
 0x270   : > { %v2959_v6 = vpop.f32.mrb[90].mxu1 }
 0x271   : > { %3031 = vst.msk [vmem:[#allocation2 + $0x1e0] sm:$0xff] %vm1727_vm11, %v2999_v59  ;;  %v3000_v37 = vadd.f32 %v2959_v6, %v2662_v58  ;;  %v2961_v40 = vpop.f32.mrb[91].mxu1 }
 0x272   : > { %v4091_v3 = vpop.f32.mrb[92].mxu0 }
 0x273   : > { %3032 = vst.msk [vmem:[#allocation2 + $0x1e8] sm:$0xff] %vm1727_vm11, %v3000_v37  ;;  %v4128_v42 = vadd.f32 %v4091_v3, %v3790_v12  ;;  %v4093_v7 = vpop.f32.mrb[93].mxu0 }
 0x274   : > { %v4094_v43 = vpop.f32.mrb[94].mxu0 }
 0x275   : > { %4160 = vst.msk [vmem:[#allocation2 + $0x2f0] sm:$0xff] %vm1727_vm11, %v4128_v42  ;;  %v4129_v4 = vadd.f32 %v4094_v43, %v3791_v24  ;;  %v4096_v41 = vpop.f32.mrb[95].mxu0  ;;  %4165 = sbr.rel (%p6743_p12) target bundleno = 1121 (0x461), region = 85 }
 0x276   : > { %v2964_v45 = vpop.f32.mrb[92].mxu1 }
 0x277   : > { %4161 = vst.msk [vmem:[#allocation2 + $0x2f8] sm:$0xff] %vm1727_vm11, %v4129_v4  ;;  %v3001_v44 = vadd.f32 %v2964_v45, %v2663_v0  ;;  %v2966_v1 = vpop.f32.mrb[93].mxu1 }
 0x278   : > { %v2967_v61 = vpop.f32.mrb[94].mxu1 }
 0x279   : > { %3033 = vst.msk [vmem:[#allocation2 + $0x1f0] sm:$0xff] %vm1727_vm11, %v3001_v44  ;;  %v3002_v51 = vadd.f32 %v2967_v61, %v2664_v47  ;;  %v2969_v2 = vpop.f32.mrb[95].mxu1 }
 0x27b   : > { %3034 = vst.msk [vmem:[#allocation2 + $0x1f8] sm:$0xff] %vm1727_vm11, %v3002_v51 }
 0x27c   : > { %v4495_v60 = vld [vmem:[%s11112_s3] sm:$0xff]  ;;  %v4496_v9 = vld [vmem:[%s11112_s3 + $0x8] sm:$0xff]  ;;  %v4497_v10 = vld [vmem:[%s11112_s3 + $0x10] sm:$0xff]  ;;  %v7880_v11 = vmov 0.0|0.0   ;;  %vm7881_vm12 = vmmov 0   ;;  %v7882_v19 = vmov 0.0  }
 0x27d   : > { %7086 = vmatprep.subr.bf16.mxu0 %v7880_v11  ;;  %v7087_v53 = vpack.c.bf16 %v4496_v9, %v4495_v60  ;;  %v4498_v63 = vld [vmem:[%s11112_s3 + $0x18] sm:$0xff]  ;;  %7083 = vmatprep.mubr.msk.f32.mxu0 %vm7881_vm12, %v7882_v19  ;;  %v4499_v55 = vld [vmem:[%s11112_s3 + $0x20] sm:$0xff]  ;;  %v4500_v5 = vld [vmem:[%s11112_s3 + $0x28] sm:$0xff]  ;;  %vm4311_vm13 = vcmask 1045504   ;;  %s7883_s8 = smov 32   ;;  %s7884_s11 = smov 64  }
 0x27e   : > { %v7090_v39 = vpack.c.bf16 %v4498_v63, %v4497_v10  ;;  %v7093_v8 = vpack.c.bf16 %v4500_v5, %v4499_v55  ;;  %v4501_v38 = vld [vmem:[%s11112_s3 + $0x30] sm:$0xff]  ;;  %v4502_v14 = vld [vmem:[%s11112_s3 + $0x38] sm:$0xff]  ;;  %v9707_v15 = vld [vmem:[%s8057_s27 + $0x200] sm:$0xe]  ;;  %s7885_s12 = smov 96   ;;  %vm5798_vm14 = vcmask 785408  }
 0x27f   : > { %7088 = vmatpush3.bf16.msra.mxu0 %v7087_v53  ;;  %v9710_v16 = vld [vmem:[%s8057_s27 + $0x204] ss:$28 sps:$4 sm:$0xff]   ;;  %v9713_v17 = vld [vmem:[%s8057_s27 + $0x208] sm:$0x1]  ;;  %v9716_v18 = vld [vmem:[%s8057_s27 + $0x21c] sm:$0xe]  ;;  %v7096_v29 = vpack.c.bf16 %v4502_v14, %v4501_v38  ;;  %v4215_v33 = vunpack.c.l.bf16 %v9707_v15 }
 0x280   : > { %7089 = vmatprep.subr.bf16.mxu0 %v7880_v11  ;;  %v9719_v21 = vld [vmem:[%s8057_s27 + $0x224] sm:$0x1]  ;;  %v9722_v22 = vld [vmem:[%s8057_s27 + $0x238] sm:$0xe]  ;;  %v9728_v25 = vld [vmem:[%s8057_s27 + $0x240] sm:$0x1]  ;;  %v4216_v50 = vunpack.c.l.bf16 %v9710_v16  ;;  %v4217_v62 = vunpack.c.l.bf16 %v9713_v17  ;;  %v4218_v57 = vunpack.c.l.bf16 %v9716_v18  ;;  %v4219_v13 = vunpack.c.h.bf16 %v9710_v16 }
 0x281   : > { %v9725_v23 = vld [vmem:[%s8057_s27 + $0x23c] ss:$28 sps:$4 sm:$0xff]   ;;  %v9731_v27 = vld [vmem:[%s8057_s27 + $0x254] sm:$0xe]  ;;  %v9737_v30 = vld [vmem:[%s8057_s27 + $0x270] sm:$0xe]  ;;  %v4220_v35 = vunpack.c.l.bf16 %v9719_v21  ;;  %v4221_v52 = vunpack.c.l.bf16 %v9722_v22  ;;  %v4223_v6 = vunpack.c.l.bf16 %v9728_v25 }
 0x282   : > { %v9734_v28 = vld [vmem:[%s8057_s27 + $0x25c] sm:$0x1]  ;;  %v9740_v31 = vld [vmem:[%s8057_s27 + $0x274] ss:$28 sps:$4 sm:$0xff]   ;;  %v9743_v32 = vld [vmem:[%s8057_s27 + $0x278] sm:$0x1]  ;;  %v4222_v54 = vunpack.c.l.bf16 %v9725_v23  ;;  %v4225_v56 = vunpack.c.h.bf16 %v9725_v23  ;;  %v4224_v12 = vunpack.c.l.bf16 %v9731_v27  ;;  %v4227_v40 = vunpack.c.l.bf16 %v9737_v30 }
 0x283   : > { %7091 = vmatpush3.bf16.msra.mxu0 %v7090_v39  ;;  %v9747_v36 = vld [vmem:[%s8057_s27 + $0x28c] sm:$0xe]  ;;  %v9750_v46 = vld [vmem:[%s8057_s27 + $0x294] sm:$0x1]  ;;  %v9753_v49 = vld [vmem:[%s8057_s27 + $0x2a8] sm:$0xe]  ;;  %v4226_v37 = vunpack.c.l.bf16 %v9734_v28  ;;  %v4228_v7 = vunpack.c.l.bf16 %v9740_v31  ;;  %v4229_v43 = vunpack.c.l.bf16 %v9743_v32 }
 0x284   : > { %7092 = vmatprep.subr.bf16.mxu0 %v7880_v11  ;;  %v9760_v20 = vld [vmem:[%s8057_s27 + $0x2ac] ss:$28 sps:$4 sm:$0xff]   ;;  %v9763_v26 = vld [vmem:[%s8057_s27 + $0x2b0] sm:$0x1]  ;;  %v9766_v34 = vld [vmem:[%s8057_s27 + $0x2c4] sm:$0xe]  ;;  %v11140_v27 = vunpack.c.l.bf16 %v9747_v36  ;;  %v11142_v23 = vunpack.c.l.bf16 %v9750_v46  ;;  %v11143_v28 = vunpack.c.l.bf16 %v9753_v49 }
 0x285   : > { %v9773_v58 = vld [vmem:[%s8057_s27 + $0x2cc] sm:$0x1]  ;;  %v9776_v59 = vld [vmem:[%s8057_s27 + $0x2e0] sm:$0xe]  ;;  %v9786_v3 = vld [vmem:[%s8057_s27 + $0x2e8] sm:$0x1]  ;;  %v11144_v30 = vunpack.c.l.bf16 %v9760_v20  ;;  %v11146_v36 = vunpack.c.l.bf16 %v9766_v34 }
 0x286   : > { %v9779_v48 = vld [vmem:[%s8057_s27 + $0x2e4] ss:$28 sps:$4 sm:$0xff]   ;;  %v9789_v24 = vld [vmem:[%s8057_s27 + $0x2fc] sm:$0xe]  ;;  %v9799_v41 = vld [vmem:[%s8057_s27 + $0x318] sm:$0xe]  ;;  %v4238_v53 = vunpack.c.l.bf16 %v9773_v58  ;;  %v11147_v49 = vunpack.c.l.bf16 %v9776_v59 }
 0x287   : > { %7094 = vmatpush3.bf16.msra.mxu0 %v7093_v8  ;;  %v9792_v42 = vld [vmem:[%s8057_s27 + $0x304] sm:$0x1]  ;;  %v9802_v45 = vld [vmem:[%s8057_s27 + $0x31c] ss:$28 sps:$4 sm:$0xff]   ;;  %v9805_v47 = vld [vmem:[%s8057_s27 + $0x320] sm:$0x1]  ;;  %v4240_v5 = vunpack.c.l.bf16 %v9779_v48 }
 0x288   : > { %7095 = vmatprep.subr.bf16.mxu0 %v7880_v11  ;;  %v9812_v2 = vld [vmem:[%s8057_s27 + $0x334] sm:$0xe]  ;;  %v9815_v60 = vld [vmem:[%s8057_s27 + $0x33c] sm:$0x1]  ;;  %v9818_v9 = vld [vmem:[%s8057_s27 + $0x350] sm:$0xe]  ;;  %v4237_v11 = vunpack.c.h.bf16 %v9760_v20 }
 0x289   : > { %v9825_v19 = vld [vmem:[%s8057_s27 + $0x354] ss:$28 sps:$4 sm:$0xff]   ;;  %v9828_v39 = vld [vmem:[%s8057_s27 + $0x358] sm:$0x1]  ;;  %v9831_v55 = vld [vmem:[%s8057_s27 + $0x36c] sm:$0xe] }
 0x28a   : > { %v9842_v51 = vld [vmem:[%s8057_s27 + $0x374] sm:$0x1]  ;;  %v9845_v61 = vld [vmem:[%s8057_s27 + $0x388] sm:$0xe]  ;;  %v9855_v58 = vld [vmem:[%s8057_s27 + $0x390] sm:$0x1]  ;;  %v4255_v63 = vunpack.c.h.bf16 %v9825_v19 }
 0x28b   : > { %7097 = vmatpush3.bf16.msra.mxu0 %v7096_v29  ;;  %v9848_v1 = vld [vmem:[%s8057_s27 + $0x38c] ss:$28 sps:$4 sm:$0xff]   ;;  %v9858_v44 = vld [vmem:[%s8057_s27 + $0x3a4] sm:$0xe]  ;;  %v4312_v0 = vrot.slane %v4215_v33, 2  ;;  %v4313_v14 = vrot.slane %v4216_v50, 2  ;;  %v4256_v4 = vunpack.c.l.bf16 %v9842_v51  ;;  %v4257_v15 = vunpack.c.l.bf16 %v9845_v61 }
 0x28c   : > { %v9866_v8 = vld [vmem:[%s8057_s27 + $0x3ac] sm:$0x1]  ;;  %v4315_v29 = vrot.slane %v4217_v62, 2  ;;  %v4317_v38 = vrot.slane %v4218_v57, 2  ;;  %v4318_v10 = vrot.slane %v4219_v13, 2  ;;  %v4320_v33 = vrot.slane %v4220_v35, 2 }
 0x28d   : > { %v4260_v62 = vunpack.c.l.bf16 %v9858_v44  ;;  %v4322_v57 = vrot.slane %v4221_v52, 2  ;;  %v4323_v13 = vrot.slane %v4222_v54, 2  ;;  %v4325_v21 = vrot.slane %v4223_v6, 2 }
 0x28e   : > { %v4314_v35 = vsel %vm4311_vm13, %v4312_v0, %v4313_v14  ;;  %v4316_v50 = vsel %vm4311_vm13, %v4313_v14, %v4315_v29  ;;  %v4319_v17 = vsel %vm4311_vm13, %v4317_v38, %v4318_v10  ;;  %v4327_v18 = vrot.slane %v4224_v12, 2 }
 0x28f   : > { %v4321_v16 = vsel %vm4311_vm13, %v4318_v10, %v4320_v33  ;;  %v4328_v22 = vrot.slane %v4225_v56, 2  ;;  %v4330_v52 = vrot.slane %v4226_v37, 2  ;;  %v4332_v25 = vrot.slane %v4227_v40, 2 }
 0x290   : > { %v4333_v54 = vrot.slane %v4228_v7, 2  ;;  %v4335_v6 = vrot.slane %v4229_v43, 2  ;;  %v4337_v12 = vrot.slane %v11140_v27, 2  ;;  %v11141_v0 = vunpack.c.h.bf16 %v9740_v31 }
 0x291   : > { %v4340_v56 = vrot.slane %v11142_v23, 2  ;;  %v4342_v37 = vrot.slane %v11143_v28, 2  ;;  %v4343_v40 = vrot.slane %v11144_v30, 2  ;;  %v11145_v7 = vunpack.c.l.bf16 %v9763_v26 }
 0x292   : > { %v4338_v10 = vrot.slane %v11141_v0, 2  ;;  %v4324_v32 = vsel %vm4311_vm13, %v4322_v57, %v4323_v13  ;;  %v4347_v43 = vrot.slane %v11146_v36, 2  ;;  %v4348_v14 = vrot.slane %v4237_v11, 2 }
 0x293   : > { %v4345_v38 = vrot.slane %v11145_v7, 2  ;;  %v4350_v31 = vrot.slane %v4238_v53, 2  ;;  %v4326_v29 = vsel %vm4311_vm13, %v4323_v13, %v4325_v21  ;;  %v4329_v46 = vsel %vm4311_vm13, %v4327_v18, %v4328_v22 }
 0x294   : > { %v4352_v33 = vrot.slane %v11147_v49, 2  ;;  %v4353_v27 = vrot.slane %v4240_v5, 2  ;;  %v4331_v20 = vsel %vm4311_vm13, %v4328_v22, %v4330_v52  ;;  %v9929_v26 = vsel %vm4311_vm13, %v4332_v25, %v4333_v54 }
 0x295   : > { %v9932_v57 = vsel %vm4311_vm13, %v4333_v54, %v4335_v6  ;;  %v9935_v34 = vsel %vm4311_vm13, %v4337_v12, %v4338_v10  ;;  %v9938_v11 = vsel %vm4311_vm13, %v4338_v10, %v4340_v56  ;;  %v9941_v53 = vsel %vm4311_vm13, %v4342_v37, %v4343_v40 }
 0x296   : > { %v9944_v59 = vsel %vm4311_vm13, %v4343_v40, %v4345_v38  ;;  %v11148_v5 = vunpack.c.l.bf16 %v9786_v3  ;;  %v9949_v13 = vsel %vm4311_vm13, %v4347_v43, %v4348_v14  ;;  %v9952_v21 = vsel %vm4311_vm13, %v4348_v14, %v4350_v31 }
 0x297   : > { %v11149_v22 = vunpack.c.l.bf16 %v9789_v24  ;;  %v11150_v25 = vunpack.c.h.bf16 %v9779_v48  ;;  %v9959_v6 = vsel %vm4311_vm13, %v4352_v33, %v4353_v27  ;;  %v11151_v12 = vunpack.c.l.bf16 %v9792_v42 }
 0x298   : > { %v4355_v18 = vrot.slane %v11148_v5, 2  ;;  %v11152_v3 = vunpack.c.l.bf16 %v9799_v41  ;;  %v4424_v23 = vsel %vm1293_vm4, %v4314_v35, 0.0  ;;  %v11153_v56 = vunpack.c.l.bf16 %v9802_v45 }
 0x299   : > { %v4357_v52 = vrot.slane %v11149_v22, 2  ;;  %v4358_v54 = vrot.slane %v11150_v25, 2  ;;  %v4360_v0 = vrot.slane %v11151_v12, 2  ;;  %v11154_v24 = vunpack.c.l.bf16 %v9805_v47  ;;  %v4883_v25 = vld [vmem:[#allocation2 + $0x108] sm:$0xff] }
 0x29a   : > { %v4362_v10 = vrot.slane %v11152_v3, 2  ;;  %v4363_v28 = vrot.slane %v11153_v56, 2  ;;  %v4425_v48 = vsel %vm1293_vm4, %v4316_v50, 0.0  ;;  %v4427_v30 = vsel %vm1293_vm4, %v4319_v17, 0.0  ;;  %v4886_v56 = vld [vmem:[#allocation2 + $0x120] sm:$0xff] }
 0x29b   : > { %v4365_v37 = vrot.slane %v11154_v24, 2  ;;  %v11155_v40 = vunpack.c.l.bf16 %v9812_v2  ;;  %v11156_v42 = vunpack.c.h.bf16 %v9802_v45  ;;  %v11157_v41 = vunpack.c.l.bf16 %v9815_v60 }
 0x29c   : > { %v4426_v35 = vadd.f32 %v4425_v48, %v4424_v23  ;;  %v11158_v43 = vunpack.c.l.bf16 %v9818_v9  ;;  %v11159_v47 = vunpack.c.l.bf16 %v9825_v19  ;;  %v11160_v50 = vunpack.c.l.bf16 %v9828_v39  ;;  %v10030_v23 = vld [vmem:[%s11111_s2 + $0x1] ss:$0 sm:$0xff]  ;;  %v4884_v48 = vld [vmem:[#allocation2 + $0x110] sm:$0xff] }
 0x29d   : > { %v4367_v7 = vrot.slane %v11155_v40, 2  ;;  %v4368_v38 = vrot.slane %v11156_v42, 2  ;;  %v4370_v36 = vrot.slane %v11157_v41, 2  ;;  %v4429_v17 = vsel %vm1293_vm4, %v4321_v16, 0.0 }
 0x29e   : > { %v4372_v14 = vrot.slane %v11158_v43, 2  ;;  %v4373_v31 = vrot.slane %v11159_v47, 2  ;;  %v4375_v49 = vrot.slane %v11160_v50, 2  ;;  %v9986_v2 = vsel %vm4311_vm13, %v4353_v27, %v4355_v18  ;;  %v4890_v47 = vld [vmem:[#allocation2 + $0x140] sm:$0xff] }
 0x29f   : > { %v11161_v45 = vunpack.c.l.bf16 %v9831_v55  ;;  %v4378_v60 = vrot.slane %v4255_v63, 2  ;;  %v4428_v5 = vadd.f32 %v4427_v30, %v4426_v35  ;;  %v9993_v9 = vsel %vm4311_vm13, %v4357_v52, %v4358_v54  ;;  %v4885_v30 = vld [vmem:[#allocation2 + $0x118] sm:$0xff] }
 0x2a0   : > { %v9996_v22 = vsel %vm4311_vm13, %v4358_v54, %v4360_v0  ;;  %v4380_v39 = vrot.slane %v4256_v4, 2  ;;  %v4431_v16 = vsel %vm1293_vm4, %v4324_v32, 0.0  ;;  %v10002_v27 = vsel %vm4311_vm13, %v4362_v10, %v4363_v28  ;;  %v4882_v32 = vld [vmem:[#allocation2 + $0x100] sm:$0xff] }
 0x2a1   : > { %v4377_v33 = vrot.slane %v11161_v45, 2  ;;  %v10005_v55 = vsel %vm4311_vm13, %v4363_v28, %v4365_v37  ;;  %v10008_v63 = vsel %vm4311_vm13, %v4367_v7, %v4368_v38  ;;  %v4430_v19 = vadd.f32 %v4429_v17, %v4428_v5  ;;  %v4887_v28 = vld [vmem:[#allocation2 + $0x128] sm:$0xff] }
 0x2a2   : > { %v10011_v18 = vsel %vm4311_vm13, %v4368_v38, %v4370_v36  ;;  %v10014_v52 = vsel %vm4311_vm13, %v4372_v14, %v4373_v31  ;;  %v10017_v4 = vsel %vm4311_vm13, %v4373_v31, %v4375_v49  ;;  %v4433_v51 = vsel %vm1293_vm4, %v4326_v29, 0.0  ;;  %v4891_v31 = vld [vmem:[#allocation2 + $0x148] sm:$0xff] }
 0x2a3   : > { %v10021_v54 = vsel %vm4311_vm13, %v4377_v33, %v4378_v60  ;;  %v4382_v12 = vrot.slane %v4257_v15, 2  ;;  %v11162_v0 = vunpack.c.l.bf16 %v9848_v1  ;;  %v4432_v10 = vadd.f32 %v4431_v16, %v4430_v19 }
 0x2a4   : > { %v10033_v29 = vsel %vm4311_vm13, %v4378_v60, %v4380_v39  ;;  %v11163_v24 = vunpack.c.l.bf16 %v9855_v58  ;;  %v4387_v61 = vrot.slane %v4260_v62, 2  ;;  %v4435_v15 = vsel %vm1293_vm4, %v4329_v46, 0.0  ;;  %v4888_v58 = vld [vmem:[#allocation2 + $0x130] sm:$0xff]  ;;  %v4889_v46 = vld [vmem:[#allocation2 + $0x138] sm:$0xff] }
 0x2a5   : > { %v4383_v3 = vrot.slane %v11162_v0, 2  ;;  %v11164_v40 = vunpack.c.h.bf16 %v9848_v1  ;;  %v11165_v42 = vunpack.c.l.bf16 %v9866_v8  ;;  %v4434_v41 = vadd.f32 %v4433_v51, %v4432_v10  ;;  %v4892_v39 = vld [vmem:[#allocation2 + $0x150] sm:$0xff]  ;;  %v4894_v10 = vld [vmem:[#allocation2 + $0x160] sm:$0xff] }
 0x2a6   : > { %v4385_v37 = vrot.slane %v11163_v24, 2  ;;  %v4437_v36 = vsel %vm1293_vm4, %v4331_v20, 0.0  ;;  %v10050_v35 = vadd.f32 %v10030_v23, %v4882_v32  ;;  %v10053_v44 = vadd.f32 %v10030_v23, %v4883_v25  ;;  %v4893_v32 = vld [vmem:[#allocation2 + $0x158] sm:$0xff] }
 0x2a7   : > { %v10042_v7 = vrot.slane %v11164_v40, 2  ;;  %v10046_v38 = vrot.slane %v11165_v42, 2  ;;  %v10056_v62 = vadd.f32 %v10030_v23, %v4886_v56  ;;  %v10059_v1 = vadd.f32 %v10030_v23, %v4887_v28 }
 0x2a8   : > { %v4436_v8 = vadd.f32 %v4435_v15, %v4434_v41  ;;  %v4439_v43 = vsel %vm1293_vm4, %v9929_v26, 0.0  ;;  %v10064_v20 = vadd.f32 %v10030_v23, %v4884_v48  ;;  %v10067_v14 = vadd.f32 %v10030_v23, %v4885_v30 }
 0x2a9   : > { %v6829_v50 = vmul.f32 -1.442695, %v10050_v35  ;;  %v6830_v49 = vmul.f32 -1.442695, %v10053_v44  ;;  %v6833_v17 = vmul.f32 -1.442695, %v10056_v62  ;;  %v10073_v45 = vadd.f32 %v10030_v23, %v4888_v58 }
 0x2aa   : > { %v10076_v33 = vsel %vm4311_vm13, %v4382_v12, %v4383_v3  ;;  %v4438_v26 = vadd.f32 %v4437_v36, %v4436_v8  ;;  %v6834_v60 = vmul.f32 -1.442695, %v10059_v1  ;;  %v10080_v5 = vadd.f32 %v10030_v23, %v4889_v46 }
 0x2ab   : > { %v4441_v16 = vsel %vm1293_vm4, %v9932_v57, 0.0  ;;  %7433 = vpow2.f32 %v6829_v50  ;;  %v6831_v19 = vmul.f32 -1.442695, %v10064_v20  ;;  %v10086_v51 = vadd.f32 %v10030_v23, %v4890_v47 }
 0x2ac   : > { %v4440_v25 = vadd.f32 %v4439_v43, %v4438_v26  ;;  %7435 = vpow2.f32 %v6830_v49  ;;  %v6832_v12 = vmul.f32 -1.442695, %v10067_v14  ;;  %v10090_v0 = vadd.f32 %v10030_v23, %v4891_v31 }
 0x2ad   : > { %v4443_v56 = vsel %vm1293_vm4, %v9935_v34, 0.0  ;;  %7437 = vpow2.f32 %v6833_v17  ;;  %v6835_v57 = vmul.f32 -1.442695, %v10073_v45  ;;  %v10096_v28 = vadd.f32 %v10030_v23, %v4892_v39  ;;  %v4895_v17 = vld [vmem:[#allocation2 + $0x168] sm:$0xff] }
 0x2ae   : > { %v4442_v24 = vadd.f32 %v4441_v16, %v4440_v25  ;;  %7439 = vpow2.f32 %v6834_v60  ;;  %v6836_v15 = vmul.f32 -1.442695, %v10080_v5  ;;  %v10100_v48 = vadd.f32 %v10030_v23, %v4893_v32 }
 0x2af   : > { %v4445_v30 = vsel %vm1293_vm4, %v9938_v11, 0.0  ;;  %7441 = vpow2.f32 %v6831_v19  ;;  %v6837_v40 = vmul.f32 -1.442695, %v10086_v51  ;;  %v10106_v34 = vadd.f32 %v10030_v23, %v4894_v10  ;;  %v4897_v19 = vld [vmem:[#allocation2 + $0x178] sm:$0xff]  ;;  %v4898_v10 = vld [vmem:[#allocation2 + $0x180] sm:$0xff] }
 0x2b0   : > { %v10109_v42 = vsel %vm4311_vm13, %v4383_v3, %v4385_v37  ;;  %v4444_v41 = vadd.f32 %v4443_v56, %v4442_v24  ;;  %7443 = vpow2.f32 %v6832_v12  ;;  %v6838_v36 = vmul.f32 -1.442695, %v10090_v0 }
 0x2b1   : > { %v10114_v58 = vsel %vm4311_vm13, %v4387_v61, %v10042_v7  ;;  %v4447_v11 = vsel %vm1293_vm4, %v9941_v53, 0.0  ;;  %7445 = vpow2.f32 %v6835_v57  ;;  %v6839_v46 = vmul.f32 -1.442695, %v10096_v28 }
 0x2b2   : > { %v4446_v8 = vadd.f32 %v4445_v30, %v4444_v41  ;;  %v4449_v43 = vsel %vm1293_vm4, %v9944_v59, 0.0  ;;  %7447 = vpow2.f32 %v6836_v15  ;;  %v6840_v3 = vmul.f32 -1.442695, %v10100_v48  ;;  %v4899_v41 = vld [vmem:[#allocation2 + $0x188] sm:$0xff] }
 0x2b3   : > { %v4451_v37 = vsel %vm1293_vm4, %v9949_v13, 0.0  ;;  %v4453_v61 = vsel %vm1293_vm4, %v9952_v21, 0.0  ;;  %7449 = vpow2.f32 %v6837_v40  ;;  %v6841_v47 = vmul.f32 -1.442695, %v10106_v34 }
 0x2b4   : > { %v4448_v53 = vadd.f32 %v4447_v11, %v4446_v8  ;;  %v4455_v31 = vsel %vm1293_vm4, %v9959_v6, 0.0  ;;  %v4457_v50 = vsel %vm1293_vm4, %v9986_v2, 0.0  ;;  %7451 = vpow2.f32 %v6838_v36 }
 0x2b5   : > { %v7434_v59 = vpop.eup %7433  ;;  %v10133_v49 = vsel %vm1293_vm4, %v9993_v9, 0.0  ;;  %v10137_v13 = vsel %vm1293_vm4, %v9996_v22, 0.0  ;;  %v10141_v21 = vsel %vm1293_vm4, %v10002_v27, 0.0  ;;  %7453 = vpow2.f32 %v6839_v46  ;;  %v4896_v9 = vld [vmem:[#allocation2 + $0x170] sm:$0xff] }
 0x2b6   : > { %v7436_v6 = vpop.eup %7435  ;;  %v4450_v26 = vadd.f32 %v4449_v43, %v4448_v53  ;;  %v10145_v2 = vsel %vm1293_vm4, %v10005_v55, 0.0  ;;  %v5050_v60 = vadd.f32 1.0, %v7434_v59  ;;  %7455 = vpow2.f32 %v6840_v3 }
 0x2b7   : > { %v7438_v39 = vpop.eup %7437  ;;  %v10149_v22 = vsel %vm1293_vm4, %v10008_v63, 0.0  ;;  %v10153_v27 = vsel %vm1293_vm4, %v10011_v18, 0.0  ;;  %v5051_v16 = vadd.f32 1.0, %v7436_v6  ;;  %7457 = vpow2.f32 %v6841_v47 }
 0x2b8   : > { %v7440_v32 = vpop.eup %7439  ;;  %v4452_v25 = vadd.f32 %v4451_v37, %v4450_v26  ;;  %7459 = vrcp.f32 %v5050_v60  ;;  %v5054_v55 = vadd.f32 1.0, %v7438_v39  ;;  %v10156_v12 = vadd.f32 %v10030_v23, %v4895_v17  ;;  %v4901_v17 = vld [vmem:[#allocation2 + $0x198] sm:$0xff]  ;;  %v4903_v39 = vld [vmem:[#allocation2 + $0x1a8] sm:$0xff] }
 0x2b9   : > { %v7442_v56 = vpop.eup %7441  ;;  %v10160_v63 = vsel %vm1293_vm4, %v10014_v52, 0.0  ;;  %7461 = vrcp.f32 %v5051_v16  ;;  %v5055_v57 = vadd.f32 1.0, %v7440_v32  ;;  %v10163_v18 = vadd.f32 %v10030_v23, %v4896_v9  ;;  %v4902_v9 = vld [vmem:[#allocation2 + $0x1a0] sm:$0xff] }
 0x2ba   : > { %v7444_v24 = vpop.eup %7443  ;;  %v4454_v15 = vadd.f32 %v4453_v61, %v4452_v25  ;;  %7463 = vrcp.f32 %v5054_v55  ;;  %v5052_v30 = vadd.f32 1.0, %v7442_v56  ;;  %v10166_v40 = vadd.f32 %v10030_v23, %v4897_v19  ;;  %v4900_v61 = vld [vmem:[#allocation2 + $0x190] sm:$0xff] }
 0x2bb   : > { %v7446_v36 = vpop.eup %7445  ;;  %v10170_v11 = vsel %vm1293_vm4, %v10017_v4, 0.0  ;;  %7465 = vrcp.f32 %v5055_v57  ;;  %v5053_v52 = vadd.f32 1.0, %v7444_v24  ;;  %v10173_v46 = vadd.f32 %v10030_v23, %v4898_v10  ;;  %v4904_v57 = vld [vmem:[#allocation2 + $0x1b0] sm:$0xff] }
 0x2bc   : > { %v7448_v8 = vpop.eup %7447  ;;  %v4456_v43 = vadd.f32 %v4455_v31, %v4454_v15  ;;  %7467 = vrcp.f32 %v5052_v30  ;;  %v5056_v3 = vadd.f32 1.0, %v7446_v36  ;;  %v6842_v37 = vmul.f32 -1.442695, %v10156_v12 }
 0x2bd   : > { %v7450_v47 = vpop.eup %7449  ;;  %7469 = vrcp.f32 %v5053_v52  ;;  %v5057_v53 = vadd.f32 1.0, %v7448_v8  ;;  %v6843_v59 = vmul.f32 -1.442695, %v10163_v18  ;;  %v10178_v4 = vadd.f32 %v10030_v23, %v4899_v41 }
 0x2be   : > { %v7452_v6 = vpop.eup %7451  ;;  %v4458_v26 = vadd.f32 %v4457_v50, %v4456_v43  ;;  %7471 = vrcp.f32 %v5056_v3  ;;  %v5058_v60 = vadd.f32 1.0, %v7450_v47  ;;  %v6844_v31 = vmul.f32 -1.442695, %v10166_v40 }
 0x2bf   : > { %v7454_v16 = vpop.eup %7453  ;;  %7473 = vrcp.f32 %v5057_v53  ;;  %v5059_v19 = vadd.f32 1.0, %v7452_v6  ;;  %v6845_v32 = vmul.f32 -1.442695, %v10173_v46  ;;  %v10183_v25 = vadd.f32 %v10030_v23, %v4900_v61 }
 0x2c0   : > { %v7456_v55 = vpop.eup %7455  ;;  %v4460_v10 = vadd.f32 %v10133_v49, %v4458_v26  ;;  %7475 = vrcp.f32 %v5058_v60  ;;  %v5060_v56 = vadd.f32 1.0, %v7454_v16  ;;  %v10187_v50 = vadd.f32 %v10030_v23, %v4901_v17  ;;  %v4905_v26 = vld [vmem:[#allocation2 + $0x1b8] sm:$0xff]  ;;  %v4906_v60 = vld [vmem:[#allocation2 + $0x1c0] sm:$0xff] }
 0x2c1   : > { %v7458_v24 = vpop.eup %7457  ;;  %7477 = vrcp.f32 %v5059_v19  ;;  %v5061_v15 = vadd.f32 1.0, %v7456_v55  ;;  %v10190_v30 = vadd.f32 %v10030_v23, %v4902_v9  ;;  %v10193_v41 = vadd.f32 %v10030_v23, %v4903_v39 }
 0x2c2   : > { %v7460_v36 = vpop.eup %7459  ;;  %v4462_v52 = vadd.f32 %v10137_v13, %v4460_v10  ;;  %7479 = vrcp.f32 %v5060_v56  ;;  %v5062_v49 = vadd.f32 1.0, %v7458_v24  ;;  %v6846_v8 = vmul.f32 -1.442695, %v10178_v4 }
 0x2c3   : > { %v7462_v43 = vpop.eup %7461  ;;  %v5146_v3 = vmul.f32 %v7460_v36, %v10050_v35  ;;  %7481 = vrcp.f32 %v5061_v15  ;;  %v6847_v61 = vmul.f32 -1.442695, %v10183_v25  ;;  %v10200_v47 = vadd.f32 %v10030_v23, %v4904_v57 }
 0x2c4   : > { %v7464_v53 = vpop.eup %7463  ;;  %v4464_v17 = vadd.f32 %v10141_v21, %v4462_v52  ;;  %v5147_v6 = vmul.f32 %v7462_v43, %v10053_v44  ;;  %7483 = vpow2.f32 %v6842_v37  ;;  %v6848_v13 = vmul.f32 -1.442695, %v10187_v50  ;;  %v4907_v44 = vld [vmem:[#allocation2 + $0x1c8] sm:$0xff] }
 0x2c5   : > { %v7466_v9 = vpop.eup %7465  ;;  %v5150_v39 = vmul.f32 %v7464_v53, %v10056_v62  ;;  %7485 = vrcp.f32 %v5062_v49  ;;  %v6849_v35 = vmul.f32 -1.442695, %v10190_v30  ;;  %v6850_v16 = vmul.f32 -1.442695, %v10193_v41 }
 0x2c6   : > { %v7468_v19 = vpop.eup %7467  ;;  %v4466_v55 = vadd.f32 %v10145_v2, %v4464_v17  ;;  %v7273_v10 = vpack.i.bf16 %v5147_v6, %v5146_v3  ;;  %v5151_v21 = vmul.f32 %v7466_v9, %v10059_v1  ;;  %7487 = vpow2.f32 %v6843_v59 }
 0x2c7   : > { %v7470_v37 = vpop.eup %7469  ;;  %v5148_v56 = vmul.f32 %v7468_v19, %v10064_v20  ;;  %7489 = vpow2.f32 %v6844_v31  ;;  %v10212_v57 = vadd.f32 %v10030_v23, %v4905_v26  ;;  %v10215_v62 = vadd.f32 %v10030_v23, %v4906_v60 }
 0x2c8   : > { %v7472_v24 = vpop.eup %7471  ;;  %v4468_v15 = vadd.f32 %v10149_v22, %v4466_v55  ;;  %7274 = vrot.lane.b32.xlu0 %v7273_v10, %s7883_s8  ;;  %v7283_v2 = vpack.i.bf16 %v5151_v21, %v5150_v39  ;;  %v5149_v1 = vmul.f32 %v7470_v37, %v10067_v14  ;;  %7491 = vpow2.f32 %v6845_v32  ;;  %v4910_v55 = vld [vmem:[#allocation2 + $0x1e0] sm:$0xff]  ;;  %v4911_v21 = vld [vmem:[#allocation2 + $0x1e8] sm:$0xff] }
 0x2c9   : > { %v7474_v59 = vpop.eup %7473  ;;  %v5152_v20 = vmul.f32 %v7472_v24, %v10073_v45  ;;  %7493 = vpow2.f32 %v6846_v8  ;;  %v6851_v31 = vmul.f32 -1.442695, %v10200_v47  ;;  %v10223_v36 = vadd.f32 %v10030_v23, %v4907_v44 }
 0x2ca   : > { %v7476_v52 = vpop.eup %7475  ;;  %v4470_v49 = vadd.f32 %v10153_v27, %v4468_v15  ;;  %7284 = vrot.lane.b32.xlu1 %v7283_v2, %s7883_s8  ;;  %v7278_v22 = vpack.i.bf16 %v5149_v1, %v5148_v56  ;;  %v5153_v43 = vmul.f32 %v7474_v59, %v10080_v5  ;;  %7495 = vpow2.f32 %v6847_v61 }
 0x2cb   : > { %v7478_v14 = vpop.eup %7477  ;;  %v5154_v32 = vmul.f32 %v7476_v52, %v10086_v51  ;;  %7497 = vpow2.f32 %v6848_v13  ;;  %v6852_v45 = vmul.f32 -1.442695, %v10212_v57  ;;  %v6853_v8 = vmul.f32 -1.442695, %v10215_v62  ;;  %v4912_v52 = vld [vmem:[#allocation2 + $0x1f0] sm:$0xff] }
 0x2cc   : > { %v7480_v3 = vpop.eup %7479  ;;  %v4472_v53 = vadd.f32 %v10160_v63, %v4470_v49  ;;  %7279 = vrot.lane.b32.xlu0 %v7278_v22, %s7883_s8  ;;  %v7288_v27 = vpack.i.bf16 %v5153_v43, %v5152_v20  ;;  %v5155_v17 = vmul.f32 %v7478_v14, %v10090_v0  ;;  %7499 = vpow2.f32 %v6849_v35  ;;  %v4908_v0 = vld [vmem:[#allocation2 + $0x1d0] sm:$0xff]  ;;  %v4909_v35 = vld [vmem:[#allocation2 + $0x1d8] sm:$0xff] }
 0x2cd   : > { %v7482_v6 = vpop.eup %7481  ;;  %v4475_v5 = vsel %vm1293_vm4, %v10021_v54, 0.0  ;;  %v5156_v51 = vmul.f32 %v7480_v3, %v10096_v28  ;;  %7501 = vpow2.f32 %v6850_v16  ;;  %v6854_v61 = vmul.f32 -1.442695, %v10223_v36  ;;  %v4913_v14 = vld [vmem:[#allocation2 + $0x1f8] sm:$0xff] }
 0x2ce   : > { %v7484_v13 = vpop.eup %7483  ;;  %v4474_v26 = vadd.f32 %v10170_v11, %v4472_v53  ;;  %7289 = vrot.lane.b32.xlu1 %v7288_v27, %s7883_s8  ;;  %v7293_v63 = vpack.i.bf16 %v5155_v17, %v5154_v32  ;;  %v5157_v60 = vmul.f32 %v7482_v6, %v10100_v48  ;;  %7503 = vpow2.f32 %v6851_v31  ;;  %v5178_v53 = vld [vmem:[#allocation2 + $0x200] sm:$0xff] }
 0x2cf   : > { %v10241_v9 = vpop.eup %7485  ;;  %v4391_v54 = vsel %vm4311_vm13, %v10042_v7, %v10046_v38  ;;  %v4477_v28 = vsel %vm1293_vm4, %v10033_v29, 0.0  ;;  %v5063_v39 = vadd.f32 1.0, %v7484_v13  ;;  %7505 = vpow2.f32 %v6852_v45  ;;  %v10274_v27 = vld [vmem:[%s11111_s2 + $0x2] ss:$0 sm:$0xff] }
 0x2d0   : > { %v7488_v11 = vpop.eup %7487  ;;  %v4476_v16 = vadd.f32 %v4475_v5, %v4474_v26  ;;  %v4479_v19 = vsel %vm1293_vm4, %v10076_v33, 0.0  ;;  %7294 = vrot.lane.b32.xlu0 %v7293_v63, %s7883_s8  ;;  %v7298_v48 = vpack.i.bf16 %v5157_v60, %v5156_v51  ;;  %7507 = vpow2.f32 %v6853_v8  ;;  %v5179_v60 = vld [vmem:[#allocation2 + $0x208] sm:$0xff] }
 0x2d1   : > { %v7490_v10 = vpop.eup %7489  ;;  %v4481_v7 = vsel %vm1293_vm4, %v10109_v42, 0.0  ;;  %7509 = vrcp.f32 %v5063_v39  ;;  %v5064_v38 = vadd.f32 1.0, %v7488_v11  ;;  %v10254_v29 = vadd.f32 %v10030_v23, %v4908_v0 }
 0x2d2   : > { %v7492_v44 = vpop.eup %7491  ;;  %v4478_v37 = vadd.f32 %v4477_v28, %v4476_v16  ;;  %7299 = vrot.lane.b32.xlu1 %v7298_v48, %s7883_s8  ;;  %v5065_v33 = vadd.f32 1.0, %v7490_v10  ;;  %7511 = vpow2.f32 %v6854_v61  ;;  %v10258_v56 = vadd.f32 %v10030_v23, %v4909_v35  ;;  %v5180_v35 = vld [vmem:[#allocation2 + $0x210] sm:$0xff] }
 0x2d3   : > { %v7494_v24 = vpop.eup %7493  ;;  %v4483_v15 = vsel %vm1293_vm4, %v10114_v58, 0.0  ;;  %7513 = vrcp.f32 %v5064_v38  ;;  %v5066_v42 = vadd.f32 1.0, %v7492_v44  ;;  %v10263_v2 = vadd.f32 %v10030_v23, %v4910_v55 }
 0x2d4   : > { %v7496_v1 = vpop.eup %7495  ;;  %v4480_v59 = vadd.f32 %v4479_v19, %v4478_v37  ;;  %7515 = vrcp.f32 %v5065_v33  ;;  %v5067_v20 = vadd.f32 1.0, %v7494_v24  ;;  %v10266_v31 = vadd.f32 %v10030_v23, %v4911_v21  ;;  %v5181_v37 = vld [vmem:[#allocation2 + $0x218] sm:$0xff] }
 0x2d5   : > { %v7498_v49 = vpop.eup %7497  ;;  %v4485_v22 = vsel %vm1293_vm4, %v4391_v54, 0.0  ;;  %7517 = vrcp.f32 %v5066_v42  ;;  %v5068_v43 = vadd.f32 1.0, %v7496_v1  ;;  %v6855_v58 = vmul.f32 -1.442695, %v10254_v29 }
 0x2d6   : > { %v7500_v32 = vpop.eup %7499  ;;  %v4482_v45 = vadd.f32 %v4481_v7, %v4480_v59  ;;  %7519 = vrcp.f32 %v5067_v20  ;;  %v5069_v8 = vadd.f32 1.0, %v7498_v49  ;;  %v6856_v3 = vmul.f32 -1.442695, %v10258_v56 }
 0x2d7   : > { %v7502_v17 = vpop.eup %7501  ;;  %7521 = vrcp.f32 %v5068_v43  ;;  %v5070_v6 = vadd.f32 1.0, %v7500_v32  ;;  %v6857_v5 = vmul.f32 -1.442695, %v10263_v2  ;;  %v10278_v51 = vadd.f32 %v10030_v23, %v4912_v52  ;;  %v5182_v52 = vld [vmem:[#allocation2 + $0x220] sm:$0xff] }
 0x2d8   : > { %v7504_v61 = vpop.eup %7503  ;;  %v4484_v13 = vadd.f32 %v4483_v15, %v4482_v45  ;;  %7523 = vrcp.f32 %v5069_v8  ;;  %v5071_v26 = vadd.f32 1.0, %v7502_v17  ;;  %v6858_v63 = vmul.f32 -1.442695, %v10266_v31 }
 0x2d9   : > { %v7506_v0 = vpop.eup %7505  ;;  %7525 = vrcp.f32 %v5070_v6  ;;  %v5072_v54 = vadd.f32 1.0, %v7504_v61  ;;  %v10282_v28 = vadd.f32 %v10030_v23, %v4913_v14  ;;  %v10285_v39 = vadd.f32 %v10274_v27, %v5178_v53  ;;  %v5183_v14 = vld [vmem:[#allocation2 + $0x228] sm:$0xff]  ;;  %v5184_v6 = vld [vmem:[#allocation2 + $0x230] sm:$0xff] }
 0x2da   : > { %v7508_v11 = vpop.eup %7507  ;;  %v4486_v16 = vadd.f32 %v4485_v22, %v4484_v13  ;;  %v5158_v19 = vmul.f32 %v10241_v9, %v10106_v34  ;;  %7527 = vrcp.f32 %v5071_v26  ;;  %v5073_v48 = vadd.f32 1.0, %v7506_v0 }
 0x2db   : > { %v7510_v55 = vpop.eup %7509  ;;  %7529 = vrcp.f32 %v5072_v54  ;;  %v5074_v10 = vadd.f32 1.0, %v7508_v11  ;;  %v6859_v7 = vmul.f32 -1.442695, %v10278_v51  ;;  %v10291_v38 = vadd.f32 %v10274_v27, %v5179_v60 }
 0x2dc   : > { %v7512_v23 = vpop.eup %7511  ;;  %v4487_v21 = vrot.slane %v4486_v16, 4  ;;  %v5159_v44 = vmul.f32 %v7510_v55, %v10156_v12  ;;  %7531 = vrcp.f32 %v5073_v48  ;;  %v10295_v33 = vadd.f32 %v10274_v27, %v5180_v35 }
 0x2dd   : > { %v7514_v34 = vpop.eup %7513  ;;  %v5075_v9 = vadd.f32 1.0, %v7512_v23  ;;  %7533 = vrcp.f32 %v5074_v10  ;;  %v6860_v24 = vmul.f32 -1.442695, %v10282_v28  ;;  %v6863_v15 = vmul.f32 -1.442695, %v10285_v39 }
 0x2de   : > { %v7516_v42 = vpop.eup %7515  ;;  %v4488_v1 = vadd.f32 %v4487_v21, %v4486_v16  ;;  %v7303_v59 = vpack.i.bf16 %v5159_v44, %v5158_v19  ;;  %v5160_v20 = vmul.f32 %v7514_v34, %v10163_v18  ;;  %7535 = vpow2.f32 %v6855_v58 }
 0x2df   : > { %v7518_v12 = vpop.eup %7517  ;;  %v5161_v49 = vmul.f32 %v7516_v42, %v10166_v40  ;;  %7537 = vrcp.f32 %v5075_v9  ;;  %v6864_v22 = vmul.f32 -1.442695, %v10291_v38  ;;  %v10303_v43 = vadd.f32 %v10274_v27, %v5181_v37 }
 0x2e0   : > { %v7520_v32 = vpop.eup %7519  ;;  %v4489_v45 = vrot.slane %v4488_v1, 2  ;;  %7304 = vrot.lane.b32.xlu0 %v7303_v59, %s7883_s8  ;;  %v5162_v8 = vmul.f32 %v7518_v12, %v10173_v46  ;;  %7539 = vpow2.f32 %v6856_v3  ;;  %v6865_v18 = vmul.f32 -1.442695, %v10295_v33 }
 0x2e1   : > { %v7522_v58 = vpop.eup %7521  ;;  %v7308_v53 = vpack.i.bf16 %v5161_v49, %v5160_v20  ;;  %v5163_v40 = vmul.f32 %v7520_v32, %v10178_v4  ;;  %7541 = vpow2.f32 %v6857_v5  ;;  %v10310_v17 = vadd.f32 %v10274_v27, %v5182_v52  ;;  %v5185_v20 = vld [vmem:[#allocation2 + $0x238] sm:$0xff] }
 0x2e2   : > { %v7524_v61 = vpop.eup %7523  ;;  %v4490_v13 = vadd.f32 %v4489_v45, %v4488_v1  ;;  %v5164_v26 = vmul.f32 %v7522_v58, %v10183_v25  ;;  %7543 = vpow2.f32 %v6858_v63  ;;  %v10314_v60 = vadd.f32 %v10274_v27, %v5183_v14 }
 0x2e3   : > { %v7526_v46 = vpop.eup %7525  ;;  %7309 = vrot.lane.b32.xlu1 %v7308_v53, %s7883_s8  ;;  %v7313_v3 = vpack.i.bf16 %v5163_v40, %v5162_v8  ;;  %v5165_v0 = vmul.f32 %v7524_v61, %v10187_v50  ;;  %7545 = vpow2.f32 %v6859_v7  ;;  %v6866_v4 = vmul.f32 -1.442695, %v10303_v43  ;;  %v5187_v8 = vld [vmem:[#allocation2 + $0x248] sm:$0xff]  ;;  %v5188_v53 = vld [vmem:[#allocation2 + $0x250] sm:$0xff] }
 0x2e4   : > { %v7528_v5 = vpop.eup %7527  ;;  %v4491_v54 = vrot.slane %v4490_v13, 1  ;;  %v5166_v35 = vmul.f32 %v7526_v46, %v10190_v30  ;;  %7547 = vpow2.f32 %v6860_v24  ;;  %v10321_v25 = vadd.f32 %v10274_v27, %v5184_v6 }
 0x2e5   : > { %v7530_v63 = vpop.eup %7529  ;;  %7314 = vrot.lane.b32.xlu0 %v7313_v3, %s7883_s8  ;;  %v7318_v11 = vpack.i.bf16 %v5165_v0, %v5164_v26  ;;  %v5167_v16 = vmul.f32 %v7528_v5, %v10193_v41  ;;  %7549 = vpow2.f32 %v6863_v15  ;;  %v6867_v50 = vmul.f32 -1.442695, %v10310_v17  ;;  %v5190_v26 = vld [vmem:[#allocation2 + $0x260] sm:$0xff] }
 0x2e6   : > { %v7532_v19 = vpop.eup %7531  ;;  %v4492_v48 = vadd.f32 %v4491_v54, %v4490_v13  ;;  %v5168_v55 = vmul.f32 %v7530_v63, %v10200_v47  ;;  %7551 = vpow2.f32 %v6864_v22  ;;  %v6868_v30 = vmul.f32 -1.442695, %v10314_v60  ;;  %v5189_v13 = vld [vmem:[#allocation2 + $0x258] sm:$0xff]  ;;  %v5191_v63 = vld [vmem:[#allocation2 + $0x268] sm:$0xff] }
 0x2e7   : > { %v7534_v10 = vpop.eup %7533  ;;  %7319 = vrot.lane.b32.xlu1 %v7318_v11, %s7883_s8  ;;  %v7323_v7 = vpack.i.bf16 %v5167_v16, %v5166_v35  ;;  %v5169_v23 = vmul.f32 %v7532_v19, %v10212_v57  ;;  %7553 = vpow2.f32 %v6865_v18  ;;  %v6869_v37 = vmul.f32 -1.442695, %v10321_v25 }
 0x2e8   : > { %v7536_v21 = vpop.eup %7535  ;;  %v4494_v44 = vmul.f32 0.00390625, %v4492_v48  ;;  %v5170_v41 = vmul.f32 %v7534_v10, %v10215_v62  ;;  %7555 = vpow2.f32 %v6866_v4  ;;  %v10338_v45 = vadd.f32 %v10274_v27, %v5185_v20  ;;  %v5192_v48 = vld [vmem:[#allocation2 + $0x270] sm:$0xff] }
 0x2e9   : > { %v7538_v34 = vpop.eup %7537  ;;  %7324 = vrot.lane.b32.xlu0 %v7323_v7, %s7883_s8  ;;  %v7328_v47 = vpack.i.bf16 %v5169_v23, %v5168_v55  ;;  %v5076_v9 = vadd.f32 1.0, %v7536_v21  ;;  %7557 = vpow2.f32 %v6867_v50  ;;  %v10344_v0 = vadd.f32 %v10274_v27, %v5187_v8 }
 0x2ea   : > { %v7540_v24 = vpop.eup %7539  ;;  %7084 = vmatmul.mubr.msk.f32.vlgmr.msra.gmra.mrb[0].mxu0 %vm1293_vm4, %v4494_v44  ;;  %v5171_v15 = vmul.f32 %v7538_v34, %v10223_v36  ;;  %7559 = vpow2.f32 %v6868_v30  ;;  %v5186_v36 = vld [vmem:[#allocation2 + $0x240] sm:$0xff]  ;;  %v6870_v54 = vmul.f32 -1.442695, %v10338_v45  ;;  %v10348_v35 = vadd.f32 %v10274_v27, %v5188_v53 }
 0x2eb   : > { %v7542_v57 = vpop.eup %7541  ;;  %7329 = vrot.lane.b32.xlu1 %v7328_v47, %s7883_s8  ;;  %v5077_v42 = vadd.f32 1.0, %v7540_v24  ;;  %7561 = vrcp.f32 %v5076_v9  ;;  %v10341_v61 = vadd.f32 %v10274_v27, %v5186_v36  ;;  %v10351_v50 = vadd.f32 %v10274_v27, %v5189_v13 }
 0x2ec   : > { %v7544_v62 = vpop.eup %7543  ;;  %v7333_v1 = vpack.i.bf16 %v5171_v15, %v5170_v41  ;;  %v5078_v59 = vadd.f32 1.0, %v7542_v57  ;;  %7563 = vpow2.f32 %v6869_v37  ;;  %v10354_v19 = vadd.f32 %v10274_v27, %v5190_v26  ;;  %v5193_v41 = vld [vmem:[#allocation2 + $0x278] sm:$0xff]  ;;  %v5194_v37 = vld [vmem:[#allocation2 + $0x280] sm:$0xff] }
 0x2ed   : > { %v7546_v52 = vpop.eup %7545  ;;  %7565 = vrcp.f32 %v5077_v42  ;;  %v5079_v12 = vadd.f32 1.0, %v7544_v62  ;;  %v6871_v10 = vmul.f32 -1.442695, %v10341_v61  ;;  %v6872_v21 = vmul.f32 -1.442695, %v10344_v0  ;;  %v5195_v62 = vld [vmem:[#allocation2 + $0x288] sm:$0xff] }
 0x2ee   : > { %v7548_v49 = vpop.eup %7547  ;;  %7334 = vrot.lane.b32.xlu0 %v7333_v1, %s7883_s8  ;;  %7567 = vrcp.f32 %v5078_v59  ;;  %v5080_v22 = vadd.f32 1.0, %v7546_v52  ;;  %v10360_v44 = vadd.f32 %v10274_v27, %v5191_v63  ;;  %v6873_v9 = vmul.f32 -1.442695, %v10348_v35 }
 0x2ef   : > { %v7550_v14 = vpop.eup %7549  ;;  %7569 = vrcp.f32 %v5079_v12  ;;  %v5081_v32 = vadd.f32 1.0, %v7548_v49  ;;  %v10364_v24 = vadd.f32 %v10274_v27, %v5192_v48  ;;  %v6875_v42 = vmul.f32 -1.442695, %v10354_v19  ;;  %v5196_v12 = vld [vmem:[#allocation2 + $0x290] sm:$0xff] }
 0x2f0   : > { %v7552_v18 = vpop.eup %7551  ;;  %7571 = vrcp.f32 %v5080_v22  ;;  %v5346_v58 = vadd.f32 1.0, %v7550_v14  ;;  %v10371_v20 = vadd.f32 %v10274_v27, %v5193_v41  ;;  %v10374_v52 = vadd.f32 %v10274_v27, %v5194_v37 }
 0x2f1   : > { %v7554_v40 = vpop.eup %7553  ;;  %7573 = vrcp.f32 %v5081_v32  ;;  %v5347_v6 = vadd.f32 1.0, %v7552_v18  ;;  %v6876_v36 = vmul.f32 -1.442695, %v10360_v44  ;;  %v10381_v8 = vadd.f32 %v10274_v27, %v5195_v62  ;;  %v5197_v18 = vld [vmem:[#allocation2 + $0x298] sm:$0xff] }
 0x2f2   : > { %v7556_v46 = vpop.eup %7555  ;;  %7575 = vrcp.f32 %v5346_v58  ;;  %v5348_v3 = vadd.f32 1.0, %v7554_v40  ;;  %v6878_v13 = vmul.f32 -1.442695, %v10371_v20  ;;  %v6879_v26 = vmul.f32 -1.442695, %v10374_v52 }
 0x2f3   : > { %v7558_v4 = vpop.eup %7557  ;;  %7577 = vrcp.f32 %v5347_v6  ;;  %v5349_v5 = vadd.f32 1.0, %v7556_v46 }
 0x2f4   : > { %v7560_v11 = vpop.eup %7559  ;;  %7579 = vrcp.f32 %v5348_v3  ;;  %v5350_v16 = vadd.f32 1.0, %v7558_v4 }
 0x2f5   : > { %v7562_v55 = vpop.eup %7561  ;;  %7581 = vrcp.f32 %v5349_v5  ;;  %v5351_v30 = vadd.f32 1.0, %v7560_v11 }
 0x2f6   : > { %v7564_v7 = vpop.eup %7563  ;;  %v5172_v23 = vmul.f32 %v7562_v55, %v10254_v29  ;;  %7583 = vrcp.f32 %v5350_v16  ;;  %v6874_v29 = vmul.f32 -1.442695, %v10351_v50 }
 0x2f7   : > { %v7566_v34 = vpop.eup %7565  ;;  %7585 = vrcp.f32 %v5351_v30  ;;  %v5352_v47 = vadd.f32 1.0, %v7564_v7 }
 0x2f8   : > { %v7568_v15 = vpop.eup %7567  ;;  %v5173_v57 = vmul.f32 %v7566_v34, %v10258_v56  ;;  %7587 = vpow2.f32 %v6870_v54 }
 0x2f9   : > { %v7570_v1 = vpop.eup %7569  ;;  %v5174_v59 = vmul.f32 %v7568_v15, %v10263_v2  ;;  %7589 = vrcp.f32 %v5352_v47  ;;  %v6877_v2 = vmul.f32 -1.442695, %v10364_v24  ;;  %v5198_v15 = vld [vmem:[#allocation2 + $0x2a0] sm:$0xff] }
 0x2fa   : > { %v7572_v49 = vpop.eup %7571  ;;  %v7338_v22 = vpack.i.bf16 %v5173_v57, %v5172_v23  ;;  %v5175_v56 = vmul.f32 %v7570_v1, %v10266_v31  ;;  %7591 = vpow2.f32 %v6871_v10  ;;  %v10386_v31 = vadd.f32 %v10274_v27, %v5196_v12 }
 0x2fb   : > { %v7574_v14 = vpop.eup %7573  ;;  %v5176_v32 = vmul.f32 %v7572_v49, %v10278_v51  ;;  %7593 = vpow2.f32 %v6872_v21 }
 0x2fc   : > { %v7576_v58 = vpop.eup %7575  ;;  %7339 = vrot.lane.b32.xlu1 %v7338_v22, %s7883_s8  ;;  %v7343_v53 = vpack.i.bf16 %v5175_v56, %v5174_v59  ;;  %v5177_v40 = vmul.f32 %v7574_v14, %v10282_v28  ;;  %7595 = vpow2.f32 %v6873_v9  ;;  %v10394_v28 = vadd.f32 %v10274_v27, %v5197_v18  ;;  %v5200_v59 = vld [vmem:[#allocation2 + $0x2b0] sm:$0xff]  ;;  %v5201_v56 = vld [vmem:[#allocation2 + $0x2b8] sm:$0xff] }
 0x2fd   : > { %v7578_v6 = vpop.eup %7577  ;;  %v5442_v51 = vmul.f32 %v7576_v58, %v10285_v39  ;;  %7597 = vpow2.f32 %v6874_v29  ;;  %v6880_v39 = vmul.f32 -1.442695, %v10381_v8  ;;  %v6881_v48 = vmul.f32 -1.442695, %v10386_v31 }
 0x2fe   : > { %v7580_v46 = vpop.eup %7579  ;;  %7344 = vrot.lane.b32.xlu0 %v7343_v53, %s7883_s8  ;;  %v7348_v3 = vpack.i.bf16 %v5177_v40, %v5176_v32  ;;  %v5443_v4 = vmul.f32 %v7578_v6, %v10291_v38  ;;  %7599 = vpow2.f32 %v6875_v42  ;;  %v6882_v7 = vmul.f32 -1.442695, %v10394_v28  ;;  %v5199_v42 = vld [vmem:[#allocation2 + $0x2a8] sm:$0xff] }
 0x2ff   : > { %v7582_v5 = vpop.eup %7581  ;;  %v5444_v54 = vmul.f32 %v7580_v46, %v10295_v33  ;;  %7601 = vpow2.f32 %v6876_v36  ;;  %v10408_v22 = vadd.f32 %v10274_v27, %v5198_v15  ;;  %v5202_v36 = vld [vmem:[#allocation2 + $0x2c0] sm:$0xff]  ;;  %v10414_v53 = vadd.f32 %v10274_v27, %v5200_v59  ;;  %v5203_v40 = vld [vmem:[#allocation2 + $0x2c8] sm:$0xff]  ;;  %v5204_v46 = vld [vmem:[#allocation2 + $0x2d0] sm:$0xff] }
 0x300   : > { %v7584_v63 = vpop.eup %7583  ;;  %7349 = vrot.lane.b32.xlu1 %v7348_v3, %s7883_s8  ;;  %v7353_v11 = vpack.i.bf16 %v5443_v4, %v5442_v51  ;;  %v5445_v16 = vmul.f32 %v7582_v5, %v10303_v43  ;;  %7603 = vpow2.f32 %v6877_v2  ;;  %v10411_v2 = vadd.f32 %v10274_v27, %v5199_v42 }
 0x301   : > { %v7586_v38 = vpop.eup %7585  ;;  %v5446_v55 = vmul.f32 %v7584_v63, %v10310_v17  ;;  %7605 = vpow2.f32 %v6878_v13  ;;  %v10417_v13 = vadd.f32 %v10274_v27, %v5201_v56 }
 0x302   : > { %v7588_v30 = vpop.eup %7587  ;;  %7354 = vrot.lane.b32.xlu0 %v7353_v11, %s7884_s11  ;;  %v7358_v33 = vpack.i.bf16 %v5445_v16, %v5444_v54  ;;  %v5447_v10 = vmul.f32 %v7586_v38, %v10314_v60  ;;  %7607 = vpow2.f32 %v6879_v26  ;;  %v10420_v26 = vadd.f32 %v10274_v27, %v5202_v36 }
 0x303   : > { %v7590_v23 = vpop.eup %7589  ;;  %v5353_v21 = vadd.f32 1.0, %v7588_v30  ;;  %7609 = vpow2.f32 %v6880_v39  ;;  %v6883_v54 = vmul.f32 -1.442695, %v10408_v22  ;;  %v6884_v11 = vmul.f32 -1.442695, %v10411_v2 }
 0x304   : > { %v7592_v43 = vpop.eup %7591  ;;  %7359 = vrot.lane.b32.xlu1 %v7358_v33, %s7884_s11  ;;  %v7363_v41 = vpack.i.bf16 %v5447_v10, %v5446_v55  ;;  %7611 = vpow2.f32 %v6881_v48  ;;  %v5448_v4 = vmul.f32 %v7590_v23, %v10321_v25  ;;  %v10426_v16 = vadd.f32 %v10274_v27, %v5203_v40  ;;  %v5205_v48 = vld [vmem:[#allocation2 + $0x2d8] sm:$0xff]  ;;  %v5206_v33 = vld [vmem:[#allocation2 + $0x2e0] sm:$0xff] }
 0x305   : > { %v7594_v17 = vpop.eup %7593  ;;  %7613 = vrcp.f32 %v5353_v21  ;;  %v5354_v37 = vadd.f32 1.0, %v7592_v43  ;;  %v6885_v30 = vmul.f32 -1.442695, %v10414_v53  ;;  %v10431_v25 = vadd.f32 %v10274_v27, %v5204_v46  ;;  %v5207_v43 = vld [vmem:[#allocation2 + $0x2e8] sm:$0xff] }
 0x306   : > { %v7596_v34 = vpop.eup %7595  ;;  %7364 = vrot.lane.b32.xlu0 %v7363_v41, %s7884_s11  ;;  %v5355_v47 = vadd.f32 1.0, %v7594_v17  ;;  %7615 = vpow2.f32 %v6882_v7  ;;  %v6886_v23 = vmul.f32 -1.442695, %v10417_v13  ;;  %v6887_v21 = vmul.f32 -1.442695, %v10420_v26 }
 0x307   : > { %v7598_v60 = vpop.eup %7597  ;;  %7617 = vrcp.f32 %v5354_v37  ;;  %v5356_v9 = vadd.f32 1.0, %v7596_v34  ;;  %v5208_v34 = vld [vmem:[#allocation2 + $0x2f0] sm:$0xff]  ;;  %v10442_v15 = vadd.f32 %v10274_v27, %v5206_v33  ;;  %v6889_v42 = vmul.f32 -1.442695, %v10431_v25 }
 0x308   : > { %v7600_v57 = vpop.eup %7599  ;;  %7619 = vrcp.f32 %v5355_v47  ;;  %v5357_v29 = vadd.f32 1.0, %v7598_v60 }
 0x309   : > { %v7602_v62 = vpop.eup %7601  ;;  %7621 = vrcp.f32 %v5356_v9  ;;  %v5358_v1 = vadd.f32 1.0, %v7600_v57  ;;  %v6888_v9 = vmul.f32 -1.442695, %v10426_v16  ;;  %v5209_v57 = vld [vmem:[#allocation2 + $0x2f8] sm:$0xff] }
 0x30a   : > { %v7604_v12 = vpop.eup %7603  ;;  %7623 = vrcp.f32 %v5357_v29  ;;  %v5359_v49 = vadd.f32 1.0, %v7602_v62  ;;  %v10448_v62 = vadd.f32 %v10274_v27, %v5207_v43  ;;  %v10457_v36 = vadd.f32 %v10274_v27, %v5209_v57 }
 0x30b   : > { %v7606_v14 = vpop.eup %7605  ;;  %7625 = vrcp.f32 %v5358_v1  ;;  %v5360_v32 = vadd.f32 1.0, %v7604_v12  ;;  %v10452_v12 = vadd.f32 %v10274_v27, %v5208_v34 }
 0x30c   : > { %v7608_v18 = vpop.eup %7607  ;;  %7627 = vrcp.f32 %v5359_v49  ;;  %v5361_v58 = vadd.f32 1.0, %v7606_v14 }
 0x30d   : > { %v7610_v6 = vpop.eup %7609  ;;  %7629 = vrcp.f32 %v5360_v32  ;;  %v5362_v51 = vadd.f32 1.0, %v7608_v18  ;;  %v6893_v46 = vmul.f32 -1.442695, %v10452_v12 }
 0x30e   : > { %v7612_v3 = vpop.eup %7611  ;;  %7631 = vrcp.f32 %v5361_v58  ;;  %v5363_v5 = vadd.f32 1.0, %v7610_v6 }
 0x30f   : > { %v7614_v39 = vpop.eup %7613  ;;  %7633 = vrcp.f32 %v5362_v51  ;;  %v5364_v63 = vadd.f32 1.0, %v7612_v3 }
 0x310   : > { %v7616_v38 = vpop.eup %7615  ;;  %v5449_v55 = vmul.f32 %v7614_v39, %v10338_v45  ;;  %7635 = vrcp.f32 %v5363_v5  ;;  %v10437_v45 = vadd.f32 %v10274_v27, %v5205_v48 }
 0x311   : > { %v7618_v10 = vpop.eup %7617  ;;  %v5365_v7 = vadd.f32 1.0, %v7616_v38  ;;  %7637 = vrcp.f32 %v5364_v63 }
 0x312   : > { %v7620_v41 = vpop.eup %7619  ;;  %v7368_v17 = vpack.i.bf16 %v5449_v55, %v5448_v4  ;;  %v5450_v37 = vmul.f32 %v7618_v10, %v10341_v61  ;;  %7639 = vpow2.f32 %v6883_v54  ;;  %v6894_v4 = vmul.f32 -1.442695, %v10457_v36 }
 0x313   : > { %v7622_v47 = vpop.eup %7621  ;;  %v5451_v60 = vmul.f32 %v7620_v41, %v10344_v0  ;;  %7641 = vrcp.f32 %v5365_v7 }
 0x314   : > { %v7624_v29 = vpop.eup %7623  ;;  %7369 = vrot.lane.b32.xlu1 %v7368_v17, %s7884_s11  ;;  %v5452_v61 = vmul.f32 %v7622_v47, %v10348_v35  ;;  %7643 = vpow2.f32 %v6884_v11  ;;  %v6890_v35 = vmul.f32 -1.442695, %v10437_v45 }
 0x315   : > { %v7626_v1 = vpop.eup %7625  ;;  %v7373_v0 = vpack.i.bf16 %v5451_v60, %v5450_v37  ;;  %v5453_v59 = vmul.f32 %v7624_v29, %v10351_v50  ;;  %7645 = vpow2.f32 %v6885_v30  ;;  %v6891_v50 = vmul.f32 -1.442695, %v10442_v15 }
 0x316   : > { %v7628_v49 = vpop.eup %7627  ;;  %v5454_v56 = vmul.f32 %v7626_v1, %v10354_v19  ;;  %7647 = vpow2.f32 %v6886_v23  ;;  %v6892_v19 = vmul.f32 -1.442695, %v10448_v62 }
 0x317   : > { %v7630_v14 = vpop.eup %7629  ;;  %7374 = vrot.lane.b32.xlu0 %v7373_v0, %s7884_s11  ;;  %v7378_v32 = vpack.i.bf16 %v5453_v59, %v5452_v61  ;;  %v5455_v18 = vmul.f32 %v7628_v49, %v10360_v44  ;;  %7649 = vpow2.f32 %v6887_v21 }
 0x318   : > { %v7632_v58 = vpop.eup %7631  ;;  %v5456_v40 = vmul.f32 %v7630_v14, %v10364_v24  ;;  %7651 = vpow2.f32 %v6888_v9 }
 0x319   : > { %v7634_v6 = vpop.eup %7633  ;;  %7379 = vrot.lane.b32.xlu1 %v7378_v32, %s7884_s11  ;;  %v7383_v27 = vpack.i.bf16 %v5455_v18, %v5454_v56  ;;  %v5457_v51 = vmul.f32 %v7632_v58, %v10371_v20  ;;  %7653 = vpow2.f32 %v6889_v42 }
 0x31a   : > { %v7636_v3 = vpop.eup %7635  ;;  %v5458_v44 = vmul.f32 %v7634_v6, %v10374_v52  ;;  %7655 = vpow2.f32 %v6890_v35 }
 0x31b   : > { %v7638_v5 = vpop.eup %7637  ;;  %7384 = vrot.lane.b32.xlu0 %v7383_v27, %s7884_s11  ;;  %v7388_v24 = vpack.i.bf16 %v5457_v51, %v5456_v40  ;;  %v5459_v54 = vmul.f32 %v7636_v3, %v10381_v8  ;;  %7657 = vpow2.f32 %v6891_v50 }
 0x31c   : > { %v7640_v39 = vpop.eup %7639  ;;  %v5460_v63 = vmul.f32 %v7638_v5, %v10386_v31  ;;  %7659 = vpow2.f32 %v6892_v19 }
 0x31d   : > { %v7642_v20 = vpop.eup %7641  ;;  %7389 = vrot.lane.b32.xlu1 %v7388_v24, %s7884_s11  ;;  %v7393_v11 = vpack.i.bf16 %v5459_v54, %v5458_v44  ;;  %v5366_v48 = vadd.f32 1.0, %v7640_v39  ;;  %7661 = vpow2.f32 %v6893_v46 }
 0x31e   : > { %v7644_v52 = vpop.eup %7643  ;;  %v5461_v38 = vmul.f32 %v7642_v20, %v10394_v28  ;;  %7663 = vpow2.f32 %v6894_v4 }
 0x31f   : > { %v7646_v55 = vpop.eup %7645  ;;  %7394 = vrot.lane.b32.xlu0 %v7393_v11, %s7884_s11  ;;  %v5367_v30 = vadd.f32 1.0, %v7644_v52  ;;  %7665 = vrcp.f32 %v5366_v48 }
 0x320   : > { %v7648_v8 = vpop.eup %7647  ;;  %v7398_v33 = vpack.i.bf16 %v5461_v38, %v5460_v63  ;;  %v5368_v10 = vadd.f32 1.0, %v7646_v55  ;;  %v10497_v55 = vld [vmem:[%s11111_s2] ss:$0 sm:$0xff] }
 0x321   : > { %v7650_v31 = vpop.eup %7649  ;;  %7667 = vrcp.f32 %v5367_v30  ;;  %v5369_v7 = vadd.f32 1.0, %v7648_v8  ;;  %v4588_v30 = vld [vmem:[#allocation2 + $0x8] sm:$0xff] }
 0x322   : > { %v7652_v23 = vpop.eup %7651  ;;  %7399 = vrot.lane.b32.xlu1 %v7398_v33, %s7884_s11  ;;  %7669 = vrcp.f32 %v5368_v10  ;;  %v5370_v21 = vadd.f32 1.0, %v7650_v31  ;;  %v4591_v10 = vld [vmem:[#allocation2 + $0x20] sm:$0xff] }
 0x323   : > { %v7654_v43 = vpop.eup %7653  ;;  %7671 = vrcp.f32 %v5369_v7  ;;  %v5371_v28 = vadd.f32 1.0, %v7652_v23  ;;  %v4592_v7 = vld [vmem:[#allocation2 + $0x28] sm:$0xff]  ;;  %v10507_v23 = vadd.f32 %v10497_v55, %v4588_v30 }
 0x324   : > { %v7656_v41 = vpop.eup %7655  ;;  %7673 = vrcp.f32 %v5370_v21  ;;  %v5372_v17 = vadd.f32 1.0, %v7654_v43  ;;  %v4589_v21 = vld [vmem:[#allocation2 + $0x10] sm:$0xff]  ;;  %v10510_v43 = vadd.f32 %v10497_v55, %v4591_v10 }
 0x325   : > { %v7658_v37 = vpop.eup %7657  ;;  %7675 = vrcp.f32 %v5371_v28  ;;  %v5373_v34 = vadd.f32 1.0, %v7656_v41  ;;  %v4590_v28 = vld [vmem:[#allocation2 + $0x18] sm:$0xff]  ;;  %v10513_v41 = vadd.f32 %v10497_v55, %v4592_v7 }
 0x326   : > { %v7660_v47 = vpop.eup %7659  ;;  %7677 = vrcp.f32 %v5372_v17  ;;  %v5374_v60 = vadd.f32 1.0, %v7658_v37  ;;  %v4593_v17 = vld [vmem:[#allocation2 + $0x30] sm:$0xff] }
 0x327   : > { %v7662_v9 = vpop.eup %7661  ;;  %7679 = vrcp.f32 %v5373_v34  ;;  %v5375_v57 = vadd.f32 1.0, %v7660_v47  ;;  %v10517_v34 = vadd.f32 %v10497_v55, %v4589_v21 }
 0x328   : > { %v7664_v29 = vpop.eup %7663  ;;  %7681 = vrcp.f32 %v5374_v60  ;;  %v5376_v61 = vadd.f32 1.0, %v7662_v9  ;;  %v4594_v60 = vld [vmem:[#allocation2 + $0x38] sm:$0xff]  ;;  %v6796_v9 = vmul.f32 -1.442695, %v10507_v23 }
 0x329   : > { %v7666_v42 = vpop.eup %7665  ;;  %7683 = vrcp.f32 %v5375_v57  ;;  %v5377_v1 = vadd.f32 1.0, %v7664_v29  ;;  %v10525_v29 = vadd.f32 %v10497_v55, %v4590_v28 }
 0x32a   : > { %v5462_v0 = vmul.f32 %v7666_v42, %v10408_v22  ;;  %7685 = vrcp.f32 %v5376_v61  ;;  %v6799_v61 = vmul.f32 -1.442695, %v10510_v43  ;;  %v10529_v42 = vadd.f32 %v10497_v55, %v4593_v17 }
 0x32b   : > { %v7668_v59 = vpop.eup %7667  ;;  %7687 = vrcp.f32 %v5377_v1  ;;  %v4595_v1 = vld [vmem:[#allocation2 + $0x40] sm:$0xff] }
 0x32c   : > { %v7670_v49 = vpop.eup %7669  ;;  %v5463_v56 = vmul.f32 %v7668_v59, %v10411_v2  ;;  %v10533_v59 = vadd.f32 %v10497_v55, %v4594_v60 }
 0x32d   : > { %v7672_v35 = vpop.eup %7671  ;;  %v5464_v14 = vmul.f32 %v7670_v49, %v10414_v53  ;;  %v6797_v49 = vmul.f32 -1.442695, %v10517_v34 }
 0x32e   : > { %v7674_v32 = vpop.eup %7673  ;;  %v7403_v18 = vpack.i.bf16 %v5463_v56, %v5462_v0  ;;  %v5465_v50 = vmul.f32 %v7672_v35, %v10417_v13  ;;  %v6800_v0 = vmul.f32 -1.442695, %v10513_v41  ;;  %v4596_v56 = vld [vmem:[#allocation2 + $0x48] sm:$0xff]  ;;  %v6798_v35 = vmul.f32 -1.442695, %v10525_v29 }
 0x32f   : > { %v7676_v58 = vpop.eup %7675  ;;  %v5466_v40 = vmul.f32 %v7674_v32, %v10420_v26  ;;  %v4597_v32 = vld [vmem:[#allocation2 + $0x50] sm:$0xff] }
 0x330   : > { %v7678_v19 = vpop.eup %7677  ;;  %7404 = vrot.lane.b32.xlu0 %v7403_v18, %s7884_s11  ;;  %v7408_v22 = vpack.i.bf16 %v5465_v50, %v5464_v14  ;;  %v5467_v6 = vmul.f32 %v7676_v58, %v10426_v16  ;;  %v10538_v14 = vadd.f32 %v10497_v55, %v4595_v1  ;;  %v6801_v18 = vmul.f32 -1.442695, %v10529_v42  ;;  %v4598_v58 = vld [vmem:[#allocation2 + $0x58] sm:$0xff] }
 0x331   : > { %v7680_v27 = vpop.eup %7679  ;;  %v5468_v51 = vmul.f32 %v7678_v19, %v10431_v25  ;;  %v4602_v1 = vld [vmem:[#allocation2 + $0x78] sm:$0xff] }
 0x332   : > { %v7682_v2 = vpop.eup %7681  ;;  %7409 = vrot.lane.b32.xlu1 %v7408_v22, %s7884_s11  ;;  %v7413_v53 = vpack.i.bf16 %v5467_v6, %v5466_v40  ;;  %v5469_v46 = vmul.f32 %v7680_v27, %v10437_v45  ;;  %v6802_v40 = vmul.f32 -1.442695, %v10533_v59  ;;  %v10547_v22 = vadd.f32 %v10497_v55, %v4596_v56  ;;  %v4599_v6 = vld [vmem:[#allocation2 + $0x60] sm:$0xff]  ;;  %v4614_v56 = vld [vmem:[#allocation2 + $0xd8] sm:$0xff] }
 0x333   : > { %v7684_v3 = vpop.eup %7683  ;;  %v5470_v13 = vmul.f32 %v7682_v2, %v10442_v15  ;;  %v10550_v27 = vadd.f32 %v10497_v55, %v4597_v32  ;;  %v10554_v2 = vadd.f32 %v10497_v55, %v4598_v58 }
 0x334   : > { %v7686_v44 = vpop.eup %7685  ;;  %7414 = vrot.lane.b32.xlu0 %v7413_v53, %s7884_s11  ;;  %v7418_v26 = vpack.i.bf16 %v5469_v46, %v5468_v51  ;;  %v5471_v4 = vmul.f32 %v7684_v3, %v10448_v62  ;;  %v4583_v62 = vlaneseq  ;;  %v6803_v51 = vmul.f32 -1.442695, %v10538_v14 }
 0x335   : > { %v7688_v5 = vpop.eup %7687  ;;  %v5472_v16 = vmul.f32 %v7686_v44, %v10452_v12  ;;  %v10557_v53 = vadd.f32 %v10497_v55, %v4599_v6  ;;  %v6804_v46 = vmul.f32 -1.442695, %v10547_v22  ;;  %v6805_v3 = vmul.f32 -1.442695, %v10550_v27 }
 0x336   : > { %7419 = vrot.lane.b32.xlu1 %v7418_v26, %s7884_s11  ;;  %v7423_v25 = vpack.i.bf16 %v5471_v4, %v5470_v13  ;;  %v5473_v24 = vmul.f32 %v7688_v5, %v10457_v36  ;;  %v4584_v11 = vshrl.u32 %v4583_v62, 7  ;;  %v4587_v36 = vld [vmem:[#allocation2] sm:$0xff]  ;;  %v6806_v44 = vmul.f32 -1.442695, %v10554_v2 }
 0x337   : > { %v10504_v31 = vadd.f32 %v10497_v55, %v4587_v36  ;;  %v6807_v5 = vmul.f32 -1.442695, %v10557_v53 }
 0x338   : > { %7424 = vrot.lane.b32.xlu0 %v7423_v25, %s7884_s11  ;;  %v7428_v45 = vpack.i.bf16 %v5473_v24, %v5472_v16  ;;  %v4585_v12 = vsub.s32 0, %v4584_v11 }
 0x339   : > { %v6795_v37 = vmul.f32 -1.442695, %v10504_v31 }
 0x33a   : > { %7429 = vrot.lane.b32.xlu1 %v7428_v45, %s7884_s11  ;;  %v10501_v33 = vpop.permute.xlu0 %7274 }
 0x33c   : > { %v10499_v8 = vpop.permute.xlu1 %7284 }
 0x33e   : > { %v10522_v57 = vpop.permute.xlu0 %7279 }
 0x340   : > { %v10519_v47 = vpop.permute.xlu1 %7289 }
 0x342   : > { %v10544_v19 = vpop.permute.xlu0 %7294 }
 0x344   : > { %v10541_v50 = vpop.permute.xlu1 %7299 }
 0x352   : > { %v10564_v26 = vpop.permute.xlu0 %7304 }
 0x355   : > { %v10561_v13 = vpop.permute.xlu1 %7309 }
 0x356   : > { %11166 = vst [vmem:[#allocation4_spill] sm:$0xff] %v10561_v13 }
 0x357   : > { %v10569_v11 = vpop.permute.xlu0 %7314 }
 0x358   : > { %11168 = vst [vmem:[#allocation6_spill] sm:$0xff] %v10569_v11 }
 0x3bd   : > { %v4572_v15 = vpop.f32.mrb[0].mxu0 }
 0x3be   : > { %v6793_v54 = vmul.f32 -1.442695, %v4572_v15  ;;  %v7085_v39 = vpop.f32.mrb[1].mxu0 }
 0x3bf   : > { %v4600_v39 = vld [vmem:[#allocation2 + $0x68] sm:$0xff] }
 0x3c0   : > { %7689 = vpow2.f32 %v6793_v54  ;;  %v10572_v30 = vadd.f32 %v10497_v55, %v4600_v39 }
 0x3ca   : > { %v7690_v63 = vpop.eup %7689 }
 0x3cb   : > { %v4579_v20 = vadd.f32 1.0, %v7690_v63  ;;  %v10567_v63 = vpop.permute.xlu1 %7319 }
 0x3cc   : > { %11167 = vst [vmem:[#allocation5_spill] sm:$0xff] %v10567_v63 }
 0x3cd   : > { %7691 = vrcp.f32 %v4579_v20 }
 0x3ce   : > { %7693 = vpow2.f32 %v6795_v37 }
 0x3cf   : > { %7695 = vpow2.f32 %v6796_v9  ;;  %v10577_v37 = vpop.permute.xlu1 %7329 }
 0x3d0   : > { %7697 = vpow2.f32 %v6799_v61  ;;  %11169 = vst [vmem:[#allocation7_spill] sm:$0xff] %v10577_v37  ;;  %v6808_v61 = vmul.f32 -1.442695, %v10572_v30 }
 0x3d1   : > { %7699 = vpow2.f32 %v6800_v0  ;;  %v10581_v0 = vpop.permute.xlu0 %7324 }
 0x3d2   : > { %7701 = vpow2.f32 %v6797_v49  ;;  %11170 = vst [vmem:[#allocation8_spill] sm:$0xff] %v10581_v0 }
 0x3d3   : > { %7703 = vpow2.f32 %v6798_v35 }
 0x3d4   : > { %7705 = vpow2.f32 %v6801_v18  ;;  %v4603_v18 = vld [vmem:[#allocation2 + $0x80] sm:$0xff] }
 0x3d5   : > { %7707 = vpow2.f32 %v6802_v40  ;;  %v4613_v40 = vld [vmem:[#allocation2 + $0xd0] sm:$0xff] }
 0x3d6   : > { %7709 = vpow2.f32 %v6803_v51 }
 0x3d7   : > { %v7692_v48 = vpop.eup %7691  ;;  %7711 = vpow2.f32 %v6804_v46  ;;  %v4604_v46 = vld [vmem:[#allocation2 + $0x88] sm:$0xff] }
 0x3d8   : > { %v4582_v52 = vmul.f32 %v7692_v48, %v4572_v15  ;;  %v7694_v4 = vpop.eup %7693  ;;  %7713 = vpow2.f32 %v6805_v3 }
 0x3d9   : > { %v7696_v16 = vpop.eup %7695  ;;  %v4754_v45 = vadd.f32 1.0, %v7694_v4  ;;  %7715 = vpow2.f32 %v6806_v44 }
 0x3da   : > { %v4586_v38 = vrot.slane %v4582_v52, %v4585_v12  ;;  %v7698_v25 = vpop.eup %7697  ;;  %v4755_v54 = vadd.f32 1.0, %v7696_v16  ;;  %7717 = vpow2.f32 %v6807_v5  ;;  %v4601_v52 = vld [vmem:[#allocation2 + $0x70] sm:$0xff]  ;;  %v10590_v5 = vadd.f32 %v10497_v55, %v4602_v1 }
 0x3db   : > { %v7700_v24 = vpop.eup %7699  ;;  %v4758_v62 = vadd.f32 1.0, %v7698_v25  ;;  %7719 = vrcp.f32 %v4754_v45  ;;  %v10575_v28 = vadd.f32 %v10497_v55, %v4601_v52  ;;  %v4605_v16 = vld [vmem:[#allocation2 + $0x90] sm:$0xff]  ;;  %v10594_v45 = vadd.f32 %v10497_v55, %v4603_v18  ;;  %v4612_v25 = vld [vmem:[#allocation2 + $0xc8] sm:$0xff] }
 0x3dc   : > { %5731 = vrot.lane.b32.xlu0 %v4586_v38, %s7885_s12  ;;  %v7702_v15 = vpop.eup %7701  ;;  %v4759_v48 = vadd.f32 1.0, %v7700_v24  ;;  %7721 = vrcp.f32 %v4755_v54  ;;  %v4609_v1 = vld [vmem:[#allocation2 + $0xb0] sm:$0xff] }
 0x3dd   : > { %v7704_v20 = vpop.eup %7703  ;;  %v4756_v36 = vadd.f32 1.0, %v7702_v15  ;;  %7723 = vrcp.f32 %v4758_v62  ;;  %v6809_v51 = vmul.f32 -1.442695, %v10575_v28  ;;  %v4606_v15 = vld [vmem:[#allocation2 + $0x98] sm:$0xff]  ;;  %v4607_v62 = vld [vmem:[#allocation2 + $0xa0] sm:$0xff] }
 0x3de   : > { %v7706_v12 = vpop.eup %7705  ;;  %v4757_v10 = vadd.f32 1.0, %v7704_v20  ;;  %7725 = vrcp.f32 %v4759_v48  ;;  %v10598_v20 = vadd.f32 %v10497_v55, %v4604_v46  ;;  %v6811_v18 = vmul.f32 -1.442695, %v10594_v45 }
 0x3df   : > { %v7708_v38 = vpop.eup %7707  ;;  %v4760_v21 = vadd.f32 1.0, %v7706_v12  ;;  %7727 = vrcp.f32 %v4756_v36  ;;  %v10600_v12 = vpop.permute.xlu1 %7339  ;;  %v10606_v36 = vadd.f32 %v10497_v55, %v4605_v16 }
 0x3e0   : > { %v7710_v7 = vpop.eup %7709  ;;  %v4761_v17 = vadd.f32 1.0, %v7708_v38  ;;  %7729 = vrcp.f32 %v4757_v10  ;;  %v4608_v10 = vld [vmem:[#allocation2 + $0xa8] sm:$0xff] }
 0x3e1   : > { %v7712_v60 = vpop.eup %7711  ;;  %v4762_v32 = vadd.f32 1.0, %v7710_v7  ;;  %7731 = vrcp.f32 %v4760_v21  ;;  %11171 = vst [vmem:[#allocation9_spill] sm:$0xff] %v10606_v36  ;;  %v10608_v7 = vpop.permute.xlu0 %7334  ;;  %v10629_v16 = vadd.f32 %v10497_v55, %v4608_v10 }
 0x3e2   : > { %v7714_v49 = vpop.eup %7713  ;;  %7733 = vrcp.f32 %v4761_v17  ;;  %v4763_v4 = vadd.f32 1.0, %v7712_v60  ;;  %v6810_v60 = vmul.f32 -1.442695, %v10590_v5 }
 0x3e3   : > { %v7716_v58 = vpop.eup %7715  ;;  %v4764_v24 = vadd.f32 1.0, %v7714_v49  ;;  %7735 = vpow2.f32 %v6808_v61  ;;  %v10615_v61 = vadd.f32 %v10497_v55, %v4606_v15  ;;  %11174 = vst [vmem:[#allocation12_spill] sm:$0xff] %v10629_v16  ;;  %v4611_v15 = vld [vmem:[#allocation2 + $0xc0] sm:$0xff]  ;;  %v10645_v54 = vpop.permute.xlu1 %7349  ;;  %v6816_v35 = vmul.f32 -1.442695, %v10629_v16 }
 0x3e4   : > { %v7718_v3 = vpop.eup %7717  ;;  %7737 = vrcp.f32 %v4762_v32  ;;  %v4765_v39 = vadd.f32 1.0, %v7716_v58  ;;  %v10622_v58 = vadd.f32 %v10497_v55, %v4607_v62  ;;  %v6813_v62 = vmul.f32 -1.442695, %v10606_v36  ;;  %v4615_v16 = vld [vmem:[#allocation2 + $0xe0] sm:$0xff] }
 0x3e5   : > { %v10602_v48 = vpop.eup %7719  ;;  %v4766_v38 = vadd.f32 1.0, %v7718_v3  ;;  %7739 = vpow2.f32 %v6809_v51  ;;  %11172 = vst [vmem:[#allocation10_spill] sm:$0xff] %v10615_v61  ;;  %v4610_v51 = vld [vmem:[#allocation2 + $0xb8] sm:$0xff]  ;;  %v10636_v32 = vadd.f32 %v10497_v55, %v4609_v1  ;;  %v6814_v3 = vmul.f32 -1.442695, %v10615_v61 }
 0x3e6   : > { %v10610_v21 = vpop.eup %7721  ;;  %7741 = vrcp.f32 %v4763_v4  ;;  %11173 = vst [vmem:[#allocation11_spill] sm:$0xff] %v10622_v58  ;;  %v6812_v4 = vmul.f32 -1.442695, %v10598_v20  ;;  %v10643_v10 = vadd.f32 %v10497_v55, %v4610_v51  ;;  %v6815_v1 = vmul.f32 -1.442695, %v10622_v58  ;;  %v4618_v51 = vld [vmem:[#allocation2 + $0xf8] sm:$0xff] }
 0x3e7   : > { %v10617_v49 = vpop.eup %7723  ;;  %7743 = vrcp.f32 %v4764_v24  ;;  %11175 = vst [vmem:[#allocation13_spill] sm:$0xff] %v10636_v32  ;;  %v10652_v6 = vadd.f32 %v10497_v55, %v4611_v15  ;;  %v10664_v15 = vadd.f32 %v10497_v55, %v4612_v25  ;;  %v10674_v25 = vadd.f32 %v10497_v55, %v4613_v40  ;;  %v10682_v44 = vpop.permute.xlu1 %7359 }
 0x3e8   : > { %v10624_v46 = vpop.eup %7725  ;;  %7745 = vrcp.f32 %v4765_v39  ;;  %11176 = vst [vmem:[#allocation14_spill] sm:$0xff] %v10643_v10  ;;  %v10654_v39 = vpop.permute.xlu0 %7344  ;;  %v4850_v37 = vmul.f32 %v10602_v48, %v10504_v31 }
 0x3e9   : > { %v10631_v52 = vpop.eup %7727  ;;  %7747 = vrcp.f32 %v4766_v38  ;;  %11177 = vst [vmem:[#allocation15_spill] sm:$0xff] %v10652_v6  ;;  %v6817_v38 = vmul.f32 -1.442695, %v10636_v32  ;;  %11178 = vst [vmem:[#allocation16_spill] sm:$0xff] %v10664_v15  ;;  %v4616_v32 = vld [vmem:[#allocation2 + $0xe8] sm:$0xff]  ;;  %v4855_v31 = vmul.f32 %v10624_v46, %v10513_v41  ;;  %v11181_v41 = vunpack.i.l.bf16 %v10501_v33 }
 0x3ea   : > { %v10638_v17 = vpop.eup %7729  ;;  %7749 = vpow2.f32 %v6810_v60  ;;  %v6820_v40 = vmul.f32 -1.442695, %v10664_v15  ;;  %v10697_v63 = vadd.f32 %v10497_v55, %v4616_v32 }
 0x3eb   : > { %v10647_v24 = vpop.eup %7731  ;;  %7751 = vpow2.f32 %v6811_v18  ;;  %v10736_v46 = vsel %vm1727_vm11, %v4850_v37, %v11181_v41  ;;  %v11184_v41 = vunpack.i.h.bf16 %v10499_v8 }
 0x3ec   : > { %v10656_v60 = vpop.eup %7733  ;;  %7753 = vpow2.f32 %v6812_v4  ;;  %v6818_v4 = vmul.f32 -1.442695, %v10643_v10  ;;  %v4617_v10 = vld [vmem:[#allocation2 + $0xf0] sm:$0xff] }
 0x3ed   : > { %v7736_v9 = vpop.eup %7735  ;;  %7755 = vpow2.f32 %v6813_v62  ;;  %v6819_v62 = vmul.f32 -1.442695, %v10652_v6  ;;  %v10689_v6 = vadd.f32 %v10497_v55, %v4615_v16  ;;  %v6821_v16 = vmul.f32 -1.442695, %v10674_v25 }
 0x3ee   : > { %v10666_v58 = vpop.eup %7737  ;;  %7757 = vpow2.f32 %v6814_v3  ;;  %v4767_v13 = vadd.f32 1.0, %v7736_v9  ;;  %v10680_v3 = vadd.f32 %v10497_v55, %v4614_v56  ;;  %v10691_v9 = vpop.permute.xlu0 %7354 }
 0x3ef   : > { %v7740_v36 = vpop.eup %7739  ;;  %7759 = vpow2.f32 %v6815_v1  ;;  %v10704_v1 = vadd.f32 %v10497_v55, %v4617_v10  ;;  %v6823_v10 = vmul.f32 -1.442695, %v10689_v6 }
 0x3f0   : > { %v10676_v11 = vpop.eup %7741  ;;  %7761 = vpow2.f32 %v6816_v35  ;;  %11179 = vst [vmem:[#allocation17_spill] sm:$0xff] %v10680_v3  ;;  %v4768_v56 = vadd.f32 1.0, %v7740_v36  ;;  %v6822_v0 = vmul.f32 -1.442695, %v10680_v3 }
 0x3f1   : > { %v10684_v18 = vpop.eup %7743  ;;  %7763 = vpow2.f32 %v6817_v38  ;;  %11180 = vst [vmem:[#allocation18_spill] sm:$0xff] %v10704_v1 }
 0x3f2   : > { %v10693_v35 = vpop.eup %7745  ;;  %7765 = vpow2.f32 %v6818_v4  ;;  %v10709_v4 = vadd.f32 %v10497_v55, %v4618_v51  ;;  %v6824_v55 = vmul.f32 -1.442695, %v10697_v63  ;;  %v10720_v51 = vpop.permute.xlu1 %7369 }
 0x3f3   : > { %v10699_v61 = vpop.eup %7747  ;;  %7767 = vpow2.f32 %v6819_v62  ;;  %v4851_v62 = vmul.f32 %v10610_v21, %v10507_v23  ;;  %v4852_v23 = vmul.f32 %v10631_v52, %v10517_v34  ;;  %v10726_v48 = vpop.permute.xlu0 %7364  ;;  %v6825_v21 = vmul.f32 -1.442695, %v10704_v1 }
 0x3f4   : > { %v7750_v15 = vpop.eup %7749  ;;  %7769 = vrcp.f32 %v4767_v13  ;;  %v4854_v13 = vmul.f32 %v10617_v49, %v10510_v43  ;;  %v4853_v49 = vmul.f32 %v10638_v17, %v10525_v29  ;;  %v11182_v34 = vunpack.i.h.bf16 %v10501_v33 }
 0x3f5   : > { %v7752_v32 = vpop.eup %7751  ;;  %7771 = vpow2.f32 %v6820_v40  ;;  %v11183_v29 = vunpack.i.l.bf16 %v10499_v8  ;;  %v4856_v17 = vmul.f32 %v10647_v24, %v10529_v42  ;;  %v10753_v33 = vsel %vm1727_vm11, %v4855_v31, %v11184_v41 }
 0x3f6   : > { %v7754_v38 = vpop.eup %7753  ;;  %7773 = vrcp.f32 %v4768_v56  ;;  %v6826_v56 = vmul.f32 -1.442695, %v10709_v4  ;;  %v10741_v52 = vsel %vm1727_vm11, %v4851_v62, %v11182_v34  ;;  %v4770_v40 = vadd.f32 1.0, %v7752_v32 }
 0x3f7   : > { %v7756_v3 = vpop.eup %7755  ;;  %7775 = vpow2.f32 %v6821_v16  ;;  %v4769_v16 = vadd.f32 1.0, %v7750_v15  ;;  %v11185_v15 = vunpack.i.l.bf16 %v10522_v57  ;;  %v10760_v34 = vpop.permute.xlu0 %7374  ;;  %v11186_v42 = vunpack.i.h.bf16 %v10522_v57 }
 0x3f8   : > { %v7758_v43 = vpop.eup %7757  ;;  %7777 = vpow2.f32 %v6822_v0  ;;  %v10746_v0 = vsel %vm1727_vm11, %v4854_v13, %v11183_v29  ;;  %v4857_v8 = vmul.f32 %v10656_v60, %v10533_v59  ;;  %v4772_v32 = vadd.f32 1.0, %v7756_v3 }
 0x3f9   : > { %v7760_v36 = vpop.eup %7759  ;;  %7779 = vpow2.f32 %v6823_v10  ;;  %v10758_v62 = vsel %vm1727_vm11, %v4852_v23, %v11185_v15  ;;  %v4771_v10 = vadd.f32 1.0, %v7754_v38  ;;  %v10765_v24 = vsel %vm1727_vm11, %v4853_v49, %v11186_v42 }
 0x3fa   : > { %v7762_v1 = vpop.eup %7761  ;;  %7781 = vpow2.f32 %v6824_v55  ;;  %v10769_v55 = vpop.permute.xlu1 %7379  ;;  %v4858_v38 = vmul.f32 %v10666_v58, %v10538_v14  ;;  %v4859_v23 = vmul.f32 %v10676_v11, %v10547_v22  ;;  %v11187_v49 = vunpack.i.l.bf16 %v10519_v47 }
 0x3fb   : > { %v7764_v37 = vpop.eup %7763  ;;  %7783 = vpow2.f32 %v6825_v21  ;;  %v4773_v21 = vadd.f32 1.0, %v7758_v43  ;;  %v4774_v59 = vadd.f32 1.0, %v7760_v36  ;;  %v4860_v14 = vmul.f32 %v10684_v18, %v10550_v27 }
 0x3fc   : > { %v7766_v13 = vpop.eup %7765  ;;  %7785 = vpow2.f32 %v6826_v56  ;;  %v10780_v29 = vsel %vm1727_vm11, %v4856_v17, %v11187_v49  ;;  %v4861_v22 = vmul.f32 %v10693_v35, %v10554_v2  ;;  %v4775_v11 = vadd.f32 1.0, %v7762_v1  ;;  %v10805_v1 = vpop.permute.xlu0 %7384 }
 0x3fd   : > { %v7768_v31 = vpop.eup %7767  ;;  %7787 = vrcp.f32 %v4769_v16  ;;  %v11188_v43 = vunpack.i.h.bf16 %v10519_v47  ;;  %v4776_v36 = vadd.f32 1.0, %v7764_v37  ;;  %v11189_v17 = vunpack.i.l.bf16 %v10544_v19 }
 0x3fe   : > { %v10775_v57 = vpop.eup %7769  ;;  %7789 = vrcp.f32 %v4770_v40  ;;  %v11190_v2 = vunpack.i.h.bf16 %v10544_v19  ;;  %v4777_v47 = vadd.f32 1.0, %v7766_v13  ;;  %v4862_v37 = vmul.f32 %v10699_v61, %v10557_v53 }
 0x3ff   : > { %v7772_v3 = vpop.eup %7771  ;;  %7791 = vrcp.f32 %v4771_v10  ;;  %v10792_v56 = vsel %vm1727_vm11, %v4857_v8, %v11188_v43  ;;  %v10798_v27 = vsel %vm1727_vm11, %v4858_v38, %v11189_v17  ;;  %v4778_v41 = vadd.f32 1.0, %v7768_v31  ;;  %v10810_v10 = vpop.permute.xlu1 %7389 }
 0x400   : > { %v10787_v58 = vpop.eup %7773  ;;  %7793 = vrcp.f32 %v4772_v32  ;;  %v10803_v18 = vsel %vm1727_vm11, %v4859_v23, %v11190_v2  ;;  %v7357_v15 = vunpack.i.h.bf16 %v10691_v9  ;;  %v11191_v19 = vunpack.i.l.bf16 %v10541_v50  ;;  %v10837_v2 = vpop.permute.xlu0 %7394 }
 0x401   : > { %v7776_v16 = vpop.eup %7775  ;;  %7795 = vrcp.f32 %v4773_v21  ;;  %v11192_v13 = vunpack.i.h.bf16 %v10541_v50  ;;  %v4779_v38 = vadd.f32 1.0, %v7772_v3  ;;  %v7356_v23 = vunpack.i.l.bf16 %v10691_v9 }
 0x402   : > { %v7778_v35 = vpop.eup %7777  ;;  %7797 = vrcp.f32 %v4774_v59  ;;  %v10815_v8 = vsel %vm1727_vm11, %v4860_v14, %v11191_v19  ;;  %v4780_v61 = vadd.f32 1.0, %v7776_v16  ;;  %v7362_v14 = vunpack.i.h.bf16 %v10682_v44  ;;  %v11211_v59 = vld [vmem:[#allocation16_spill] sm:$0xff] }
 0x403   : > { %v7780_v42 = vpop.eup %7779  ;;  %v10820_v32 = vsel %vm1727_vm11, %v4861_v22, %v11192_v13  ;;  %7799 = vrcp.f32 %v4775_v11  ;;  %v4781_v49 = vadd.f32 1.0, %v7778_v35  ;;  %v11193_v22 = vunpack.i.l.bf16 %v10564_v26 }
 0x404   : > { %v7782_v53 = vpop.eup %7781  ;;  %7801 = vrcp.f32 %v4776_v36  ;;  %v4782_v3 = vadd.f32 1.0, %v7780_v42  ;;  %v10833_v43 = vsel %vm1293_vm4, %v10741_v52, %v7357_v15  ;;  %v7361_v16 = vunpack.i.l.bf16 %v10682_v44 }
 0x405   : > { %v7784_v21 = vpop.eup %7783  ;;  %7803 = vrcp.f32 %v4777_v47  ;;  %v10829_v11 = vsel %vm1727_vm11, %v4862_v37, %v11193_v22  ;;  %v4783_v36 = vadd.f32 1.0, %v7782_v53  ;;  %v7367_v17 = vunpack.i.h.bf16 %v10726_v48  ;;  %v10877_v22 = vpop.permute.xlu0 %7404 }
 0x406   : > { %v7786_v50 = vpop.eup %7785  ;;  %7805 = vrcp.f32 %v4778_v41  ;;  %v10841_v35 = vsel %vm1293_vm4, %v10736_v46, %v7356_v23  ;;  %v7366_v37 = vunpack.i.l.bf16 %v10726_v48  ;;  %v10844_v41 = vpop.permute.xlu1 %7399  ;;  %v4784_v52 = vadd.f32 1.0, %v7784_v21 }
 0x407   : > { %v7788_v9 = vpop.eup %7787  ;;  %7807 = vrcp.f32 %v4779_v38  ;;  %v10848_v44 = vsel %vm1293_vm4, %v10765_v24, %v7362_v14  ;;  %v7372_v42 = vunpack.i.h.bf16 %v10720_v51  ;;  %v4785_v19 = vadd.f32 1.0, %v7786_v50 }
 0x408   : > { %v7790_v47 = vpop.eup %7789  ;;  %7809 = vrcp.f32 %v4780_v61  ;;  %v7371_v38 = vunpack.i.l.bf16 %v10720_v51  ;;  %v7377_v46 = vunpack.i.h.bf16 %v10760_v34  ;;  %v7376_v48 = vunpack.i.l.bf16 %v10760_v34 }
 0x409   : > { %v7792_v15 = vpop.eup %7791  ;;  %7811 = vrcp.f32 %v4781_v49  ;;  %v10856_v61 = vsel %vm1293_vm4, %v10758_v62, %v7361_v16  ;;  %v10860_v24 = vsel %vm1293_vm4, %v10753_v33, %v7367_v17  ;;  %v7382_v23 = vunpack.i.h.bf16 %v10769_v55 }
 0x40a   : > { %v7794_v13 = vpop.eup %7793  ;;  %7813 = vrcp.f32 %v4782_v3  ;;  %v4863_v51 = vmul.f32 %v10775_v57, %v10572_v30  ;;  %v4864_v49 = vmul.f32 %v10787_v58, %v10575_v28  ;;  %v10869_v34 = vsel %vm1293_vm4, %v10746_v0, %v7366_v37 }
 0x40b   : > { %v7796_v53 = vpop.eup %7795  ;;  %7815 = vrcp.f32 %v4783_v36  ;;  %v4865_v14 = vmul.f32 %v7788_v9, %v10590_v5  ;;  %v4866_v33 = vmul.f32 %v7790_v47, %v10594_v45  ;;  %v10875_v50 = vsel %vm1293_vm4, %v10792_v56, %v7372_v42  ;;  %v10892_v45 = vpop.permute.xlu1 %7409  ;;  %v11194_v56 = vld [vmem:[#allocation10_spill] sm:$0xff] }
 0x40c   : > { %v7798_v21 = vpop.eup %7797  ;;  %7817 = vrcp.f32 %v4784_v52  ;;  %v4867_v28 = vmul.f32 %v7792_v15, %v10598_v20  ;;  %v10882_v0 = vsel %vm1293_vm4, %v10780_v29, %v7371_v38  ;;  %v10886_v57 = vsel %vm1293_vm4, %v10798_v27, %v7376_v48  ;;  %v11200_v42 = vld [vmem:[#allocation6_spill] sm:$0xff] }
 0x40d   : > { %v7800_v62 = vpop.eup %7799  ;;  %7819 = vrcp.f32 %v4785_v19  ;;  %v10890_v5 = vsel %vm1293_vm4, %v10803_v18, %v7377_v46  ;;  %v4869_v3 = vmul.f32 %v7796_v53, %v11194_v56  ;;  %v7381_v9 = vunpack.i.l.bf16 %v10769_v55  ;;  %v11197_v18 = vld [vmem:[#allocation4_spill] sm:$0xff] }
 0x40e   : > { %v7802_v30 = vpop.eup %7801  ;;  %v10898_v20 = vsel %vm1293_vm4, %v10820_v32, %v7382_v23  ;;  %v7387_v29 = vunpack.i.h.bf16 %v10805_v1  ;;  %v11196_v27 = vunpack.i.h.bf16 %v10564_v26  ;;  %v11198_v17 = vunpack.i.l.bf16 %v11197_v18  ;;  %v11202_v26 = vld [vmem:[#allocation9_spill] sm:$0xff] }
 0x40f   : > { %v7804_v58 = vpop.eup %7803  ;;  %11195 = vst [vmem:[#allocation10_spill] sm:$0xff] %v10898_v20  ;;  %v7386_v37 = vunpack.i.l.bf16 %v10805_v1  ;;  %v7392_v52 = vunpack.i.h.bf16 %v10810_v10  ;;  %v11199_v15 = vunpack.i.h.bf16 %v11197_v18  ;;  %v11201_v19 = vunpack.i.l.bf16 %v11200_v42  ;;  %v11205_v18 = vld [vmem:[#allocation5_spill] sm:$0xff]  ;;  %v7420_v40 = vpop.permute.xlu1 %7419 }
 0x410   : > { %v7806_v36 = vpop.eup %7805  ;;  %v5747_v16 = vsel %vm1727_vm11, %v4863_v51, %v11196_v27  ;;  %v5748_v47 = vsel %vm1727_vm11, %v4864_v49, %v11198_v17  ;;  %v4868_v46 = vmul.f32 %v7794_v13, %v11202_v26  ;;  %v7391_v48 = vunpack.i.l.bf16 %v10810_v10  ;;  %v11204_v51 = vld [vmem:[#allocation11_spill] sm:$0xff] }
 0x411   : > { %v7808_v55 = vpop.eup %7807  ;;  %v5749_v32 = vsel %vm1727_vm11, %v4865_v14, %v11199_v15  ;;  %v5750_v38 = vsel %vm1727_vm11, %v4866_v33, %v11201_v19  ;;  %v11203_v23 = vunpack.i.h.bf16 %v11200_v42  ;;  %v4870_v49 = vmul.f32 %v7798_v21, %v11204_v51  ;;  %v11207_v15 = vld [vmem:[#allocation12_spill] sm:$0xff]  ;;  %v11208_v19 = vld [vmem:[#allocation13_spill] sm:$0xff]  ;;  %v7415_v42 = vpop.permute.xlu0 %7414  ;;  %v11210_v21 = vld [vmem:[#allocation15_spill] sm:$0xff] }
 0x412   : > { %v7810_v53 = vpop.eup %7809  ;;  %v7397_v56 = vunpack.i.h.bf16 %v10837_v2  ;;  %v7396_v27 = vunpack.i.l.bf16 %v10837_v2  ;;  %v11206_v17 = vunpack.i.h.bf16 %v11205_v18  ;;  %v4871_v13 = vmul.f32 %v7800_v62, %v11207_v15 }
 0x413   : > { %v5751_v1 = vsel %vm1727_vm11, %v4867_v28, %v11203_v23  ;;  %v7812_v14 = vpop.eup %7811  ;;  %v4872_v10 = vmul.f32 %v7802_v30, %v11208_v19  ;;  %v7402_v26 = vunpack.i.h.bf16 %v10844_v41  ;;  %v11209_v28 = vld [vmem:[#allocation14_spill] sm:$0xff]  ;;  %v4874_v51 = vmul.f32 %v7806_v36, %v11210_v21  ;;  %v11213_v36 = vld [vmem:[#allocation8_spill] sm:$0xff] }
 0x414   : > { %v5753_v33 = vsel %vm1727_vm11, %v4869_v3, %v11206_v17  ;;  %v7814_v31 = vpop.eup %7813  ;;  %v4873_v23 = vmul.f32 %v7804_v58, %v11209_v28  ;;  %v4875_v60 = vmul.f32 %v7808_v55, %v11211_v59  ;;  %v7401_v2 = vunpack.i.l.bf16 %v10844_v41 }
 0x415   : > { %v7816_v20 = vpop.eup %7815  ;;  %v11212_v3 = vunpack.i.l.bf16 %v11205_v18  ;;  %v10938_v30 = vsel %vm1293_vm4, %v10815_v8, %v7381_v9  ;;  %v10942_v17 = vsel %vm1293_vm4, %v10829_v11, %v7386_v37  ;;  %v10945_v58 = vsel %vm1293_vm4, %v5747_v16, %v7387_v29  ;;  %v11216_v16 = vld [vmem:[#allocation7_spill] sm:$0xff]  ;;  %v7425_v28 = vpop.permute.xlu0 %7424 }
 0x416   : > { %v7818_v59 = vpop.eup %7817  ;;  %v11214_v41 = vunpack.i.l.bf16 %v11213_v36  ;;  %v10951_v18 = vsel %vm1293_vm4, %v5748_v47, %v7391_v48  ;;  %v10957_v8 = vsel %vm1293_vm4, %v5751_v1, %v7397_v56  ;;  %v11215_v11 = vunpack.i.h.bf16 %v11213_v36 }
 0x417   : > { %v5752_v62 = vsel %vm1727_vm11, %v4868_v46, %v11212_v3  ;;  %v10954_v46 = vsel %vm1293_vm4, %v5749_v32, %v7392_v52  ;;  %v7820_v9 = vpop.eup %7819  ;;  %v11217_v37 = vunpack.i.l.bf16 %v11216_v16  ;;  %v10969_v47 = vsel %vm1293_vm4, %v5753_v33, %v7402_v26  ;;  %v11222_v3 = vld [vmem:[#allocation18_spill] sm:$0xff] }
 0x418   : > { %v5754_v55 = vsel %vm1727_vm11, %v4870_v49, %v11214_v41  ;;  %v5755_v29 = vsel %vm1727_vm11, %v4871_v13, %v11215_v11  ;;  %v10966_v49 = vsel %vm1293_vm4, %v5750_v38, %v7396_v27  ;;  %v11218_v52 = vunpack.i.h.bf16 %v11216_v16  ;;  %v11221_v27 = vld [vmem:[#allocation17_spill] sm:$0xff] }
 0x419   : > { %v5756_v15 = vsel %vm1727_vm11, %v4872_v10, %v11217_v37  ;;  %v11219_v48 = vunpack.i.l.bf16 %v10608_v7  ;;  %v11220_v56 = vunpack.i.h.bf16 %v10608_v7  ;;  %v5784_v19 = vsel %vm1293_vm4, %v5752_v62, %v7401_v2 }
 0x41a   : > { %v5757_v32 = vsel %vm1727_vm11, %v4873_v23, %v11218_v52  ;;  %v4876_v38 = vmul.f32 %v7810_v53, %v10674_v25  ;;  %v4877_v33 = vmul.f32 %v7812_v14, %v11221_v27  ;;  %v7407_v10 = vunpack.i.h.bf16 %v10877_v22 }
 0x41b   : > { %v5758_v1 = vsel %vm1727_vm11, %v4874_v51, %v11219_v48  ;;  %v5759_v13 = vsel %vm1727_vm11, %v4875_v60, %v11220_v56  ;;  %v7406_v26 = vunpack.i.l.bf16 %v10877_v22  ;;  %v4878_v23 = vmul.f32 %v7814_v31, %v10689_v6  ;;  %v7430_v51 = vpop.permute.xlu1 %7429 }
 0x41c   : > { %v4879_v21 = vmul.f32 %v7816_v20, %v10697_v63  ;;  %v4880_v7 = vmul.f32 %v7818_v59, %v11222_v3  ;;  %v4881_v60 = vmul.f32 %v7820_v9, %v10709_v4  ;;  %v7412_v2 = vunpack.i.h.bf16 %v10892_v45  ;;  %v11229_v3 = vld [vmem:[#allocation10_spill] sm:$0xff] }
 0x41d   : > { %v7411_v25 = vunpack.i.l.bf16 %v10892_v45  ;;  %v7417_v53 = vunpack.i.h.bf16 %v7415_v42  ;;  %v7416_v14 = vunpack.i.l.bf16 %v7415_v42  ;;  %v7422_v62 = vunpack.i.h.bf16 %v7420_v40 }
 0x41e   : > { %v7421_v36 = vunpack.i.l.bf16 %v7420_v40  ;;  %v7427_v41 = vunpack.i.h.bf16 %v7425_v28  ;;  %v7426_v22 = vunpack.i.l.bf16 %v7425_v28  ;;  %v11223_v11 = vunpack.i.l.bf16 %v10600_v12 }
 0x41f   : > { %v11224_v63 = vunpack.i.h.bf16 %v10600_v12  ;;  %v7432_v20 = vunpack.i.h.bf16 %v7430_v51  ;;  %v7431_v4 = vunpack.i.l.bf16 %v7430_v51  ;;  %v11225_v59 = vunpack.i.l.bf16 %v10654_v39 }
 0x420   : > { %v5760_v6 = vsel %vm1727_vm11, %v4876_v38, %v11223_v11  ;;  %v11226_v42 = vunpack.i.h.bf16 %v10654_v39  ;;  %v11227_v9 = vunpack.i.l.bf16 %v10645_v54  ;;  %v11228_v37 = vunpack.i.h.bf16 %v10645_v54 }
 0x421   : > { %v5761_v31 = vsel %vm1727_vm11, %v4877_v33, %v11224_v63  ;;  %v5762_v45 = vsel %vm1727_vm11, %v4878_v23, %v11225_v59  ;;  %v5786_v52 = vsel %vm1293_vm4, %v5754_v55, %v7406_v26  ;;  %v5787_v48 = vsel %vm1293_vm4, %v5755_v29, %v7407_v10 }
 0x422   : > { %v5763_v40 = vsel %vm1727_vm11, %v4879_v21, %v11226_v42  ;;  %v5764_v16 = vsel %vm1727_vm11, %v4880_v7, %v11227_v9  ;;  %v5765_v12 = vsel %vm1727_vm11, %v4881_v60, %v11228_v37  ;;  %v5788_v56 = vsel %vm1293_vm4, %v5756_v15, %v7411_v25 }
 0x423   : > { %v5789_v38 = vsel %vm1293_vm4, %v5757_v32, %v7412_v2  ;;  %v5790_v39 = vsel %vm1293_vm4, %v5758_v1, %v7416_v14  ;;  %v5791_v27 = vsel %vm1293_vm4, %v5759_v13, %v7417_v53  ;;  %v5792_v33 = vsel %vm1293_vm4, %v5760_v6, %v7421_v36 }
 0x424   : > { %v5793_v28 = vsel %vm1293_vm4, %v5761_v31, %v7422_v62  ;;  %v5794_v54 = vsel %vm1293_vm4, %v5762_v45, %v7426_v22  ;;  %v5795_v23 = vsel %vm1293_vm4, %v5763_v40, %v7427_v41  ;;  %v5796_v55 = vsel %vm1293_vm4, %v5764_v16, %v7431_v4 }
 0x425   : > { %v5797_v29 = vsel %vm1293_vm4, %v5765_v12, %v7432_v20 }
 0x44e   : > { %v5732_v10 = vpop.permute.xlu0 %5731 }
 0x44f   : > { %v5799_v15 = vsel %vm5798_vm14, %v10841_v35, %v5732_v10  ;;  %v5800_v32 = vsel %vm5798_vm14, %v10833_v43, %v5732_v10  ;;  %v5801_v1 = vsel %vm5798_vm14, %v10856_v61, %v5732_v10  ;;  %v5802_v13 = vsel %vm5798_vm14, %v10848_v44, %v5732_v10 }
 0x450   : > { %v5803_v26 = vsel %vm5798_vm14, %v10869_v34, %v5732_v10  ;;  %v5804_v21 = vsel %vm5798_vm14, %v10860_v24, %v5732_v10  ;;  %v5805_v51 = vsel %vm5798_vm14, %v10882_v0, %v5732_v10  ;;  %v5806_v35 = vsel %vm5798_vm14, %v10875_v50, %v5732_v10 }
 0x451   : > { %v5807_v43 = vsel %vm5798_vm14, %v10886_v57, %v5732_v10  ;;  %v5808_v61 = vsel %vm5798_vm14, %v10890_v5, %v5732_v10  ;;  %v5809_v44 = vsel %vm5798_vm14, %v10938_v30, %v5732_v10  ;;  %v5810_v34 = vsel %vm5798_vm14, %v11229_v3, %v5732_v10 }
 0x452   : > { %v5811_v24 = vsel %vm5798_vm14, %v10942_v17, %v5732_v10  ;;  %v5812_v0 = vsel %vm5798_vm14, %v10945_v58, %v5732_v10  ;;  %v5813_v50 = vsel %vm5798_vm14, %v10951_v18, %v5732_v10  ;;  %v5814_v57 = vsel %vm5798_vm14, %v10954_v46, %v5732_v10 }
 0x453   : > { %v5815_v5 = vsel %vm5798_vm14, %v10966_v49, %v5732_v10  ;;  %v5816_v30 = vsel %vm5798_vm14, %v10957_v8, %v5732_v10  ;;  %v5817_v7 = vsel %vm5798_vm14, %v5784_v19, %v5732_v10  ;;  %v5818_v17 = vsel %vm5798_vm14, %v10969_v47, %v5732_v10 }
 0x454   : > { %v5819_v60 = vsel %vm5798_vm14, %v5786_v52, %v5732_v10  ;;  %v5820_v58 = vsel %vm5798_vm14, %v5787_v48, %v5732_v10  ;;  %v5821_v18 = vsel %vm5798_vm14, %v5788_v56, %v5732_v10  ;;  %v5822_v2 = vsel %vm5798_vm14, %v5789_v38, %v5732_v10 }
 0x455   : > { %v5823_v46 = vsel %vm5798_vm14, %v5790_v39, %v5732_v10  ;;  %v5824_v49 = vsel %vm5798_vm14, %v5791_v27, %v5732_v10  ;;  %v5825_v8 = vsel %vm5798_vm14, %v5792_v33, %v5732_v10  ;;  %v5826_v19 = vsel %vm5798_vm14, %v5793_v28, %v5732_v10 }
 0x456   : > { %v5827_v47 = vsel %vm5798_vm14, %v5794_v54, %v5732_v10  ;;  %v5828_v25 = vsel %vm5798_vm14, %v5795_v23, %v5732_v10  ;;  %v5829_v53 = vsel %vm5798_vm14, %v5796_v55, %v5732_v10  ;;  %v5830_v14 = vsel %vm5798_vm14, %v5797_v29, %v5732_v10 }
 0x457   : > { %v6966_v62 = vpack.c.bf16 %v5800_v32, %v5799_v15  ;;  %v6971_v36 = vpack.c.bf16 %v5802_v13, %v5801_v1  ;;  %v6976_v41 = vpack.c.bf16 %v5804_v21, %v5803_v26  ;;  %v6981_v22 = vpack.c.bf16 %v5806_v35, %v5805_v51 }
 0x458   : > { %v6986_v11 = vpack.c.bf16 %v5808_v61, %v5807_v43  ;;  %v6991_v6 = vpack.c.bf16 %v5810_v34, %v5809_v44  ;;  %v6996_v63 = vpack.c.bf16 %v5812_v0, %v5811_v24  ;;  %v7001_v31 = vpack.c.bf16 %v5814_v57, %v5813_v50 }
 0x459   : > { %6967 = vst [vmem:[%s8052_s14] sm:$0xff] %v6966_v62   ;;  %7043 = vst [vmem:[%s8052_s14 + $0x8] sm:$0xff] %v6971_v36   ;;  %v7006_v20 = vpack.c.bf16 %v5816_v30, %v5815_v5  ;;  %v7011_v4 = vpack.c.bf16 %v5818_v17, %v5817_v7  ;;  %v7016_v59 = vpack.c.bf16 %v5820_v58, %v5819_v60 }
 0x45a   : > { %7044 = vst [vmem:[%s8052_s14 + $0x10] sm:$0xff] %v6976_v41   ;;  %7045 = vst [vmem:[%s8052_s14 + $0x18] sm:$0xff] %v6981_v22   ;;  %v7021_v45 = vpack.c.bf16 %v5822_v2, %v5821_v18  ;;  %v7026_v42 = vpack.c.bf16 %v5824_v49, %v5823_v46  ;;  %v7031_v40 = vpack.c.bf16 %v5826_v19, %v5825_v8 }
 0x45b   : > { %7046 = vst [vmem:[%s8052_s14 + $0x20] sm:$0xff] %v6986_v11   ;;  %7047 = vst [vmem:[%s8052_s14 + $0x28] sm:$0xff] %v6991_v6   ;;  %v7036_v9 = vpack.c.bf16 %v5828_v25, %v5827_v47  ;;  %v7041_v16 = vpack.c.bf16 %v5830_v14, %v5829_v53 }
 0x45c   : > { %7048 = vst [vmem:[%s8052_s14 + $0x30] sm:$0xff] %v6996_v63   ;;  %7049 = vst [vmem:[%s8052_s14 + $0x38] sm:$0xff] %v7001_v31  }
 0x45d   : > { %7050 = vst [vmem:[%s8052_s14 + $0x40] sm:$0xff] %v7006_v20   ;;  %7051 = vst [vmem:[%s8052_s14 + $0x48] sm:$0xff] %v7011_v4  }
 0x45e   : > { %7052 = vst [vmem:[%s8052_s14 + $0x50] sm:$0xff] %v7016_v59   ;;  %7053 = vst [vmem:[%s8052_s14 + $0x58] sm:$0xff] %v7021_v45  }
 0x45f   : > { %7054 = vst [vmem:[%s8052_s14 + $0x60] sm:$0xff] %v7026_v42   ;;  %7055 = vst [vmem:[%s8052_s14 + $0x68] sm:$0xff] %v7031_v40  }
 0x460   : > { %7056 = vst [vmem:[%s8052_s14 + $0x70] sm:$0xff] %v7036_v9   ;;  %7057 = vst [vmem:[%s8052_s14 + $0x78] sm:$0xff] %v7041_v16  }
 0x461 PF: > { %s14_s21 = sadd.s32 1, %s7875_s21   ;;  %s11230_s15 = smov %s7855_s16 }
 0x462   : > { %p11_p13 = scmp.ge.s32.totalorder %s14_s21, 8   ;;  %s11231_s16 = smov %s7960_s26 }
 0x463   : > { %s11232_s17 = smov %s7867_s19  ;;  %s11233_s18 = smov %s7871_s20 }
 0x464   : > { %s11234_s19 = smov %s11237_s22  ;;  %s11235_s20 = smov %s11241_s23 }
 0x465   :  { %13 = sbr.rel (!%p11_p13) target bundleno = 4 (0x4), region = 133 }

</bundles_post_ra>
